<compile_context>
chip_gen: v6e
topology: v6e:2x2x1
jax: 0.10.0
libtpu: 0.0.40
codegen_flags: <defaults>
</compile_context>

<pallas_src>
import jax
import jax.numpy as jnp
from jax.experimental import pallas as pl
from jax.experimental.pallas import tpu as pltpu

CFG = {'stride': [8, 16, 32], 'head_dim': 64, 'head_norm': 'BN',
       'head_act': 'lrelu', 'num_cls_heads': 2, 'num_reg_heads': 2,
       'head_depthwise': True}
NUM_CLASSES = 24
CLS_PAD = 128                 # lane-dense padded class dimension (>= 128 lanes)
BK_DIM_3D = 464               # ShuffleNetV2(width_mult=1.0) output channels
BK_DIM_2D = 24                # YoloBody per-pixel cls feature channels
NUM_LEVELS = len(CFG['stride'])
HEAD_DIM = CFG['head_dim']


# ----------------------------------------------------------------------------
# Pallas kernel: (channel-encoder + 2-block head + cls_pred), all levels fused
# into a single launch.  Per-tile level id (scalar prefetch) selects the
# stacked per-level weights via the index_maps.
# ----------------------------------------------------------------------------
def _lrelu(x):
    return jnp.where(x > 0, x, 0.1 * x)


def fused_head_kernel(level_ids_ref,                       # scalar prefetch (SMEM)
                      x2d_ref, f3p_ref,                    # [tile_n, 24], [tile_n, 64]
                      w_e2d_ref,                           # [1, 24, 64]
                      w_h1_ref, b_h1_ref,                  # [1, 64, 64], [1, 1, 64]
                      w_h2_ref, b_h2_ref,                  # [1, 64, 64], [1, 1, 64]
                      w_cls_ref, b_cls_ref,                # [1, 64, 128], [1, 1, 128]
                      out_ref):                            # [tile_n, 128]
    del level_ids_ref  # consumed only by the index_maps

    # channel encoder: concat([cls_feat, feat_3d_up], C) -> 1x1 conv (+folded BN)
    #   == x2d @ W2d  +  upsample(f3 @ W3d + b_e)
    # the 464->64 projection of the 3-D feature (the big-K matmul) is hoisted
    # to coarse resolution OUTSIDE the kernel; here it is just an add.
    x = (jnp.dot(x2d_ref[...], w_e2d_ref[0], preferred_element_type=jnp.float32)
         + f3p_ref[...].astype(jnp.float32))
    x = _lrelu(x)
    # head block 1 (1x1 conv + folded BN + lrelu)
    x = _lrelu(jnp.dot(x.astype(jnp.bfloat16), w_h1_ref[0],
                       preferred_element_type=jnp.float32) + b_h1_ref[0])
    # head block 2 (1x1 conv + folded BN + lrelu)
    x = _lrelu(jnp.dot(x.astype(jnp.bfloat16), w_h2_ref[0],
                       preferred_element_type=jnp.float32) + b_h2_ref[0])
    # cls_pred: head_dim -> num_classes, lane-padded to 128 cols (unmasked vst)
    out_ref[...] = (jnp.dot(x.astype(jnp.bfloat16), w_cls_ref[0],
                            preferred_element_type=jnp.float32)
                    + b_cls_ref[0]).astype(out_ref.dtype)


def fused_cls_heads(level_ids, x2d_all, f3p_all, stacked, tile_n):
    """Single launch over all levels.

    x2d_all: [N_pad, 24] bf16, f3p_all: [N_pad, 64] bf16, level_ids: [n_tiles] i32.
    Returns [N_pad, CLS_PAD] f32 (caller slices [:, :NUM_CLASSES]).
    """
    N, C2d = x2d_all.shape
    Cd = f3p_all.shape[1]
    n_tiles = N // tile_n

    row = lambda i, lids: (i, 0)
    lvl = lambda i, lids: (lids[i], 0, 0)

    return pl.pallas_call(
        fused_head_kernel,
        out_shape=jax.ShapeDtypeStruct((N, CLS_PAD), jnp.float32),
        grid_spec=pltpu.PrefetchScalarGridSpec(
            num_scalar_prefetch=1,
            grid=(n_tiles,),
            in_specs=[
                pl.BlockSpec((tile_n, C2d), row),          # x2d
                pl.BlockSpec((tile_n, Cd), row),           # projected+upsampled 3d
                pl.BlockSpec((1, C2d, Cd), lvl),           # w_e2d
                pl.BlockSpec((1, Cd, Cd), lvl),            # w_h1
                pl.BlockSpec((1, 1, Cd), lvl),             # b_h1
                pl.BlockSpec((1, Cd, Cd), lvl),            # w_h2
                pl.BlockSpec((1, 1, Cd), lvl),             # b_h2
                pl.BlockSpec((1, Cd, CLS_PAD), lvl),       # w_cls (padded)
                pl.BlockSpec((1, 1, CLS_PAD), lvl),        # b_cls (padded)
            ],
            out_specs=pl.BlockSpec((tile_n, CLS_PAD), row),
        ),
        compiler_params=pltpu.CompilerParams(
            dimension_semantics=("parallel",)),            # megacore-shardable
    )(level_ids, x2d_all, f3p_all,
      stacked['w_e2d'], stacked['w_h1'], stacked['b_h1'],
      stacked['w_h2'], stacked['b_h2'], stacked['w_cls'], stacked['b_cls'])


def _pick_tile_n(max_rows):
    # >=128 rows for MXU utilization; larger tiles on big inputs.  Per-tile
    # VMEM use is tiny (bf16 24+64 cols in, 128 f32 cols out), so 512 rows is
    # far under the v7x 32 MiB scoped default even with double buffering.
    for t in (512, 256, 128):
        if max_rows >= t:
            return t
    return 128


# ----------------------------------------------------------------------------
# Deterministic parameter init (shapes implied by __init__ / cfg).
# ----------------------------------------------------------------------------
def init_params(key):
    keys = jax.random.split(key, NUM_LEVELS + 1)
    s = 0.05
    w_e2d, w_e3d, b_e = [], [], []
    w_h1, b_h1, w_h2, b_h2, w_cls, b_cls = [], [], [], [], [], []
    for lvl in range(NUM_LEVELS):
        k = jax.random.split(keys[lvl], 9)
        w_e2d.append(s * jax.random.normal(k[0], (BK_DIM_2D, HEAD_DIM), jnp.float32))
        w_e3d.append(s * jax.random.normal(k[1], (BK_DIM_3D, HEAD_DIM), jnp.float32))
        b_e.append(s * jax.random.normal(k[2], (1, HEAD_DIM), jnp.float32))
        w_h1.append(s * jax.random.normal(k[3], (HEAD_DIM, HEAD_DIM), jnp.float32))
        b_h1.append(s * jax.random.normal(k[4], (1, HEAD_DIM), jnp.float32))
        w_h2.append(s * jax.random.normal(k[5], (HEAD_DIM, HEAD_DIM), jnp.float32))
        b_h2.append(s * jax.random.normal(k[6], (1, HEAD_DIM), jnp.float32))
        wc = s * jax.random.normal(k[7], (HEAD_DIM, NUM_CLASSES), jnp.float32)
        bc = s * jax.random.normal(k[8], (1, NUM_CLASSES), jnp.float32)
        # lane-dense padding of the 24-class head to 128 output columns
        w_cls.append(jnp.pad(wc, ((0, 0), (0, CLS_PAD - NUM_CLASSES))))
        b_cls.append(jnp.pad(bc, ((0, 0), (0, CLS_PAD - NUM_CLASSES))))

    stacked = {
        'w_e2d': jnp.stack(w_e2d).astype(jnp.bfloat16),    # [L, 24, 64]
        'w_h1':  jnp.stack(w_h1).astype(jnp.bfloat16),     # [L, 64, 64]
        'b_h1':  jnp.stack(b_h1),                          # [L, 1, 64]  f32
        'w_h2':  jnp.stack(w_h2).astype(jnp.bfloat16),     # [L, 64, 64]
        'b_h2':  jnp.stack(b_h2),                          # [L, 1, 64]  f32
        'w_cls': jnp.stack(w_cls).astype(jnp.bfloat16),    # [L, 64, 128]
        'b_cls': jnp.stack(b_cls),                         # [L, 1, 128] f32
    }
    # per-level encoder projection of the 3-D feature (applied at coarse
    # resolution in the wrapper, outside the kernel)
    levels = [{'w_e3d': w_e3d[l], 'b_e': b_e[l]} for l in range(NUM_LEVELS)]

    # backbone stand-in projections
    k3, k2c, k2r, k2o = jax.random.split(keys[NUM_LEVELS], 4)
    bb = {
        'w_3d':  0.1 * jax.random.normal(k3,  (3, BK_DIM_3D), jnp.float32),
        'w_cls': 0.1 * jax.random.normal(k2c, (3, BK_DIM_2D), jnp.float32),
        'w_reg': 0.1 * jax.random.normal(k2r, (3, 4), jnp.float32),
        'w_obj': 0.1 * jax.random.normal(k2o, (3, 1), jnp.float32),
    }
    return {'levels': levels, 'stacked': stacked, 'bb': bb}


# ----------------------------------------------------------------------------
# Glue: synthetic backbones, anchors, merged-level kernel launch (plain JAX).
# ----------------------------------------------------------------------------
def _avg_pool_nchw(x, k):
    B, C, H, W = x.shape
    return x.reshape(B, C, H // k, k, W // k, k).mean(axis=(3, 5))


def generate_anchors(fmp_size, stride):
    fh, fw = fmp_size
    ay, ax = jnp.meshgrid(jnp.arange(fh), jnp.arange(fw), indexing='ij')
    xy = jnp.stack([ax, ay], axis=-1).astype(jnp.float32).reshape(-1, 2) + 0.5
    return xy * stride


def _backbone_and_encoder(video, params):
    """Stand-in backbones + hoisted (coarse-resolution) 3-D encoder branch.

    Returns per-level regression / objectness features, fmp sizes, and the
    flattened bf16 per-pixel feature chunks consumed by the fused head.
    """
    B, Cin, T, H, W = video.shape
    key_frame = video[:, :, -1, :, :]                       # [B, 3, H, W]

    # ---- backbone_3d stand-in: temporal mean + pool to stride-32 grid + 3->464
    f3 = video.mean(axis=2)                                 # [B, 3, H, W]
    f3 = _avg_pool_nchw(f3, 32)                             # [B, 3, H/32, W/32]
    f3 = jnp.transpose(f3, (0, 2, 3, 1)) @ params['bb']['w_3d']   # [B,h32,w32,464]

    # ---- backbone_2d stand-in per level
    reg_feats, obj_feats, cls_feats, fmp_sizes = [], [], [], []
    for lvl, stride in enumerate(CFG['stride']):
        f2 = _avg_pool_nchw(key_frame, stride)              # [B, 3, Hl, Wl]
        f2 = jnp.transpose(f2, (0, 2, 3, 1))                # NHWC
        _, Hl, Wl, _ = f2.shape
        flat = f2.reshape(B, Hl * Wl, 3)
        cls_feats.append(flat @ params['bb']['w_cls'])      # [B, M, 24]
        reg_feats.append(flat @ params['bb']['w_reg'])      # [B, M, 4]
        obj = (flat @ params['bb']['w_obj']).reshape(B, Hl, Wl, 1)
        obj_feats.append(jnp.transpose(obj, (0, 3, 1, 2)))  # [B, 1, Hl, Wl]
        fmp_sizes.append((Hl, Wl))

    # ---- per-pixel inputs of the fused head (channels-last, flattened) -----
    x2d_chunks, f3p_chunks, level_rows = [], [], []
    for level in range(NUM_LEVELS):
        Hl, Wl = fmp_sizes[level]
        N_l = B * Hl * Wl
        sf = 2 ** (2 - level)
        lp = params['levels'][level]
        # Hoisted channel-encoder 3-D branch: project 464->64 (+b_e, folded BN)
        # at the coarse stride-32 resolution, THEN nearest-upsample the 64-ch
        # result.  Exact: F.interpolate(nearest) commutes with the per-pixel
        # linear 1x1 projection.  Cuts the dominant K=464 matmul 16x/4x on
        # levels 0/1 and removes the 464-ch upsample/HBM traffic entirely.
        f3p = jnp.einsum('bhwc,cd->bhwd', f3, lp['w_e3d']) + lp['b_e']
        f3p = jnp.repeat(jnp.repeat(f3p, sf, axis=1), sf, axis=2)   # [B,Hl,Wl,64]
        x2d_chunks.append(cls_feats[level].reshape(N_l, BK_DIM_2D).astype(jnp.bfloat16))
        f3p_chunks.append(f3p.reshape(N_l, HEAD_DIM).astype(jnp.bfloat16))
        level_rows.append(N_l)

    return reg_feats, obj_feats, fmp_sizes, x2d_chunks, f3p_chunks, level_rows


def _assemble_outputs(out_per_level, obj_feats, reg_feats, fmp_sizes, B):
    all_conf, all_cls, all_box, all_anchors = [], [], [], []
    for level in range(NUM_LEVELS):
        M = fmp_sizes[level][0] * fmp_sizes[level][1]
        all_cls.append(out_per_level[level].reshape(B, M, NUM_CLASSES))
        all_conf.append(obj_feats[level])
        all_box.append(reg_feats[level])
        all_anchors.append(generate_anchors(fmp_sizes[level], CFG['stride'][level]))
    return {'pred_conf': all_conf, 'pred_cls': all_cls,
            'pred_box': all_box, 'anchors': all_anchors,
            'strides': CFG['stride']}


def yowo_forward(video, params):
    B = video.shape[0]
    (reg_feats, obj_feats, fmp_sizes,
     x2d_chunks, f3p_chunks, level_rows) = _backbone_and_encoder(video, params)

    # ---- build merged, per-level-padded inputs for one fused Pallas launch -
    tile_n = _pick_tile_n(max(level_rows))
    x2d_all, f3p_all, level_ids, offsets = [], [], [], []
    off = 0
    for level in range(NUM_LEVELS):
        n = level_rows[level]
        p = (-n) % tile_n                                   # pad each level up
        x2d = x2d_chunks[level]
        f3p = f3p_chunks[level]
        if p:
            x2d = jnp.concatenate([x2d, jnp.zeros((p, BK_DIM_2D), x2d.dtype)], 0)
            f3p = jnp.concatenate([f3p, jnp.zeros((p, HEAD_DIM), f3p.dtype)], 0)
        x2d_all.append(x2d)
        f3p_all.append(f3p)
        level_ids += [level] * ((n + p) // tile_n)
        offsets.append(off)
        off += n + p
    x2d_all = jnp.concatenate(x2d_all, axis=0)              # [N_pad, 24] bf16
    f3p_all = jnp.concatenate(f3p_all, axis=0)              # [N_pad, 64] bf16
    level_ids = jnp.asarray(level_ids, jnp.int32)           # [n_tiles]

    # --- Pallas hot path: channel encoder + head + cls_pred, all levels -----
    out_all = fused_cls_heads(level_ids, x2d_all, f3p_all,
                              params['stacked'], tile_n)    # [N_pad, 128] f32

    out_per_level = [out_all[offsets[l]:offsets[l] + level_rows[l], :NUM_CLASSES]
                     for l in range(NUM_LEVELS)]
    return _assemble_outputs(out_per_level, obj_feats, reg_feats, fmp_sizes, B)


def yowo_forward_reference(video, params):
    """Pure-JAX replica of the fused head (same dtypes/casts) for validation."""
    B = video.shape[0]
    (reg_feats, obj_feats, fmp_sizes,
     x2d_chunks, f3p_chunks, level_rows) = _backbone_and_encoder(video, params)
    st = params['stacked']
    out_per_level = []
    for lvl in range(NUM_LEVELS):
        x = (jnp.dot(x2d_chunks[lvl], st['w_e2d'][lvl],
                     preferred_element_type=jnp.float32)
             + f3p_chunks[lvl].astype(jnp.float32))
        x = _lrelu(x)
        x = _lrelu(jnp.dot(x.astype(jnp.bfloat16), st['w_h1'][lvl],
                           preferred_element_type=jnp.float32) + st['b_h1'][lvl])
        x = _lrelu(jnp.dot(x.astype(jnp.bfloat16), st['w_h2'][lvl],
                           preferred_element_type=jnp.float32) + st['b_h2'][lvl])
        o = (jnp.dot(x.astype(jnp.bfloat16), st['w_cls'][lvl],
                     preferred_element_type=jnp.float32) + st['b_cls'][lvl])
        out_per_level.append(o[:, :NUM_CLASSES])
    return _assemble_outputs(out_per_level, obj_feats, reg_feats, fmp_sizes, B)


if __name__ == "__main__":
    key = jax.random.PRNGKey(0)
    kp, kx = jax.random.split(key)
    params = init_params(kp)
    # small video clip: [B=2, C=3, T=4, H=64, W=64] -> fmp sizes 8x8, 4x4, 2x2
    video = jax.random.normal(kx, (2, 3, 4, 64, 64), jnp.float32)

    fwd = jax.jit(yowo_forward)
    out = fwd(video, params)
    jax.block_until_ready(out['pred_cls'])
    jax.block_until_ready(out['pred_conf'])
    jax.block_until_ready(out['pred_box'])
    jax.block_until_ready(out['anchors'])

    # sanity on shapes
    assert out['pred_cls'][0].shape == (2, 64, NUM_CLASSES)
    assert out['pred_cls'][1].shape == (2, 16, NUM_CLASSES)
    assert out['pred_cls'][2].shape == (2, 4, NUM_CLASSES)
    assert out['pred_conf'][0].shape == (2, 1, 8, 8)
    assert out['pred_box'][0].shape == (2, 64, 4)
    assert out['anchors'][0].shape == (64, 2)

    # numerical check against a pure-JAX replica (same bf16/f32 casting)
    ref = yowo_forward_reference(video, params)
    for lvl in range(NUM_LEVELS):
        d = jnp.max(jnp.abs(out['pred_cls'][lvl] - ref['pred_cls'][lvl]))
        assert float(d) < 5e-2, f"level {lvl} max diff {float(d)}"

    print("KERNEL_OK")
</pallas_src>

<mosaic_0001>
module attributes {stable_mosaic.version = 11 : i64} {
  func.func @fused_head_kernel(%arg0: i32, %arg1: memref<3xi32, #tpu.memory_space<smem>>, %arg2: memref<128x24xbf16, #tpu.memory_space<vmem>>, %arg3: memref<128x64xbf16, #tpu.memory_space<vmem>>, %arg4: memref<1x24x64xbf16, #tpu.memory_space<vmem>>, %arg5: memref<1x64x64xbf16, #tpu.memory_space<vmem>>, %arg6: memref<1x1x64xf32, #tpu.memory_space<vmem>>, %arg7: memref<1x64x64xbf16, #tpu.memory_space<vmem>>, %arg8: memref<1x1x64xf32, #tpu.memory_space<vmem>>, %arg9: memref<1x64x128xbf16, #tpu.memory_space<vmem>>, %arg10: memref<1x1x128xf32, #tpu.memory_space<vmem>>, %arg11: memref<128x128xf32, #tpu.memory_space<vmem>>) attributes {dimension_semantics = [#tpu.dimension_semantics<parallel>], iteration_bounds = array<i64: 3>, scalar_prefetch = 1 : i64, scratch_operands = 0 : i64, tpu.core_type = #tpu.core_type<tc>, window_params = [{transform_indices = @transform_0, window_bounds = array<i64: 128, 24>}, {transform_indices = @transform_1, window_bounds = array<i64: 128, 64>}, {transform_indices = @transform_2, window_bounds = array<i64: 1, 24, 64>}, {transform_indices = @transform_3, window_bounds = array<i64: 1, 64, 64>}, {transform_indices = @transform_4, window_bounds = array<i64: 1, 1, 64>}, {transform_indices = @transform_5, window_bounds = array<i64: 1, 64, 64>}, {transform_indices = @transform_6, window_bounds = array<i64: 1, 1, 64>}, {transform_indices = @transform_7, window_bounds = array<i64: 1, 64, 128>}, {transform_indices = @transform_8, window_bounds = array<i64: 1, 1, 128>}, {transform_indices = @transform_9, window_bounds = array<i64: 128, 128>}]} {
    %c0 = arith.constant 0 : index
    %c0_0 = arith.constant 0 : index
    %0 = vector.load %arg2[%c0, %c0_0] : memref<128x24xbf16, #tpu.memory_space<vmem>>, vector<128x24xbf16>
    %c0_1 = arith.constant 0 : index
    %c0_2 = arith.constant 0 : index
    %c0_3 = arith.constant 0 : index
    %1 = vector.load %arg4[%c0_1, %c0_2, %c0_3] : memref<1x24x64xbf16, #tpu.memory_space<vmem>>, vector<1x24x64xbf16>
    %2 = vector.shape_cast %1 : vector<1x24x64xbf16> to vector<24x64xbf16>
    %cst = arith.constant dense<0.000000e+00> : vector<128x64xf32>
    %3 = tpu.matmul %0, %2, %cst {dimension_numbers = #tpu.dot_dimension_numbers<[1], [0], [0], [1], [0, 0, 1, 1], [], []>} : vector<128x24xbf16>, vector<24x64xbf16>, vector<128x64xf32> -> vector<128x64xf32>
    %c0_4 = arith.constant 0 : index
    %c0_5 = arith.constant 0 : index
    %4 = vector.load %arg3[%c0_4, %c0_5] : memref<128x64xbf16, #tpu.memory_space<vmem>>, vector<128x64xbf16>
    %5 = arith.extf %4 : vector<128x64xbf16> to vector<128x64xf32>
    %6 = arith.addf %3, %5 : vector<128x64xf32>
    %cst_6 = arith.constant 0.000000e+00 : f32
    %7 = vector.broadcast %cst_6 : f32 to vector<128x64xf32>
    %8 = arith.cmpf ogt, %6, %7 : vector<128x64xf32>
    %cst_7 = arith.constant 1.000000e-01 : f32
    %9 = vector.broadcast %cst_7 : f32 to vector<128x64xf32>
    %10 = arith.mulf %9, %6 : vector<128x64xf32>
    %11 = arith.select %8, %6, %10 : vector<128x64xi1>, vector<128x64xf32>
    %12 = arith.truncf %11 : vector<128x64xf32> to vector<128x64xbf16>
    %c0_8 = arith.constant 0 : index
    %c0_9 = arith.constant 0 : index
    %c0_10 = arith.constant 0 : index
    %13 = vector.load %arg5[%c0_8, %c0_9, %c0_10] : memref<1x64x64xbf16, #tpu.memory_space<vmem>>, vector<1x64x64xbf16>
    %14 = vector.shape_cast %13 : vector<1x64x64xbf16> to vector<64x64xbf16>
    %cst_11 = arith.constant dense<0.000000e+00> : vector<128x64xf32>
    %15 = tpu.matmul %12, %14, %cst_11 {dimension_numbers = #tpu.dot_dimension_numbers<[1], [0], [0], [1], [0, 0, 1, 1], [], []>} : vector<128x64xbf16>, vector<64x64xbf16>, vector<128x64xf32> -> vector<128x64xf32>
    %c0_12 = arith.constant 0 : index
    %c0_13 = arith.constant 0 : index
    %c0_14 = arith.constant 0 : index
    %16 = vector.load %arg6[%c0_12, %c0_13, %c0_14] : memref<1x1x64xf32, #tpu.memory_space<vmem>>, vector<1x1x64xf32>
    %17 = vector.shape_cast %16 : vector<1x1x64xf32> to vector<1x64xf32>
    %18 = vector.broadcast %17 : vector<1x64xf32> to vector<128x64xf32>
    %19 = arith.addf %15, %18 : vector<128x64xf32>
    %cst_15 = arith.constant 0.000000e+00 : f32
    %20 = vector.broadcast %cst_15 : f32 to vector<128x64xf32>
    %21 = arith.cmpf ogt, %19, %20 : vector<128x64xf32>
    %cst_16 = arith.constant 1.000000e-01 : f32
    %22 = vector.broadcast %cst_16 : f32 to vector<128x64xf32>
    %23 = arith.mulf %22, %19 : vector<128x64xf32>
    %24 = arith.select %21, %19, %23 : vector<128x64xi1>, vector<128x64xf32>
    %25 = arith.truncf %24 : vector<128x64xf32> to vector<128x64xbf16>
    %c0_17 = arith.constant 0 : index
    %c0_18 = arith.constant 0 : index
    %c0_19 = arith.constant 0 : index
    %26 = vector.load %arg7[%c0_17, %c0_18, %c0_19] : memref<1x64x64xbf16, #tpu.memory_space<vmem>>, vector<1x64x64xbf16>
    %27 = vector.shape_cast %26 : vector<1x64x64xbf16> to vector<64x64xbf16>
    %cst_20 = arith.constant dense<0.000000e+00> : vector<128x64xf32>
    %28 = tpu.matmul %25, %27, %cst_20 {dimension_numbers = #tpu.dot_dimension_numbers<[1], [0], [0], [1], [0, 0, 1, 1], [], []>} : vector<128x64xbf16>, vector<64x64xbf16>, vector<128x64xf32> -> vector<128x64xf32>
    %c0_21 = arith.constant 0 : index
    %c0_22 = arith.constant 0 : index
    %c0_23 = arith.constant 0 : index
    %29 = vector.load %arg8[%c0_21, %c0_22, %c0_23] : memref<1x1x64xf32, #tpu.memory_space<vmem>>, vector<1x1x64xf32>
    %30 = vector.shape_cast %29 : vector<1x1x64xf32> to vector<1x64xf32>
    %31 = vector.broadcast %30 : vector<1x64xf32> to vector<128x64xf32>
    %32 = arith.addf %28, %31 : vector<128x64xf32>
    %cst_24 = arith.constant 0.000000e+00 : f32
    %33 = vector.broadcast %cst_24 : f32 to vector<128x64xf32>
    %34 = arith.cmpf ogt, %32, %33 : vector<128x64xf32>
    %cst_25 = arith.constant 1.000000e-01 : f32
    %35 = vector.broadcast %cst_25 : f32 to vector<128x64xf32>
    %36 = arith.mulf %35, %32 : vector<128x64xf32>
    %37 = arith.select %34, %32, %36 : vector<128x64xi1>, vector<128x64xf32>
    %38 = arith.truncf %37 : vector<128x64xf32> to vector<128x64xbf16>
    %c0_26 = arith.constant 0 : index
    %c0_27 = arith.constant 0 : index
    %c0_28 = arith.constant 0 : index
    %39 = vector.load %arg9[%c0_26, %c0_27, %c0_28] : memref<1x64x128xbf16, #tpu.memory_space<vmem>>, vector<1x64x128xbf16>
    %40 = vector.shape_cast %39 : vector<1x64x128xbf16> to vector<64x128xbf16>
    %cst_29 = arith.constant dense<0.000000e+00> : vector<128x128xf32>
    %41 = tpu.matmul %38, %40, %cst_29 {dimension_numbers = #tpu.dot_dimension_numbers<[1], [0], [0], [1], [0, 0, 1, 1], [], []>} : vector<128x64xbf16>, vector<64x128xbf16>, vector<128x128xf32> -> vector<128x128xf32>
    %c0_30 = arith.constant 0 : index
    %c0_31 = arith.constant 0 : index
    %c0_32 = arith.constant 0 : index
    %42 = vector.load %arg10[%c0_30, %c0_31, %c0_32] : memref<1x1x128xf32, #tpu.memory_space<vmem>>, vector<1x1x128xf32>
    %43 = vector.shape_cast %42 : vector<1x1x128xf32> to vector<1x128xf32>
    %44 = vector.broadcast %43 : vector<1x128xf32> to vector<128x128xf32>
    %45 = arith.addf %41, %44 : vector<128x128xf32>
    %c0_33 = arith.constant 0 : index
    %c0_34 = arith.constant 0 : index
    %46 = vector.load %arg11[%c0_33, %c0_34] : memref<128x128xf32, #tpu.memory_space<vmem>>, vector<128x128xf32>
    tpu.vector_store %arg11[%c0_33, %c0_34], %45 {strides = array<i32>} : memref<128x128xf32, #tpu.memory_space<vmem>>, vector<128x128xf32>,
    return
  }
  func.func @transform_0(%arg0: i32, %arg1: memref<3xi32, #tpu.memory_space<smem>>) -> (i32, i32) {
    %c0_i32 = arith.constant 0 : i32
    %c0_i32_0 = arith.constant 0 : i32
    return %arg0, %c0_i32 : i32, i32
  }
  func.func @transform_1(%arg0: i32, %arg1: memref<3xi32, #tpu.memory_space<smem>>) -> (i32, i32) {
    %c0_i32 = arith.constant 0 : i32
    %c0_i32_0 = arith.constant 0 : i32
    return %arg0, %c0_i32 : i32, i32
  }
  func.func @transform_2(%arg0: i32, %arg1: memref<3xi32, #tpu.memory_space<smem>>) -> (i32, i32, i32) {
    %0 = arith.index_cast %arg0 : i32 to index
    %1 = memref.load %arg1[%0] : memref<3xi32, #tpu.memory_space<smem>>
    %c0_i32 = arith.constant 0 : i32
    %c0_i32_0 = arith.constant 0 : i32
    %c0_i32_1 = arith.constant 0 : i32
    return %1, %c0_i32, %c0_i32_0 : i32, i32, i32
  }
  func.func @transform_3(%arg0: i32, %arg1: memref<3xi32, #tpu.memory_space<smem>>) -> (i32, i32, i32) {
    %0 = arith.index_cast %arg0 : i32 to index
    %1 = memref.load %arg1[%0] : memref<3xi32, #tpu.memory_space<smem>>
    %c0_i32 = arith.constant 0 : i32
    %c0_i32_0 = arith.constant 0 : i32
    %c0_i32_1 = arith.constant 0 : i32
    return %1, %c0_i32, %c0_i32_0 : i32, i32, i32
  }
  func.func @transform_4(%arg0: i32, %arg1: memref<3xi32, #tpu.memory_space<smem>>) -> (i32, i32, i32) {
    %0 = arith.index_cast %arg0 : i32 to index
    %1 = memref.load %arg1[%0] : memref<3xi32, #tpu.memory_space<smem>>
    %c0_i32 = arith.constant 0 : i32
    %c0_i32_0 = arith.constant 0 : i32
    %c0_i32_1 = arith.constant 0 : i32
    return %1, %c0_i32, %c0_i32_0 : i32, i32, i32
  }
  func.func @transform_5(%arg0: i32, %arg1: memref<3xi32, #tpu.memory_space<smem>>) -> (i32, i32, i32) {
    %0 = arith.index_cast %arg0 : i32 to index
    %1 = memref.load %arg1[%0] : memref<3xi32, #tpu.memory_space<smem>>
    %c0_i32 = arith.constant 0 : i32
    %c0_i32_0 = arith.constant 0 : i32
    %c0_i32_1 = arith.constant 0 : i32
    return %1, %c0_i32, %c0_i32_0 : i32, i32, i32
  }
  func.func @transform_6(%arg0: i32, %arg1: memref<3xi32, #tpu.memory_space<smem>>) -> (i32, i32, i32) {
    %0 = arith.index_cast %arg0 : i32 to index
    %1 = memref.load %arg1[%0] : memref<3xi32, #tpu.memory_space<smem>>
    %c0_i32 = arith.constant 0 : i32
    %c0_i32_0 = arith.constant 0 : i32
    %c0_i32_1 = arith.constant 0 : i32
    return %1, %c0_i32, %c0_i32_0 : i32, i32, i32
  }
  func.func @transform_7(%arg0: i32, %arg1: memref<3xi32, #tpu.memory_space<smem>>) -> (i32, i32, i32) {
    %0 = arith.index_cast %arg0 : i32 to index
    %1 = memref.load %arg1[%0] : memref<3xi32, #tpu.memory_space<smem>>
    %c0_i32 = arith.constant 0 : i32
    %c0_i32_0 = arith.constant 0 : i32
    %c0_i32_1 = arith.constant 0 : i32
    return %1, %c0_i32, %c0_i32_0 : i32, i32, i32
  }
  func.func @transform_8(%arg0: i32, %arg1: memref<3xi32, #tpu.memory_space<smem>>) -> (i32, i32, i32) {
    %0 = arith.index_cast %arg0 : i32 to index
    %1 = memref.load %arg1[%0] : memref<3xi32, #tpu.memory_space<smem>>
    %c0_i32 = arith.constant 0 : i32
    %c0_i32_0 = arith.constant 0 : i32
    %c0_i32_1 = arith.constant 0 : i32
    return %1, %c0_i32, %c0_i32_0 : i32, i32, i32
  }
  func.func @transform_9(%arg0: i32, %arg1: memref<3xi32, #tpu.memory_space<smem>>) -> (i32, i32) {
    %c0_i32 = arith.constant 0 : i32
    %c0_i32_0 = arith.constant 0 : i32
    return %arg0, %c0_i32 : i32, i32
  }
}

</mosaic_0001>

<bundles_post_ra>
// kernel: squeeze.3
= control target key start
LH: loop header
LB: loop body
LE: loop exit
PB: predicated region body
PF: predicated region fallthrough
CT: control target
= control target key end

     0   :  { %s4537_s10 = smov 120   ;;  %vm3_vm0 = vcmask 64512   ;;  %s4539_s9 = smov 104   ;;  %s9186_s0 = inlined_call_operand.vmem [shape: f32[2,3,1,64,64], index: 0, kind: input, shape index: {}]   ;;  %s9187_s1 = inlined_call_operand.vmem [shape: f32[2,3,8,8,8,8], index: 1, kind: output, shape index: {}]  }
   0x1   :  { %v4557_v0 = vld [vmem:[%s9186_s0 + $0x10] sm:$0xff]   ;;  %v4562_v1 = vld [vmem:[%s9186_s0] sm:$0xff]   ;;  %v4571_v2 = vld [vmem:[%s9186_s0 + $0x18] sm:$0xff]   ;;  %s4540_s8 = smov 96   ;;  %s4541_s14 = smov 88  }
   0x2   :  { %354 = vrot.lane.b32.xlu1 %v4557_v0, %s4537_s10  ;;  %336 = vrot.lane.b32.xlu0 %v4562_v1, %s4537_s10  ;;  %v4576_v3 = vld [vmem:[%s9186_s0 + $0x8] sm:$0xff]   ;;  %v4590_v5 = vld [vmem:[%s9186_s0 + $0x20] sm:$0xff]   ;;  %s4542_s26 = smov 80   ;;  %s4543_s28 = smov 72  }
   0x3   :  { %v4585_v4 = vld [vmem:[%s9186_s0 + $0x28] sm:$0xff]   ;;  %v4599_v6 = vld [vmem:[%s9186_s0 + $0x38] sm:$0xff]   ;;  %v4604_v7 = vld [vmem:[%s9186_s0 + $0x30] sm:$0xff]  }
   0x4   :  { %v4613_v8 = vld [vmem:[%s9186_s0 + $0x48] sm:$0xff]   ;;  %v4618_v9 = vld [vmem:[%s9186_s0 + $0x40] sm:$0xff]   ;;  %v4627_v10 = vld [vmem:[%s9186_s0 + $0x58] sm:$0xff]  }
   0x5   :  { %v4632_v11 = vld [vmem:[%s9186_s0 + $0x50] sm:$0xff]   ;;  %v4641_v12 = vld [vmem:[%s9186_s0 + $0x68] sm:$0xff]   ;;  %v4646_v13 = vld [vmem:[%s9186_s0 + $0x60] sm:$0xff]  }
   0x6   :  { %363 = vrot.lane.b32.xlu1 %v4571_v2, %s4537_s10  ;;  %345 = vrot.lane.b32.xlu0 %v4576_v3, %s4537_s10  ;;  %v4655_v14 = vld [vmem:[%s9186_s0 + $0x78] sm:$0xff]   ;;  %v4660_v15 = vld [vmem:[%s9186_s0 + $0x70] sm:$0xff]  }
   0x7   :  { %v4669_v16 = vld [vmem:[%s9186_s0 + $0x88] sm:$0xff]   ;;  %v4674_v17 = vld [vmem:[%s9186_s0 + $0x80] sm:$0xff]   ;;  %v4683_v18 = vld [vmem:[%s9186_s0 + $0x98] sm:$0xff]  }
   0x8   :  { %v4688_v19 = vld [vmem:[%s9186_s0 + $0x90] sm:$0xff]   ;;  %v4697_v20 = vld [vmem:[%s9186_s0 + $0xa8] sm:$0xff]   ;;  %v4702_v21 = vld [vmem:[%s9186_s0 + $0xa0] sm:$0xff]  }
   0x9   :  { %v4711_v22 = vld [vmem:[%s9186_s0 + $0xb8] sm:$0xff]   ;;  %v4716_v23 = vld [vmem:[%s9186_s0 + $0xb0] sm:$0xff]   ;;  %v4725_v24 = vld [vmem:[%s9186_s0 + $0xc8] sm:$0xff]  }
   0xa   :  { %381 = vrot.lane.b32.xlu1 %v4585_v4, %s4537_s10  ;;  %372 = vrot.lane.b32.xlu0 %v4590_v5, %s4537_s10  ;;  %v4730_v25 = vld [vmem:[%s9186_s0 + $0xc0] sm:$0xff]   ;;  %v4739_v26 = vld [vmem:[%s9186_s0 + $0xd8] sm:$0xff]  }
   0xb   :  { %v4744_v27 = vld [vmem:[%s9186_s0 + $0xd0] sm:$0xff]   ;;  %v4753_v28 = vld [vmem:[%s9186_s0 + $0xe8] sm:$0xff]   ;;  %v4758_v29 = vld [vmem:[%s9186_s0 + $0xe0] sm:$0xff]  }
   0xc   :  { %v4767_v30 = vld [vmem:[%s9186_s0 + $0xf8] sm:$0xff]   ;;  %v4772_v31 = vld [vmem:[%s9186_s0 + $0xf0] sm:$0xff]   ;;  %v4781_v32 = vld [vmem:[%s9186_s0 + $0x108] sm:$0xff]  }
   0xd   :  { %v4786_v33 = vld [vmem:[%s9186_s0 + $0x100] sm:$0xff]   ;;  %v4795_v34 = vld [vmem:[%s9186_s0 + $0x118] sm:$0xff]   ;;  %v4800_v35 = vld [vmem:[%s9186_s0 + $0x110] sm:$0xff]  }
   0xe   :  { %399 = vrot.lane.b32.xlu1 %v4599_v6, %s4537_s10  ;;  %390 = vrot.lane.b32.xlu0 %v4604_v7, %s4537_s10  ;;  %v4809_v36 = vld [vmem:[%s9186_s0 + $0x128] sm:$0xff]   ;;  %v4814_v37 = vld [vmem:[%s9186_s0 + $0x120] sm:$0xff]  }
   0xf   :  { %v4823_v38 = vld [vmem:[%s9186_s0 + $0x138] sm:$0xff]   ;;  %v4828_v39 = vld [vmem:[%s9186_s0 + $0x130] sm:$0xff]   ;;  %v4837_v40 = vld [vmem:[%s9186_s0 + $0x148] sm:$0xff]  }
  0x10   :  { %v4842_v41 = vld [vmem:[%s9186_s0 + $0x140] sm:$0xff]   ;;  %v4851_v42 = vld [vmem:[%s9186_s0 + $0x158] sm:$0xff]   ;;  %v4856_v43 = vld [vmem:[%s9186_s0 + $0x150] sm:$0xff]  }
  0x11   :  { %v4865_v44 = vld [vmem:[%s9186_s0 + $0x168] sm:$0xff]   ;;  %v4870_v45 = vld [vmem:[%s9186_s0 + $0x160] sm:$0xff]   ;;  %v4879_v46 = vld [vmem:[%s9186_s0 + $0x178] sm:$0xff]  }
  0x12   :  { %417 = vrot.lane.b32.xlu1 %v4613_v8, %s4537_s10  ;;  %408 = vrot.lane.b32.xlu0 %v4618_v9, %s4537_s10  ;;  %v4884_v47 = vld [vmem:[%s9186_s0 + $0x170] sm:$0xff]  }
  0x16   :  { %435 = vrot.lane.b32.xlu1 %v4627_v10, %s4537_s10  ;;  %426 = vrot.lane.b32.xlu0 %v4632_v11, %s4537_s10 }
  0x1a   :  { %453 = vrot.lane.b32.xlu1 %v4641_v12, %s4537_s10  ;;  %444 = vrot.lane.b32.xlu0 %v4646_v13, %s4537_s10 }
  0x1e   :  { %471 = vrot.lane.b32.xlu1 %v4655_v14, %s4537_s10  ;;  %462 = vrot.lane.b32.xlu0 %v4660_v15, %s4537_s10 }
  0x22   :  { %489 = vrot.lane.b32.xlu1 %v4669_v16, %s4537_s10  ;;  %480 = vrot.lane.b32.xlu0 %v4674_v17, %s4537_s10 }
  0x26   :  { %507 = vrot.lane.b32.xlu1 %v4683_v18, %s4537_s10  ;;  %498 = vrot.lane.b32.xlu0 %v4688_v19, %s4537_s10 }
  0x2a   :  { %525 = vrot.lane.b32.xlu1 %v4697_v20, %s4537_s10  ;;  %516 = vrot.lane.b32.xlu0 %v4702_v21, %s4537_s10 }
  0x2e   :  { %543 = vrot.lane.b32.xlu1 %v4711_v22, %s4537_s10  ;;  %534 = vrot.lane.b32.xlu0 %v4716_v23, %s4537_s10 }
  0x32   :  { %561 = vrot.lane.b32.xlu1 %v4725_v24, %s4537_s10  ;;  %552 = vrot.lane.b32.xlu0 %v4730_v25, %s4537_s10 }
  0x36   :  { %579 = vrot.lane.b32.xlu1 %v4739_v26, %s4537_s10  ;;  %570 = vrot.lane.b32.xlu0 %v4744_v27, %s4537_s10 }
  0x3a   :  { %597 = vrot.lane.b32.xlu1 %v4753_v28, %s4537_s10  ;;  %588 = vrot.lane.b32.xlu0 %v4758_v29, %s4537_s10 }
  0x3e   :  { %615 = vrot.lane.b32.xlu1 %v4767_v30, %s4537_s10  ;;  %606 = vrot.lane.b32.xlu0 %v4772_v31, %s4537_s10 }
  0x42   :  { %633 = vrot.lane.b32.xlu1 %v4781_v32, %s4537_s10  ;;  %624 = vrot.lane.b32.xlu0 %v4786_v33, %s4537_s10 }
  0x46   :  { %651 = vrot.lane.b32.xlu1 %v4795_v34, %s4537_s10  ;;  %642 = vrot.lane.b32.xlu0 %v4800_v35, %s4537_s10 }
  0x4a   :  { %669 = vrot.lane.b32.xlu1 %v4809_v36, %s4537_s10  ;;  %660 = vrot.lane.b32.xlu0 %v4814_v37, %s4537_s10 }
  0x4e   :  { %687 = vrot.lane.b32.xlu1 %v4823_v38, %s4537_s10  ;;  %678 = vrot.lane.b32.xlu0 %v4828_v39, %s4537_s10 }
  0x52   :  { %705 = vrot.lane.b32.xlu1 %v4837_v40, %s4537_s10  ;;  %696 = vrot.lane.b32.xlu0 %v4842_v41, %s4537_s10 }
  0x56   :  { %723 = vrot.lane.b32.xlu1 %v4851_v42, %s4537_s10  ;;  %714 = vrot.lane.b32.xlu0 %v4856_v43, %s4537_s10 }
  0x5a   :  { %741 = vrot.lane.b32.xlu1 %v4865_v44, %s4537_s10  ;;  %732 = vrot.lane.b32.xlu0 %v4870_v45, %s4537_s10 }
  0x5e   :  { %759 = vrot.lane.b32.xlu1 %v4879_v46, %s4537_s10  ;;  %750 = vrot.lane.b32.xlu0 %v4884_v47, %s4537_s10  ;;  %s4538_s10 = smov 112  }
  0x62   :  { %776 = vrot.lane.b32.xlu1 %v4576_v3, %s4538_s10  ;;  %767 = vrot.lane.b32.xlu0 %v4562_v1, %s4538_s10 }
  0x66   :  { %794 = vrot.lane.b32.xlu1 %v4571_v2, %s4538_s10  ;;  %785 = vrot.lane.b32.xlu0 %v4557_v0, %s4538_s10 }
  0x6a   :  { %812 = vrot.lane.b32.xlu1 %v4585_v4, %s4538_s10  ;;  %803 = vrot.lane.b32.xlu0 %v4590_v5, %s4538_s10 }
  0x6e   :  { %830 = vrot.lane.b32.xlu1 %v4599_v6, %s4538_s10  ;;  %821 = vrot.lane.b32.xlu0 %v4604_v7, %s4538_s10 }
  0x72   :  { %848 = vrot.lane.b32.xlu1 %v4613_v8, %s4538_s10  ;;  %839 = vrot.lane.b32.xlu0 %v4618_v9, %s4538_s10 }
  0x74   :  { %v355_v48 = vpop.permute.xlu1 %354   ;;  %v337_v49 = vpop.permute.xlu0 %336  }
  0x75   :  { %3499 = vst.msk [vmem:[%s9187_s1 + $0x81] ss:$8 sm:$0xf] %vm3_vm0, %v355_v48   ;;  %3500 = vst.msk [vmem:[%s9187_s1 + $0x81] ss:$8 sm:$0xf0] %vm3_vm0, %v355_v48  }
  0x76   :  { %3493 = vst.msk [vmem:[%s9187_s1 + $0x1] ss:$8 sm:$0xf] %vm3_vm0, %v337_v49   ;;  %3494 = vst.msk [vmem:[%s9187_s1 + $0x1] ss:$8 sm:$0xf0] %vm3_vm0, %v337_v49   ;;  %866 = vrot.lane.b32.xlu1 %v4627_v10, %s4538_s10  ;;  %857 = vrot.lane.b32.xlu0 %v4632_v11, %s4538_s10 }
  0x78   :  { %v364_v50 = vpop.permute.xlu1 %363   ;;  %v346_v51 = vpop.permute.xlu0 %345  }
  0x79   :  { %3502 = vst.msk [vmem:[%s9187_s1 + $0xc1] ss:$8 sm:$0xf] %vm3_vm0, %v364_v50   ;;  %3503 = vst.msk [vmem:[%s9187_s1 + $0xc1] ss:$8 sm:$0xf0] %vm3_vm0, %v364_v50  }
  0x7a   :  { %3496 = vst.msk [vmem:[%s9187_s1 + $0x41] ss:$8 sm:$0xf] %vm3_vm0, %v346_v51   ;;  %3497 = vst.msk [vmem:[%s9187_s1 + $0x41] ss:$8 sm:$0xf0] %vm3_vm0, %v346_v51   ;;  %884 = vrot.lane.b32.xlu1 %v4641_v12, %s4538_s10  ;;  %875 = vrot.lane.b32.xlu0 %v4646_v13, %s4538_s10 }
  0x7c   :  { %v382_v52 = vpop.permute.xlu1 %381   ;;  %v373_v53 = vpop.permute.xlu0 %372  }
  0x7d   :  { %3508 = vst.msk [vmem:[%s9187_s1 + $0x141] ss:$8 sm:$0xf] %vm3_vm0, %v382_v52   ;;  %3509 = vst.msk [vmem:[%s9187_s1 + $0x141] ss:$8 sm:$0xf0] %vm3_vm0, %v382_v52  }
  0x7e   :  { %3505 = vst.msk [vmem:[%s9187_s1 + $0x101] ss:$8 sm:$0xf] %vm3_vm0, %v373_v53   ;;  %3506 = vst.msk [vmem:[%s9187_s1 + $0x101] ss:$8 sm:$0xf0] %vm3_vm0, %v373_v53   ;;  %902 = vrot.lane.b32.xlu1 %v4655_v14, %s4538_s10  ;;  %893 = vrot.lane.b32.xlu0 %v4660_v15, %s4538_s10 }
  0x80   :  { %v400_v54 = vpop.permute.xlu1 %399   ;;  %v391_v55 = vpop.permute.xlu0 %390  }
  0x81   :  { %3514 = vst.msk [vmem:[%s9187_s1 + $0x1c1] ss:$8 sm:$0xf] %vm3_vm0, %v400_v54   ;;  %3515 = vst.msk [vmem:[%s9187_s1 + $0x1c1] ss:$8 sm:$0xf0] %vm3_vm0, %v400_v54  }
  0x82   :  { %3511 = vst.msk [vmem:[%s9187_s1 + $0x181] ss:$8 sm:$0xf] %vm3_vm0, %v391_v55   ;;  %3512 = vst.msk [vmem:[%s9187_s1 + $0x181] ss:$8 sm:$0xf0] %vm3_vm0, %v391_v55   ;;  %920 = vrot.lane.b32.xlu1 %v4669_v16, %s4538_s10  ;;  %911 = vrot.lane.b32.xlu0 %v4674_v17, %s4538_s10 }
  0x84   :  { %v418_v56 = vpop.permute.xlu1 %417   ;;  %v409_v57 = vpop.permute.xlu0 %408  }
  0x85   :  { %3520 = vst.msk [vmem:[%s9187_s1 + $0x241] ss:$8 sm:$0xf] %vm3_vm0, %v418_v56   ;;  %3521 = vst.msk [vmem:[%s9187_s1 + $0x241] ss:$8 sm:$0xf0] %vm3_vm0, %v418_v56  }
  0x86   :  { %3517 = vst.msk [vmem:[%s9187_s1 + $0x201] ss:$8 sm:$0xf] %vm3_vm0, %v409_v57   ;;  %3518 = vst.msk [vmem:[%s9187_s1 + $0x201] ss:$8 sm:$0xf0] %vm3_vm0, %v409_v57   ;;  %938 = vrot.lane.b32.xlu1 %v4683_v18, %s4538_s10  ;;  %929 = vrot.lane.b32.xlu0 %v4688_v19, %s4538_s10 }
  0x88   :  { %v436_v58 = vpop.permute.xlu1 %435   ;;  %v427_v59 = vpop.permute.xlu0 %426  }
  0x89   :  { %3526 = vst.msk [vmem:[%s9187_s1 + $0x2c1] ss:$8 sm:$0xf] %vm3_vm0, %v436_v58   ;;  %3527 = vst.msk [vmem:[%s9187_s1 + $0x2c1] ss:$8 sm:$0xf0] %vm3_vm0, %v436_v58  }
  0x8a   :  { %3523 = vst.msk [vmem:[%s9187_s1 + $0x281] ss:$8 sm:$0xf] %vm3_vm0, %v427_v59   ;;  %3524 = vst.msk [vmem:[%s9187_s1 + $0x281] ss:$8 sm:$0xf0] %vm3_vm0, %v427_v59   ;;  %956 = vrot.lane.b32.xlu1 %v4697_v20, %s4538_s10  ;;  %947 = vrot.lane.b32.xlu0 %v4702_v21, %s4538_s10 }
  0x8c   :  { %v454_v60 = vpop.permute.xlu1 %453   ;;  %v445_v61 = vpop.permute.xlu0 %444  }
  0x8d   :  { %3532 = vst.msk [vmem:[%s9187_s1 + $0x341] ss:$8 sm:$0xf] %vm3_vm0, %v454_v60   ;;  %3533 = vst.msk [vmem:[%s9187_s1 + $0x341] ss:$8 sm:$0xf0] %vm3_vm0, %v454_v60  }
  0x8e   :  { %3529 = vst.msk [vmem:[%s9187_s1 + $0x301] ss:$8 sm:$0xf] %vm3_vm0, %v445_v61   ;;  %3530 = vst.msk [vmem:[%s9187_s1 + $0x301] ss:$8 sm:$0xf0] %vm3_vm0, %v445_v61   ;;  %974 = vrot.lane.b32.xlu1 %v4711_v22, %s4538_s10  ;;  %965 = vrot.lane.b32.xlu0 %v4716_v23, %s4538_s10 }
  0x90   :  { %v472_v62 = vpop.permute.xlu1 %471   ;;  %v463_v63 = vpop.permute.xlu0 %462  }
  0x91   :  { %3538 = vst.msk [vmem:[%s9187_s1 + $0x3c1] ss:$8 sm:$0xf] %vm3_vm0, %v472_v62   ;;  %3539 = vst.msk [vmem:[%s9187_s1 + $0x3c1] ss:$8 sm:$0xf0] %vm3_vm0, %v472_v62  }
  0x92   :  { %3535 = vst.msk [vmem:[%s9187_s1 + $0x381] ss:$8 sm:$0xf] %vm3_vm0, %v463_v63   ;;  %3536 = vst.msk [vmem:[%s9187_s1 + $0x381] ss:$8 sm:$0xf0] %vm3_vm0, %v463_v63   ;;  %992 = vrot.lane.b32.xlu1 %v4725_v24, %s4538_s10  ;;  %983 = vrot.lane.b32.xlu0 %v4730_v25, %s4538_s10 }
  0x94   :  { %v490_v48 = vpop.permute.xlu1 %489   ;;  %v481_v49 = vpop.permute.xlu0 %480  }
  0x95   :  { %3544 = vst.msk [vmem:[%s9187_s1 + $0x441] ss:$8 sm:$0xf] %vm3_vm0, %v490_v48   ;;  %3545 = vst.msk [vmem:[%s9187_s1 + $0x441] ss:$8 sm:$0xf0] %vm3_vm0, %v490_v48  }
  0x96   :  { %3541 = vst.msk [vmem:[%s9187_s1 + $0x401] ss:$8 sm:$0xf] %vm3_vm0, %v481_v49   ;;  %3542 = vst.msk [vmem:[%s9187_s1 + $0x401] ss:$8 sm:$0xf0] %vm3_vm0, %v481_v49   ;;  %1010 = vrot.lane.b32.xlu1 %v4739_v26, %s4538_s10  ;;  %1001 = vrot.lane.b32.xlu0 %v4744_v27, %s4538_s10 }
  0x98   :  { %v508_v50 = vpop.permute.xlu1 %507   ;;  %v499_v51 = vpop.permute.xlu0 %498  }
  0x99   :  { %3550 = vst.msk [vmem:[%s9187_s1 + $0x4c1] ss:$8 sm:$0xf] %vm3_vm0, %v508_v50   ;;  %3551 = vst.msk [vmem:[%s9187_s1 + $0x4c1] ss:$8 sm:$0xf0] %vm3_vm0, %v508_v50  }
  0x9a   :  { %3547 = vst.msk [vmem:[%s9187_s1 + $0x481] ss:$8 sm:$0xf] %vm3_vm0, %v499_v51   ;;  %3548 = vst.msk [vmem:[%s9187_s1 + $0x481] ss:$8 sm:$0xf0] %vm3_vm0, %v499_v51   ;;  %1028 = vrot.lane.b32.xlu1 %v4753_v28, %s4538_s10  ;;  %1019 = vrot.lane.b32.xlu0 %v4758_v29, %s4538_s10 }
  0x9c   :  { %v526_v52 = vpop.permute.xlu1 %525   ;;  %v517_v53 = vpop.permute.xlu0 %516  }
  0x9d   :  { %3556 = vst.msk [vmem:[%s9187_s1 + $0x541] ss:$8 sm:$0xf] %vm3_vm0, %v526_v52   ;;  %3557 = vst.msk [vmem:[%s9187_s1 + $0x541] ss:$8 sm:$0xf0] %vm3_vm0, %v526_v52  }
  0x9e   :  { %3553 = vst.msk [vmem:[%s9187_s1 + $0x501] ss:$8 sm:$0xf] %vm3_vm0, %v517_v53   ;;  %3554 = vst.msk [vmem:[%s9187_s1 + $0x501] ss:$8 sm:$0xf0] %vm3_vm0, %v517_v53   ;;  %1046 = vrot.lane.b32.xlu1 %v4767_v30, %s4538_s10  ;;  %1037 = vrot.lane.b32.xlu0 %v4772_v31, %s4538_s10 }
  0xa0   :  { %v544_v54 = vpop.permute.xlu1 %543   ;;  %v535_v55 = vpop.permute.xlu0 %534  }
  0xa1   :  { %3562 = vst.msk [vmem:[%s9187_s1 + $0x5c1] ss:$8 sm:$0xf] %vm3_vm0, %v544_v54   ;;  %3563 = vst.msk [vmem:[%s9187_s1 + $0x5c1] ss:$8 sm:$0xf0] %vm3_vm0, %v544_v54  }
  0xa2   :  { %3559 = vst.msk [vmem:[%s9187_s1 + $0x581] ss:$8 sm:$0xf] %vm3_vm0, %v535_v55   ;;  %3560 = vst.msk [vmem:[%s9187_s1 + $0x581] ss:$8 sm:$0xf0] %vm3_vm0, %v535_v55   ;;  %1064 = vrot.lane.b32.xlu1 %v4781_v32, %s4538_s10  ;;  %1055 = vrot.lane.b32.xlu0 %v4786_v33, %s4538_s10 }
  0xa4   :  { %v562_v56 = vpop.permute.xlu1 %561   ;;  %v553_v57 = vpop.permute.xlu0 %552  }
  0xa5   :  { %3568 = vst.msk [vmem:[%s9187_s1 + $0x641] ss:$8 sm:$0xf] %vm3_vm0, %v562_v56   ;;  %3569 = vst.msk [vmem:[%s9187_s1 + $0x641] ss:$8 sm:$0xf0] %vm3_vm0, %v562_v56  }
  0xa6   :  { %3565 = vst.msk [vmem:[%s9187_s1 + $0x601] ss:$8 sm:$0xf] %vm3_vm0, %v553_v57   ;;  %3566 = vst.msk [vmem:[%s9187_s1 + $0x601] ss:$8 sm:$0xf0] %vm3_vm0, %v553_v57   ;;  %1082 = vrot.lane.b32.xlu1 %v4795_v34, %s4538_s10  ;;  %1073 = vrot.lane.b32.xlu0 %v4800_v35, %s4538_s10 }
  0xa8   :  { %v580_v58 = vpop.permute.xlu1 %579   ;;  %v571_v59 = vpop.permute.xlu0 %570  }
  0xa9   :  { %3574 = vst.msk [vmem:[%s9187_s1 + $0x6c1] ss:$8 sm:$0xf] %vm3_vm0, %v580_v58   ;;  %3575 = vst.msk [vmem:[%s9187_s1 + $0x6c1] ss:$8 sm:$0xf0] %vm3_vm0, %v580_v58  }
  0xaa   :  { %3571 = vst.msk [vmem:[%s9187_s1 + $0x681] ss:$8 sm:$0xf] %vm3_vm0, %v571_v59   ;;  %3572 = vst.msk [vmem:[%s9187_s1 + $0x681] ss:$8 sm:$0xf0] %vm3_vm0, %v571_v59   ;;  %1100 = vrot.lane.b32.xlu1 %v4809_v36, %s4538_s10  ;;  %1091 = vrot.lane.b32.xlu0 %v4814_v37, %s4538_s10 }
  0xab   :  { %v5803_v58 = vld [vmem:[%s9186_s0 + $0x18] sm:$0xff]   ;;  %v5808_v59 = vld [vmem:[%s9186_s0 + $0x10] sm:$0xff]  }
  0xac   :  { %v598_v60 = vpop.permute.xlu1 %597   ;;  %v589_v61 = vpop.permute.xlu0 %588  }
  0xad   :  { %3580 = vst.msk [vmem:[%s9187_s1 + $0x741] ss:$8 sm:$0xf] %vm3_vm0, %v598_v60   ;;  %3581 = vst.msk [vmem:[%s9187_s1 + $0x741] ss:$8 sm:$0xf0] %vm3_vm0, %v598_v60  }
  0xae   :  { %3577 = vst.msk [vmem:[%s9187_s1 + $0x701] ss:$8 sm:$0xf] %vm3_vm0, %v589_v61   ;;  %3578 = vst.msk [vmem:[%s9187_s1 + $0x701] ss:$8 sm:$0xf0] %vm3_vm0, %v589_v61   ;;  %1118 = vrot.lane.b32.xlu1 %v4823_v38, %s4538_s10  ;;  %1109 = vrot.lane.b32.xlu0 %v4828_v39, %s4538_s10 }
  0xb0   :  { %v616_v62 = vpop.permute.xlu1 %615   ;;  %v607_v63 = vpop.permute.xlu0 %606  }
  0xb1   :  { %3586 = vst.msk [vmem:[%s9187_s1 + $0x7c1] ss:$8 sm:$0xf] %vm3_vm0, %v616_v62   ;;  %3587 = vst.msk [vmem:[%s9187_s1 + $0x7c1] ss:$8 sm:$0xf0] %vm3_vm0, %v616_v62  }
  0xb2   :  { %3583 = vst.msk [vmem:[%s9187_s1 + $0x781] ss:$8 sm:$0xf] %vm3_vm0, %v607_v63   ;;  %3584 = vst.msk [vmem:[%s9187_s1 + $0x781] ss:$8 sm:$0xf0] %vm3_vm0, %v607_v63   ;;  %1136 = vrot.lane.b32.xlu1 %v4837_v40, %s4538_s10  ;;  %1127 = vrot.lane.b32.xlu0 %v4842_v41, %s4538_s10 }
  0xb3   :  { %v5833_v62 = vld [vmem:[%s9186_s0 + $0x28] sm:$0xff]   ;;  %v5838_v63 = vld [vmem:[%s9186_s0 + $0x20] sm:$0xff]  }
  0xb4   :  { %v634_v48 = vpop.permute.xlu1 %633   ;;  %v625_v49 = vpop.permute.xlu0 %624  }
  0xb5   :  { %3592 = vst.msk [vmem:[%s9187_s1 + $0x841] ss:$8 sm:$0xf] %vm3_vm0, %v634_v48   ;;  %3593 = vst.msk [vmem:[%s9187_s1 + $0x841] ss:$8 sm:$0xf0] %vm3_vm0, %v634_v48  }
  0xb6   :  { %3589 = vst.msk [vmem:[%s9187_s1 + $0x801] ss:$8 sm:$0xf] %vm3_vm0, %v625_v49   ;;  %3590 = vst.msk [vmem:[%s9187_s1 + $0x801] ss:$8 sm:$0xf0] %vm3_vm0, %v625_v49   ;;  %1154 = vrot.lane.b32.xlu1 %v4851_v42, %s4538_s10  ;;  %1145 = vrot.lane.b32.xlu0 %v4856_v43, %s4538_s10 }
  0xb8   :  { %v652_v50 = vpop.permute.xlu1 %651   ;;  %v643_v51 = vpop.permute.xlu0 %642  }
  0xb9   :  { %3598 = vst.msk [vmem:[%s9187_s1 + $0x8c1] ss:$8 sm:$0xf] %vm3_vm0, %v652_v50   ;;  %3599 = vst.msk [vmem:[%s9187_s1 + $0x8c1] ss:$8 sm:$0xf0] %vm3_vm0, %v652_v50  }
  0xba   :  { %3595 = vst.msk [vmem:[%s9187_s1 + $0x881] ss:$8 sm:$0xf] %vm3_vm0, %v643_v51   ;;  %3596 = vst.msk [vmem:[%s9187_s1 + $0x881] ss:$8 sm:$0xf0] %vm3_vm0, %v643_v51   ;;  %1172 = vrot.lane.b32.xlu1 %v4865_v44, %s4538_s10  ;;  %1163 = vrot.lane.b32.xlu0 %v4870_v45, %s4538_s10 }
  0xbb   :  { %v5863_v50 = vld [vmem:[%s9186_s0 + $0x38] sm:$0xff]   ;;  %v5868_v51 = vld [vmem:[%s9186_s0 + $0x30] sm:$0xff]  }
  0xbc   :  { %v670_v52 = vpop.permute.xlu1 %669   ;;  %v661_v53 = vpop.permute.xlu0 %660  }
  0xbd   :  { %3604 = vst.msk [vmem:[%s9187_s1 + $0x941] ss:$8 sm:$0xf] %vm3_vm0, %v670_v52   ;;  %3605 = vst.msk [vmem:[%s9187_s1 + $0x941] ss:$8 sm:$0xf0] %vm3_vm0, %v670_v52  }
  0xbe   :  { %3601 = vst.msk [vmem:[%s9187_s1 + $0x901] ss:$8 sm:$0xf] %vm3_vm0, %v661_v53   ;;  %3602 = vst.msk [vmem:[%s9187_s1 + $0x901] ss:$8 sm:$0xf0] %vm3_vm0, %v661_v53   ;;  %1190 = vrot.lane.b32.xlu1 %v4879_v46, %s4538_s10  ;;  %1181 = vrot.lane.b32.xlu0 %v4884_v47, %s4538_s10 }
  0xc0   :  { %v688_v54 = vpop.permute.xlu1 %687   ;;  %v679_v55 = vpop.permute.xlu0 %678  }
  0xc1   :  { %3610 = vst.msk [vmem:[%s9187_s1 + $0x9c1] ss:$8 sm:$0xf] %vm3_vm0, %v688_v54   ;;  %3611 = vst.msk [vmem:[%s9187_s1 + $0x9c1] ss:$8 sm:$0xf0] %vm3_vm0, %v688_v54  }
  0xc2   :  { %3607 = vst.msk [vmem:[%s9187_s1 + $0x981] ss:$8 sm:$0xf] %vm3_vm0, %v679_v55   ;;  %3608 = vst.msk [vmem:[%s9187_s1 + $0x981] ss:$8 sm:$0xf0] %vm3_vm0, %v679_v55   ;;  %1207 = vrot.lane.b32.xlu1 %v4576_v3, %s4539_s9  ;;  %1198 = vrot.lane.b32.xlu0 %v4562_v1, %s4539_s9 }
  0xc3   :  { %v5893_v54 = vld [vmem:[%s9186_s0 + $0x48] sm:$0xff]   ;;  %v5898_v55 = vld [vmem:[%s9186_s0 + $0x40] sm:$0xff]  }
  0xc4   :  { %v706_v1 = vpop.permute.xlu1 %705   ;;  %v697_v3 = vpop.permute.xlu0 %696  }
  0xc5   :  { %3616 = vst.msk [vmem:[%s9187_s1 + $0xa41] ss:$8 sm:$0xf] %vm3_vm0, %v706_v1   ;;  %3617 = vst.msk [vmem:[%s9187_s1 + $0xa41] ss:$8 sm:$0xf0] %vm3_vm0, %v706_v1  }
  0xc6   :  { %3613 = vst.msk [vmem:[%s9187_s1 + $0xa01] ss:$8 sm:$0xf] %vm3_vm0, %v697_v3   ;;  %3614 = vst.msk [vmem:[%s9187_s1 + $0xa01] ss:$8 sm:$0xf0] %vm3_vm0, %v697_v3   ;;  %1225 = vrot.lane.b32.xlu1 %v4571_v2, %s4539_s9  ;;  %1216 = vrot.lane.b32.xlu0 %v4557_v0, %s4539_s9 }
  0xc8   :  { %v724_v0 = vpop.permute.xlu1 %723   ;;  %v715_v2 = vpop.permute.xlu0 %714  }
  0xc9   :  { %3622 = vst.msk [vmem:[%s9187_s1 + $0xac1] ss:$8 sm:$0xf] %vm3_vm0, %v724_v0   ;;  %3623 = vst.msk [vmem:[%s9187_s1 + $0xac1] ss:$8 sm:$0xf0] %vm3_vm0, %v724_v0  }
  0xca   :  { %3619 = vst.msk [vmem:[%s9187_s1 + $0xa81] ss:$8 sm:$0xf] %vm3_vm0, %v715_v2   ;;  %3620 = vst.msk [vmem:[%s9187_s1 + $0xa81] ss:$8 sm:$0xf0] %vm3_vm0, %v715_v2   ;;  %1243 = vrot.lane.b32.xlu1 %v4585_v4, %s4539_s9  ;;  %1234 = vrot.lane.b32.xlu0 %v4590_v5, %s4539_s9 }
  0xcb   :  { %v5923_v0 = vld [vmem:[%s9186_s0 + $0x58] sm:$0xff]   ;;  %v5928_v2 = vld [vmem:[%s9186_s0 + $0x50] sm:$0xff]  }
  0xcc   :  { %v742_v4 = vpop.permute.xlu1 %741   ;;  %v733_v5 = vpop.permute.xlu0 %732  }
  0xcd   :  { %3628 = vst.msk [vmem:[%s9187_s1 + $0xb41] ss:$8 sm:$0xf] %vm3_vm0, %v742_v4   ;;  %3629 = vst.msk [vmem:[%s9187_s1 + $0xb41] ss:$8 sm:$0xf0] %vm3_vm0, %v742_v4  }
  0xce   :  { %3625 = vst.msk [vmem:[%s9187_s1 + $0xb01] ss:$8 sm:$0xf] %vm3_vm0, %v733_v5   ;;  %3626 = vst.msk [vmem:[%s9187_s1 + $0xb01] ss:$8 sm:$0xf0] %vm3_vm0, %v733_v5   ;;  %1261 = vrot.lane.b32.xlu1 %v4599_v6, %s4539_s9  ;;  %1252 = vrot.lane.b32.xlu0 %v4604_v7, %s4539_s9 }
  0xd0   :  { %v760_v6 = vpop.permute.xlu1 %759   ;;  %v751_v7 = vpop.permute.xlu0 %750  }
  0xd1   :  { %3634 = vst.msk [vmem:[%s9187_s1 + $0xbc1] ss:$8 sm:$0xf] %vm3_vm0, %v760_v6   ;;  %3635 = vst.msk [vmem:[%s9187_s1 + $0xbc1] ss:$8 sm:$0xf0] %vm3_vm0, %v760_v6  }
  0xd2   :  { %3631 = vst.msk [vmem:[%s9187_s1 + $0xb81] ss:$8 sm:$0xf] %vm3_vm0, %v751_v7   ;;  %3632 = vst.msk [vmem:[%s9187_s1 + $0xb81] ss:$8 sm:$0xf0] %vm3_vm0, %v751_v7   ;;  %1279 = vrot.lane.b32.xlu1 %v4613_v8, %s4539_s9  ;;  %1270 = vrot.lane.b32.xlu0 %v4618_v9, %s4539_s9 }
  0xd3   :  { %v5953_v6 = vld [vmem:[%s9186_s0 + $0x68] sm:$0xff]   ;;  %v5958_v7 = vld [vmem:[%s9186_s0 + $0x60] sm:$0xff]  }
  0xd4   :  { %v777_v8 = vpop.permute.xlu1 %776   ;;  %v768_v9 = vpop.permute.xlu0 %767  }
  0xd5   :  { %3639 = vst.msk [vmem:[%s9187_s1 + $0x42] ss:$8 sm:$0xf] %vm3_vm0, %v777_v8   ;;  %3640 = vst.msk [vmem:[%s9187_s1 + $0x42] ss:$8 sm:$0xf0] %vm3_vm0, %v777_v8  }
  0xd6   :  { %3636 = vst.msk [vmem:[%s9187_s1 + $0x2] ss:$8 sm:$0xf] %vm3_vm0, %v768_v9   ;;  %3637 = vst.msk [vmem:[%s9187_s1 + $0x2] ss:$8 sm:$0xf0] %vm3_vm0, %v768_v9   ;;  %1297 = vrot.lane.b32.xlu1 %v4627_v10, %s4539_s9  ;;  %1288 = vrot.lane.b32.xlu0 %v4632_v11, %s4539_s9 }
  0xd8   :  { %v795_v10 = vpop.permute.xlu1 %794   ;;  %v786_v11 = vpop.permute.xlu0 %785  }
  0xd9   :  { %3645 = vst.msk [vmem:[%s9187_s1 + $0xc2] ss:$8 sm:$0xf] %vm3_vm0, %v795_v10   ;;  %3646 = vst.msk [vmem:[%s9187_s1 + $0xc2] ss:$8 sm:$0xf0] %vm3_vm0, %v795_v10  }
  0xda   :  { %3642 = vst.msk [vmem:[%s9187_s1 + $0x82] ss:$8 sm:$0xf] %vm3_vm0, %v786_v11   ;;  %3643 = vst.msk [vmem:[%s9187_s1 + $0x82] ss:$8 sm:$0xf0] %vm3_vm0, %v786_v11   ;;  %1315 = vrot.lane.b32.xlu1 %v4641_v12, %s4539_s9  ;;  %1306 = vrot.lane.b32.xlu0 %v4646_v13, %s4539_s9 }
  0xdb   :  { %v5983_v10 = vld [vmem:[%s9186_s0 + $0x78] sm:$0xff]   ;;  %v5988_v11 = vld [vmem:[%s9186_s0 + $0x70] sm:$0xff]  }
  0xdc   :  { %v813_v12 = vpop.permute.xlu1 %812   ;;  %v804_v13 = vpop.permute.xlu0 %803  }
  0xdd   :  { %3651 = vst.msk [vmem:[%s9187_s1 + $0x142] ss:$8 sm:$0xf] %vm3_vm0, %v813_v12   ;;  %3652 = vst.msk [vmem:[%s9187_s1 + $0x142] ss:$8 sm:$0xf0] %vm3_vm0, %v813_v12  }
  0xde   :  { %3648 = vst.msk [vmem:[%s9187_s1 + $0x102] ss:$8 sm:$0xf] %vm3_vm0, %v804_v13   ;;  %3649 = vst.msk [vmem:[%s9187_s1 + $0x102] ss:$8 sm:$0xf0] %vm3_vm0, %v804_v13   ;;  %1333 = vrot.lane.b32.xlu1 %v4655_v14, %s4539_s9  ;;  %1324 = vrot.lane.b32.xlu0 %v4660_v15, %s4539_s9 }
  0xe0   :  { %v831_v14 = vpop.permute.xlu1 %830   ;;  %v822_v15 = vpop.permute.xlu0 %821  }
  0xe1   :  { %3657 = vst.msk [vmem:[%s9187_s1 + $0x1c2] ss:$8 sm:$0xf] %vm3_vm0, %v831_v14   ;;  %3658 = vst.msk [vmem:[%s9187_s1 + $0x1c2] ss:$8 sm:$0xf0] %vm3_vm0, %v831_v14  }
  0xe2   :  { %3654 = vst.msk [vmem:[%s9187_s1 + $0x182] ss:$8 sm:$0xf] %vm3_vm0, %v822_v15   ;;  %3655 = vst.msk [vmem:[%s9187_s1 + $0x182] ss:$8 sm:$0xf0] %vm3_vm0, %v822_v15   ;;  %1351 = vrot.lane.b32.xlu1 %v4669_v16, %s4539_s9  ;;  %1342 = vrot.lane.b32.xlu0 %v4674_v17, %s4539_s9 }
  0xe3   :  { %v6013_v14 = vld [vmem:[%s9186_s0 + $0x88] sm:$0xff]   ;;  %v6018_v15 = vld [vmem:[%s9186_s0 + $0x80] sm:$0xff]  }
  0xe4   :  { %v849_v16 = vpop.permute.xlu1 %848   ;;  %v840_v17 = vpop.permute.xlu0 %839  }
  0xe5   :  { %3663 = vst.msk [vmem:[%s9187_s1 + $0x242] ss:$8 sm:$0xf] %vm3_vm0, %v849_v16   ;;  %3664 = vst.msk [vmem:[%s9187_s1 + $0x242] ss:$8 sm:$0xf0] %vm3_vm0, %v849_v16  }
  0xe6   :  { %3660 = vst.msk [vmem:[%s9187_s1 + $0x202] ss:$8 sm:$0xf] %vm3_vm0, %v840_v17   ;;  %3661 = vst.msk [vmem:[%s9187_s1 + $0x202] ss:$8 sm:$0xf0] %vm3_vm0, %v840_v17   ;;  %1369 = vrot.lane.b32.xlu1 %v4683_v18, %s4539_s9  ;;  %1360 = vrot.lane.b32.xlu0 %v4688_v19, %s4539_s9 }
  0xe8   :  { %v867_v18 = vpop.permute.xlu1 %866   ;;  %v858_v19 = vpop.permute.xlu0 %857  }
  0xe9   :  { %3669 = vst.msk [vmem:[%s9187_s1 + $0x2c2] ss:$8 sm:$0xf] %vm3_vm0, %v867_v18   ;;  %3670 = vst.msk [vmem:[%s9187_s1 + $0x2c2] ss:$8 sm:$0xf0] %vm3_vm0, %v867_v18  }
  0xea   :  { %3666 = vst.msk [vmem:[%s9187_s1 + $0x282] ss:$8 sm:$0xf] %vm3_vm0, %v858_v19   ;;  %3667 = vst.msk [vmem:[%s9187_s1 + $0x282] ss:$8 sm:$0xf0] %vm3_vm0, %v858_v19   ;;  %1387 = vrot.lane.b32.xlu1 %v4697_v20, %s4539_s9  ;;  %1378 = vrot.lane.b32.xlu0 %v4702_v21, %s4539_s9 }
  0xeb   :  { %v6043_v18 = vld [vmem:[%s9186_s0 + $0x98] sm:$0xff]   ;;  %v6048_v19 = vld [vmem:[%s9186_s0 + $0x90] sm:$0xff]  }
  0xec   :  { %v885_v20 = vpop.permute.xlu1 %884   ;;  %v876_v21 = vpop.permute.xlu0 %875  }
  0xed   :  { %3675 = vst.msk [vmem:[%s9187_s1 + $0x342] ss:$8 sm:$0xf] %vm3_vm0, %v885_v20   ;;  %3676 = vst.msk [vmem:[%s9187_s1 + $0x342] ss:$8 sm:$0xf0] %vm3_vm0, %v885_v20  }
  0xee   :  { %3672 = vst.msk [vmem:[%s9187_s1 + $0x302] ss:$8 sm:$0xf] %vm3_vm0, %v876_v21   ;;  %3673 = vst.msk [vmem:[%s9187_s1 + $0x302] ss:$8 sm:$0xf0] %vm3_vm0, %v876_v21   ;;  %1405 = vrot.lane.b32.xlu1 %v4711_v22, %s4539_s9  ;;  %1396 = vrot.lane.b32.xlu0 %v4716_v23, %s4539_s9 }
  0xf0   :  { %v903_v22 = vpop.permute.xlu1 %902   ;;  %v894_v23 = vpop.permute.xlu0 %893  }
  0xf1   :  { %3681 = vst.msk [vmem:[%s9187_s1 + $0x3c2] ss:$8 sm:$0xf] %vm3_vm0, %v903_v22   ;;  %3682 = vst.msk [vmem:[%s9187_s1 + $0x3c2] ss:$8 sm:$0xf0] %vm3_vm0, %v903_v22  }
  0xf2   :  { %3678 = vst.msk [vmem:[%s9187_s1 + $0x382] ss:$8 sm:$0xf] %vm3_vm0, %v894_v23   ;;  %3679 = vst.msk [vmem:[%s9187_s1 + $0x382] ss:$8 sm:$0xf0] %vm3_vm0, %v894_v23   ;;  %1423 = vrot.lane.b32.xlu1 %v4725_v24, %s4539_s9  ;;  %1414 = vrot.lane.b32.xlu0 %v4730_v25, %s4539_s9 }
  0xf3   :  { %v6073_v22 = vld [vmem:[%s9186_s0 + $0xa8] sm:$0xff]   ;;  %v6078_v23 = vld [vmem:[%s9186_s0 + $0xa0] sm:$0xff]  }
  0xf4   :  { %v921_v24 = vpop.permute.xlu1 %920   ;;  %v912_v25 = vpop.permute.xlu0 %911  }
  0xf5   :  { %3687 = vst.msk [vmem:[%s9187_s1 + $0x442] ss:$8 sm:$0xf] %vm3_vm0, %v921_v24   ;;  %3688 = vst.msk [vmem:[%s9187_s1 + $0x442] ss:$8 sm:$0xf0] %vm3_vm0, %v921_v24  }
  0xf6   :  { %3684 = vst.msk [vmem:[%s9187_s1 + $0x402] ss:$8 sm:$0xf] %vm3_vm0, %v912_v25   ;;  %3685 = vst.msk [vmem:[%s9187_s1 + $0x402] ss:$8 sm:$0xf0] %vm3_vm0, %v912_v25   ;;  %1441 = vrot.lane.b32.xlu1 %v4739_v26, %s4539_s9  ;;  %1432 = vrot.lane.b32.xlu0 %v4744_v27, %s4539_s9 }
  0xf8   :  { %v939_v26 = vpop.permute.xlu1 %938   ;;  %v930_v27 = vpop.permute.xlu0 %929  }
  0xf9   :  { %3693 = vst.msk [vmem:[%s9187_s1 + $0x4c2] ss:$8 sm:$0xf] %vm3_vm0, %v939_v26   ;;  %3694 = vst.msk [vmem:[%s9187_s1 + $0x4c2] ss:$8 sm:$0xf0] %vm3_vm0, %v939_v26  }
  0xfa   :  { %3690 = vst.msk [vmem:[%s9187_s1 + $0x482] ss:$8 sm:$0xf] %vm3_vm0, %v930_v27   ;;  %3691 = vst.msk [vmem:[%s9187_s1 + $0x482] ss:$8 sm:$0xf0] %vm3_vm0, %v930_v27   ;;  %1459 = vrot.lane.b32.xlu1 %v4753_v28, %s4539_s9  ;;  %1450 = vrot.lane.b32.xlu0 %v4758_v29, %s4539_s9 }
  0xfb   :  { %v6103_v26 = vld [vmem:[%s9186_s0 + $0xb8] sm:$0xff]   ;;  %v6108_v27 = vld [vmem:[%s9186_s0 + $0xb0] sm:$0xff]  }
  0xfc   :  { %v957_v28 = vpop.permute.xlu1 %956   ;;  %v948_v29 = vpop.permute.xlu0 %947  }
  0xfd   :  { %3699 = vst.msk [vmem:[%s9187_s1 + $0x542] ss:$8 sm:$0xf] %vm3_vm0, %v957_v28   ;;  %3700 = vst.msk [vmem:[%s9187_s1 + $0x542] ss:$8 sm:$0xf0] %vm3_vm0, %v957_v28  }
  0xfe   :  { %3696 = vst.msk [vmem:[%s9187_s1 + $0x502] ss:$8 sm:$0xf] %vm3_vm0, %v948_v29   ;;  %3697 = vst.msk [vmem:[%s9187_s1 + $0x502] ss:$8 sm:$0xf0] %vm3_vm0, %v948_v29   ;;  %1477 = vrot.lane.b32.xlu1 %v4767_v30, %s4539_s9  ;;  %1468 = vrot.lane.b32.xlu0 %v4772_v31, %s4539_s9 }
 0x100   :  { %v975_v30 = vpop.permute.xlu1 %974   ;;  %v966_v31 = vpop.permute.xlu0 %965  }
 0x101   :  { %3705 = vst.msk [vmem:[%s9187_s1 + $0x5c2] ss:$8 sm:$0xf] %vm3_vm0, %v975_v30   ;;  %3706 = vst.msk [vmem:[%s9187_s1 + $0x5c2] ss:$8 sm:$0xf0] %vm3_vm0, %v975_v30  }
 0x102   :  { %3702 = vst.msk [vmem:[%s9187_s1 + $0x582] ss:$8 sm:$0xf] %vm3_vm0, %v966_v31   ;;  %3703 = vst.msk [vmem:[%s9187_s1 + $0x582] ss:$8 sm:$0xf0] %vm3_vm0, %v966_v31   ;;  %1495 = vrot.lane.b32.xlu1 %v4781_v32, %s4539_s9  ;;  %1486 = vrot.lane.b32.xlu0 %v4786_v33, %s4539_s9 }
 0x103   :  { %v6133_v30 = vld [vmem:[%s9186_s0 + $0xc8] sm:$0xff]   ;;  %v6138_v31 = vld [vmem:[%s9186_s0 + $0xc0] sm:$0xff]  }
 0x104   :  { %v993_v32 = vpop.permute.xlu1 %992   ;;  %v984_v33 = vpop.permute.xlu0 %983  }
 0x105   :  { %3711 = vst.msk [vmem:[%s9187_s1 + $0x642] ss:$8 sm:$0xf] %vm3_vm0, %v993_v32   ;;  %3712 = vst.msk [vmem:[%s9187_s1 + $0x642] ss:$8 sm:$0xf0] %vm3_vm0, %v993_v32  }
 0x106   :  { %3708 = vst.msk [vmem:[%s9187_s1 + $0x602] ss:$8 sm:$0xf] %vm3_vm0, %v984_v33   ;;  %3709 = vst.msk [vmem:[%s9187_s1 + $0x602] ss:$8 sm:$0xf0] %vm3_vm0, %v984_v33   ;;  %1513 = vrot.lane.b32.xlu1 %v4795_v34, %s4539_s9  ;;  %1504 = vrot.lane.b32.xlu0 %v4800_v35, %s4539_s9 }
 0x108   :  { %v1011_v34 = vpop.permute.xlu1 %1010   ;;  %v1002_v35 = vpop.permute.xlu0 %1001  }
 0x109   :  { %3717 = vst.msk [vmem:[%s9187_s1 + $0x6c2] ss:$8 sm:$0xf] %vm3_vm0, %v1011_v34   ;;  %3718 = vst.msk [vmem:[%s9187_s1 + $0x6c2] ss:$8 sm:$0xf0] %vm3_vm0, %v1011_v34  }
 0x10a   :  { %3714 = vst.msk [vmem:[%s9187_s1 + $0x682] ss:$8 sm:$0xf] %vm3_vm0, %v1002_v35   ;;  %3715 = vst.msk [vmem:[%s9187_s1 + $0x682] ss:$8 sm:$0xf0] %vm3_vm0, %v1002_v35   ;;  %1531 = vrot.lane.b32.xlu1 %v4809_v36, %s4539_s9  ;;  %1522 = vrot.lane.b32.xlu0 %v4814_v37, %s4539_s9 }
 0x10b   :  { %v6163_v34 = vld [vmem:[%s9186_s0 + $0xd8] sm:$0xff]   ;;  %v6168_v35 = vld [vmem:[%s9186_s0 + $0xd0] sm:$0xff]  }
 0x10c   :  { %v1029_v36 = vpop.permute.xlu1 %1028   ;;  %v1020_v37 = vpop.permute.xlu0 %1019  }
 0x10d   :  { %3723 = vst.msk [vmem:[%s9187_s1 + $0x742] ss:$8 sm:$0xf] %vm3_vm0, %v1029_v36   ;;  %3724 = vst.msk [vmem:[%s9187_s1 + $0x742] ss:$8 sm:$0xf0] %vm3_vm0, %v1029_v36  }
 0x10e   :  { %3720 = vst.msk [vmem:[%s9187_s1 + $0x702] ss:$8 sm:$0xf] %vm3_vm0, %v1020_v37   ;;  %3721 = vst.msk [vmem:[%s9187_s1 + $0x702] ss:$8 sm:$0xf0] %vm3_vm0, %v1020_v37   ;;  %1549 = vrot.lane.b32.xlu1 %v4823_v38, %s4539_s9  ;;  %1540 = vrot.lane.b32.xlu0 %v4828_v39, %s4539_s9 }
 0x110   :  { %v1047_v38 = vpop.permute.xlu1 %1046   ;;  %v1038_v39 = vpop.permute.xlu0 %1037  }
 0x111   :  { %3729 = vst.msk [vmem:[%s9187_s1 + $0x7c2] ss:$8 sm:$0xf] %vm3_vm0, %v1047_v38   ;;  %3730 = vst.msk [vmem:[%s9187_s1 + $0x7c2] ss:$8 sm:$0xf0] %vm3_vm0, %v1047_v38  }
 0x112   :  { %3726 = vst.msk [vmem:[%s9187_s1 + $0x782] ss:$8 sm:$0xf] %vm3_vm0, %v1038_v39   ;;  %3727 = vst.msk [vmem:[%s9187_s1 + $0x782] ss:$8 sm:$0xf0] %vm3_vm0, %v1038_v39   ;;  %1567 = vrot.lane.b32.xlu1 %v4837_v40, %s4539_s9  ;;  %1558 = vrot.lane.b32.xlu0 %v4842_v41, %s4539_s9 }
 0x113   :  { %v6193_v38 = vld [vmem:[%s9186_s0 + $0xe8] sm:$0xff]   ;;  %v6198_v39 = vld [vmem:[%s9186_s0 + $0xe0] sm:$0xff]  }
 0x114   :  { %v1065_v40 = vpop.permute.xlu1 %1064   ;;  %v1056_v41 = vpop.permute.xlu0 %1055  }
 0x115   :  { %3735 = vst.msk [vmem:[%s9187_s1 + $0x842] ss:$8 sm:$0xf] %vm3_vm0, %v1065_v40   ;;  %3736 = vst.msk [vmem:[%s9187_s1 + $0x842] ss:$8 sm:$0xf0] %vm3_vm0, %v1065_v40  }
 0x116   :  { %3732 = vst.msk [vmem:[%s9187_s1 + $0x802] ss:$8 sm:$0xf] %vm3_vm0, %v1056_v41   ;;  %3733 = vst.msk [vmem:[%s9187_s1 + $0x802] ss:$8 sm:$0xf0] %vm3_vm0, %v1056_v41   ;;  %1585 = vrot.lane.b32.xlu1 %v4851_v42, %s4539_s9  ;;  %1576 = vrot.lane.b32.xlu0 %v4856_v43, %s4539_s9 }
 0x118   :  { %v1083_v42 = vpop.permute.xlu1 %1082   ;;  %v1074_v43 = vpop.permute.xlu0 %1073  }
 0x119   :  { %3741 = vst.msk [vmem:[%s9187_s1 + $0x8c2] ss:$8 sm:$0xf] %vm3_vm0, %v1083_v42   ;;  %3742 = vst.msk [vmem:[%s9187_s1 + $0x8c2] ss:$8 sm:$0xf0] %vm3_vm0, %v1083_v42  }
 0x11a   :  { %3738 = vst.msk [vmem:[%s9187_s1 + $0x882] ss:$8 sm:$0xf] %vm3_vm0, %v1074_v43   ;;  %3739 = vst.msk [vmem:[%s9187_s1 + $0x882] ss:$8 sm:$0xf0] %vm3_vm0, %v1074_v43   ;;  %1603 = vrot.lane.b32.xlu1 %v4865_v44, %s4539_s9  ;;  %1594 = vrot.lane.b32.xlu0 %v4870_v45, %s4539_s9 }
 0x11b   :  { %v6223_v42 = vld [vmem:[%s9186_s0 + $0xf8] sm:$0xff]   ;;  %v6228_v43 = vld [vmem:[%s9186_s0 + $0xf0] sm:$0xff]  }
 0x11c   :  { %v1101_v44 = vpop.permute.xlu1 %1100   ;;  %v1092_v45 = vpop.permute.xlu0 %1091  }
 0x11d   :  { %3747 = vst.msk [vmem:[%s9187_s1 + $0x942] ss:$8 sm:$0xf] %vm3_vm0, %v1101_v44   ;;  %3748 = vst.msk [vmem:[%s9187_s1 + $0x942] ss:$8 sm:$0xf0] %vm3_vm0, %v1101_v44  }
 0x11e   :  { %3744 = vst.msk [vmem:[%s9187_s1 + $0x902] ss:$8 sm:$0xf] %vm3_vm0, %v1092_v45   ;;  %3745 = vst.msk [vmem:[%s9187_s1 + $0x902] ss:$8 sm:$0xf0] %vm3_vm0, %v1092_v45   ;;  %1621 = vrot.lane.b32.xlu1 %v4879_v46, %s4539_s9  ;;  %1612 = vrot.lane.b32.xlu0 %v4884_v47, %s4539_s9 }
 0x11f   :  { %v5773_v46 = vld [vmem:[%s9186_s0 + $0x8] sm:$0xff]   ;;  %v5778_v47 = vld [vmem:[%s9186_s0] sm:$0xff]  }
 0x120   :  { %v1119_v56 = vpop.permute.xlu1 %1118   ;;  %v1110_v57 = vpop.permute.xlu0 %1109  }
 0x121   :  { %3753 = vst.msk [vmem:[%s9187_s1 + $0x9c2] ss:$8 sm:$0xf] %vm3_vm0, %v1119_v56   ;;  %3754 = vst.msk [vmem:[%s9187_s1 + $0x9c2] ss:$8 sm:$0xf0] %vm3_vm0, %v1119_v56  }
 0x122   :  { %3750 = vst.msk [vmem:[%s9187_s1 + $0x982] ss:$8 sm:$0xf] %vm3_vm0, %v1110_v57   ;;  %3751 = vst.msk [vmem:[%s9187_s1 + $0x982] ss:$8 sm:$0xf0] %vm3_vm0, %v1110_v57   ;;  %1638 = vrot.lane.b32.xlu1 %v5773_v46, %s4540_s8  ;;  %1629 = vrot.lane.b32.xlu0 %v5778_v47, %s4540_s8 }
 0x123   :  { %v6253_v56 = vld [vmem:[%s9186_s0 + $0x108] sm:$0xff]   ;;  %v6258_v57 = vld [vmem:[%s9186_s0 + $0x100] sm:$0xff]  }
 0x124   :  { %v1137_v60 = vpop.permute.xlu1 %1136   ;;  %v1128_v61 = vpop.permute.xlu0 %1127  }
 0x125   :  { %3759 = vst.msk [vmem:[%s9187_s1 + $0xa42] ss:$8 sm:$0xf] %vm3_vm0, %v1137_v60   ;;  %3760 = vst.msk [vmem:[%s9187_s1 + $0xa42] ss:$8 sm:$0xf0] %vm3_vm0, %v1137_v60  }
 0x126   :  { %3756 = vst.msk [vmem:[%s9187_s1 + $0xa02] ss:$8 sm:$0xf] %vm3_vm0, %v1128_v61   ;;  %3757 = vst.msk [vmem:[%s9187_s1 + $0xa02] ss:$8 sm:$0xf0] %vm3_vm0, %v1128_v61   ;;  %1656 = vrot.lane.b32.xlu1 %v5803_v58, %s4540_s8  ;;  %1647 = vrot.lane.b32.xlu0 %v5808_v59, %s4540_s8 }
 0x128   :  { %v1155_v48 = vpop.permute.xlu1 %1154   ;;  %v1146_v49 = vpop.permute.xlu0 %1145  }
 0x129   :  { %3765 = vst.msk [vmem:[%s9187_s1 + $0xac2] ss:$8 sm:$0xf] %vm3_vm0, %v1155_v48   ;;  %3766 = vst.msk [vmem:[%s9187_s1 + $0xac2] ss:$8 sm:$0xf0] %vm3_vm0, %v1155_v48  }
 0x12a   :  { %3762 = vst.msk [vmem:[%s9187_s1 + $0xa82] ss:$8 sm:$0xf] %vm3_vm0, %v1146_v49   ;;  %3763 = vst.msk [vmem:[%s9187_s1 + $0xa82] ss:$8 sm:$0xf0] %vm3_vm0, %v1146_v49   ;;  %1674 = vrot.lane.b32.xlu1 %v5833_v62, %s4540_s8  ;;  %1665 = vrot.lane.b32.xlu0 %v5838_v63, %s4540_s8 }
 0x12b   :  { %v6283_v48 = vld [vmem:[%s9186_s0 + $0x118] sm:$0xff]   ;;  %v6288_v49 = vld [vmem:[%s9186_s0 + $0x110] sm:$0xff]  }
 0x12c   :  { %v1173_v52 = vpop.permute.xlu1 %1172   ;;  %v1164_v53 = vpop.permute.xlu0 %1163  }
 0x12d   :  { %3771 = vst.msk [vmem:[%s9187_s1 + $0xb42] ss:$8 sm:$0xf] %vm3_vm0, %v1173_v52   ;;  %3772 = vst.msk [vmem:[%s9187_s1 + $0xb42] ss:$8 sm:$0xf0] %vm3_vm0, %v1173_v52  }
 0x12e   :  { %3768 = vst.msk [vmem:[%s9187_s1 + $0xb02] ss:$8 sm:$0xf] %vm3_vm0, %v1164_v53   ;;  %3769 = vst.msk [vmem:[%s9187_s1 + $0xb02] ss:$8 sm:$0xf0] %vm3_vm0, %v1164_v53   ;;  %1692 = vrot.lane.b32.xlu1 %v5863_v50, %s4540_s8  ;;  %1683 = vrot.lane.b32.xlu0 %v5868_v51, %s4540_s8 }
 0x130   :  { %v1191_v1 = vpop.permute.xlu1 %1190   ;;  %v1182_v3 = vpop.permute.xlu0 %1181  }
 0x131   :  { %3777 = vst.msk [vmem:[%s9187_s1 + $0xbc2] ss:$8 sm:$0xf] %vm3_vm0, %v1191_v1   ;;  %3778 = vst.msk [vmem:[%s9187_s1 + $0xbc2] ss:$8 sm:$0xf0] %vm3_vm0, %v1191_v1  }
 0x132   :  { %3774 = vst.msk [vmem:[%s9187_s1 + $0xb82] ss:$8 sm:$0xf] %vm3_vm0, %v1182_v3   ;;  %3775 = vst.msk [vmem:[%s9187_s1 + $0xb82] ss:$8 sm:$0xf0] %vm3_vm0, %v1182_v3   ;;  %1710 = vrot.lane.b32.xlu1 %v5893_v54, %s4540_s8  ;;  %1701 = vrot.lane.b32.xlu0 %v5898_v55, %s4540_s8 }
 0x133   :  { %v6313_v1 = vld [vmem:[%s9186_s0 + $0x128] sm:$0xff]   ;;  %v6318_v3 = vld [vmem:[%s9186_s0 + $0x120] sm:$0xff]  }
 0x134   :  { %v1208_v4 = vpop.permute.xlu1 %1207   ;;  %v1199_v5 = vpop.permute.xlu0 %1198  }
 0x135   :  { %3782 = vst.msk [vmem:[%s9187_s1 + $0x43] ss:$8 sm:$0xf] %vm3_vm0, %v1208_v4   ;;  %3783 = vst.msk [vmem:[%s9187_s1 + $0x43] ss:$8 sm:$0xf0] %vm3_vm0, %v1208_v4  }
 0x136   :  { %3779 = vst.msk [vmem:[%s9187_s1 + $0x3] ss:$8 sm:$0xf] %vm3_vm0, %v1199_v5   ;;  %3780 = vst.msk [vmem:[%s9187_s1 + $0x3] ss:$8 sm:$0xf0] %vm3_vm0, %v1199_v5   ;;  %1728 = vrot.lane.b32.xlu1 %v5923_v0, %s4540_s8  ;;  %1719 = vrot.lane.b32.xlu0 %v5928_v2, %s4540_s8 }
 0x138   :  { %v1226_v8 = vpop.permute.xlu1 %1225   ;;  %v1217_v9 = vpop.permute.xlu0 %1216  }
 0x139   :  { %3788 = vst.msk [vmem:[%s9187_s1 + $0xc3] ss:$8 sm:$0xf] %vm3_vm0, %v1226_v8   ;;  %3789 = vst.msk [vmem:[%s9187_s1 + $0xc3] ss:$8 sm:$0xf0] %vm3_vm0, %v1226_v8  }
 0x13a   :  { %3785 = vst.msk [vmem:[%s9187_s1 + $0x83] ss:$8 sm:$0xf] %vm3_vm0, %v1217_v9   ;;  %3786 = vst.msk [vmem:[%s9187_s1 + $0x83] ss:$8 sm:$0xf0] %vm3_vm0, %v1217_v9   ;;  %1746 = vrot.lane.b32.xlu1 %v5953_v6, %s4540_s8  ;;  %1737 = vrot.lane.b32.xlu0 %v5958_v7, %s4540_s8 }
 0x13b   :  { %v6343_v8 = vld [vmem:[%s9186_s0 + $0x138] sm:$0xff]   ;;  %v6348_v9 = vld [vmem:[%s9186_s0 + $0x130] sm:$0xff]  }
 0x13c   :  { %v1244_v12 = vpop.permute.xlu1 %1243   ;;  %v1235_v13 = vpop.permute.xlu0 %1234  }
 0x13d   :  { %3794 = vst.msk [vmem:[%s9187_s1 + $0x143] ss:$8 sm:$0xf] %vm3_vm0, %v1244_v12   ;;  %3795 = vst.msk [vmem:[%s9187_s1 + $0x143] ss:$8 sm:$0xf0] %vm3_vm0, %v1244_v12  }
 0x13e   :  { %3791 = vst.msk [vmem:[%s9187_s1 + $0x103] ss:$8 sm:$0xf] %vm3_vm0, %v1235_v13   ;;  %3792 = vst.msk [vmem:[%s9187_s1 + $0x103] ss:$8 sm:$0xf0] %vm3_vm0, %v1235_v13   ;;  %1764 = vrot.lane.b32.xlu1 %v5983_v10, %s4540_s8  ;;  %1755 = vrot.lane.b32.xlu0 %v5988_v11, %s4540_s8 }
 0x140   :  { %v1262_v16 = vpop.permute.xlu1 %1261   ;;  %v1253_v17 = vpop.permute.xlu0 %1252  }
 0x141   :  { %3800 = vst.msk [vmem:[%s9187_s1 + $0x1c3] ss:$8 sm:$0xf] %vm3_vm0, %v1262_v16   ;;  %3801 = vst.msk [vmem:[%s9187_s1 + $0x1c3] ss:$8 sm:$0xf0] %vm3_vm0, %v1262_v16  }
 0x142   :  { %3797 = vst.msk [vmem:[%s9187_s1 + $0x183] ss:$8 sm:$0xf] %vm3_vm0, %v1253_v17   ;;  %3798 = vst.msk [vmem:[%s9187_s1 + $0x183] ss:$8 sm:$0xf0] %vm3_vm0, %v1253_v17   ;;  %1782 = vrot.lane.b32.xlu1 %v6013_v14, %s4540_s8  ;;  %1773 = vrot.lane.b32.xlu0 %v6018_v15, %s4540_s8 }
 0x143   :  { %v6373_v16 = vld [vmem:[%s9186_s0 + $0x148] sm:$0xff]   ;;  %v6378_v17 = vld [vmem:[%s9186_s0 + $0x140] sm:$0xff]  }
 0x144   :  { %v1280_v20 = vpop.permute.xlu1 %1279   ;;  %v1271_v21 = vpop.permute.xlu0 %1270  }
 0x145   :  { %3806 = vst.msk [vmem:[%s9187_s1 + $0x243] ss:$8 sm:$0xf] %vm3_vm0, %v1280_v20   ;;  %3807 = vst.msk [vmem:[%s9187_s1 + $0x243] ss:$8 sm:$0xf0] %vm3_vm0, %v1280_v20  }
 0x146   :  { %3803 = vst.msk [vmem:[%s9187_s1 + $0x203] ss:$8 sm:$0xf] %vm3_vm0, %v1271_v21   ;;  %3804 = vst.msk [vmem:[%s9187_s1 + $0x203] ss:$8 sm:$0xf0] %vm3_vm0, %v1271_v21   ;;  %1800 = vrot.lane.b32.xlu1 %v6043_v18, %s4540_s8  ;;  %1791 = vrot.lane.b32.xlu0 %v6048_v19, %s4540_s8 }
 0x148   :  { %v1298_v24 = vpop.permute.xlu1 %1297   ;;  %v1289_v25 = vpop.permute.xlu0 %1288  }
 0x149   :  { %3812 = vst.msk [vmem:[%s9187_s1 + $0x2c3] ss:$8 sm:$0xf] %vm3_vm0, %v1298_v24   ;;  %3813 = vst.msk [vmem:[%s9187_s1 + $0x2c3] ss:$8 sm:$0xf0] %vm3_vm0, %v1298_v24  }
 0x14a   :  { %3809 = vst.msk [vmem:[%s9187_s1 + $0x283] ss:$8 sm:$0xf] %vm3_vm0, %v1289_v25   ;;  %3810 = vst.msk [vmem:[%s9187_s1 + $0x283] ss:$8 sm:$0xf0] %vm3_vm0, %v1289_v25   ;;  %1818 = vrot.lane.b32.xlu1 %v6073_v22, %s4540_s8  ;;  %1809 = vrot.lane.b32.xlu0 %v6078_v23, %s4540_s8 }
 0x14b   :  { %v6403_v24 = vld [vmem:[%s9186_s0 + $0x158] sm:$0xff]   ;;  %v6408_v25 = vld [vmem:[%s9186_s0 + $0x150] sm:$0xff]  }
 0x14c   :  { %v1316_v28 = vpop.permute.xlu1 %1315   ;;  %v1307_v29 = vpop.permute.xlu0 %1306  }
 0x14d   :  { %3818 = vst.msk [vmem:[%s9187_s1 + $0x343] ss:$8 sm:$0xf] %vm3_vm0, %v1316_v28   ;;  %3819 = vst.msk [vmem:[%s9187_s1 + $0x343] ss:$8 sm:$0xf0] %vm3_vm0, %v1316_v28  }
 0x14e   :  { %3815 = vst.msk [vmem:[%s9187_s1 + $0x303] ss:$8 sm:$0xf] %vm3_vm0, %v1307_v29   ;;  %3816 = vst.msk [vmem:[%s9187_s1 + $0x303] ss:$8 sm:$0xf0] %vm3_vm0, %v1307_v29   ;;  %1836 = vrot.lane.b32.xlu1 %v6103_v26, %s4540_s8  ;;  %1827 = vrot.lane.b32.xlu0 %v6108_v27, %s4540_s8 }
 0x150   :  { %v1334_v32 = vpop.permute.xlu1 %1333   ;;  %v1325_v33 = vpop.permute.xlu0 %1324  }
 0x151   :  { %3824 = vst.msk [vmem:[%s9187_s1 + $0x3c3] ss:$8 sm:$0xf] %vm3_vm0, %v1334_v32   ;;  %3825 = vst.msk [vmem:[%s9187_s1 + $0x3c3] ss:$8 sm:$0xf0] %vm3_vm0, %v1334_v32  }
 0x152   :  { %3821 = vst.msk [vmem:[%s9187_s1 + $0x383] ss:$8 sm:$0xf] %vm3_vm0, %v1325_v33   ;;  %3822 = vst.msk [vmem:[%s9187_s1 + $0x383] ss:$8 sm:$0xf0] %vm3_vm0, %v1325_v33   ;;  %1854 = vrot.lane.b32.xlu1 %v6133_v30, %s4540_s8  ;;  %1845 = vrot.lane.b32.xlu0 %v6138_v31, %s4540_s8 }
 0x153   :  { %v6433_v32 = vld [vmem:[%s9186_s0 + $0x168] sm:$0xff]   ;;  %v6438_v33 = vld [vmem:[%s9186_s0 + $0x160] sm:$0xff]  }
 0x154   :  { %v1352_v36 = vpop.permute.xlu1 %1351   ;;  %v1343_v37 = vpop.permute.xlu0 %1342  }
 0x155   :  { %3830 = vst.msk [vmem:[%s9187_s1 + $0x443] ss:$8 sm:$0xf] %vm3_vm0, %v1352_v36   ;;  %3831 = vst.msk [vmem:[%s9187_s1 + $0x443] ss:$8 sm:$0xf0] %vm3_vm0, %v1352_v36  }
 0x156   :  { %3827 = vst.msk [vmem:[%s9187_s1 + $0x403] ss:$8 sm:$0xf] %vm3_vm0, %v1343_v37   ;;  %3828 = vst.msk [vmem:[%s9187_s1 + $0x403] ss:$8 sm:$0xf0] %vm3_vm0, %v1343_v37   ;;  %1872 = vrot.lane.b32.xlu1 %v6163_v34, %s4540_s8  ;;  %1863 = vrot.lane.b32.xlu0 %v6168_v35, %s4540_s8 }
 0x158   :  { %v1370_v40 = vpop.permute.xlu1 %1369   ;;  %v1361_v41 = vpop.permute.xlu0 %1360  }
 0x159   :  { %3836 = vst.msk [vmem:[%s9187_s1 + $0x4c3] ss:$8 sm:$0xf] %vm3_vm0, %v1370_v40   ;;  %3837 = vst.msk [vmem:[%s9187_s1 + $0x4c3] ss:$8 sm:$0xf0] %vm3_vm0, %v1370_v40  }
 0x15a   :  { %3833 = vst.msk [vmem:[%s9187_s1 + $0x483] ss:$8 sm:$0xf] %vm3_vm0, %v1361_v41   ;;  %3834 = vst.msk [vmem:[%s9187_s1 + $0x483] ss:$8 sm:$0xf0] %vm3_vm0, %v1361_v41   ;;  %1890 = vrot.lane.b32.xlu1 %v6193_v38, %s4540_s8  ;;  %1881 = vrot.lane.b32.xlu0 %v6198_v39, %s4540_s8 }
 0x15b   :  { %v6463_v40 = vld [vmem:[%s9186_s0 + $0x178] sm:$0xff]   ;;  %v6468_v41 = vld [vmem:[%s9186_s0 + $0x170] sm:$0xff]  }
 0x15c   :  { %v1388_v44 = vpop.permute.xlu1 %1387   ;;  %v1379_v45 = vpop.permute.xlu0 %1378  }
 0x15d   :  { %3842 = vst.msk [vmem:[%s9187_s1 + $0x543] ss:$8 sm:$0xf] %vm3_vm0, %v1388_v44   ;;  %3843 = vst.msk [vmem:[%s9187_s1 + $0x543] ss:$8 sm:$0xf0] %vm3_vm0, %v1388_v44  }
 0x15e   :  { %3839 = vst.msk [vmem:[%s9187_s1 + $0x503] ss:$8 sm:$0xf] %vm3_vm0, %v1379_v45   ;;  %3840 = vst.msk [vmem:[%s9187_s1 + $0x503] ss:$8 sm:$0xf0] %vm3_vm0, %v1379_v45   ;;  %1908 = vrot.lane.b32.xlu1 %v6223_v42, %s4540_s8  ;;  %1899 = vrot.lane.b32.xlu0 %v6228_v43, %s4540_s8 }
 0x160   :  { %v1406_v60 = vpop.permute.xlu1 %1405   ;;  %v1397_v61 = vpop.permute.xlu0 %1396  }
 0x161   :  { %3848 = vst.msk [vmem:[%s9187_s1 + $0x5c3] ss:$8 sm:$0xf] %vm3_vm0, %v1406_v60   ;;  %3849 = vst.msk [vmem:[%s9187_s1 + $0x5c3] ss:$8 sm:$0xf0] %vm3_vm0, %v1406_v60  }
 0x162   :  { %3845 = vst.msk [vmem:[%s9187_s1 + $0x583] ss:$8 sm:$0xf] %vm3_vm0, %v1397_v61   ;;  %3846 = vst.msk [vmem:[%s9187_s1 + $0x583] ss:$8 sm:$0xf0] %vm3_vm0, %v1397_v61   ;;  %1926 = vrot.lane.b32.xlu1 %v6253_v56, %s4540_s8  ;;  %1917 = vrot.lane.b32.xlu0 %v6258_v57, %s4540_s8 }
 0x164   :  { %v1424_v52 = vpop.permute.xlu1 %1423   ;;  %v1415_v53 = vpop.permute.xlu0 %1414  }
 0x165   :  { %3854 = vst.msk [vmem:[%s9187_s1 + $0x643] ss:$8 sm:$0xf] %vm3_vm0, %v1424_v52   ;;  %3855 = vst.msk [vmem:[%s9187_s1 + $0x643] ss:$8 sm:$0xf0] %vm3_vm0, %v1424_v52  }
 0x166   :  { %3851 = vst.msk [vmem:[%s9187_s1 + $0x603] ss:$8 sm:$0xf] %vm3_vm0, %v1415_v53   ;;  %3852 = vst.msk [vmem:[%s9187_s1 + $0x603] ss:$8 sm:$0xf0] %vm3_vm0, %v1415_v53   ;;  %1944 = vrot.lane.b32.xlu1 %v6283_v48, %s4540_s8  ;;  %1935 = vrot.lane.b32.xlu0 %v6288_v49, %s4540_s8 }
 0x168   :  { %v1442_v4 = vpop.permute.xlu1 %1441   ;;  %v1433_v5 = vpop.permute.xlu0 %1432  }
 0x169   :  { %3860 = vst.msk [vmem:[%s9187_s1 + $0x6c3] ss:$8 sm:$0xf] %vm3_vm0, %v1442_v4   ;;  %3861 = vst.msk [vmem:[%s9187_s1 + $0x6c3] ss:$8 sm:$0xf0] %vm3_vm0, %v1442_v4  }
 0x16a   :  { %3857 = vst.msk [vmem:[%s9187_s1 + $0x683] ss:$8 sm:$0xf] %vm3_vm0, %v1433_v5   ;;  %3858 = vst.msk [vmem:[%s9187_s1 + $0x683] ss:$8 sm:$0xf0] %vm3_vm0, %v1433_v5   ;;  %1962 = vrot.lane.b32.xlu1 %v6313_v1, %s4540_s8  ;;  %1953 = vrot.lane.b32.xlu0 %v6318_v3, %s4540_s8 }
 0x16c   :  { %v1460_v12 = vpop.permute.xlu1 %1459   ;;  %v1451_v13 = vpop.permute.xlu0 %1450  }
 0x16d   :  { %3866 = vst.msk [vmem:[%s9187_s1 + $0x743] ss:$8 sm:$0xf] %vm3_vm0, %v1460_v12   ;;  %3867 = vst.msk [vmem:[%s9187_s1 + $0x743] ss:$8 sm:$0xf0] %vm3_vm0, %v1460_v12  }
 0x16e   :  { %3863 = vst.msk [vmem:[%s9187_s1 + $0x703] ss:$8 sm:$0xf] %vm3_vm0, %v1451_v13   ;;  %3864 = vst.msk [vmem:[%s9187_s1 + $0x703] ss:$8 sm:$0xf0] %vm3_vm0, %v1451_v13   ;;  %1980 = vrot.lane.b32.xlu1 %v6343_v8, %s4540_s8  ;;  %1971 = vrot.lane.b32.xlu0 %v6348_v9, %s4540_s8 }
 0x170   :  { %v1478_v20 = vpop.permute.xlu1 %1477   ;;  %v1469_v21 = vpop.permute.xlu0 %1468  }
 0x171   :  { %3872 = vst.msk [vmem:[%s9187_s1 + $0x7c3] ss:$8 sm:$0xf] %vm3_vm0, %v1478_v20   ;;  %3873 = vst.msk [vmem:[%s9187_s1 + $0x7c3] ss:$8 sm:$0xf0] %vm3_vm0, %v1478_v20  }
 0x172   :  { %3869 = vst.msk [vmem:[%s9187_s1 + $0x783] ss:$8 sm:$0xf] %vm3_vm0, %v1469_v21   ;;  %3870 = vst.msk [vmem:[%s9187_s1 + $0x783] ss:$8 sm:$0xf0] %vm3_vm0, %v1469_v21   ;;  %1998 = vrot.lane.b32.xlu1 %v6373_v16, %s4540_s8  ;;  %1989 = vrot.lane.b32.xlu0 %v6378_v17, %s4540_s8 }
 0x174   :  { %v1496_v28 = vpop.permute.xlu1 %1495   ;;  %v1487_v29 = vpop.permute.xlu0 %1486  }
 0x175   :  { %3878 = vst.msk [vmem:[%s9187_s1 + $0x843] ss:$8 sm:$0xf] %vm3_vm0, %v1496_v28   ;;  %3879 = vst.msk [vmem:[%s9187_s1 + $0x843] ss:$8 sm:$0xf0] %vm3_vm0, %v1496_v28  }
 0x176   :  { %3875 = vst.msk [vmem:[%s9187_s1 + $0x803] ss:$8 sm:$0xf] %vm3_vm0, %v1487_v29   ;;  %3876 = vst.msk [vmem:[%s9187_s1 + $0x803] ss:$8 sm:$0xf0] %vm3_vm0, %v1487_v29   ;;  %2016 = vrot.lane.b32.xlu1 %v6403_v24, %s4540_s8  ;;  %2007 = vrot.lane.b32.xlu0 %v6408_v25, %s4540_s8 }
 0x178   :  { %v1514_v36 = vpop.permute.xlu1 %1513   ;;  %v1505_v37 = vpop.permute.xlu0 %1504  }
 0x179   :  { %3884 = vst.msk [vmem:[%s9187_s1 + $0x8c3] ss:$8 sm:$0xf] %vm3_vm0, %v1514_v36   ;;  %3885 = vst.msk [vmem:[%s9187_s1 + $0x8c3] ss:$8 sm:$0xf0] %vm3_vm0, %v1514_v36  }
 0x17a   :  { %3881 = vst.msk [vmem:[%s9187_s1 + $0x883] ss:$8 sm:$0xf] %vm3_vm0, %v1505_v37   ;;  %3882 = vst.msk [vmem:[%s9187_s1 + $0x883] ss:$8 sm:$0xf0] %vm3_vm0, %v1505_v37   ;;  %2034 = vrot.lane.b32.xlu1 %v6433_v32, %s4540_s8  ;;  %2025 = vrot.lane.b32.xlu0 %v6438_v33, %s4540_s8 }
 0x17c   :  { %v1532_v44 = vpop.permute.xlu1 %1531   ;;  %v1523_v45 = vpop.permute.xlu0 %1522  }
 0x17d   :  { %3890 = vst.msk [vmem:[%s9187_s1 + $0x943] ss:$8 sm:$0xf] %vm3_vm0, %v1532_v44   ;;  %3891 = vst.msk [vmem:[%s9187_s1 + $0x943] ss:$8 sm:$0xf0] %vm3_vm0, %v1532_v44  }
 0x17e   :  { %3887 = vst.msk [vmem:[%s9187_s1 + $0x903] ss:$8 sm:$0xf] %vm3_vm0, %v1523_v45   ;;  %3888 = vst.msk [vmem:[%s9187_s1 + $0x903] ss:$8 sm:$0xf0] %vm3_vm0, %v1523_v45   ;;  %2052 = vrot.lane.b32.xlu1 %v6463_v40, %s4540_s8  ;;  %2043 = vrot.lane.b32.xlu0 %v6468_v41, %s4540_s8 }
 0x17f   :  { %v6829_v44 = vld [vmem:[%s9186_s0 + $0x8] sm:$0xff]   ;;  %v6834_v45 = vld [vmem:[%s9186_s0] sm:$0xff]  }
 0x180   :  { %v1550_v60 = vpop.permute.xlu1 %1549   ;;  %v1541_v61 = vpop.permute.xlu0 %1540   ;;  %4 = vst.msk [vmem:[%s9187_s1] ss:$8 sm:$0xf] %vm3_vm0, %v6834_v45   ;;  %5 = vst.msk [vmem:[%s9187_s1] ss:$8 sm:$0xf0] %vm3_vm0, %v6834_v45  }
 0x181   :  { %3896 = vst.msk [vmem:[%s9187_s1 + $0x9c3] ss:$8 sm:$0xf] %vm3_vm0, %v1550_v60   ;;  %3897 = vst.msk [vmem:[%s9187_s1 + $0x9c3] ss:$8 sm:$0xf0] %vm3_vm0, %v1550_v60  }
 0x182   :  { %3893 = vst.msk [vmem:[%s9187_s1 + $0x983] ss:$8 sm:$0xf] %vm3_vm0, %v1541_v61   ;;  %3894 = vst.msk [vmem:[%s9187_s1 + $0x983] ss:$8 sm:$0xf0] %vm3_vm0, %v1541_v61   ;;  %2069 = vrot.lane.b32.xlu1 %v5773_v46, %s4541_s14  ;;  %2060 = vrot.lane.b32.xlu0 %v5778_v47, %s4541_s14 }
 0x183   :  { %3353 = vst.msk [vmem:[%s9187_s1 + $0x40] ss:$8 sm:$0xf] %vm3_vm0, %v6829_v44   ;;  %3354 = vst.msk [vmem:[%s9187_s1 + $0x40] ss:$8 sm:$0xf0] %vm3_vm0, %v6829_v44  }
 0x184   :  { %v1568_v52 = vpop.permute.xlu1 %1567   ;;  %v1559_v53 = vpop.permute.xlu0 %1558   ;;  %v6879_v60 = vld [vmem:[%s9186_s0 + $0x18] sm:$0xff]   ;;  %v6884_v61 = vld [vmem:[%s9186_s0 + $0x10] sm:$0xff]  }
 0x185   :  { %3902 = vst.msk [vmem:[%s9187_s1 + $0xa43] ss:$8 sm:$0xf] %vm3_vm0, %v1568_v52   ;;  %3903 = vst.msk [vmem:[%s9187_s1 + $0xa43] ss:$8 sm:$0xf0] %vm3_vm0, %v1568_v52  }
 0x186   :  { %3899 = vst.msk [vmem:[%s9187_s1 + $0xa03] ss:$8 sm:$0xf] %vm3_vm0, %v1559_v53   ;;  %3900 = vst.msk [vmem:[%s9187_s1 + $0xa03] ss:$8 sm:$0xf0] %vm3_vm0, %v1559_v53   ;;  %2087 = vrot.lane.b32.xlu1 %v5803_v58, %s4541_s14  ;;  %2078 = vrot.lane.b32.xlu0 %v5808_v59, %s4541_s14 }
 0x187   :  { %3356 = vst.msk [vmem:[%s9187_s1 + $0x80] ss:$8 sm:$0xf] %vm3_vm0, %v6884_v61   ;;  %3357 = vst.msk [vmem:[%s9187_s1 + $0x80] ss:$8 sm:$0xf0] %vm3_vm0, %v6884_v61  }
 0x188   :  { %v1586_v4 = vpop.permute.xlu1 %1585   ;;  %v1577_v5 = vpop.permute.xlu0 %1576   ;;  %3359 = vst.msk [vmem:[%s9187_s1 + $0xc0] ss:$8 sm:$0xf] %vm3_vm0, %v6879_v60   ;;  %3360 = vst.msk [vmem:[%s9187_s1 + $0xc0] ss:$8 sm:$0xf0] %vm3_vm0, %v6879_v60  }
 0x189   :  { %3908 = vst.msk [vmem:[%s9187_s1 + $0xac3] ss:$8 sm:$0xf] %vm3_vm0, %v1586_v4   ;;  %3909 = vst.msk [vmem:[%s9187_s1 + $0xac3] ss:$8 sm:$0xf0] %vm3_vm0, %v1586_v4  }
 0x18a   :  { %3905 = vst.msk [vmem:[%s9187_s1 + $0xa83] ss:$8 sm:$0xf] %vm3_vm0, %v1577_v5   ;;  %3906 = vst.msk [vmem:[%s9187_s1 + $0xa83] ss:$8 sm:$0xf0] %vm3_vm0, %v1577_v5   ;;  %2105 = vrot.lane.b32.xlu1 %v5833_v62, %s4541_s14  ;;  %2096 = vrot.lane.b32.xlu0 %v5838_v63, %s4541_s14 }
 0x18b   :  { %v6929_v52 = vld [vmem:[%s9186_s0 + $0x28] sm:$0xff]   ;;  %v6934_v53 = vld [vmem:[%s9186_s0 + $0x20] sm:$0xff]   ;;  %v6979_v4 = vld [vmem:[%s9186_s0 + $0x38] sm:$0xff]  }
 0x18c   :  { %v1604_v12 = vpop.permute.xlu1 %1603   ;;  %v1595_v13 = vpop.permute.xlu0 %1594   ;;  %3362 = vst.msk [vmem:[%s9187_s1 + $0x100] ss:$8 sm:$0xf] %vm3_vm0, %v6934_v53   ;;  %3363 = vst.msk [vmem:[%s9187_s1 + $0x100] ss:$8 sm:$0xf0] %vm3_vm0, %v6934_v53  }
 0x18d   :  { %3914 = vst.msk [vmem:[%s9187_s1 + $0xb43] ss:$8 sm:$0xf] %vm3_vm0, %v1604_v12   ;;  %3915 = vst.msk [vmem:[%s9187_s1 + $0xb43] ss:$8 sm:$0xf0] %vm3_vm0, %v1604_v12  }
 0x18e   :  { %3911 = vst.msk [vmem:[%s9187_s1 + $0xb03] ss:$8 sm:$0xf] %vm3_vm0, %v1595_v13   ;;  %3912 = vst.msk [vmem:[%s9187_s1 + $0xb03] ss:$8 sm:$0xf0] %vm3_vm0, %v1595_v13   ;;  %2123 = vrot.lane.b32.xlu1 %v5863_v50, %s4541_s14  ;;  %2114 = vrot.lane.b32.xlu0 %v5868_v51, %s4541_s14 }
 0x18f   :  { %3365 = vst.msk [vmem:[%s9187_s1 + $0x140] ss:$8 sm:$0xf] %vm3_vm0, %v6929_v52   ;;  %3366 = vst.msk [vmem:[%s9187_s1 + $0x140] ss:$8 sm:$0xf0] %vm3_vm0, %v6929_v52  }
 0x190   :  { %v1622_v20 = vpop.permute.xlu1 %1621   ;;  %v1613_v21 = vpop.permute.xlu0 %1612   ;;  %v6984_v5 = vld [vmem:[%s9186_s0 + $0x30] sm:$0xff]   ;;  %3371 = vst.msk [vmem:[%s9187_s1 + $0x1c0] ss:$8 sm:$0xf] %vm3_vm0, %v6979_v4   ;;  %v7029_v12 = vld [vmem:[%s9186_s0 + $0x48] sm:$0xff]   ;;  %v7034_v13 = vld [vmem:[%s9186_s0 + $0x40] sm:$0xff]  }
 0x191   :  { %3920 = vst.msk [vmem:[%s9187_s1 + $0xbc3] ss:$8 sm:$0xf] %vm3_vm0, %v1622_v20   ;;  %3921 = vst.msk [vmem:[%s9187_s1 + $0xbc3] ss:$8 sm:$0xf0] %vm3_vm0, %v1622_v20  }
 0x192   :  { %3917 = vst.msk [vmem:[%s9187_s1 + $0xb83] ss:$8 sm:$0xf] %vm3_vm0, %v1613_v21   ;;  %3918 = vst.msk [vmem:[%s9187_s1 + $0xb83] ss:$8 sm:$0xf0] %vm3_vm0, %v1613_v21   ;;  %2141 = vrot.lane.b32.xlu1 %v5893_v54, %s4541_s14  ;;  %2132 = vrot.lane.b32.xlu0 %v5898_v55, %s4541_s14 }
 0x193   :  { %3368 = vst.msk [vmem:[%s9187_s1 + $0x180] ss:$8 sm:$0xf] %vm3_vm0, %v6984_v5   ;;  %3369 = vst.msk [vmem:[%s9187_s1 + $0x180] ss:$8 sm:$0xf0] %vm3_vm0, %v6984_v5  }
 0x194   :  { %v1639_v28 = vpop.permute.xlu1 %1638   ;;  %v1630_v29 = vpop.permute.xlu0 %1629   ;;  %3372 = vst.msk [vmem:[%s9187_s1 + $0x1c0] ss:$8 sm:$0xf0] %vm3_vm0, %v6979_v4   ;;  %3374 = vst.msk [vmem:[%s9187_s1 + $0x200] ss:$8 sm:$0xf] %vm3_vm0, %v7034_v13  }
 0x195   :  { %3925 = vst.msk [vmem:[%s9187_s1 + $0x44] ss:$8 sm:$0xf] %vm3_vm0, %v1639_v28   ;;  %3926 = vst.msk [vmem:[%s9187_s1 + $0x44] ss:$8 sm:$0xf0] %vm3_vm0, %v1639_v28  }
 0x196   :  { %3922 = vst.msk [vmem:[%s9187_s1 + $0x4] ss:$8 sm:$0xf] %vm3_vm0, %v1630_v29   ;;  %3923 = vst.msk [vmem:[%s9187_s1 + $0x4] ss:$8 sm:$0xf0] %vm3_vm0, %v1630_v29   ;;  %2159 = vrot.lane.b32.xlu1 %v5923_v0, %s4541_s14  ;;  %2150 = vrot.lane.b32.xlu0 %v5928_v2, %s4541_s14 }
 0x197   :  { %3375 = vst.msk [vmem:[%s9187_s1 + $0x200] ss:$8 sm:$0xf0] %vm3_vm0, %v7034_v13   ;;  %3377 = vst.msk [vmem:[%s9187_s1 + $0x240] ss:$8 sm:$0xf] %vm3_vm0, %v7029_v12  }
 0x198   :  { %v1657_v36 = vpop.permute.xlu1 %1656   ;;  %v1648_v37 = vpop.permute.xlu0 %1647   ;;  %3378 = vst.msk [vmem:[%s9187_s1 + $0x240] ss:$8 sm:$0xf0] %vm3_vm0, %v7029_v12   ;;  %v7079_v20 = vld [vmem:[%s9186_s0 + $0x58] sm:$0xff]   ;;  %v7084_v21 = vld [vmem:[%s9186_s0 + $0x50] sm:$0xff]   ;;  %v7129_v28 = vld [vmem:[%s9186_s0 + $0x68] sm:$0xff]  }
 0x199   :  { %3931 = vst.msk [vmem:[%s9187_s1 + $0xc4] ss:$8 sm:$0xf] %vm3_vm0, %v1657_v36   ;;  %3932 = vst.msk [vmem:[%s9187_s1 + $0xc4] ss:$8 sm:$0xf0] %vm3_vm0, %v1657_v36  }
 0x19a   :  { %3928 = vst.msk [vmem:[%s9187_s1 + $0x84] ss:$8 sm:$0xf] %vm3_vm0, %v1648_v37   ;;  %3929 = vst.msk [vmem:[%s9187_s1 + $0x84] ss:$8 sm:$0xf0] %vm3_vm0, %v1648_v37   ;;  %2177 = vrot.lane.b32.xlu1 %v5953_v6, %s4541_s14  ;;  %2168 = vrot.lane.b32.xlu0 %v5958_v7, %s4541_s14 }
 0x19b   :  { %3380 = vst.msk [vmem:[%s9187_s1 + $0x280] ss:$8 sm:$0xf] %vm3_vm0, %v7084_v21   ;;  %3381 = vst.msk [vmem:[%s9187_s1 + $0x280] ss:$8 sm:$0xf0] %vm3_vm0, %v7084_v21  }
 0x19c   :  { %v1675_v6 = vpop.permute.xlu1 %1674   ;;  %v1666_v7 = vpop.permute.xlu0 %1665   ;;  %3383 = vst.msk [vmem:[%s9187_s1 + $0x2c0] ss:$8 sm:$0xf] %vm3_vm0, %v7079_v20   ;;  %3384 = vst.msk [vmem:[%s9187_s1 + $0x2c0] ss:$8 sm:$0xf0] %vm3_vm0, %v7079_v20  }
 0x19d   :  { %3937 = vst.msk [vmem:[%s9187_s1 + $0x144] ss:$8 sm:$0xf] %vm3_vm0, %v1675_v6   ;;  %3938 = vst.msk [vmem:[%s9187_s1 + $0x144] ss:$8 sm:$0xf0] %vm3_vm0, %v1675_v6  }
 0x19e   :  { %3934 = vst.msk [vmem:[%s9187_s1 + $0x104] ss:$8 sm:$0xf] %vm3_vm0, %v1666_v7   ;;  %3935 = vst.msk [vmem:[%s9187_s1 + $0x104] ss:$8 sm:$0xf0] %vm3_vm0, %v1666_v7   ;;  %2195 = vrot.lane.b32.xlu1 %v5983_v10, %s4541_s14  ;;  %2186 = vrot.lane.b32.xlu0 %v5988_v11, %s4541_s14 }
 0x19f   :  { %v7134_v29 = vld [vmem:[%s9186_s0 + $0x60] sm:$0xff]   ;;  %3389 = vst.msk [vmem:[%s9187_s1 + $0x340] ss:$8 sm:$0xf] %vm3_vm0, %v7129_v28   ;;  %v7179_v36 = vld [vmem:[%s9186_s0 + $0x78] sm:$0xff]   ;;  %v7184_v37 = vld [vmem:[%s9186_s0 + $0x70] sm:$0xff]  }
 0x1a0   :  { %v1693_v10 = vpop.permute.xlu1 %1692   ;;  %v1684_v11 = vpop.permute.xlu0 %1683   ;;  %3386 = vst.msk [vmem:[%s9187_s1 + $0x300] ss:$8 sm:$0xf] %vm3_vm0, %v7134_v29   ;;  %3387 = vst.msk [vmem:[%s9187_s1 + $0x300] ss:$8 sm:$0xf0] %vm3_vm0, %v7134_v29  }
 0x1a1   :  { %3943 = vst.msk [vmem:[%s9187_s1 + $0x1c4] ss:$8 sm:$0xf] %vm3_vm0, %v1693_v10   ;;  %3944 = vst.msk [vmem:[%s9187_s1 + $0x1c4] ss:$8 sm:$0xf0] %vm3_vm0, %v1693_v10  }
 0x1a2   :  { %3940 = vst.msk [vmem:[%s9187_s1 + $0x184] ss:$8 sm:$0xf] %vm3_vm0, %v1684_v11   ;;  %3941 = vst.msk [vmem:[%s9187_s1 + $0x184] ss:$8 sm:$0xf0] %vm3_vm0, %v1684_v11   ;;  %2213 = vrot.lane.b32.xlu1 %v6013_v14, %s4541_s14  ;;  %2204 = vrot.lane.b32.xlu0 %v6018_v15, %s4541_s14 }
 0x1a3   :  { %3390 = vst.msk [vmem:[%s9187_s1 + $0x340] ss:$8 sm:$0xf0] %vm3_vm0, %v7129_v28   ;;  %3392 = vst.msk [vmem:[%s9187_s1 + $0x380] ss:$8 sm:$0xf] %vm3_vm0, %v7184_v37  }
 0x1a4   :  { %v1711_v14 = vpop.permute.xlu1 %1710   ;;  %v1702_v15 = vpop.permute.xlu0 %1701   ;;  %3393 = vst.msk [vmem:[%s9187_s1 + $0x380] ss:$8 sm:$0xf0] %vm3_vm0, %v7184_v37   ;;  %3395 = vst.msk [vmem:[%s9187_s1 + $0x3c0] ss:$8 sm:$0xf] %vm3_vm0, %v7179_v36  }
 0x1a5   :  { %3949 = vst.msk [vmem:[%s9187_s1 + $0x244] ss:$8 sm:$0xf] %vm3_vm0, %v1711_v14   ;;  %3950 = vst.msk [vmem:[%s9187_s1 + $0x244] ss:$8 sm:$0xf0] %vm3_vm0, %v1711_v14  }
 0x1a6   :  { %3946 = vst.msk [vmem:[%s9187_s1 + $0x204] ss:$8 sm:$0xf] %vm3_vm0, %v1702_v15   ;;  %3947 = vst.msk [vmem:[%s9187_s1 + $0x204] ss:$8 sm:$0xf0] %vm3_vm0, %v1702_v15   ;;  %2231 = vrot.lane.b32.xlu1 %v6043_v18, %s4541_s14  ;;  %2222 = vrot.lane.b32.xlu0 %v6048_v19, %s4541_s14 }
 0x1a7   :  { %3396 = vst.msk [vmem:[%s9187_s1 + $0x3c0] ss:$8 sm:$0xf0] %vm3_vm0, %v7179_v36   ;;  %v7229_v6 = vld [vmem:[%s9186_s0 + $0x88] sm:$0xff]   ;;  %v7234_v7 = vld [vmem:[%s9186_s0 + $0x80] sm:$0xff]   ;;  %v7279_v10 = vld [vmem:[%s9186_s0 + $0x98] sm:$0xff]  }
 0x1a8   :  { %v1729_v18 = vpop.permute.xlu1 %1728   ;;  %v1720_v19 = vpop.permute.xlu0 %1719   ;;  %3398 = vst.msk [vmem:[%s9187_s1 + $0x400] ss:$8 sm:$0xf] %vm3_vm0, %v7234_v7   ;;  %3399 = vst.msk [vmem:[%s9187_s1 + $0x400] ss:$8 sm:$0xf0] %vm3_vm0, %v7234_v7  }
 0x1a9   :  { %3955 = vst.msk [vmem:[%s9187_s1 + $0x2c4] ss:$8 sm:$0xf] %vm3_vm0, %v1729_v18   ;;  %3956 = vst.msk [vmem:[%s9187_s1 + $0x2c4] ss:$8 sm:$0xf0] %vm3_vm0, %v1729_v18  }
 0x1aa   :  { %3952 = vst.msk [vmem:[%s9187_s1 + $0x284] ss:$8 sm:$0xf] %vm3_vm0, %v1720_v19   ;;  %3953 = vst.msk [vmem:[%s9187_s1 + $0x284] ss:$8 sm:$0xf0] %vm3_vm0, %v1720_v19   ;;  %2249 = vrot.lane.b32.xlu1 %v6073_v22, %s4541_s14  ;;  %2240 = vrot.lane.b32.xlu0 %v6078_v23, %s4541_s14 }
 0x1ab   :  { %3401 = vst.msk [vmem:[%s9187_s1 + $0x440] ss:$8 sm:$0xf] %vm3_vm0, %v7229_v6   ;;  %3402 = vst.msk [vmem:[%s9187_s1 + $0x440] ss:$8 sm:$0xf0] %vm3_vm0, %v7229_v6  }
 0x1ac   :  { %v1747_v22 = vpop.permute.xlu1 %1746   ;;  %v1738_v23 = vpop.permute.xlu0 %1737   ;;  %v7284_v11 = vld [vmem:[%s9186_s0 + $0x90] sm:$0xff]   ;;  %3407 = vst.msk [vmem:[%s9187_s1 + $0x4c0] ss:$8 sm:$0xf] %vm3_vm0, %v7279_v10   ;;  %v7329_v14 = vld [vmem:[%s9186_s0 + $0xa8] sm:$0xff]   ;;  %v7334_v15 = vld [vmem:[%s9186_s0 + $0xa0] sm:$0xff]  }
 0x1ad   :  { %3961 = vst.msk [vmem:[%s9187_s1 + $0x344] ss:$8 sm:$0xf] %vm3_vm0, %v1747_v22   ;;  %3962 = vst.msk [vmem:[%s9187_s1 + $0x344] ss:$8 sm:$0xf0] %vm3_vm0, %v1747_v22  }
 0x1ae   :  { %3958 = vst.msk [vmem:[%s9187_s1 + $0x304] ss:$8 sm:$0xf] %vm3_vm0, %v1738_v23   ;;  %3959 = vst.msk [vmem:[%s9187_s1 + $0x304] ss:$8 sm:$0xf0] %vm3_vm0, %v1738_v23   ;;  %2267 = vrot.lane.b32.xlu1 %v6103_v26, %s4541_s14  ;;  %2258 = vrot.lane.b32.xlu0 %v6108_v27, %s4541_s14 }
 0x1af   :  { %3404 = vst.msk [vmem:[%s9187_s1 + $0x480] ss:$8 sm:$0xf] %vm3_vm0, %v7284_v11   ;;  %3405 = vst.msk [vmem:[%s9187_s1 + $0x480] ss:$8 sm:$0xf0] %vm3_vm0, %v7284_v11  }
 0x1b0   :  { %v1765_v26 = vpop.permute.xlu1 %1764   ;;  %v1756_v27 = vpop.permute.xlu0 %1755   ;;  %3408 = vst.msk [vmem:[%s9187_s1 + $0x4c0] ss:$8 sm:$0xf0] %vm3_vm0, %v7279_v10   ;;  %3410 = vst.msk [vmem:[%s9187_s1 + $0x500] ss:$8 sm:$0xf] %vm3_vm0, %v7334_v15  }
 0x1b1   :  { %3967 = vst.msk [vmem:[%s9187_s1 + $0x3c4] ss:$8 sm:$0xf] %vm3_vm0, %v1765_v26   ;;  %3968 = vst.msk [vmem:[%s9187_s1 + $0x3c4] ss:$8 sm:$0xf0] %vm3_vm0, %v1765_v26  }
 0x1b2   :  { %3964 = vst.msk [vmem:[%s9187_s1 + $0x384] ss:$8 sm:$0xf] %vm3_vm0, %v1756_v27   ;;  %3965 = vst.msk [vmem:[%s9187_s1 + $0x384] ss:$8 sm:$0xf0] %vm3_vm0, %v1756_v27   ;;  %2285 = vrot.lane.b32.xlu1 %v6133_v30, %s4541_s14  ;;  %2276 = vrot.lane.b32.xlu0 %v6138_v31, %s4541_s14 }
 0x1b3   :  { %3411 = vst.msk [vmem:[%s9187_s1 + $0x500] ss:$8 sm:$0xf0] %vm3_vm0, %v7334_v15   ;;  %3413 = vst.msk [vmem:[%s9187_s1 + $0x540] ss:$8 sm:$0xf] %vm3_vm0, %v7329_v14  }
 0x1b4   :  { %v1783_v30 = vpop.permute.xlu1 %1782   ;;  %v1774_v31 = vpop.permute.xlu0 %1773   ;;  %3414 = vst.msk [vmem:[%s9187_s1 + $0x540] ss:$8 sm:$0xf0] %vm3_vm0, %v7329_v14   ;;  %v7379_v18 = vld [vmem:[%s9186_s0 + $0xb8] sm:$0xff]   ;;  %v7384_v19 = vld [vmem:[%s9186_s0 + $0xb0] sm:$0xff]   ;;  %v7429_v22 = vld [vmem:[%s9186_s0 + $0xc8] sm:$0xff]  }
 0x1b5   :  { %3973 = vst.msk [vmem:[%s9187_s1 + $0x444] ss:$8 sm:$0xf] %vm3_vm0, %v1783_v30   ;;  %3974 = vst.msk [vmem:[%s9187_s1 + $0x444] ss:$8 sm:$0xf0] %vm3_vm0, %v1783_v30  }
 0x1b6   :  { %3970 = vst.msk [vmem:[%s9187_s1 + $0x404] ss:$8 sm:$0xf] %vm3_vm0, %v1774_v31   ;;  %3971 = vst.msk [vmem:[%s9187_s1 + $0x404] ss:$8 sm:$0xf0] %vm3_vm0, %v1774_v31   ;;  %2303 = vrot.lane.b32.xlu1 %v6163_v34, %s4541_s14  ;;  %2294 = vrot.lane.b32.xlu0 %v6168_v35, %s4541_s14 }
 0x1b7   :  { %3416 = vst.msk [vmem:[%s9187_s1 + $0x580] ss:$8 sm:$0xf] %vm3_vm0, %v7384_v19   ;;  %3417 = vst.msk [vmem:[%s9187_s1 + $0x580] ss:$8 sm:$0xf0] %vm3_vm0, %v7384_v19  }
 0x1b8   :  { %v1801_v34 = vpop.permute.xlu1 %1800   ;;  %v1792_v35 = vpop.permute.xlu0 %1791   ;;  %3419 = vst.msk [vmem:[%s9187_s1 + $0x5c0] ss:$8 sm:$0xf] %vm3_vm0, %v7379_v18   ;;  %3420 = vst.msk [vmem:[%s9187_s1 + $0x5c0] ss:$8 sm:$0xf0] %vm3_vm0, %v7379_v18  }
 0x1b9   :  { %3979 = vst.msk [vmem:[%s9187_s1 + $0x4c4] ss:$8 sm:$0xf] %vm3_vm0, %v1801_v34   ;;  %3980 = vst.msk [vmem:[%s9187_s1 + $0x4c4] ss:$8 sm:$0xf0] %vm3_vm0, %v1801_v34  }
 0x1ba   :  { %3976 = vst.msk [vmem:[%s9187_s1 + $0x484] ss:$8 sm:$0xf] %vm3_vm0, %v1792_v35   ;;  %3977 = vst.msk [vmem:[%s9187_s1 + $0x484] ss:$8 sm:$0xf0] %vm3_vm0, %v1792_v35   ;;  %2321 = vrot.lane.b32.xlu1 %v6193_v38, %s4541_s14  ;;  %2312 = vrot.lane.b32.xlu0 %v6198_v39, %s4541_s14 }
 0x1bb   :  { %v7434_v23 = vld [vmem:[%s9186_s0 + $0xc0] sm:$0xff]   ;;  %3425 = vst.msk [vmem:[%s9187_s1 + $0x640] ss:$8 sm:$0xf] %vm3_vm0, %v7429_v22   ;;  %v7479_v26 = vld [vmem:[%s9186_s0 + $0xd8] sm:$0xff]   ;;  %v7484_v27 = vld [vmem:[%s9186_s0 + $0xd0] sm:$0xff]  }
 0x1bc   :  { %v1819_v38 = vpop.permute.xlu1 %1818   ;;  %v1810_v39 = vpop.permute.xlu0 %1809   ;;  %3422 = vst.msk [vmem:[%s9187_s1 + $0x600] ss:$8 sm:$0xf] %vm3_vm0, %v7434_v23   ;;  %3423 = vst.msk [vmem:[%s9187_s1 + $0x600] ss:$8 sm:$0xf0] %vm3_vm0, %v7434_v23  }
 0x1bd   :  { %3985 = vst.msk [vmem:[%s9187_s1 + $0x544] ss:$8 sm:$0xf] %vm3_vm0, %v1819_v38   ;;  %3986 = vst.msk [vmem:[%s9187_s1 + $0x544] ss:$8 sm:$0xf0] %vm3_vm0, %v1819_v38  }
 0x1be   :  { %3982 = vst.msk [vmem:[%s9187_s1 + $0x504] ss:$8 sm:$0xf] %vm3_vm0, %v1810_v39   ;;  %3983 = vst.msk [vmem:[%s9187_s1 + $0x504] ss:$8 sm:$0xf0] %vm3_vm0, %v1810_v39   ;;  %2339 = vrot.lane.b32.xlu1 %v6223_v42, %s4541_s14  ;;  %2330 = vrot.lane.b32.xlu0 %v6228_v43, %s4541_s14 }
 0x1bf   :  { %3426 = vst.msk [vmem:[%s9187_s1 + $0x640] ss:$8 sm:$0xf0] %vm3_vm0, %v7429_v22   ;;  %3428 = vst.msk [vmem:[%s9187_s1 + $0x680] ss:$8 sm:$0xf] %vm3_vm0, %v7484_v27  }
 0x1c0   :  { %v1837_v42 = vpop.permute.xlu1 %1836   ;;  %v1828_v43 = vpop.permute.xlu0 %1827   ;;  %3429 = vst.msk [vmem:[%s9187_s1 + $0x680] ss:$8 sm:$0xf0] %vm3_vm0, %v7484_v27   ;;  %3431 = vst.msk [vmem:[%s9187_s1 + $0x6c0] ss:$8 sm:$0xf] %vm3_vm0, %v7479_v26  }
 0x1c1   :  { %3991 = vst.msk [vmem:[%s9187_s1 + $0x5c4] ss:$8 sm:$0xf] %vm3_vm0, %v1837_v42   ;;  %3992 = vst.msk [vmem:[%s9187_s1 + $0x5c4] ss:$8 sm:$0xf0] %vm3_vm0, %v1837_v42  }
 0x1c2   :  { %3988 = vst.msk [vmem:[%s9187_s1 + $0x584] ss:$8 sm:$0xf] %vm3_vm0, %v1828_v43   ;;  %3989 = vst.msk [vmem:[%s9187_s1 + $0x584] ss:$8 sm:$0xf0] %vm3_vm0, %v1828_v43   ;;  %2357 = vrot.lane.b32.xlu1 %v6253_v56, %s4541_s14  ;;  %2348 = vrot.lane.b32.xlu0 %v6258_v57, %s4541_s14 }
 0x1c3   :  { %3432 = vst.msk [vmem:[%s9187_s1 + $0x6c0] ss:$8 sm:$0xf0] %vm3_vm0, %v7479_v26   ;;  %v7529_v30 = vld [vmem:[%s9186_s0 + $0xe8] sm:$0xff]   ;;  %v7534_v31 = vld [vmem:[%s9186_s0 + $0xe0] sm:$0xff]   ;;  %v7583_v42 = vld [vmem:[%s9186_s0 + $0xf8] sm:$0xff]  }
 0x1c4   :  { %v1855_v56 = vpop.permute.xlu1 %1854   ;;  %v1846_v57 = vpop.permute.xlu0 %1845   ;;  %v4501_v34 = vld [vmem:[%s9186_s0 + $0x68] sm:$0xff]   ;;  %v4502_v35 = vld [vmem:[%s9186_s0 + $0x60] sm:$0xff]   ;;  %3434 = vst.msk [vmem:[%s9187_s1 + $0x700] ss:$8 sm:$0xf] %vm3_vm0, %v7534_v31   ;;  %v7588_v43 = vld [vmem:[%s9186_s0 + $0xf0] sm:$0xff]  }
 0x1c5   :  { %3997 = vst.msk [vmem:[%s9187_s1 + $0x644] ss:$8 sm:$0xf] %vm3_vm0, %v1855_v56   ;;  %3998 = vst.msk [vmem:[%s9187_s1 + $0x644] ss:$8 sm:$0xf0] %vm3_vm0, %v1855_v56  }
 0x1c6   :  { %3994 = vst.msk [vmem:[%s9187_s1 + $0x604] ss:$8 sm:$0xf] %vm3_vm0, %v1846_v57   ;;  %3995 = vst.msk [vmem:[%s9187_s1 + $0x604] ss:$8 sm:$0xf0] %vm3_vm0, %v1846_v57   ;;  %2375 = vrot.lane.b32.xlu1 %v6283_v48, %s4541_s14  ;;  %2366 = vrot.lane.b32.xlu0 %v6288_v49, %s4541_s14 }
 0x1c7   :  { %3435 = vst.msk [vmem:[%s9187_s1 + $0x700] ss:$8 sm:$0xf0] %vm3_vm0, %v7534_v31   ;;  %3437 = vst.msk [vmem:[%s9187_s1 + $0x740] ss:$8 sm:$0xf] %vm3_vm0, %v7529_v30  }
 0x1c8   :  { %v1873_v48 = vpop.permute.xlu1 %1872   ;;  %v1864_v49 = vpop.permute.xlu0 %1863   ;;  %3438 = vst.msk [vmem:[%s9187_s1 + $0x740] ss:$8 sm:$0xf0] %vm3_vm0, %v7529_v30   ;;  %v4503_v56 = vld [vmem:[%s9186_s0 + $0x78] sm:$0xff]   ;;  %v4504_v57 = vld [vmem:[%s9186_s0 + $0x70] sm:$0xff]  }
 0x1c9   :  { %4003 = vst.msk [vmem:[%s9187_s1 + $0x6c4] ss:$8 sm:$0xf] %vm3_vm0, %v1873_v48   ;;  %4004 = vst.msk [vmem:[%s9187_s1 + $0x6c4] ss:$8 sm:$0xf0] %vm3_vm0, %v1873_v48  }
 0x1ca   :  { %4000 = vst.msk [vmem:[%s9187_s1 + $0x684] ss:$8 sm:$0xf] %vm3_vm0, %v1864_v49   ;;  %4001 = vst.msk [vmem:[%s9187_s1 + $0x684] ss:$8 sm:$0xf0] %vm3_vm0, %v1864_v49   ;;  %2393 = vrot.lane.b32.xlu1 %v6313_v1, %s4541_s14  ;;  %2384 = vrot.lane.b32.xlu0 %v6318_v3, %s4541_s14 }
 0x1cb   :  { %3440 = vst.msk [vmem:[%s9187_s1 + $0x780] ss:$8 sm:$0xf] %vm3_vm0, %v7588_v43   ;;  %3441 = vst.msk [vmem:[%s9187_s1 + $0x780] ss:$8 sm:$0xf0] %vm3_vm0, %v7588_v43  }
 0x1cc   :  { %v1891_v1 = vpop.permute.xlu1 %1890   ;;  %v1882_v3 = vpop.permute.xlu0 %1881   ;;  %3443 = vst.msk [vmem:[%s9187_s1 + $0x7c0] ss:$8 sm:$0xf] %vm3_vm0, %v7583_v42   ;;  %3444 = vst.msk [vmem:[%s9187_s1 + $0x7c0] ss:$8 sm:$0xf0] %vm3_vm0, %v7583_v42  }
 0x1cd   :  { %4009 = vst.msk [vmem:[%s9187_s1 + $0x744] ss:$8 sm:$0xf] %vm3_vm0, %v1891_v1   ;;  %4010 = vst.msk [vmem:[%s9187_s1 + $0x744] ss:$8 sm:$0xf0] %vm3_vm0, %v1891_v1  }
 0x1ce   :  { %4006 = vst.msk [vmem:[%s9187_s1 + $0x704] ss:$8 sm:$0xf] %vm3_vm0, %v1882_v3   ;;  %4007 = vst.msk [vmem:[%s9187_s1 + $0x704] ss:$8 sm:$0xf0] %vm3_vm0, %v1882_v3   ;;  %2411 = vrot.lane.b32.xlu1 %v6343_v8, %s4541_s14  ;;  %2402 = vrot.lane.b32.xlu0 %v6348_v9, %s4541_s14 }
 0x1cf   :  { %v7637_v1 = vld [vmem:[%s9186_s0 + $0x108] sm:$0xff]   ;;  %v7642_v3 = vld [vmem:[%s9186_s0 + $0x100] sm:$0xff]  }
 0x1d0   :  { %v1909_v8 = vpop.permute.xlu1 %1908   ;;  %v1900_v9 = vpop.permute.xlu0 %1899   ;;  %3446 = vst.msk [vmem:[%s9187_s1 + $0x800] ss:$8 sm:$0xf] %vm3_vm0, %v7642_v3   ;;  %3447 = vst.msk [vmem:[%s9187_s1 + $0x800] ss:$8 sm:$0xf0] %vm3_vm0, %v7642_v3  }
 0x1d1   :  { %4015 = vst.msk [vmem:[%s9187_s1 + $0x7c4] ss:$8 sm:$0xf] %vm3_vm0, %v1909_v8   ;;  %4016 = vst.msk [vmem:[%s9187_s1 + $0x7c4] ss:$8 sm:$0xf0] %vm3_vm0, %v1909_v8  }
 0x1d2   :  { %4012 = vst.msk [vmem:[%s9187_s1 + $0x784] ss:$8 sm:$0xf] %vm3_vm0, %v1900_v9   ;;  %4013 = vst.msk [vmem:[%s9187_s1 + $0x784] ss:$8 sm:$0xf0] %vm3_vm0, %v1900_v9   ;;  %2429 = vrot.lane.b32.xlu1 %v6373_v16, %s4541_s14  ;;  %2420 = vrot.lane.b32.xlu0 %v6378_v17, %s4541_s14 }
 0x1d3   :  { %v4505_v8 = vld [vmem:[%s9186_s0 + $0x88] sm:$0xff]   ;;  %v4506_v9 = vld [vmem:[%s9186_s0 + $0x80] sm:$0xff]   ;;  %3449 = vst.msk [vmem:[%s9187_s1 + $0x840] ss:$8 sm:$0xf] %vm3_vm0, %v7637_v1  }
 0x1d4   :  { %v1927_v16 = vpop.permute.xlu1 %1926   ;;  %v1918_v17 = vpop.permute.xlu0 %1917   ;;  %3450 = vst.msk [vmem:[%s9187_s1 + $0x840] ss:$8 sm:$0xf0] %vm3_vm0, %v7637_v1  }
 0x1d5   :  { %4021 = vst.msk [vmem:[%s9187_s1 + $0x844] ss:$8 sm:$0xf] %vm3_vm0, %v1927_v16   ;;  %4022 = vst.msk [vmem:[%s9187_s1 + $0x844] ss:$8 sm:$0xf0] %vm3_vm0, %v1927_v16  }
 0x1d6   :  { %4018 = vst.msk [vmem:[%s9187_s1 + $0x804] ss:$8 sm:$0xf] %vm3_vm0, %v1918_v17   ;;  %4019 = vst.msk [vmem:[%s9187_s1 + $0x804] ss:$8 sm:$0xf0] %vm3_vm0, %v1918_v17   ;;  %2447 = vrot.lane.b32.xlu1 %v6403_v24, %s4541_s14  ;;  %2438 = vrot.lane.b32.xlu0 %v6408_v25, %s4541_s14 }
 0x1d8   :  { %v1945_v24 = vpop.permute.xlu1 %1944   ;;  %v1936_v25 = vpop.permute.xlu0 %1935  }
 0x1d9   :  { %4027 = vst.msk [vmem:[%s9187_s1 + $0x8c4] ss:$8 sm:$0xf] %vm3_vm0, %v1945_v24   ;;  %4028 = vst.msk [vmem:[%s9187_s1 + $0x8c4] ss:$8 sm:$0xf0] %vm3_vm0, %v1945_v24  }
 0x1da   :  { %4024 = vst.msk [vmem:[%s9187_s1 + $0x884] ss:$8 sm:$0xf] %vm3_vm0, %v1936_v25   ;;  %4025 = vst.msk [vmem:[%s9187_s1 + $0x884] ss:$8 sm:$0xf0] %vm3_vm0, %v1936_v25   ;;  %2465 = vrot.lane.b32.xlu1 %v6433_v32, %s4541_s14  ;;  %2456 = vrot.lane.b32.xlu0 %v6438_v33, %s4541_s14 }
 0x1db   :  { %v7691_v24 = vld [vmem:[%s9186_s0 + $0x118] sm:$0xff]   ;;  %v7696_v25 = vld [vmem:[%s9186_s0 + $0x110] sm:$0xff]  }
 0x1dc   :  { %v1963_v32 = vpop.permute.xlu1 %1962   ;;  %v1954_v33 = vpop.permute.xlu0 %1953   ;;  %3452 = vst.msk [vmem:[%s9187_s1 + $0x880] ss:$8 sm:$0xf] %vm3_vm0, %v7696_v25   ;;  %3453 = vst.msk [vmem:[%s9187_s1 + $0x880] ss:$8 sm:$0xf0] %vm3_vm0, %v7696_v25  }
 0x1dd   :  { %4033 = vst.msk [vmem:[%s9187_s1 + $0x944] ss:$8 sm:$0xf] %vm3_vm0, %v1963_v32   ;;  %4034 = vst.msk [vmem:[%s9187_s1 + $0x944] ss:$8 sm:$0xf0] %vm3_vm0, %v1963_v32  }
 0x1de   :  { %4030 = vst.msk [vmem:[%s9187_s1 + $0x904] ss:$8 sm:$0xf] %vm3_vm0, %v1954_v33   ;;  %4031 = vst.msk [vmem:[%s9187_s1 + $0x904] ss:$8 sm:$0xf0] %vm3_vm0, %v1954_v33   ;;  %2483 = vrot.lane.b32.xlu1 %v6463_v40, %s4541_s14  ;;  %2474 = vrot.lane.b32.xlu0 %v6468_v41, %s4541_s14 }
 0x1df   :  { %v4507_v32 = vld [vmem:[%s9186_s0 + $0x98] sm:$0xff]   ;;  %v4508_v33 = vld [vmem:[%s9186_s0 + $0x90] sm:$0xff]   ;;  %3455 = vst.msk [vmem:[%s9187_s1 + $0x8c0] ss:$8 sm:$0xf] %vm3_vm0, %v7691_v24  }
 0x1e0   :  { %v1981_v40 = vpop.permute.xlu1 %1980   ;;  %v1972_v41 = vpop.permute.xlu0 %1971   ;;  %3456 = vst.msk [vmem:[%s9187_s1 + $0x8c0] ss:$8 sm:$0xf0] %vm3_vm0, %v7691_v24  }
 0x1e1   :  { %4039 = vst.msk [vmem:[%s9187_s1 + $0x9c4] ss:$8 sm:$0xf] %vm3_vm0, %v1981_v40   ;;  %4040 = vst.msk [vmem:[%s9187_s1 + $0x9c4] ss:$8 sm:$0xf0] %vm3_vm0, %v1981_v40  }
 0x1e2   :  { %4036 = vst.msk [vmem:[%s9187_s1 + $0x984] ss:$8 sm:$0xf] %vm3_vm0, %v1972_v41   ;;  %4037 = vst.msk [vmem:[%s9187_s1 + $0x984] ss:$8 sm:$0xf0] %vm3_vm0, %v1972_v41   ;;  %2500 = vrot.lane.b32.xlu1 %v5773_v46, %s4542_s26  ;;  %2491 = vrot.lane.b32.xlu0 %v5778_v47, %s4542_s26 }
 0x1e4   :  { %v1999_v46 = vpop.permute.xlu1 %1998   ;;  %v1990_v47 = vpop.permute.xlu0 %1989  }
 0x1e5   :  { %4045 = vst.msk [vmem:[%s9187_s1 + $0xa44] ss:$8 sm:$0xf] %vm3_vm0, %v1999_v46   ;;  %4046 = vst.msk [vmem:[%s9187_s1 + $0xa44] ss:$8 sm:$0xf0] %vm3_vm0, %v1999_v46  }
 0x1e6   :  { %4042 = vst.msk [vmem:[%s9187_s1 + $0xa04] ss:$8 sm:$0xf] %vm3_vm0, %v1990_v47   ;;  %4043 = vst.msk [vmem:[%s9187_s1 + $0xa04] ss:$8 sm:$0xf0] %vm3_vm0, %v1990_v47   ;;  %2518 = vrot.lane.b32.xlu1 %v5803_v58, %s4542_s26  ;;  %2509 = vrot.lane.b32.xlu0 %v5808_v59, %s4542_s26 }
 0x1e7   :  { %v7745_v46 = vld [vmem:[%s9186_s0 + $0x128] sm:$0xff]   ;;  %v7750_v47 = vld [vmem:[%s9186_s0 + $0x120] sm:$0xff]  }
 0x1e8   :  { %v2017_v58 = vpop.permute.xlu1 %2016   ;;  %v2008_v59 = vpop.permute.xlu0 %2007   ;;  %3458 = vst.msk [vmem:[%s9187_s1 + $0x900] ss:$8 sm:$0xf] %vm3_vm0, %v7750_v47   ;;  %3459 = vst.msk [vmem:[%s9187_s1 + $0x900] ss:$8 sm:$0xf0] %vm3_vm0, %v7750_v47  }
 0x1e9   :  { %4051 = vst.msk [vmem:[%s9187_s1 + $0xac4] ss:$8 sm:$0xf] %vm3_vm0, %v2017_v58   ;;  %4052 = vst.msk [vmem:[%s9187_s1 + $0xac4] ss:$8 sm:$0xf0] %vm3_vm0, %v2017_v58  }
 0x1ea   :  { %4048 = vst.msk [vmem:[%s9187_s1 + $0xa84] ss:$8 sm:$0xf] %vm3_vm0, %v2008_v59   ;;  %4049 = vst.msk [vmem:[%s9187_s1 + $0xa84] ss:$8 sm:$0xf0] %vm3_vm0, %v2008_v59   ;;  %2536 = vrot.lane.b32.xlu1 %v5833_v62, %s4542_s26  ;;  %2527 = vrot.lane.b32.xlu0 %v5838_v63, %s4542_s26 }
 0x1eb   :  { %v4509_v58 = vld [vmem:[%s9186_s0 + $0xa8] sm:$0xff]   ;;  %v4510_v59 = vld [vmem:[%s9186_s0 + $0xa0] sm:$0xff]   ;;  %3461 = vst.msk [vmem:[%s9187_s1 + $0x940] ss:$8 sm:$0xf] %vm3_vm0, %v7745_v46  }
 0x1ec   :  { %v2035_v62 = vpop.permute.xlu1 %2034   ;;  %v2026_v63 = vpop.permute.xlu0 %2025   ;;  %3462 = vst.msk [vmem:[%s9187_s1 + $0x940] ss:$8 sm:$0xf0] %vm3_vm0, %v7745_v46  }
 0x1ed   :  { %4057 = vst.msk [vmem:[%s9187_s1 + $0xb44] ss:$8 sm:$0xf] %vm3_vm0, %v2035_v62   ;;  %4058 = vst.msk [vmem:[%s9187_s1 + $0xb44] ss:$8 sm:$0xf0] %vm3_vm0, %v2035_v62  }
 0x1ee   :  { %4054 = vst.msk [vmem:[%s9187_s1 + $0xb04] ss:$8 sm:$0xf] %vm3_vm0, %v2026_v63   ;;  %4055 = vst.msk [vmem:[%s9187_s1 + $0xb04] ss:$8 sm:$0xf0] %vm3_vm0, %v2026_v63   ;;  %2554 = vrot.lane.b32.xlu1 %v5863_v50, %s4542_s26  ;;  %2545 = vrot.lane.b32.xlu0 %v5868_v51, %s4542_s26 }
 0x1f0   :  { %v2053_v50 = vpop.permute.xlu1 %2052   ;;  %v2044_v51 = vpop.permute.xlu0 %2043  }
 0x1f1   :  { %4063 = vst.msk [vmem:[%s9187_s1 + $0xbc4] ss:$8 sm:$0xf] %vm3_vm0, %v2053_v50   ;;  %4064 = vst.msk [vmem:[%s9187_s1 + $0xbc4] ss:$8 sm:$0xf0] %vm3_vm0, %v2053_v50  }
 0x1f2   :  { %4060 = vst.msk [vmem:[%s9187_s1 + $0xb84] ss:$8 sm:$0xf] %vm3_vm0, %v2044_v51   ;;  %4061 = vst.msk [vmem:[%s9187_s1 + $0xb84] ss:$8 sm:$0xf0] %vm3_vm0, %v2044_v51   ;;  %2572 = vrot.lane.b32.xlu1 %v5893_v54, %s4542_s26  ;;  %2563 = vrot.lane.b32.xlu0 %v5898_v55, %s4542_s26 }
 0x1f3   :  { %v7799_v50 = vld [vmem:[%s9186_s0 + $0x138] sm:$0xff]   ;;  %v7804_v51 = vld [vmem:[%s9186_s0 + $0x130] sm:$0xff]  }
 0x1f4   :  { %v2070_v54 = vpop.permute.xlu1 %2069   ;;  %v2061_v55 = vpop.permute.xlu0 %2060   ;;  %3464 = vst.msk [vmem:[%s9187_s1 + $0x980] ss:$8 sm:$0xf] %vm3_vm0, %v7804_v51   ;;  %3465 = vst.msk [vmem:[%s9187_s1 + $0x980] ss:$8 sm:$0xf0] %vm3_vm0, %v7804_v51  }
 0x1f5   :  { %4068 = vst.msk [vmem:[%s9187_s1 + $0x45] ss:$8 sm:$0xf] %vm3_vm0, %v2070_v54   ;;  %4069 = vst.msk [vmem:[%s9187_s1 + $0x45] ss:$8 sm:$0xf0] %vm3_vm0, %v2070_v54  }
 0x1f6   :  { %4065 = vst.msk [vmem:[%s9187_s1 + $0x5] ss:$8 sm:$0xf] %vm3_vm0, %v2061_v55   ;;  %4066 = vst.msk [vmem:[%s9187_s1 + $0x5] ss:$8 sm:$0xf0] %vm3_vm0, %v2061_v55   ;;  %2590 = vrot.lane.b32.xlu1 %v5923_v0, %s4542_s26  ;;  %2581 = vrot.lane.b32.xlu0 %v5928_v2, %s4542_s26 }
 0x1f7   :  { %v4511_v54 = vld [vmem:[%s9186_s0 + $0xb8] sm:$0xff]   ;;  %v4512_v55 = vld [vmem:[%s9186_s0 + $0xb0] sm:$0xff]   ;;  %3467 = vst.msk [vmem:[%s9187_s1 + $0x9c0] ss:$8 sm:$0xf] %vm3_vm0, %v7799_v50  }
 0x1f8   :  { %v2088_v0 = vpop.permute.xlu1 %2087   ;;  %v2079_v2 = vpop.permute.xlu0 %2078   ;;  %3468 = vst.msk [vmem:[%s9187_s1 + $0x9c0] ss:$8 sm:$0xf0] %vm3_vm0, %v7799_v50  }
 0x1f9   :  { %4074 = vst.msk [vmem:[%s9187_s1 + $0xc5] ss:$8 sm:$0xf] %vm3_vm0, %v2088_v0   ;;  %4075 = vst.msk [vmem:[%s9187_s1 + $0xc5] ss:$8 sm:$0xf0] %vm3_vm0, %v2088_v0  }
 0x1fa   :  { %4071 = vst.msk [vmem:[%s9187_s1 + $0x85] ss:$8 sm:$0xf] %vm3_vm0, %v2079_v2   ;;  %4072 = vst.msk [vmem:[%s9187_s1 + $0x85] ss:$8 sm:$0xf0] %vm3_vm0, %v2079_v2   ;;  %2608 = vrot.lane.b32.xlu1 %v4501_v34, %s4542_s26  ;;  %2599 = vrot.lane.b32.xlu0 %v4502_v35, %s4542_s26 }
 0x1fb   :  { %v7853_v34 = vld [vmem:[%s9186_s0 + $0x148] sm:$0xff]   ;;  %v7858_v35 = vld [vmem:[%s9186_s0 + $0x140] sm:$0xff]  }
 0x1fc   :  { %v2106_v38 = vpop.permute.xlu1 %2105   ;;  %v2097_v39 = vpop.permute.xlu0 %2096   ;;  %3470 = vst.msk [vmem:[%s9187_s1 + $0xa00] ss:$8 sm:$0xf] %vm3_vm0, %v7858_v35   ;;  %3471 = vst.msk [vmem:[%s9187_s1 + $0xa00] ss:$8 sm:$0xf0] %vm3_vm0, %v7858_v35  }
 0x1fd   :  { %4080 = vst.msk [vmem:[%s9187_s1 + $0x145] ss:$8 sm:$0xf] %vm3_vm0, %v2106_v38   ;;  %4081 = vst.msk [vmem:[%s9187_s1 + $0x145] ss:$8 sm:$0xf0] %vm3_vm0, %v2106_v38  }
 0x1fe   :  { %4077 = vst.msk [vmem:[%s9187_s1 + $0x105] ss:$8 sm:$0xf] %vm3_vm0, %v2097_v39   ;;  %4078 = vst.msk [vmem:[%s9187_s1 + $0x105] ss:$8 sm:$0xf0] %vm3_vm0, %v2097_v39   ;;  %2626 = vrot.lane.b32.xlu1 %v4503_v56, %s4542_s26  ;;  %2617 = vrot.lane.b32.xlu0 %v4504_v57, %s4542_s26 }
 0x1ff   :  { %v4513_v38 = vld [vmem:[%s9186_s0 + $0xc8] sm:$0xff]   ;;  %v4514_v39 = vld [vmem:[%s9186_s0 + $0xc0] sm:$0xff]   ;;  %3473 = vst.msk [vmem:[%s9187_s1 + $0xa40] ss:$8 sm:$0xf] %vm3_vm0, %v7853_v34  }
 0x200   :  { %v2124_v48 = vpop.permute.xlu1 %2123   ;;  %v2115_v49 = vpop.permute.xlu0 %2114   ;;  %3474 = vst.msk [vmem:[%s9187_s1 + $0xa40] ss:$8 sm:$0xf0] %vm3_vm0, %v7853_v34  }
 0x201   :  { %4086 = vst.msk [vmem:[%s9187_s1 + $0x1c5] ss:$8 sm:$0xf] %vm3_vm0, %v2124_v48   ;;  %4087 = vst.msk [vmem:[%s9187_s1 + $0x1c5] ss:$8 sm:$0xf0] %vm3_vm0, %v2124_v48  }
 0x202   :  { %4083 = vst.msk [vmem:[%s9187_s1 + $0x185] ss:$8 sm:$0xf] %vm3_vm0, %v2115_v49   ;;  %4084 = vst.msk [vmem:[%s9187_s1 + $0x185] ss:$8 sm:$0xf0] %vm3_vm0, %v2115_v49   ;;  %2644 = vrot.lane.b32.xlu1 %v4505_v8, %s4542_s26  ;;  %2635 = vrot.lane.b32.xlu0 %v4506_v9, %s4542_s26 }
 0x203   :  { %v7907_v48 = vld [vmem:[%s9186_s0 + $0x158] sm:$0xff]   ;;  %v7912_v49 = vld [vmem:[%s9186_s0 + $0x150] sm:$0xff]  }
 0x204   :  { %v2142_v16 = vpop.permute.xlu1 %2141   ;;  %v2133_v17 = vpop.permute.xlu0 %2132   ;;  %v4515_v8 = vld [vmem:[%s9186_s0 + $0xd8] sm:$0xff]   ;;  %v4516_v9 = vld [vmem:[%s9186_s0 + $0xd0] sm:$0xff]   ;;  %3476 = vst.msk [vmem:[%s9187_s1 + $0xa80] ss:$8 sm:$0xf] %vm3_vm0, %v7912_v49  }
 0x205   :  { %4092 = vst.msk [vmem:[%s9187_s1 + $0x245] ss:$8 sm:$0xf] %vm3_vm0, %v2142_v16   ;;  %4093 = vst.msk [vmem:[%s9187_s1 + $0x245] ss:$8 sm:$0xf0] %vm3_vm0, %v2142_v16  }
 0x206   :  { %4089 = vst.msk [vmem:[%s9187_s1 + $0x205] ss:$8 sm:$0xf] %vm3_vm0, %v2133_v17   ;;  %4090 = vst.msk [vmem:[%s9187_s1 + $0x205] ss:$8 sm:$0xf0] %vm3_vm0, %v2133_v17   ;;  %2662 = vrot.lane.b32.xlu1 %v4507_v32, %s4542_s26  ;;  %2653 = vrot.lane.b32.xlu0 %v4508_v33, %s4542_s26 }
 0x207   :  { %3477 = vst.msk [vmem:[%s9187_s1 + $0xa80] ss:$8 sm:$0xf0] %vm3_vm0, %v7912_v49   ;;  %3479 = vst.msk [vmem:[%s9187_s1 + $0xac0] ss:$8 sm:$0xf] %vm3_vm0, %v7907_v48  }
 0x208   :  { %v2160_v40 = vpop.permute.xlu1 %2159   ;;  %v2151_v41 = vpop.permute.xlu0 %2150   ;;  %3480 = vst.msk [vmem:[%s9187_s1 + $0xac0] ss:$8 sm:$0xf0] %vm3_vm0, %v7907_v48   ;;  %v7961_v32 = vld [vmem:[%s9186_s0 + $0x168] sm:$0xff]   ;;  %v7966_v33 = vld [vmem:[%s9186_s0 + $0x160] sm:$0xff]  }
 0x209   :  { %4098 = vst.msk [vmem:[%s9187_s1 + $0x2c5] ss:$8 sm:$0xf] %vm3_vm0, %v2160_v40   ;;  %4099 = vst.msk [vmem:[%s9187_s1 + $0x2c5] ss:$8 sm:$0xf0] %vm3_vm0, %v2160_v40  }
 0x20a   :  { %4095 = vst.msk [vmem:[%s9187_s1 + $0x285] ss:$8 sm:$0xf] %vm3_vm0, %v2151_v41   ;;  %4096 = vst.msk [vmem:[%s9187_s1 + $0x285] ss:$8 sm:$0xf0] %vm3_vm0, %v2151_v41   ;;  %2680 = vrot.lane.b32.xlu1 %v4509_v58, %s4542_s26  ;;  %2671 = vrot.lane.b32.xlu0 %v4510_v59, %s4542_s26 }
 0x20b   :  { %v4517_v40 = vld [vmem:[%s9186_s0 + $0xe8] sm:$0xff]   ;;  %v4518_v41 = vld [vmem:[%s9186_s0 + $0xe0] sm:$0xff]   ;;  %3482 = vst.msk [vmem:[%s9187_s1 + $0xb00] ss:$8 sm:$0xf] %vm3_vm0, %v7966_v33  }
 0x20c   :  { %v2178_v62 = vpop.permute.xlu1 %2177   ;;  %v2169_v63 = vpop.permute.xlu0 %2168   ;;  %3483 = vst.msk [vmem:[%s9187_s1 + $0xb00] ss:$8 sm:$0xf0] %vm3_vm0, %v7966_v33   ;;  %3485 = vst.msk [vmem:[%s9187_s1 + $0xb40] ss:$8 sm:$0xf] %vm3_vm0, %v7961_v32  }
 0x20d   :  { %4104 = vst.msk [vmem:[%s9187_s1 + $0x345] ss:$8 sm:$0xf] %vm3_vm0, %v2178_v62   ;;  %4105 = vst.msk [vmem:[%s9187_s1 + $0x345] ss:$8 sm:$0xf0] %vm3_vm0, %v2178_v62  }
 0x20e   :  { %4101 = vst.msk [vmem:[%s9187_s1 + $0x305] ss:$8 sm:$0xf] %vm3_vm0, %v2169_v63   ;;  %4102 = vst.msk [vmem:[%s9187_s1 + $0x305] ss:$8 sm:$0xf0] %vm3_vm0, %v2169_v63   ;;  %2698 = vrot.lane.b32.xlu1 %v4511_v54, %s4542_s26  ;;  %2689 = vrot.lane.b32.xlu0 %v4512_v55, %s4542_s26 }
 0x20f   :  { %3486 = vst.msk [vmem:[%s9187_s1 + $0xb40] ss:$8 sm:$0xf0] %vm3_vm0, %v7961_v32   ;;  %v8015_v62 = vld [vmem:[%s9186_s0 + $0x178] sm:$0xff]   ;;  %v8020_v63 = vld [vmem:[%s9186_s0 + $0x170] sm:$0xff]  }
 0x210   :  { %v2196_v0 = vpop.permute.xlu1 %2195   ;;  %v2187_v2 = vpop.permute.xlu0 %2186   ;;  %v4519_v54 = vld [vmem:[%s9186_s0 + $0xf8] sm:$0xff]   ;;  %v4520_v55 = vld [vmem:[%s9186_s0 + $0xf0] sm:$0xff]   ;;  %3488 = vst.msk [vmem:[%s9187_s1 + $0xb80] ss:$8 sm:$0xf] %vm3_vm0, %v8020_v63  }
 0x211   :  { %4110 = vst.msk [vmem:[%s9187_s1 + $0x3c5] ss:$8 sm:$0xf] %vm3_vm0, %v2196_v0   ;;  %4111 = vst.msk [vmem:[%s9187_s1 + $0x3c5] ss:$8 sm:$0xf0] %vm3_vm0, %v2196_v0  }
 0x212   :  { %4107 = vst.msk [vmem:[%s9187_s1 + $0x385] ss:$8 sm:$0xf] %vm3_vm0, %v2187_v2   ;;  %4108 = vst.msk [vmem:[%s9187_s1 + $0x385] ss:$8 sm:$0xf0] %vm3_vm0, %v2187_v2   ;;  %2716 = vrot.lane.b32.xlu1 %v4513_v38, %s4542_s26  ;;  %2707 = vrot.lane.b32.xlu0 %v4514_v39, %s4542_s26 }
 0x213   :  { %3489 = vst.msk [vmem:[%s9187_s1 + $0xb80] ss:$8 sm:$0xf0] %vm3_vm0, %v8020_v63   ;;  %3491 = vst.msk [vmem:[%s9187_s1 + $0xbc0] ss:$8 sm:$0xf] %vm3_vm0, %v8015_v62  }
 0x214   :  { %v2214_v56 = vpop.permute.xlu1 %2213   ;;  %v2205_v57 = vpop.permute.xlu0 %2204   ;;  %3492 = vst.msk [vmem:[%s9187_s1 + $0xbc0] ss:$8 sm:$0xf0] %vm3_vm0, %v8015_v62   ;;  %v4521_v38 = vld [vmem:[%s9186_s0 + $0x108] sm:$0xff]   ;;  %v4522_v39 = vld [vmem:[%s9186_s0 + $0x100] sm:$0xff]  }
 0x215   :  { %4116 = vst.msk [vmem:[%s9187_s1 + $0x445] ss:$8 sm:$0xf] %vm3_vm0, %v2214_v56   ;;  %4117 = vst.msk [vmem:[%s9187_s1 + $0x445] ss:$8 sm:$0xf0] %vm3_vm0, %v2214_v56  }
 0x216   :  { %4113 = vst.msk [vmem:[%s9187_s1 + $0x405] ss:$8 sm:$0xf] %vm3_vm0, %v2205_v57   ;;  %4114 = vst.msk [vmem:[%s9187_s1 + $0x405] ss:$8 sm:$0xf0] %vm3_vm0, %v2205_v57   ;;  %2734 = vrot.lane.b32.xlu1 %v4515_v8, %s4542_s26  ;;  %2725 = vrot.lane.b32.xlu0 %v4516_v9, %s4542_s26 }
 0x217   :  { %v4523_v8 = vld [vmem:[%s9186_s0 + $0x118] sm:$0xff]   ;;  %v4524_v9 = vld [vmem:[%s9186_s0 + $0x110] sm:$0xff]  }
 0x218   :  { %v2232_v16 = vpop.permute.xlu1 %2231   ;;  %v2223_v17 = vpop.permute.xlu0 %2222  }
 0x219   :  { %4122 = vst.msk [vmem:[%s9187_s1 + $0x4c5] ss:$8 sm:$0xf] %vm3_vm0, %v2232_v16   ;;  %4123 = vst.msk [vmem:[%s9187_s1 + $0x4c5] ss:$8 sm:$0xf0] %vm3_vm0, %v2232_v16  }
 0x21a   :  { %4119 = vst.msk [vmem:[%s9187_s1 + $0x485] ss:$8 sm:$0xf] %vm3_vm0, %v2223_v17   ;;  %4120 = vst.msk [vmem:[%s9187_s1 + $0x485] ss:$8 sm:$0xf0] %vm3_vm0, %v2223_v17   ;;  %2752 = vrot.lane.b32.xlu1 %v4517_v40, %s4542_s26  ;;  %2743 = vrot.lane.b32.xlu0 %v4518_v41, %s4542_s26 }
 0x21b   :  { %v4525_v40 = vld [vmem:[%s9186_s0 + $0x128] sm:$0xff]   ;;  %v4526_v41 = vld [vmem:[%s9186_s0 + $0x120] sm:$0xff]  }
 0x21c   :  { %v2250_v58 = vpop.permute.xlu1 %2249   ;;  %v2241_v59 = vpop.permute.xlu0 %2240  }
 0x21d   :  { %4128 = vst.msk [vmem:[%s9187_s1 + $0x545] ss:$8 sm:$0xf] %vm3_vm0, %v2250_v58   ;;  %4129 = vst.msk [vmem:[%s9187_s1 + $0x545] ss:$8 sm:$0xf0] %vm3_vm0, %v2250_v58  }
 0x21e   :  { %4125 = vst.msk [vmem:[%s9187_s1 + $0x505] ss:$8 sm:$0xf] %vm3_vm0, %v2241_v59   ;;  %4126 = vst.msk [vmem:[%s9187_s1 + $0x505] ss:$8 sm:$0xf0] %vm3_vm0, %v2241_v59   ;;  %2770 = vrot.lane.b32.xlu1 %v4519_v54, %s4542_s26  ;;  %2761 = vrot.lane.b32.xlu0 %v4520_v55, %s4542_s26 }
 0x21f   :  { %v4527_v54 = vld [vmem:[%s9186_s0 + $0x138] sm:$0xff]   ;;  %v4528_v55 = vld [vmem:[%s9186_s0 + $0x130] sm:$0xff]  }
 0x220   :  { %v2268_v0 = vpop.permute.xlu1 %2267   ;;  %v2259_v2 = vpop.permute.xlu0 %2258  }
 0x221   :  { %4134 = vst.msk [vmem:[%s9187_s1 + $0x5c5] ss:$8 sm:$0xf] %vm3_vm0, %v2268_v0   ;;  %4135 = vst.msk [vmem:[%s9187_s1 + $0x5c5] ss:$8 sm:$0xf0] %vm3_vm0, %v2268_v0  }
 0x222   :  { %4131 = vst.msk [vmem:[%s9187_s1 + $0x585] ss:$8 sm:$0xf] %vm3_vm0, %v2259_v2   ;;  %4132 = vst.msk [vmem:[%s9187_s1 + $0x585] ss:$8 sm:$0xf0] %vm3_vm0, %v2259_v2   ;;  %2788 = vrot.lane.b32.xlu1 %v4521_v38, %s4542_s26  ;;  %2779 = vrot.lane.b32.xlu0 %v4522_v39, %s4542_s26 }
 0x223   :  { %v4529_v38 = vld [vmem:[%s9186_s0 + $0x148] sm:$0xff]   ;;  %v4530_v39 = vld [vmem:[%s9186_s0 + $0x140] sm:$0xff]  }
 0x224   :  { %v2286_v56 = vpop.permute.xlu1 %2285   ;;  %v2277_v57 = vpop.permute.xlu0 %2276  }
 0x225   :  { %4140 = vst.msk [vmem:[%s9187_s1 + $0x645] ss:$8 sm:$0xf] %vm3_vm0, %v2286_v56   ;;  %4141 = vst.msk [vmem:[%s9187_s1 + $0x645] ss:$8 sm:$0xf0] %vm3_vm0, %v2286_v56  }
 0x226   :  { %4137 = vst.msk [vmem:[%s9187_s1 + $0x605] ss:$8 sm:$0xf] %vm3_vm0, %v2277_v57   ;;  %4138 = vst.msk [vmem:[%s9187_s1 + $0x605] ss:$8 sm:$0xf0] %vm3_vm0, %v2277_v57   ;;  %2806 = vrot.lane.b32.xlu1 %v4523_v8, %s4542_s26  ;;  %2797 = vrot.lane.b32.xlu0 %v4524_v9, %s4542_s26 }
 0x227   :  { %v4531_v8 = vld [vmem:[%s9186_s0 + $0x158] sm:$0xff]   ;;  %v4532_v9 = vld [vmem:[%s9186_s0 + $0x150] sm:$0xff]  }
 0x228   :  { %v2304_v16 = vpop.permute.xlu1 %2303   ;;  %v2295_v17 = vpop.permute.xlu0 %2294  }
 0x229   :  { %4146 = vst.msk [vmem:[%s9187_s1 + $0x6c5] ss:$8 sm:$0xf] %vm3_vm0, %v2304_v16   ;;  %4147 = vst.msk [vmem:[%s9187_s1 + $0x6c5] ss:$8 sm:$0xf0] %vm3_vm0, %v2304_v16  }
 0x22a   :  { %4143 = vst.msk [vmem:[%s9187_s1 + $0x685] ss:$8 sm:$0xf] %vm3_vm0, %v2295_v17   ;;  %4144 = vst.msk [vmem:[%s9187_s1 + $0x685] ss:$8 sm:$0xf0] %vm3_vm0, %v2295_v17   ;;  %2824 = vrot.lane.b32.xlu1 %v4525_v40, %s4542_s26  ;;  %2815 = vrot.lane.b32.xlu0 %v4526_v41, %s4542_s26 }
 0x22b   :  { %v4533_v40 = vld [vmem:[%s9186_s0 + $0x168] sm:$0xff]   ;;  %v4534_v41 = vld [vmem:[%s9186_s0 + $0x160] sm:$0xff]  }
 0x22c   :  { %v2322_v58 = vpop.permute.xlu1 %2321   ;;  %v2313_v59 = vpop.permute.xlu0 %2312  }
 0x22d   :  { %4152 = vst.msk [vmem:[%s9187_s1 + $0x745] ss:$8 sm:$0xf] %vm3_vm0, %v2322_v58   ;;  %4153 = vst.msk [vmem:[%s9187_s1 + $0x745] ss:$8 sm:$0xf0] %vm3_vm0, %v2322_v58  }
 0x22e   :  { %4149 = vst.msk [vmem:[%s9187_s1 + $0x705] ss:$8 sm:$0xf] %vm3_vm0, %v2313_v59   ;;  %4150 = vst.msk [vmem:[%s9187_s1 + $0x705] ss:$8 sm:$0xf0] %vm3_vm0, %v2313_v59   ;;  %2842 = vrot.lane.b32.xlu1 %v4527_v54, %s4542_s26  ;;  %2833 = vrot.lane.b32.xlu0 %v4528_v55, %s4542_s26 }
 0x22f   :  { %v4535_v54 = vld [vmem:[%s9186_s0 + $0x178] sm:$0xff]   ;;  %v4536_v55 = vld [vmem:[%s9186_s0 + $0x170] sm:$0xff]  }
 0x230   :  { %v2340_v0 = vpop.permute.xlu1 %2339   ;;  %v2331_v2 = vpop.permute.xlu0 %2330  }
 0x231   :  { %4158 = vst.msk [vmem:[%s9187_s1 + $0x7c5] ss:$8 sm:$0xf] %vm3_vm0, %v2340_v0   ;;  %4159 = vst.msk [vmem:[%s9187_s1 + $0x7c5] ss:$8 sm:$0xf0] %vm3_vm0, %v2340_v0  }
 0x232   :  { %4155 = vst.msk [vmem:[%s9187_s1 + $0x785] ss:$8 sm:$0xf] %vm3_vm0, %v2331_v2   ;;  %4156 = vst.msk [vmem:[%s9187_s1 + $0x785] ss:$8 sm:$0xf0] %vm3_vm0, %v2331_v2   ;;  %2860 = vrot.lane.b32.xlu1 %v4529_v38, %s4542_s26  ;;  %2851 = vrot.lane.b32.xlu0 %v4530_v39, %s4542_s26 }
 0x234   :  { %v2358_v56 = vpop.permute.xlu1 %2357   ;;  %v2349_v57 = vpop.permute.xlu0 %2348  }
 0x235   :  { %4164 = vst.msk [vmem:[%s9187_s1 + $0x845] ss:$8 sm:$0xf] %vm3_vm0, %v2358_v56   ;;  %4165 = vst.msk [vmem:[%s9187_s1 + $0x845] ss:$8 sm:$0xf0] %vm3_vm0, %v2358_v56  }
 0x236   :  { %4161 = vst.msk [vmem:[%s9187_s1 + $0x805] ss:$8 sm:$0xf] %vm3_vm0, %v2349_v57   ;;  %4162 = vst.msk [vmem:[%s9187_s1 + $0x805] ss:$8 sm:$0xf0] %vm3_vm0, %v2349_v57   ;;  %2878 = vrot.lane.b32.xlu1 %v4531_v8, %s4542_s26  ;;  %2869 = vrot.lane.b32.xlu0 %v4532_v9, %s4542_s26 }
 0x238   :  { %v2376_v16 = vpop.permute.xlu1 %2375   ;;  %v2367_v17 = vpop.permute.xlu0 %2366  }
 0x239   :  { %4170 = vst.msk [vmem:[%s9187_s1 + $0x8c5] ss:$8 sm:$0xf] %vm3_vm0, %v2376_v16   ;;  %4171 = vst.msk [vmem:[%s9187_s1 + $0x8c5] ss:$8 sm:$0xf0] %vm3_vm0, %v2376_v16  }
 0x23a   :  { %4167 = vst.msk [vmem:[%s9187_s1 + $0x885] ss:$8 sm:$0xf] %vm3_vm0, %v2367_v17   ;;  %4168 = vst.msk [vmem:[%s9187_s1 + $0x885] ss:$8 sm:$0xf0] %vm3_vm0, %v2367_v17   ;;  %2896 = vrot.lane.b32.xlu1 %v4533_v40, %s4542_s26  ;;  %2887 = vrot.lane.b32.xlu0 %v4534_v41, %s4542_s26 }
 0x23c   :  { %v2394_v58 = vpop.permute.xlu1 %2393   ;;  %v2385_v59 = vpop.permute.xlu0 %2384  }
 0x23d   :  { %4176 = vst.msk [vmem:[%s9187_s1 + $0x945] ss:$8 sm:$0xf] %vm3_vm0, %v2394_v58   ;;  %4177 = vst.msk [vmem:[%s9187_s1 + $0x945] ss:$8 sm:$0xf0] %vm3_vm0, %v2394_v58  }
 0x23e   :  { %4173 = vst.msk [vmem:[%s9187_s1 + $0x905] ss:$8 sm:$0xf] %vm3_vm0, %v2385_v59   ;;  %4174 = vst.msk [vmem:[%s9187_s1 + $0x905] ss:$8 sm:$0xf0] %vm3_vm0, %v2385_v59   ;;  %2914 = vrot.lane.b32.xlu1 %v4535_v54, %s4542_s26  ;;  %2905 = vrot.lane.b32.xlu0 %v4536_v55, %s4542_s26 }
 0x240   :  { %v2412_v0 = vpop.permute.xlu1 %2411   ;;  %v2403_v2 = vpop.permute.xlu0 %2402  }
 0x241   :  { %4182 = vst.msk [vmem:[%s9187_s1 + $0x9c5] ss:$8 sm:$0xf] %vm3_vm0, %v2412_v0   ;;  %4183 = vst.msk [vmem:[%s9187_s1 + $0x9c5] ss:$8 sm:$0xf0] %vm3_vm0, %v2412_v0  }
 0x242   :  { %4179 = vst.msk [vmem:[%s9187_s1 + $0x985] ss:$8 sm:$0xf] %vm3_vm0, %v2403_v2   ;;  %4180 = vst.msk [vmem:[%s9187_s1 + $0x985] ss:$8 sm:$0xf0] %vm3_vm0, %v2403_v2   ;;  %2931 = vrot.lane.b32.xlu1 %v6829_v44, %s4543_s28  ;;  %2922 = vrot.lane.b32.xlu0 %v6834_v45, %s4543_s28 }
 0x244   :  { %v2430_v44 = vpop.permute.xlu1 %2429   ;;  %v2421_v45 = vpop.permute.xlu0 %2420  }
 0x245   :  { %4188 = vst.msk [vmem:[%s9187_s1 + $0xa45] ss:$8 sm:$0xf] %vm3_vm0, %v2430_v44   ;;  %4189 = vst.msk [vmem:[%s9187_s1 + $0xa45] ss:$8 sm:$0xf0] %vm3_vm0, %v2430_v44  }
 0x246   :  { %4185 = vst.msk [vmem:[%s9187_s1 + $0xa05] ss:$8 sm:$0xf] %vm3_vm0, %v2421_v45   ;;  %4186 = vst.msk [vmem:[%s9187_s1 + $0xa05] ss:$8 sm:$0xf0] %vm3_vm0, %v2421_v45   ;;  %2949 = vrot.lane.b32.xlu1 %v6879_v60, %s4543_s28  ;;  %2940 = vrot.lane.b32.xlu0 %v6884_v61, %s4543_s28 }
 0x248   :  { %v2448_v60 = vpop.permute.xlu1 %2447   ;;  %v2439_v61 = vpop.permute.xlu0 %2438  }
 0x249   :  { %4194 = vst.msk [vmem:[%s9187_s1 + $0xac5] ss:$8 sm:$0xf] %vm3_vm0, %v2448_v60   ;;  %4195 = vst.msk [vmem:[%s9187_s1 + $0xac5] ss:$8 sm:$0xf0] %vm3_vm0, %v2448_v60  }
 0x24a   :  { %4191 = vst.msk [vmem:[%s9187_s1 + $0xa85] ss:$8 sm:$0xf] %vm3_vm0, %v2439_v61   ;;  %4192 = vst.msk [vmem:[%s9187_s1 + $0xa85] ss:$8 sm:$0xf0] %vm3_vm0, %v2439_v61   ;;  %2967 = vrot.lane.b32.xlu1 %v6929_v52, %s4543_s28  ;;  %2958 = vrot.lane.b32.xlu0 %v6934_v53, %s4543_s28 }
 0x24c   :  { %v2466_v52 = vpop.permute.xlu1 %2465   ;;  %v2457_v53 = vpop.permute.xlu0 %2456  }
 0x24d   :  { %4200 = vst.msk [vmem:[%s9187_s1 + $0xb45] ss:$8 sm:$0xf] %vm3_vm0, %v2466_v52   ;;  %4201 = vst.msk [vmem:[%s9187_s1 + $0xb45] ss:$8 sm:$0xf0] %vm3_vm0, %v2466_v52  }
 0x24e   :  { %4197 = vst.msk [vmem:[%s9187_s1 + $0xb05] ss:$8 sm:$0xf] %vm3_vm0, %v2457_v53   ;;  %4198 = vst.msk [vmem:[%s9187_s1 + $0xb05] ss:$8 sm:$0xf0] %vm3_vm0, %v2457_v53   ;;  %2985 = vrot.lane.b32.xlu1 %v6979_v4, %s4543_s28  ;;  %2976 = vrot.lane.b32.xlu0 %v6984_v5, %s4543_s28 }
 0x250   :  { %v2484_v4 = vpop.permute.xlu1 %2483   ;;  %v2475_v5 = vpop.permute.xlu0 %2474  }
 0x251   :  { %4206 = vst.msk [vmem:[%s9187_s1 + $0xbc5] ss:$8 sm:$0xf] %vm3_vm0, %v2484_v4   ;;  %4207 = vst.msk [vmem:[%s9187_s1 + $0xbc5] ss:$8 sm:$0xf0] %vm3_vm0, %v2484_v4  }
 0x252   :  { %4203 = vst.msk [vmem:[%s9187_s1 + $0xb85] ss:$8 sm:$0xf] %vm3_vm0, %v2475_v5   ;;  %4204 = vst.msk [vmem:[%s9187_s1 + $0xb85] ss:$8 sm:$0xf0] %vm3_vm0, %v2475_v5   ;;  %3003 = vrot.lane.b32.xlu1 %v7029_v12, %s4543_s28  ;;  %2994 = vrot.lane.b32.xlu0 %v7034_v13, %s4543_s28 }
 0x254   :  { %v2501_v12 = vpop.permute.xlu1 %2500   ;;  %v2492_v13 = vpop.permute.xlu0 %2491  }
 0x255   :  { %4211 = vst.msk [vmem:[%s9187_s1 + $0x46] ss:$8 sm:$0xf] %vm3_vm0, %v2501_v12   ;;  %4212 = vst.msk [vmem:[%s9187_s1 + $0x46] ss:$8 sm:$0xf0] %vm3_vm0, %v2501_v12  }
 0x256   :  { %4208 = vst.msk [vmem:[%s9187_s1 + $0x6] ss:$8 sm:$0xf] %vm3_vm0, %v2492_v13   ;;  %4209 = vst.msk [vmem:[%s9187_s1 + $0x6] ss:$8 sm:$0xf0] %vm3_vm0, %v2492_v13   ;;  %3021 = vrot.lane.b32.xlu1 %v7079_v20, %s4543_s28  ;;  %3012 = vrot.lane.b32.xlu0 %v7084_v21, %s4543_s28 }
 0x258   :  { %v2519_v20 = vpop.permute.xlu1 %2518   ;;  %v2510_v21 = vpop.permute.xlu0 %2509  }
 0x259   :  { %4217 = vst.msk [vmem:[%s9187_s1 + $0xc6] ss:$8 sm:$0xf] %vm3_vm0, %v2519_v20   ;;  %4218 = vst.msk [vmem:[%s9187_s1 + $0xc6] ss:$8 sm:$0xf0] %vm3_vm0, %v2519_v20  }
 0x25a   :  { %4214 = vst.msk [vmem:[%s9187_s1 + $0x86] ss:$8 sm:$0xf] %vm3_vm0, %v2510_v21   ;;  %4215 = vst.msk [vmem:[%s9187_s1 + $0x86] ss:$8 sm:$0xf0] %vm3_vm0, %v2510_v21   ;;  %3039 = vrot.lane.b32.xlu1 %v7129_v28, %s4543_s28  ;;  %3030 = vrot.lane.b32.xlu0 %v7134_v29, %s4543_s28 }
 0x25c   :  { %v2537_v28 = vpop.permute.xlu1 %2536   ;;  %v2528_v29 = vpop.permute.xlu0 %2527  }
 0x25d   :  { %4223 = vst.msk [vmem:[%s9187_s1 + $0x146] ss:$8 sm:$0xf] %vm3_vm0, %v2537_v28   ;;  %4224 = vst.msk [vmem:[%s9187_s1 + $0x146] ss:$8 sm:$0xf0] %vm3_vm0, %v2537_v28  }
 0x25e   :  { %4220 = vst.msk [vmem:[%s9187_s1 + $0x106] ss:$8 sm:$0xf] %vm3_vm0, %v2528_v29   ;;  %4221 = vst.msk [vmem:[%s9187_s1 + $0x106] ss:$8 sm:$0xf0] %vm3_vm0, %v2528_v29   ;;  %3057 = vrot.lane.b32.xlu1 %v7179_v36, %s4543_s28  ;;  %3048 = vrot.lane.b32.xlu0 %v7184_v37, %s4543_s28 }
 0x260   :  { %v2555_v36 = vpop.permute.xlu1 %2554   ;;  %v2546_v37 = vpop.permute.xlu0 %2545  }
 0x261   :  { %4229 = vst.msk [vmem:[%s9187_s1 + $0x1c6] ss:$8 sm:$0xf] %vm3_vm0, %v2555_v36   ;;  %4230 = vst.msk [vmem:[%s9187_s1 + $0x1c6] ss:$8 sm:$0xf0] %vm3_vm0, %v2555_v36  }
 0x262   :  { %4226 = vst.msk [vmem:[%s9187_s1 + $0x186] ss:$8 sm:$0xf] %vm3_vm0, %v2546_v37   ;;  %4227 = vst.msk [vmem:[%s9187_s1 + $0x186] ss:$8 sm:$0xf0] %vm3_vm0, %v2546_v37   ;;  %3075 = vrot.lane.b32.xlu1 %v7229_v6, %s4543_s28  ;;  %3066 = vrot.lane.b32.xlu0 %v7234_v7, %s4543_s28 }
 0x264   :  { %v2573_v6 = vpop.permute.xlu1 %2572   ;;  %v2564_v7 = vpop.permute.xlu0 %2563  }
 0x265   :  { %4235 = vst.msk [vmem:[%s9187_s1 + $0x246] ss:$8 sm:$0xf] %vm3_vm0, %v2573_v6   ;;  %4236 = vst.msk [vmem:[%s9187_s1 + $0x246] ss:$8 sm:$0xf0] %vm3_vm0, %v2573_v6  }
 0x266   :  { %4232 = vst.msk [vmem:[%s9187_s1 + $0x206] ss:$8 sm:$0xf] %vm3_vm0, %v2564_v7   ;;  %4233 = vst.msk [vmem:[%s9187_s1 + $0x206] ss:$8 sm:$0xf0] %vm3_vm0, %v2564_v7   ;;  %3093 = vrot.lane.b32.xlu1 %v7279_v10, %s4543_s28  ;;  %3084 = vrot.lane.b32.xlu0 %v7284_v11, %s4543_s28 }
 0x268   :  { %v2591_v10 = vpop.permute.xlu1 %2590   ;;  %v2582_v11 = vpop.permute.xlu0 %2581  }
 0x269   :  { %4241 = vst.msk [vmem:[%s9187_s1 + $0x2c6] ss:$8 sm:$0xf] %vm3_vm0, %v2591_v10   ;;  %4242 = vst.msk [vmem:[%s9187_s1 + $0x2c6] ss:$8 sm:$0xf0] %vm3_vm0, %v2591_v10  }
 0x26a   :  { %4238 = vst.msk [vmem:[%s9187_s1 + $0x286] ss:$8 sm:$0xf] %vm3_vm0, %v2582_v11   ;;  %4239 = vst.msk [vmem:[%s9187_s1 + $0x286] ss:$8 sm:$0xf0] %vm3_vm0, %v2582_v11   ;;  %3111 = vrot.lane.b32.xlu1 %v7329_v14, %s4543_s28  ;;  %3102 = vrot.lane.b32.xlu0 %v7334_v15, %s4543_s28 }
 0x26c   :  { %v2609_v14 = vpop.permute.xlu1 %2608   ;;  %v2600_v15 = vpop.permute.xlu0 %2599  }
 0x26d   :  { %4247 = vst.msk [vmem:[%s9187_s1 + $0x346] ss:$8 sm:$0xf] %vm3_vm0, %v2609_v14   ;;  %4248 = vst.msk [vmem:[%s9187_s1 + $0x346] ss:$8 sm:$0xf0] %vm3_vm0, %v2609_v14  }
 0x26e   :  { %4244 = vst.msk [vmem:[%s9187_s1 + $0x306] ss:$8 sm:$0xf] %vm3_vm0, %v2600_v15   ;;  %4245 = vst.msk [vmem:[%s9187_s1 + $0x306] ss:$8 sm:$0xf0] %vm3_vm0, %v2600_v15   ;;  %3129 = vrot.lane.b32.xlu1 %v7379_v18, %s4543_s28  ;;  %3120 = vrot.lane.b32.xlu0 %v7384_v19, %s4543_s28 }
 0x270   :  { %v2627_v18 = vpop.permute.xlu1 %2626   ;;  %v2618_v19 = vpop.permute.xlu0 %2617  }
 0x271   :  { %4253 = vst.msk [vmem:[%s9187_s1 + $0x3c6] ss:$8 sm:$0xf] %vm3_vm0, %v2627_v18   ;;  %4254 = vst.msk [vmem:[%s9187_s1 + $0x3c6] ss:$8 sm:$0xf0] %vm3_vm0, %v2627_v18  }
 0x272   :  { %4250 = vst.msk [vmem:[%s9187_s1 + $0x386] ss:$8 sm:$0xf] %vm3_vm0, %v2618_v19   ;;  %4251 = vst.msk [vmem:[%s9187_s1 + $0x386] ss:$8 sm:$0xf0] %vm3_vm0, %v2618_v19   ;;  %3147 = vrot.lane.b32.xlu1 %v7429_v22, %s4543_s28  ;;  %3138 = vrot.lane.b32.xlu0 %v7434_v23, %s4543_s28 }
 0x274   :  { %v2645_v22 = vpop.permute.xlu1 %2644   ;;  %v2636_v23 = vpop.permute.xlu0 %2635  }
 0x275   :  { %4259 = vst.msk [vmem:[%s9187_s1 + $0x446] ss:$8 sm:$0xf] %vm3_vm0, %v2645_v22   ;;  %4260 = vst.msk [vmem:[%s9187_s1 + $0x446] ss:$8 sm:$0xf0] %vm3_vm0, %v2645_v22  }
 0x276   :  { %4256 = vst.msk [vmem:[%s9187_s1 + $0x406] ss:$8 sm:$0xf] %vm3_vm0, %v2636_v23   ;;  %4257 = vst.msk [vmem:[%s9187_s1 + $0x406] ss:$8 sm:$0xf0] %vm3_vm0, %v2636_v23   ;;  %3165 = vrot.lane.b32.xlu1 %v7479_v26, %s4543_s28  ;;  %3156 = vrot.lane.b32.xlu0 %v7484_v27, %s4543_s28 }
 0x278   :  { %v2663_v26 = vpop.permute.xlu1 %2662   ;;  %v2654_v27 = vpop.permute.xlu0 %2653  }
 0x279   :  { %4265 = vst.msk [vmem:[%s9187_s1 + $0x4c6] ss:$8 sm:$0xf] %vm3_vm0, %v2663_v26   ;;  %4266 = vst.msk [vmem:[%s9187_s1 + $0x4c6] ss:$8 sm:$0xf0] %vm3_vm0, %v2663_v26  }
 0x27a   :  { %4262 = vst.msk [vmem:[%s9187_s1 + $0x486] ss:$8 sm:$0xf] %vm3_vm0, %v2654_v27   ;;  %4263 = vst.msk [vmem:[%s9187_s1 + $0x486] ss:$8 sm:$0xf0] %vm3_vm0, %v2654_v27   ;;  %3183 = vrot.lane.b32.xlu1 %v7529_v30, %s4543_s28  ;;  %3174 = vrot.lane.b32.xlu0 %v7534_v31, %s4543_s28 }
 0x27c   :  { %v2681_v30 = vpop.permute.xlu1 %2680   ;;  %v2672_v31 = vpop.permute.xlu0 %2671  }
 0x27d   :  { %4271 = vst.msk [vmem:[%s9187_s1 + $0x546] ss:$8 sm:$0xf] %vm3_vm0, %v2681_v30   ;;  %4272 = vst.msk [vmem:[%s9187_s1 + $0x546] ss:$8 sm:$0xf0] %vm3_vm0, %v2681_v30  }
 0x27e   :  { %4268 = vst.msk [vmem:[%s9187_s1 + $0x506] ss:$8 sm:$0xf] %vm3_vm0, %v2672_v31   ;;  %4269 = vst.msk [vmem:[%s9187_s1 + $0x506] ss:$8 sm:$0xf0] %vm3_vm0, %v2672_v31   ;;  %3201 = vrot.lane.b32.xlu1 %v7583_v42, %s4543_s28  ;;  %3192 = vrot.lane.b32.xlu0 %v7588_v43, %s4543_s28 }
 0x280   :  { %v2699_v42 = vpop.permute.xlu1 %2698   ;;  %v2690_v43 = vpop.permute.xlu0 %2689  }
 0x281   :  { %4277 = vst.msk [vmem:[%s9187_s1 + $0x5c6] ss:$8 sm:$0xf] %vm3_vm0, %v2699_v42   ;;  %4278 = vst.msk [vmem:[%s9187_s1 + $0x5c6] ss:$8 sm:$0xf0] %vm3_vm0, %v2699_v42  }
 0x282   :  { %4274 = vst.msk [vmem:[%s9187_s1 + $0x586] ss:$8 sm:$0xf] %vm3_vm0, %v2690_v43   ;;  %4275 = vst.msk [vmem:[%s9187_s1 + $0x586] ss:$8 sm:$0xf0] %vm3_vm0, %v2690_v43   ;;  %3219 = vrot.lane.b32.xlu1 %v7637_v1, %s4543_s28  ;;  %3210 = vrot.lane.b32.xlu0 %v7642_v3, %s4543_s28 }
 0x284   :  { %v2717_v1 = vpop.permute.xlu1 %2716   ;;  %v2708_v3 = vpop.permute.xlu0 %2707  }
 0x285   :  { %4283 = vst.msk [vmem:[%s9187_s1 + $0x646] ss:$8 sm:$0xf] %vm3_vm0, %v2717_v1   ;;  %4284 = vst.msk [vmem:[%s9187_s1 + $0x646] ss:$8 sm:$0xf0] %vm3_vm0, %v2717_v1  }
 0x286   :  { %4280 = vst.msk [vmem:[%s9187_s1 + $0x606] ss:$8 sm:$0xf] %vm3_vm0, %v2708_v3   ;;  %4281 = vst.msk [vmem:[%s9187_s1 + $0x606] ss:$8 sm:$0xf0] %vm3_vm0, %v2708_v3   ;;  %3237 = vrot.lane.b32.xlu1 %v7691_v24, %s4543_s28  ;;  %3228 = vrot.lane.b32.xlu0 %v7696_v25, %s4543_s28 }
 0x288   :  { %v2735_v24 = vpop.permute.xlu1 %2734   ;;  %v2726_v25 = vpop.permute.xlu0 %2725  }
 0x289   :  { %4289 = vst.msk [vmem:[%s9187_s1 + $0x6c6] ss:$8 sm:$0xf] %vm3_vm0, %v2735_v24   ;;  %4290 = vst.msk [vmem:[%s9187_s1 + $0x6c6] ss:$8 sm:$0xf0] %vm3_vm0, %v2735_v24  }
 0x28a   :  { %4286 = vst.msk [vmem:[%s9187_s1 + $0x686] ss:$8 sm:$0xf] %vm3_vm0, %v2726_v25   ;;  %4287 = vst.msk [vmem:[%s9187_s1 + $0x686] ss:$8 sm:$0xf0] %vm3_vm0, %v2726_v25   ;;  %3255 = vrot.lane.b32.xlu1 %v7745_v46, %s4543_s28  ;;  %3246 = vrot.lane.b32.xlu0 %v7750_v47, %s4543_s28 }
 0x28c   :  { %v2753_v46 = vpop.permute.xlu1 %2752   ;;  %v2744_v47 = vpop.permute.xlu0 %2743  }
 0x28d   :  { %4295 = vst.msk [vmem:[%s9187_s1 + $0x746] ss:$8 sm:$0xf] %vm3_vm0, %v2753_v46   ;;  %4296 = vst.msk [vmem:[%s9187_s1 + $0x746] ss:$8 sm:$0xf0] %vm3_vm0, %v2753_v46  }
 0x28e   :  { %4292 = vst.msk [vmem:[%s9187_s1 + $0x706] ss:$8 sm:$0xf] %vm3_vm0, %v2744_v47   ;;  %4293 = vst.msk [vmem:[%s9187_s1 + $0x706] ss:$8 sm:$0xf0] %vm3_vm0, %v2744_v47   ;;  %3273 = vrot.lane.b32.xlu1 %v7799_v50, %s4543_s28  ;;  %3264 = vrot.lane.b32.xlu0 %v7804_v51, %s4543_s28 }
 0x290   :  { %v2771_v50 = vpop.permute.xlu1 %2770   ;;  %v2762_v51 = vpop.permute.xlu0 %2761  }
 0x291   :  { %4301 = vst.msk [vmem:[%s9187_s1 + $0x7c6] ss:$8 sm:$0xf] %vm3_vm0, %v2771_v50   ;;  %4302 = vst.msk [vmem:[%s9187_s1 + $0x7c6] ss:$8 sm:$0xf0] %vm3_vm0, %v2771_v50  }
 0x292   :  { %4298 = vst.msk [vmem:[%s9187_s1 + $0x786] ss:$8 sm:$0xf] %vm3_vm0, %v2762_v51   ;;  %4299 = vst.msk [vmem:[%s9187_s1 + $0x786] ss:$8 sm:$0xf0] %vm3_vm0, %v2762_v51   ;;  %3291 = vrot.lane.b32.xlu1 %v7853_v34, %s4543_s28  ;;  %3282 = vrot.lane.b32.xlu0 %v7858_v35, %s4543_s28 }
 0x294   :  { %v2789_v34 = vpop.permute.xlu1 %2788   ;;  %v2780_v35 = vpop.permute.xlu0 %2779  }
 0x295   :  { %4307 = vst.msk [vmem:[%s9187_s1 + $0x846] ss:$8 sm:$0xf] %vm3_vm0, %v2789_v34   ;;  %4308 = vst.msk [vmem:[%s9187_s1 + $0x846] ss:$8 sm:$0xf0] %vm3_vm0, %v2789_v34  }
 0x296   :  { %4304 = vst.msk [vmem:[%s9187_s1 + $0x806] ss:$8 sm:$0xf] %vm3_vm0, %v2780_v35   ;;  %4305 = vst.msk [vmem:[%s9187_s1 + $0x806] ss:$8 sm:$0xf0] %vm3_vm0, %v2780_v35   ;;  %3309 = vrot.lane.b32.xlu1 %v7907_v48, %s4543_s28  ;;  %3300 = vrot.lane.b32.xlu0 %v7912_v49, %s4543_s28 }
 0x298   :  { %v2807_v48 = vpop.permute.xlu1 %2806   ;;  %v2798_v49 = vpop.permute.xlu0 %2797  }
 0x299   :  { %4313 = vst.msk [vmem:[%s9187_s1 + $0x8c6] ss:$8 sm:$0xf] %vm3_vm0, %v2807_v48   ;;  %4314 = vst.msk [vmem:[%s9187_s1 + $0x8c6] ss:$8 sm:$0xf0] %vm3_vm0, %v2807_v48  }
 0x29a   :  { %4310 = vst.msk [vmem:[%s9187_s1 + $0x886] ss:$8 sm:$0xf] %vm3_vm0, %v2798_v49   ;;  %4311 = vst.msk [vmem:[%s9187_s1 + $0x886] ss:$8 sm:$0xf0] %vm3_vm0, %v2798_v49   ;;  %3327 = vrot.lane.b32.xlu1 %v7961_v32, %s4543_s28  ;;  %3318 = vrot.lane.b32.xlu0 %v7966_v33, %s4543_s28 }
 0x29c   :  { %v2825_v32 = vpop.permute.xlu1 %2824   ;;  %v2816_v33 = vpop.permute.xlu0 %2815  }
 0x29d   :  { %4319 = vst.msk [vmem:[%s9187_s1 + $0x946] ss:$8 sm:$0xf] %vm3_vm0, %v2825_v32   ;;  %4320 = vst.msk [vmem:[%s9187_s1 + $0x946] ss:$8 sm:$0xf0] %vm3_vm0, %v2825_v32  }
 0x29e   :  { %4316 = vst.msk [vmem:[%s9187_s1 + $0x906] ss:$8 sm:$0xf] %vm3_vm0, %v2816_v33   ;;  %4317 = vst.msk [vmem:[%s9187_s1 + $0x906] ss:$8 sm:$0xf0] %vm3_vm0, %v2816_v33   ;;  %3345 = vrot.lane.b32.xlu1 %v8015_v62, %s4543_s28  ;;  %3336 = vrot.lane.b32.xlu0 %v8020_v63, %s4543_s28 }
 0x2a0   :  { %v2843_v62 = vpop.permute.xlu1 %2842   ;;  %v2834_v63 = vpop.permute.xlu0 %2833  }
 0x2a1   :  { %4325 = vst.msk [vmem:[%s9187_s1 + $0x9c6] ss:$8 sm:$0xf] %vm3_vm0, %v2843_v62   ;;  %4326 = vst.msk [vmem:[%s9187_s1 + $0x9c6] ss:$8 sm:$0xf0] %vm3_vm0, %v2843_v62  }
 0x2a2   :  { %4322 = vst.msk [vmem:[%s9187_s1 + $0x986] ss:$8 sm:$0xf] %vm3_vm0, %v2834_v63   ;;  %4323 = vst.msk [vmem:[%s9187_s1 + $0x986] ss:$8 sm:$0xf0] %vm3_vm0, %v2834_v63  }
 0x2a4   :  { %v2861_v38 = vpop.permute.xlu1 %2860   ;;  %v2852_v39 = vpop.permute.xlu0 %2851  }
 0x2a5   :  { %4331 = vst.msk [vmem:[%s9187_s1 + $0xa46] ss:$8 sm:$0xf] %vm3_vm0, %v2861_v38   ;;  %4332 = vst.msk [vmem:[%s9187_s1 + $0xa46] ss:$8 sm:$0xf0] %vm3_vm0, %v2861_v38  }
 0x2a6   :  { %4328 = vst.msk [vmem:[%s9187_s1 + $0xa06] ss:$8 sm:$0xf] %vm3_vm0, %v2852_v39   ;;  %4329 = vst.msk [vmem:[%s9187_s1 + $0xa06] ss:$8 sm:$0xf0] %vm3_vm0, %v2852_v39  }
 0x2a8   :  { %v2879_v56 = vpop.permute.xlu1 %2878   ;;  %v2870_v57 = vpop.permute.xlu0 %2869  }
 0x2a9   :  { %4337 = vst.msk [vmem:[%s9187_s1 + $0xac6] ss:$8 sm:$0xf] %vm3_vm0, %v2879_v56   ;;  %4338 = vst.msk [vmem:[%s9187_s1 + $0xac6] ss:$8 sm:$0xf0] %vm3_vm0, %v2879_v56  }
 0x2aa   :  { %4334 = vst.msk [vmem:[%s9187_s1 + $0xa86] ss:$8 sm:$0xf] %vm3_vm0, %v2870_v57   ;;  %4335 = vst.msk [vmem:[%s9187_s1 + $0xa86] ss:$8 sm:$0xf0] %vm3_vm0, %v2870_v57  }
 0x2ac   :  { %v2897_v8 = vpop.permute.xlu1 %2896   ;;  %v2888_v9 = vpop.permute.xlu0 %2887  }
 0x2ad   :  { %4343 = vst.msk [vmem:[%s9187_s1 + $0xb46] ss:$8 sm:$0xf] %vm3_vm0, %v2897_v8   ;;  %4344 = vst.msk [vmem:[%s9187_s1 + $0xb46] ss:$8 sm:$0xf0] %vm3_vm0, %v2897_v8  }
 0x2ae   :  { %4340 = vst.msk [vmem:[%s9187_s1 + $0xb06] ss:$8 sm:$0xf] %vm3_vm0, %v2888_v9   ;;  %4341 = vst.msk [vmem:[%s9187_s1 + $0xb06] ss:$8 sm:$0xf0] %vm3_vm0, %v2888_v9  }
 0x2b0   :  { %v2915_v16 = vpop.permute.xlu1 %2914   ;;  %v2906_v17 = vpop.permute.xlu0 %2905  }
 0x2b1   :  { %4349 = vst.msk [vmem:[%s9187_s1 + $0xbc6] ss:$8 sm:$0xf] %vm3_vm0, %v2915_v16   ;;  %4350 = vst.msk [vmem:[%s9187_s1 + $0xbc6] ss:$8 sm:$0xf0] %vm3_vm0, %v2915_v16  }
 0x2b2   :  { %4346 = vst.msk [vmem:[%s9187_s1 + $0xb86] ss:$8 sm:$0xf] %vm3_vm0, %v2906_v17   ;;  %4347 = vst.msk [vmem:[%s9187_s1 + $0xb86] ss:$8 sm:$0xf0] %vm3_vm0, %v2906_v17  }
 0x2b4   :  { %v2932_v40 = vpop.permute.xlu1 %2931   ;;  %v2923_v41 = vpop.permute.xlu0 %2922  }
 0x2b5   :  { %4354 = vst.msk [vmem:[%s9187_s1 + $0x47] ss:$8 sm:$0xf] %vm3_vm0, %v2932_v40   ;;  %4355 = vst.msk [vmem:[%s9187_s1 + $0x47] ss:$8 sm:$0xf0] %vm3_vm0, %v2932_v40  }
 0x2b6   :  { %4351 = vst.msk [vmem:[%s9187_s1 + $0x7] ss:$8 sm:$0xf] %vm3_vm0, %v2923_v41   ;;  %4352 = vst.msk [vmem:[%s9187_s1 + $0x7] ss:$8 sm:$0xf0] %vm3_vm0, %v2923_v41  }
 0x2b8   :  { %v2950_v58 = vpop.permute.xlu1 %2949   ;;  %v2941_v59 = vpop.permute.xlu0 %2940  }
 0x2b9   :  { %4360 = vst.msk [vmem:[%s9187_s1 + $0xc7] ss:$8 sm:$0xf] %vm3_vm0, %v2950_v58   ;;  %4361 = vst.msk [vmem:[%s9187_s1 + $0xc7] ss:$8 sm:$0xf0] %vm3_vm0, %v2950_v58  }
 0x2ba   :  { %4357 = vst.msk [vmem:[%s9187_s1 + $0x87] ss:$8 sm:$0xf] %vm3_vm0, %v2941_v59   ;;  %4358 = vst.msk [vmem:[%s9187_s1 + $0x87] ss:$8 sm:$0xf0] %vm3_vm0, %v2941_v59  }
 0x2bc   :  { %v2968_v54 = vpop.permute.xlu1 %2967   ;;  %v2959_v55 = vpop.permute.xlu0 %2958  }
 0x2bd   :  { %4366 = vst.msk [vmem:[%s9187_s1 + $0x147] ss:$8 sm:$0xf] %vm3_vm0, %v2968_v54   ;;  %4367 = vst.msk [vmem:[%s9187_s1 + $0x147] ss:$8 sm:$0xf0] %vm3_vm0, %v2968_v54  }
 0x2be   :  { %4363 = vst.msk [vmem:[%s9187_s1 + $0x107] ss:$8 sm:$0xf] %vm3_vm0, %v2959_v55   ;;  %4364 = vst.msk [vmem:[%s9187_s1 + $0x107] ss:$8 sm:$0xf0] %vm3_vm0, %v2959_v55  }
 0x2c0   :  { %v2986_v0 = vpop.permute.xlu1 %2985   ;;  %v2977_v2 = vpop.permute.xlu0 %2976  }
 0x2c1   :  { %4372 = vst.msk [vmem:[%s9187_s1 + $0x1c7] ss:$8 sm:$0xf] %vm3_vm0, %v2986_v0   ;;  %4373 = vst.msk [vmem:[%s9187_s1 + $0x1c7] ss:$8 sm:$0xf0] %vm3_vm0, %v2986_v0  }
 0x2c2   :  { %4369 = vst.msk [vmem:[%s9187_s1 + $0x187] ss:$8 sm:$0xf] %vm3_vm0, %v2977_v2   ;;  %4370 = vst.msk [vmem:[%s9187_s1 + $0x187] ss:$8 sm:$0xf0] %vm3_vm0, %v2977_v2  }
 0x2c4   :  { %v3004_v44 = vpop.permute.xlu1 %3003   ;;  %v2995_v45 = vpop.permute.xlu0 %2994  }
 0x2c5   :  { %4378 = vst.msk [vmem:[%s9187_s1 + $0x247] ss:$8 sm:$0xf] %vm3_vm0, %v3004_v44   ;;  %4379 = vst.msk [vmem:[%s9187_s1 + $0x247] ss:$8 sm:$0xf0] %vm3_vm0, %v3004_v44  }
 0x2c6   :  { %4375 = vst.msk [vmem:[%s9187_s1 + $0x207] ss:$8 sm:$0xf] %vm3_vm0, %v2995_v45   ;;  %4376 = vst.msk [vmem:[%s9187_s1 + $0x207] ss:$8 sm:$0xf0] %vm3_vm0, %v2995_v45  }
 0x2c8   :  { %v3022_v60 = vpop.permute.xlu1 %3021   ;;  %v3013_v61 = vpop.permute.xlu0 %3012  }
 0x2c9   :  { %4384 = vst.msk [vmem:[%s9187_s1 + $0x2c7] ss:$8 sm:$0xf] %vm3_vm0, %v3022_v60   ;;  %4385 = vst.msk [vmem:[%s9187_s1 + $0x2c7] ss:$8 sm:$0xf0] %vm3_vm0, %v3022_v60  }
 0x2ca   :  { %4381 = vst.msk [vmem:[%s9187_s1 + $0x287] ss:$8 sm:$0xf] %vm3_vm0, %v3013_v61   ;;  %4382 = vst.msk [vmem:[%s9187_s1 + $0x287] ss:$8 sm:$0xf0] %vm3_vm0, %v3013_v61  }
 0x2cc   :  { %v3040_v52 = vpop.permute.xlu1 %3039   ;;  %v3031_v53 = vpop.permute.xlu0 %3030  }
 0x2cd   :  { %4390 = vst.msk [vmem:[%s9187_s1 + $0x347] ss:$8 sm:$0xf] %vm3_vm0, %v3040_v52   ;;  %4391 = vst.msk [vmem:[%s9187_s1 + $0x347] ss:$8 sm:$0xf0] %vm3_vm0, %v3040_v52  }
 0x2ce   :  { %4387 = vst.msk [vmem:[%s9187_s1 + $0x307] ss:$8 sm:$0xf] %vm3_vm0, %v3031_v53   ;;  %4388 = vst.msk [vmem:[%s9187_s1 + $0x307] ss:$8 sm:$0xf0] %vm3_vm0, %v3031_v53  }
 0x2d0   :  { %v3058_v4 = vpop.permute.xlu1 %3057   ;;  %v3049_v5 = vpop.permute.xlu0 %3048  }
 0x2d1   :  { %4396 = vst.msk [vmem:[%s9187_s1 + $0x3c7] ss:$8 sm:$0xf] %vm3_vm0, %v3058_v4   ;;  %4397 = vst.msk [vmem:[%s9187_s1 + $0x3c7] ss:$8 sm:$0xf0] %vm3_vm0, %v3058_v4  }
 0x2d2   :  { %4393 = vst.msk [vmem:[%s9187_s1 + $0x387] ss:$8 sm:$0xf] %vm3_vm0, %v3049_v5   ;;  %4394 = vst.msk [vmem:[%s9187_s1 + $0x387] ss:$8 sm:$0xf0] %vm3_vm0, %v3049_v5  }
 0x2d4   :  { %v3076_v12 = vpop.permute.xlu1 %3075   ;;  %v3067_v13 = vpop.permute.xlu0 %3066  }
 0x2d5   :  { %4402 = vst.msk [vmem:[%s9187_s1 + $0x447] ss:$8 sm:$0xf] %vm3_vm0, %v3076_v12   ;;  %4403 = vst.msk [vmem:[%s9187_s1 + $0x447] ss:$8 sm:$0xf0] %vm3_vm0, %v3076_v12  }
 0x2d6   :  { %4399 = vst.msk [vmem:[%s9187_s1 + $0x407] ss:$8 sm:$0xf] %vm3_vm0, %v3067_v13   ;;  %4400 = vst.msk [vmem:[%s9187_s1 + $0x407] ss:$8 sm:$0xf0] %vm3_vm0, %v3067_v13  }
 0x2d8   :  { %v3094_v20 = vpop.permute.xlu1 %3093   ;;  %v3085_v21 = vpop.permute.xlu0 %3084  }
 0x2d9   :  { %4408 = vst.msk [vmem:[%s9187_s1 + $0x4c7] ss:$8 sm:$0xf] %vm3_vm0, %v3094_v20   ;;  %4409 = vst.msk [vmem:[%s9187_s1 + $0x4c7] ss:$8 sm:$0xf0] %vm3_vm0, %v3094_v20  }
 0x2da   :  { %4405 = vst.msk [vmem:[%s9187_s1 + $0x487] ss:$8 sm:$0xf] %vm3_vm0, %v3085_v21   ;;  %4406 = vst.msk [vmem:[%s9187_s1 + $0x487] ss:$8 sm:$0xf0] %vm3_vm0, %v3085_v21  }
 0x2dc   :  { %v3112_v28 = vpop.permute.xlu1 %3111   ;;  %v3103_v29 = vpop.permute.xlu0 %3102  }
 0x2dd   :  { %4414 = vst.msk [vmem:[%s9187_s1 + $0x547] ss:$8 sm:$0xf] %vm3_vm0, %v3112_v28   ;;  %4415 = vst.msk [vmem:[%s9187_s1 + $0x547] ss:$8 sm:$0xf0] %vm3_vm0, %v3112_v28  }
 0x2de   :  { %4411 = vst.msk [vmem:[%s9187_s1 + $0x507] ss:$8 sm:$0xf] %vm3_vm0, %v3103_v29   ;;  %4412 = vst.msk [vmem:[%s9187_s1 + $0x507] ss:$8 sm:$0xf0] %vm3_vm0, %v3103_v29  }
 0x2e0   :  { %v3130_v36 = vpop.permute.xlu1 %3129   ;;  %v3121_v37 = vpop.permute.xlu0 %3120  }
 0x2e1   :  { %4420 = vst.msk [vmem:[%s9187_s1 + $0x5c7] ss:$8 sm:$0xf] %vm3_vm0, %v3130_v36   ;;  %4421 = vst.msk [vmem:[%s9187_s1 + $0x5c7] ss:$8 sm:$0xf0] %vm3_vm0, %v3130_v36  }
 0x2e2   :  { %4417 = vst.msk [vmem:[%s9187_s1 + $0x587] ss:$8 sm:$0xf] %vm3_vm0, %v3121_v37   ;;  %4418 = vst.msk [vmem:[%s9187_s1 + $0x587] ss:$8 sm:$0xf0] %vm3_vm0, %v3121_v37  }
 0x2e4   :  { %v3148_v6 = vpop.permute.xlu1 %3147   ;;  %v3139_v7 = vpop.permute.xlu0 %3138  }
 0x2e5   :  { %4426 = vst.msk [vmem:[%s9187_s1 + $0x647] ss:$8 sm:$0xf] %vm3_vm0, %v3148_v6   ;;  %4427 = vst.msk [vmem:[%s9187_s1 + $0x647] ss:$8 sm:$0xf0] %vm3_vm0, %v3148_v6  }
 0x2e6   :  { %4423 = vst.msk [vmem:[%s9187_s1 + $0x607] ss:$8 sm:$0xf] %vm3_vm0, %v3139_v7   ;;  %4424 = vst.msk [vmem:[%s9187_s1 + $0x607] ss:$8 sm:$0xf0] %vm3_vm0, %v3139_v7  }
 0x2e8   :  { %v3166_v10 = vpop.permute.xlu1 %3165   ;;  %v3157_v11 = vpop.permute.xlu0 %3156  }
 0x2e9   :  { %4432 = vst.msk [vmem:[%s9187_s1 + $0x6c7] ss:$8 sm:$0xf] %vm3_vm0, %v3166_v10   ;;  %4433 = vst.msk [vmem:[%s9187_s1 + $0x6c7] ss:$8 sm:$0xf0] %vm3_vm0, %v3166_v10  }
 0x2ea   :  { %4429 = vst.msk [vmem:[%s9187_s1 + $0x687] ss:$8 sm:$0xf] %vm3_vm0, %v3157_v11   ;;  %4430 = vst.msk [vmem:[%s9187_s1 + $0x687] ss:$8 sm:$0xf0] %vm3_vm0, %v3157_v11  }
 0x2ec   :  { %v3184_v14 = vpop.permute.xlu1 %3183   ;;  %v3175_v15 = vpop.permute.xlu0 %3174  }
 0x2ed   :  { %4438 = vst.msk [vmem:[%s9187_s1 + $0x747] ss:$8 sm:$0xf] %vm3_vm0, %v3184_v14   ;;  %4439 = vst.msk [vmem:[%s9187_s1 + $0x747] ss:$8 sm:$0xf0] %vm3_vm0, %v3184_v14  }
 0x2ee   :  { %4435 = vst.msk [vmem:[%s9187_s1 + $0x707] ss:$8 sm:$0xf] %vm3_vm0, %v3175_v15   ;;  %4436 = vst.msk [vmem:[%s9187_s1 + $0x707] ss:$8 sm:$0xf0] %vm3_vm0, %v3175_v15  }
 0x2f0   :  { %v3202_v18 = vpop.permute.xlu1 %3201   ;;  %v3193_v19 = vpop.permute.xlu0 %3192  }
 0x2f1   :  { %4444 = vst.msk [vmem:[%s9187_s1 + $0x7c7] ss:$8 sm:$0xf] %vm3_vm0, %v3202_v18   ;;  %4445 = vst.msk [vmem:[%s9187_s1 + $0x7c7] ss:$8 sm:$0xf0] %vm3_vm0, %v3202_v18  }
 0x2f2   :  { %4441 = vst.msk [vmem:[%s9187_s1 + $0x787] ss:$8 sm:$0xf] %vm3_vm0, %v3193_v19   ;;  %4442 = vst.msk [vmem:[%s9187_s1 + $0x787] ss:$8 sm:$0xf0] %vm3_vm0, %v3193_v19  }
 0x2f4   :  { %v3220_v22 = vpop.permute.xlu1 %3219   ;;  %v3211_v23 = vpop.permute.xlu0 %3210  }
 0x2f5   :  { %4450 = vst.msk [vmem:[%s9187_s1 + $0x847] ss:$8 sm:$0xf] %vm3_vm0, %v3220_v22   ;;  %4451 = vst.msk [vmem:[%s9187_s1 + $0x847] ss:$8 sm:$0xf0] %vm3_vm0, %v3220_v22  }
 0x2f6   :  { %4447 = vst.msk [vmem:[%s9187_s1 + $0x807] ss:$8 sm:$0xf] %vm3_vm0, %v3211_v23   ;;  %4448 = vst.msk [vmem:[%s9187_s1 + $0x807] ss:$8 sm:$0xf0] %vm3_vm0, %v3211_v23  }
 0x2f8   :  { %v3238_v26 = vpop.permute.xlu1 %3237   ;;  %v3229_v27 = vpop.permute.xlu0 %3228  }
 0x2f9   :  { %4456 = vst.msk [vmem:[%s9187_s1 + $0x8c7] ss:$8 sm:$0xf] %vm3_vm0, %v3238_v26   ;;  %4457 = vst.msk [vmem:[%s9187_s1 + $0x8c7] ss:$8 sm:$0xf0] %vm3_vm0, %v3238_v26  }
 0x2fa   :  { %4453 = vst.msk [vmem:[%s9187_s1 + $0x887] ss:$8 sm:$0xf] %vm3_vm0, %v3229_v27   ;;  %4454 = vst.msk [vmem:[%s9187_s1 + $0x887] ss:$8 sm:$0xf0] %vm3_vm0, %v3229_v27  }
 0x2fc   :  { %v3256_v30 = vpop.permute.xlu1 %3255   ;;  %v3247_v31 = vpop.permute.xlu0 %3246  }
 0x2fd   :  { %4462 = vst.msk [vmem:[%s9187_s1 + $0x947] ss:$8 sm:$0xf] %vm3_vm0, %v3256_v30   ;;  %4463 = vst.msk [vmem:[%s9187_s1 + $0x947] ss:$8 sm:$0xf0] %vm3_vm0, %v3256_v30  }
 0x2fe   :  { %4459 = vst.msk [vmem:[%s9187_s1 + $0x907] ss:$8 sm:$0xf] %vm3_vm0, %v3247_v31   ;;  %4460 = vst.msk [vmem:[%s9187_s1 + $0x907] ss:$8 sm:$0xf0] %vm3_vm0, %v3247_v31  }
 0x300   :  { %v3274_v42 = vpop.permute.xlu1 %3273   ;;  %v3265_v43 = vpop.permute.xlu0 %3264  }
 0x301   :  { %4468 = vst.msk [vmem:[%s9187_s1 + $0x9c7] ss:$8 sm:$0xf] %vm3_vm0, %v3274_v42   ;;  %4469 = vst.msk [vmem:[%s9187_s1 + $0x9c7] ss:$8 sm:$0xf0] %vm3_vm0, %v3274_v42  }
 0x302   :  { %4465 = vst.msk [vmem:[%s9187_s1 + $0x987] ss:$8 sm:$0xf] %vm3_vm0, %v3265_v43   ;;  %4466 = vst.msk [vmem:[%s9187_s1 + $0x987] ss:$8 sm:$0xf0] %vm3_vm0, %v3265_v43  }
 0x304   :  { %v3292_v1 = vpop.permute.xlu1 %3291   ;;  %v3283_v3 = vpop.permute.xlu0 %3282  }
 0x305   :  { %4474 = vst.msk [vmem:[%s9187_s1 + $0xa47] ss:$8 sm:$0xf] %vm3_vm0, %v3292_v1   ;;  %4475 = vst.msk [vmem:[%s9187_s1 + $0xa47] ss:$8 sm:$0xf0] %vm3_vm0, %v3292_v1  }
 0x306   :  { %4471 = vst.msk [vmem:[%s9187_s1 + $0xa07] ss:$8 sm:$0xf] %vm3_vm0, %v3283_v3   ;;  %4472 = vst.msk [vmem:[%s9187_s1 + $0xa07] ss:$8 sm:$0xf0] %vm3_vm0, %v3283_v3  }
 0x308   :  { %v3310_v24 = vpop.permute.xlu1 %3309   ;;  %v3301_v25 = vpop.permute.xlu0 %3300  }
 0x309   :  { %4480 = vst.msk [vmem:[%s9187_s1 + $0xac7] ss:$8 sm:$0xf] %vm3_vm0, %v3310_v24   ;;  %4481 = vst.msk [vmem:[%s9187_s1 + $0xac7] ss:$8 sm:$0xf0] %vm3_vm0, %v3310_v24  }
 0x30a   :  { %4477 = vst.msk [vmem:[%s9187_s1 + $0xa87] ss:$8 sm:$0xf] %vm3_vm0, %v3301_v25   ;;  %4478 = vst.msk [vmem:[%s9187_s1 + $0xa87] ss:$8 sm:$0xf0] %vm3_vm0, %v3301_v25  }
 0x30c   :  { %v3328_v46 = vpop.permute.xlu1 %3327   ;;  %v3319_v47 = vpop.permute.xlu0 %3318  }
 0x30d   :  { %4486 = vst.msk [vmem:[%s9187_s1 + $0xb47] ss:$8 sm:$0xf] %vm3_vm0, %v3328_v46   ;;  %4487 = vst.msk [vmem:[%s9187_s1 + $0xb47] ss:$8 sm:$0xf0] %vm3_vm0, %v3328_v46  }
 0x30e   :  { %4483 = vst.msk [vmem:[%s9187_s1 + $0xb07] ss:$8 sm:$0xf] %vm3_vm0, %v3319_v47   ;;  %4484 = vst.msk [vmem:[%s9187_s1 + $0xb07] ss:$8 sm:$0xf0] %vm3_vm0, %v3319_v47  }
 0x310   :  { %v3346_v50 = vpop.permute.xlu1 %3345   ;;  %v3337_v51 = vpop.permute.xlu0 %3336  }
 0x311   :  { %4492 = vst.msk [vmem:[%s9187_s1 + $0xbc7] ss:$8 sm:$0xf] %vm3_vm0, %v3346_v50   ;;  %4493 = vst.msk [vmem:[%s9187_s1 + $0xbc7] ss:$8 sm:$0xf0] %vm3_vm0, %v3346_v50  }
 0x312   :  { %4489 = vst.msk [vmem:[%s9187_s1 + $0xb87] ss:$8 sm:$0xf] %vm3_vm0, %v3337_v51   ;;  %4490 = vst.msk [vmem:[%s9187_s1 + $0xb87] ss:$8 sm:$0xf0] %vm3_vm0, %v3337_v51  }

// kernel: squeeze.4
= control target key start
LH: loop header
LB: loop body
LE: loop exit
PB: predicated region body
PF: predicated region fallthrough
CT: control target
= control target key end

     0   :  { %vm3_vm0 = vcmask 130048   ;;  %s5272_s12 = smov 112   ;;  %s5274_s19 = smov 80   ;;  %s7478_s0 = inlined_call_operand.vmem [shape: f32[2,3,1,64,64], index: 0, kind: input, shape index: {}]   ;;  %s7479_s1 = inlined_call_operand.vmem [shape: f32[2,3,4,16,4,16], index: 1, kind: output, shape index: {}]  }
   0x1   :  { %v5288_v0 = vld [vmem:[%s7478_s0 + $0x10] sm:$0xff]   ;;  %v5293_v1 = vld [vmem:[%s7478_s0] sm:$0xff]   ;;  %v5298_v2 = vld [vmem:[%s7478_s0 + $0x18] sm:$0xff]  }
   0x2   :  { %354 = vrot.lane.b32.xlu1 %v5288_v0, %s5272_s12  ;;  %336 = vrot.lane.b32.xlu0 %v5293_v1, %s5272_s12  ;;  %v5307_v3 = vld [vmem:[%s7478_s0 + $0x8] sm:$0xff]   ;;  %4 = vst.msk [vmem:[#allocation0] ss:$8 sm:$0xf] %vm3_vm0, %v5293_v1   ;;  %v5329_v5 = vld [vmem:[%s7478_s0 + $0x20] sm:$0xff]  }
   0x3   :  { %v5312_v4 = vld [vmem:[%s7478_s0 + $0x28] sm:$0xff]   ;;  %5 = vst.msk [vmem:[#allocation0] ss:$8 sm:$0xf0] %vm3_vm0, %v5293_v1   ;;  %v5334_v6 = vld [vmem:[%s7478_s0 + $0x38] sm:$0xff]   ;;  %v5339_v7 = vld [vmem:[%s7478_s0 + $0x30] sm:$0xff]  }
   0x4   :  { %24 = vst.msk [vmem:[#allocation0 + $0xc0] ss:$8 sm:$0xf] %vm3_vm0, %v5298_v2   ;;  %26 = vst.msk [vmem:[#allocation0 + $0xc0] ss:$8 sm:$0xf0] %vm3_vm0, %v5298_v2  }
   0x5   :  { %17 = vst.msk [vmem:[#allocation0 + $0x80] ss:$8 sm:$0xf] %vm3_vm0, %v5288_v0   ;;  %19 = vst.msk [vmem:[#allocation0 + $0x80] ss:$8 sm:$0xf0] %vm3_vm0, %v5288_v0  }
   0x6   :  { %10 = vst.msk [vmem:[#allocation0 + $0x40] ss:$8 sm:$0xf] %vm3_vm0, %v5307_v3   ;;  %12 = vst.msk [vmem:[#allocation0 + $0x40] ss:$8 sm:$0xf0] %vm3_vm0, %v5307_v3   ;;  %363 = vrot.lane.b32.xlu1 %v5298_v2, %s5272_s12  ;;  %345 = vrot.lane.b32.xlu0 %v5307_v3, %s5272_s12 }
   0x7   :  { %38 = vst.msk [vmem:[#allocation0 + $0x140] ss:$8 sm:$0xf] %vm3_vm0, %v5312_v4   ;;  %40 = vst.msk [vmem:[#allocation0 + $0x140] ss:$8 sm:$0xf0] %vm3_vm0, %v5312_v4  }
   0x8   :  { %v5352_v8 = vld [vmem:[%s7478_s0 + $0x48] sm:$0xff]   ;;  %v5357_v9 = vld [vmem:[%s7478_s0 + $0x40] sm:$0xff]   ;;  %v5362_v10 = vld [vmem:[%s7478_s0 + $0x58] sm:$0xff]   ;;  %31 = vst.msk [vmem:[#allocation0 + $0x100] ss:$8 sm:$0xf] %vm3_vm0, %v5329_v5  }
   0x9   :  { %33 = vst.msk [vmem:[#allocation0 + $0x100] ss:$8 sm:$0xf0] %vm3_vm0, %v5329_v5   ;;  %52 = vst.msk [vmem:[#allocation0 + $0x1c0] ss:$8 sm:$0xf] %vm3_vm0, %v5334_v6  }
   0xa   :  { %54 = vst.msk [vmem:[#allocation0 + $0x1c0] ss:$8 sm:$0xf0] %vm3_vm0, %v5334_v6   ;;  %45 = vst.msk [vmem:[#allocation0 + $0x180] ss:$8 sm:$0xf] %vm3_vm0, %v5339_v7   ;;  %381 = vrot.lane.b32.xlu1 %v5312_v4, %s5272_s12  ;;  %372 = vrot.lane.b32.xlu0 %v5329_v5, %s5272_s12 }
   0xb   :  { %47 = vst.msk [vmem:[#allocation0 + $0x180] ss:$8 sm:$0xf0] %vm3_vm0, %v5339_v7   ;;  %v5379_v11 = vld [vmem:[%s7478_s0 + $0x50] sm:$0xff]   ;;  %v5384_v12 = vld [vmem:[%s7478_s0 + $0x68] sm:$0xff]   ;;  %v5389_v13 = vld [vmem:[%s7478_s0 + $0x60] sm:$0xff]  }
   0xc   :  { %66 = vst.msk [vmem:[#allocation0 + $0x240] ss:$8 sm:$0xf] %vm3_vm0, %v5352_v8   ;;  %68 = vst.msk [vmem:[#allocation0 + $0x240] ss:$8 sm:$0xf0] %vm3_vm0, %v5352_v8  }
   0xd   :  { %59 = vst.msk [vmem:[#allocation0 + $0x200] ss:$8 sm:$0xf] %vm3_vm0, %v5357_v9   ;;  %61 = vst.msk [vmem:[#allocation0 + $0x200] ss:$8 sm:$0xf0] %vm3_vm0, %v5357_v9  }
   0xe   :  { %80 = vst.msk [vmem:[#allocation0 + $0x2c0] ss:$8 sm:$0xf] %vm3_vm0, %v5362_v10   ;;  %82 = vst.msk [vmem:[#allocation0 + $0x2c0] ss:$8 sm:$0xf0] %vm3_vm0, %v5362_v10   ;;  %399 = vrot.lane.b32.xlu1 %v5334_v6, %s5272_s12  ;;  %390 = vrot.lane.b32.xlu0 %v5339_v7, %s5272_s12 }
   0xf   :  { %v5410_v14 = vld [vmem:[%s7478_s0 + $0x78] sm:$0xff]   ;;  %73 = vst.msk [vmem:[#allocation0 + $0x280] ss:$8 sm:$0xf] %vm3_vm0, %v5379_v11   ;;  %v5451_v15 = vld [vmem:[%s7478_s0 + $0x70] sm:$0xff]   ;;  %v5460_v16 = vld [vmem:[%s7478_s0 + $0x88] sm:$0xff]  }
  0x10   :  { %75 = vst.msk [vmem:[#allocation0 + $0x280] ss:$8 sm:$0xf0] %vm3_vm0, %v5379_v11   ;;  %94 = vst.msk [vmem:[#allocation0 + $0x340] ss:$8 sm:$0xf] %vm3_vm0, %v5384_v12  }
  0x11   :  { %96 = vst.msk [vmem:[#allocation0 + $0x340] ss:$8 sm:$0xf0] %vm3_vm0, %v5384_v12   ;;  %87 = vst.msk [vmem:[#allocation0 + $0x300] ss:$8 sm:$0xf] %vm3_vm0, %v5389_v13  }
  0x12   :  { %89 = vst.msk [vmem:[#allocation0 + $0x300] ss:$8 sm:$0xf0] %vm3_vm0, %v5389_v13   ;;  %110 = vst.msk [vmem:[#allocation0 + $0x3c0] ss:$8 sm:$0xf0] %vm3_vm0, %v5410_v14   ;;  %417 = vrot.lane.b32.xlu1 %v5352_v8, %s5272_s12  ;;  %408 = vrot.lane.b32.xlu0 %v5357_v9, %s5272_s12 }
  0x13   :  { %108 = vst.msk [vmem:[#allocation0 + $0x3c0] ss:$8 sm:$0xf] %vm3_vm0, %v5410_v14   ;;  %v5465_v17 = vld [vmem:[%s7478_s0 + $0x80] sm:$0xff]   ;;  %v5474_v18 = vld [vmem:[%s7478_s0 + $0x98] sm:$0xff]   ;;  %v5479_v19 = vld [vmem:[%s7478_s0 + $0x90] sm:$0xff]  }
  0x14   :  { %v5488_v20 = vld [vmem:[%s7478_s0 + $0xa8] sm:$0xff]   ;;  %v5493_v21 = vld [vmem:[%s7478_s0 + $0xa0] sm:$0xff]   ;;  %v5502_v22 = vld [vmem:[%s7478_s0 + $0xb8] sm:$0xff]  }
  0x15   :  { %v5507_v23 = vld [vmem:[%s7478_s0 + $0xb0] sm:$0xff]   ;;  %v5516_v24 = vld [vmem:[%s7478_s0 + $0xc8] sm:$0xff]   ;;  %v5521_v25 = vld [vmem:[%s7478_s0 + $0xc0] sm:$0xff]  }
  0x16   :  { %435 = vrot.lane.b32.xlu1 %v5362_v10, %s5272_s12  ;;  %426 = vrot.lane.b32.xlu0 %v5379_v11, %s5272_s12  ;;  %v5530_v26 = vld [vmem:[%s7478_s0 + $0xd8] sm:$0xff]   ;;  %v5535_v27 = vld [vmem:[%s7478_s0 + $0xd0] sm:$0xff]  }
  0x17   :  { %v5544_v28 = vld [vmem:[%s7478_s0 + $0xe8] sm:$0xff]   ;;  %v5549_v29 = vld [vmem:[%s7478_s0 + $0xe0] sm:$0xff]   ;;  %v5558_v30 = vld [vmem:[%s7478_s0 + $0xf8] sm:$0xff]  }
  0x18   :  { %v5563_v31 = vld [vmem:[%s7478_s0 + $0xf0] sm:$0xff]   ;;  %v5572_v32 = vld [vmem:[%s7478_s0 + $0x108] sm:$0xff]   ;;  %v5577_v33 = vld [vmem:[%s7478_s0 + $0x100] sm:$0xff]  }
  0x19   :  { %v5586_v34 = vld [vmem:[%s7478_s0 + $0x118] sm:$0xff]   ;;  %v5591_v35 = vld [vmem:[%s7478_s0 + $0x110] sm:$0xff]   ;;  %v5600_v36 = vld [vmem:[%s7478_s0 + $0x128] sm:$0xff]  }
  0x1a   :  { %453 = vrot.lane.b32.xlu1 %v5384_v12, %s5272_s12  ;;  %444 = vrot.lane.b32.xlu0 %v5389_v13, %s5272_s12  ;;  %v5605_v37 = vld [vmem:[%s7478_s0 + $0x120] sm:$0xff]   ;;  %v5614_v38 = vld [vmem:[%s7478_s0 + $0x138] sm:$0xff]  }
  0x1b   :  { %v5619_v39 = vld [vmem:[%s7478_s0 + $0x130] sm:$0xff]   ;;  %v5628_v40 = vld [vmem:[%s7478_s0 + $0x148] sm:$0xff]   ;;  %v5633_v41 = vld [vmem:[%s7478_s0 + $0x140] sm:$0xff]  }
  0x1c   :  { %v5642_v42 = vld [vmem:[%s7478_s0 + $0x158] sm:$0xff]   ;;  %v5647_v43 = vld [vmem:[%s7478_s0 + $0x150] sm:$0xff]   ;;  %v5656_v44 = vld [vmem:[%s7478_s0 + $0x168] sm:$0xff]  }
  0x1d   :  { %v5661_v45 = vld [vmem:[%s7478_s0 + $0x160] sm:$0xff]   ;;  %v5670_v46 = vld [vmem:[%s7478_s0 + $0x178] sm:$0xff]   ;;  %v5675_v47 = vld [vmem:[%s7478_s0 + $0x170] sm:$0xff]  }
  0x1e   :  { %471 = vrot.lane.b32.xlu1 %v5410_v14, %s5272_s12  ;;  %462 = vrot.lane.b32.xlu0 %v5451_v15, %s5272_s12 }
  0x22   :  { %489 = vrot.lane.b32.xlu1 %v5460_v16, %s5272_s12  ;;  %480 = vrot.lane.b32.xlu0 %v5465_v17, %s5272_s12 }
  0x26   :  { %507 = vrot.lane.b32.xlu1 %v5474_v18, %s5272_s12  ;;  %498 = vrot.lane.b32.xlu0 %v5479_v19, %s5272_s12 }
  0x2a   :  { %525 = vrot.lane.b32.xlu1 %v5488_v20, %s5272_s12  ;;  %516 = vrot.lane.b32.xlu0 %v5493_v21, %s5272_s12 }
  0x2e   :  { %543 = vrot.lane.b32.xlu1 %v5502_v22, %s5272_s12  ;;  %534 = vrot.lane.b32.xlu0 %v5507_v23, %s5272_s12 }
  0x32   :  { %561 = vrot.lane.b32.xlu1 %v5516_v24, %s5272_s12  ;;  %552 = vrot.lane.b32.xlu0 %v5521_v25, %s5272_s12 }
  0x36   :  { %579 = vrot.lane.b32.xlu1 %v5530_v26, %s5272_s12  ;;  %570 = vrot.lane.b32.xlu0 %v5535_v27, %s5272_s12 }
  0x3a   :  { %597 = vrot.lane.b32.xlu1 %v5544_v28, %s5272_s12  ;;  %588 = vrot.lane.b32.xlu0 %v5549_v29, %s5272_s12 }
  0x3e   :  { %615 = vrot.lane.b32.xlu1 %v5558_v30, %s5272_s12  ;;  %606 = vrot.lane.b32.xlu0 %v5563_v31, %s5272_s12 }
  0x42   :  { %633 = vrot.lane.b32.xlu1 %v5572_v32, %s5272_s12  ;;  %624 = vrot.lane.b32.xlu0 %v5577_v33, %s5272_s12 }
  0x46   :  { %651 = vrot.lane.b32.xlu1 %v5586_v34, %s5272_s12  ;;  %642 = vrot.lane.b32.xlu0 %v5591_v35, %s5272_s12 }
  0x4a   :  { %669 = vrot.lane.b32.xlu1 %v5600_v36, %s5272_s12  ;;  %660 = vrot.lane.b32.xlu0 %v5605_v37, %s5272_s12 }
  0x4e   :  { %687 = vrot.lane.b32.xlu1 %v5614_v38, %s5272_s12  ;;  %678 = vrot.lane.b32.xlu0 %v5619_v39, %s5272_s12 }
  0x52   :  { %705 = vrot.lane.b32.xlu1 %v5628_v40, %s5272_s12  ;;  %696 = vrot.lane.b32.xlu0 %v5633_v41, %s5272_s12 }
  0x56   :  { %723 = vrot.lane.b32.xlu1 %v5642_v42, %s5272_s12  ;;  %714 = vrot.lane.b32.xlu0 %v5647_v43, %s5272_s12 }
  0x5a   :  { %741 = vrot.lane.b32.xlu1 %v5656_v44, %s5272_s12  ;;  %732 = vrot.lane.b32.xlu0 %v5661_v45, %s5272_s12 }
  0x5e   :  { %759 = vrot.lane.b32.xlu1 %v5670_v46, %s5272_s12  ;;  %750 = vrot.lane.b32.xlu0 %v5675_v47, %s5272_s12  ;;  %s5273_s12 = smov 96  }
  0x62   :  { %776 = vrot.lane.b32.xlu1 %v5307_v3, %s5273_s12  ;;  %767 = vrot.lane.b32.xlu0 %v5293_v1, %s5273_s12 }
  0x66   :  { %794 = vrot.lane.b32.xlu1 %v5298_v2, %s5273_s12  ;;  %785 = vrot.lane.b32.xlu0 %v5288_v0, %s5273_s12 }
  0x6a   :  { %812 = vrot.lane.b32.xlu1 %v5312_v4, %s5273_s12  ;;  %803 = vrot.lane.b32.xlu0 %v5329_v5, %s5273_s12 }
  0x6e   :  { %830 = vrot.lane.b32.xlu1 %v5334_v6, %s5273_s12  ;;  %821 = vrot.lane.b32.xlu0 %v5339_v7, %s5273_s12 }
  0x72   :  { %848 = vrot.lane.b32.xlu1 %v5352_v8, %s5273_s12  ;;  %839 = vrot.lane.b32.xlu0 %v5357_v9, %s5273_s12 }
  0x74   :  { %v355_v48 = vpop.permute.xlu1 %354   ;;  %v337_v49 = vpop.permute.xlu0 %336  }
  0x75   :  { %358 = vst.msk [vmem:[#allocation0 + $0x81] ss:$8 sm:$0xf] %vm3_vm0, %v355_v48   ;;  %360 = vst.msk [vmem:[#allocation0 + $0x81] ss:$8 sm:$0xf0] %vm3_vm0, %v355_v48  }
  0x76   :  { %340 = vst.msk [vmem:[#allocation0 + $0x1] ss:$8 sm:$0xf] %vm3_vm0, %v337_v49   ;;  %342 = vst.msk [vmem:[#allocation0 + $0x1] ss:$8 sm:$0xf0] %vm3_vm0, %v337_v49   ;;  %866 = vrot.lane.b32.xlu1 %v5362_v10, %s5273_s12  ;;  %857 = vrot.lane.b32.xlu0 %v5379_v11, %s5273_s12 }
  0x78   :  { %v364_v50 = vpop.permute.xlu1 %363   ;;  %v346_v51 = vpop.permute.xlu0 %345  }
  0x79   :  { %367 = vst.msk [vmem:[#allocation0 + $0xc1] ss:$8 sm:$0xf] %vm3_vm0, %v364_v50   ;;  %369 = vst.msk [vmem:[#allocation0 + $0xc1] ss:$8 sm:$0xf0] %vm3_vm0, %v364_v50  }
  0x7a   :  { %349 = vst.msk [vmem:[#allocation0 + $0x41] ss:$8 sm:$0xf] %vm3_vm0, %v346_v51   ;;  %351 = vst.msk [vmem:[#allocation0 + $0x41] ss:$8 sm:$0xf0] %vm3_vm0, %v346_v51   ;;  %884 = vrot.lane.b32.xlu1 %v5384_v12, %s5273_s12  ;;  %875 = vrot.lane.b32.xlu0 %v5389_v13, %s5273_s12 }
  0x7c   :  { %v382_v52 = vpop.permute.xlu1 %381   ;;  %v373_v53 = vpop.permute.xlu0 %372  }
  0x7d   :  { %385 = vst.msk [vmem:[#allocation0 + $0x141] ss:$8 sm:$0xf] %vm3_vm0, %v382_v52   ;;  %387 = vst.msk [vmem:[#allocation0 + $0x141] ss:$8 sm:$0xf0] %vm3_vm0, %v382_v52  }
  0x7e   :  { %376 = vst.msk [vmem:[#allocation0 + $0x101] ss:$8 sm:$0xf] %vm3_vm0, %v373_v53   ;;  %378 = vst.msk [vmem:[#allocation0 + $0x101] ss:$8 sm:$0xf0] %vm3_vm0, %v373_v53   ;;  %902 = vrot.lane.b32.xlu1 %v5410_v14, %s5273_s12  ;;  %893 = vrot.lane.b32.xlu0 %v5451_v15, %s5273_s12 }
  0x80   :  { %v400_v54 = vpop.permute.xlu1 %399   ;;  %v391_v55 = vpop.permute.xlu0 %390  }
  0x81   :  { %403 = vst.msk [vmem:[#allocation0 + $0x1c1] ss:$8 sm:$0xf] %vm3_vm0, %v400_v54   ;;  %405 = vst.msk [vmem:[#allocation0 + $0x1c1] ss:$8 sm:$0xf0] %vm3_vm0, %v400_v54  }
  0x82   :  { %394 = vst.msk [vmem:[#allocation0 + $0x181] ss:$8 sm:$0xf] %vm3_vm0, %v391_v55   ;;  %396 = vst.msk [vmem:[#allocation0 + $0x181] ss:$8 sm:$0xf0] %vm3_vm0, %v391_v55   ;;  %920 = vrot.lane.b32.xlu1 %v5460_v16, %s5273_s12  ;;  %911 = vrot.lane.b32.xlu0 %v5465_v17, %s5273_s12 }
  0x84   :  { %v418_v56 = vpop.permute.xlu1 %417   ;;  %v409_v57 = vpop.permute.xlu0 %408  }
  0x85   :  { %421 = vst.msk [vmem:[#allocation0 + $0x241] ss:$8 sm:$0xf] %vm3_vm0, %v418_v56   ;;  %423 = vst.msk [vmem:[#allocation0 + $0x241] ss:$8 sm:$0xf0] %vm3_vm0, %v418_v56  }
  0x86   :  { %412 = vst.msk [vmem:[#allocation0 + $0x201] ss:$8 sm:$0xf] %vm3_vm0, %v409_v57   ;;  %414 = vst.msk [vmem:[#allocation0 + $0x201] ss:$8 sm:$0xf0] %vm3_vm0, %v409_v57   ;;  %938 = vrot.lane.b32.xlu1 %v5474_v18, %s5273_s12  ;;  %929 = vrot.lane.b32.xlu0 %v5479_v19, %s5273_s12 }
  0x88   :  { %v436_v58 = vpop.permute.xlu1 %435   ;;  %v427_v59 = vpop.permute.xlu0 %426  }
  0x89   :  { %439 = vst.msk [vmem:[#allocation0 + $0x2c1] ss:$8 sm:$0xf] %vm3_vm0, %v436_v58   ;;  %441 = vst.msk [vmem:[#allocation0 + $0x2c1] ss:$8 sm:$0xf0] %vm3_vm0, %v436_v58  }
  0x8a   :  { %430 = vst.msk [vmem:[#allocation0 + $0x281] ss:$8 sm:$0xf] %vm3_vm0, %v427_v59   ;;  %432 = vst.msk [vmem:[#allocation0 + $0x281] ss:$8 sm:$0xf0] %vm3_vm0, %v427_v59   ;;  %956 = vrot.lane.b32.xlu1 %v5488_v20, %s5273_s12  ;;  %947 = vrot.lane.b32.xlu0 %v5493_v21, %s5273_s12 }
  0x8c   :  { %v454_v60 = vpop.permute.xlu1 %453   ;;  %v445_v61 = vpop.permute.xlu0 %444  }
  0x8d   :  { %457 = vst.msk [vmem:[#allocation0 + $0x341] ss:$8 sm:$0xf] %vm3_vm0, %v454_v60   ;;  %459 = vst.msk [vmem:[#allocation0 + $0x341] ss:$8 sm:$0xf0] %vm3_vm0, %v454_v60  }
  0x8e   :  { %448 = vst.msk [vmem:[#allocation0 + $0x301] ss:$8 sm:$0xf] %vm3_vm0, %v445_v61   ;;  %450 = vst.msk [vmem:[#allocation0 + $0x301] ss:$8 sm:$0xf0] %vm3_vm0, %v445_v61   ;;  %974 = vrot.lane.b32.xlu1 %v5502_v22, %s5273_s12  ;;  %965 = vrot.lane.b32.xlu0 %v5507_v23, %s5273_s12 }
  0x90   :  { %v472_v62 = vpop.permute.xlu1 %471   ;;  %v463_v63 = vpop.permute.xlu0 %462  }
  0x91   :  { %475 = vst.msk [vmem:[#allocation0 + $0x3c1] ss:$8 sm:$0xf] %vm3_vm0, %v472_v62   ;;  %477 = vst.msk [vmem:[#allocation0 + $0x3c1] ss:$8 sm:$0xf0] %vm3_vm0, %v472_v62  }
  0x92   :  { %466 = vst.msk [vmem:[#allocation0 + $0x381] ss:$8 sm:$0xf] %vm3_vm0, %v463_v63   ;;  %468 = vst.msk [vmem:[#allocation0 + $0x381] ss:$8 sm:$0xf0] %vm3_vm0, %v463_v63   ;;  %992 = vrot.lane.b32.xlu1 %v5516_v24, %s5273_s12  ;;  %983 = vrot.lane.b32.xlu0 %v5521_v25, %s5273_s12 }
  0x94   :  { %v490_v48 = vpop.permute.xlu1 %489   ;;  %v481_v49 = vpop.permute.xlu0 %480  }
  0x95   :  { %493 = vst.msk [vmem:[#allocation0 + $0x441] ss:$8 sm:$0xf] %vm3_vm0, %v490_v48   ;;  %495 = vst.msk [vmem:[#allocation0 + $0x441] ss:$8 sm:$0xf0] %vm3_vm0, %v490_v48  }
  0x96   :  { %484 = vst.msk [vmem:[#allocation0 + $0x401] ss:$8 sm:$0xf] %vm3_vm0, %v481_v49   ;;  %486 = vst.msk [vmem:[#allocation0 + $0x401] ss:$8 sm:$0xf0] %vm3_vm0, %v481_v49   ;;  %1010 = vrot.lane.b32.xlu1 %v5530_v26, %s5273_s12  ;;  %1001 = vrot.lane.b32.xlu0 %v5535_v27, %s5273_s12 }
  0x98   :  { %v508_v50 = vpop.permute.xlu1 %507   ;;  %v499_v51 = vpop.permute.xlu0 %498  }
  0x99   :  { %511 = vst.msk [vmem:[#allocation0 + $0x4c1] ss:$8 sm:$0xf] %vm3_vm0, %v508_v50   ;;  %513 = vst.msk [vmem:[#allocation0 + $0x4c1] ss:$8 sm:$0xf0] %vm3_vm0, %v508_v50  }
  0x9a   :  { %502 = vst.msk [vmem:[#allocation0 + $0x481] ss:$8 sm:$0xf] %vm3_vm0, %v499_v51   ;;  %504 = vst.msk [vmem:[#allocation0 + $0x481] ss:$8 sm:$0xf0] %vm3_vm0, %v499_v51   ;;  %1028 = vrot.lane.b32.xlu1 %v5544_v28, %s5273_s12  ;;  %1019 = vrot.lane.b32.xlu0 %v5549_v29, %s5273_s12 }
  0x9c   :  { %v526_v52 = vpop.permute.xlu1 %525   ;;  %v517_v53 = vpop.permute.xlu0 %516  }
  0x9d   :  { %529 = vst.msk [vmem:[#allocation0 + $0x541] ss:$8 sm:$0xf] %vm3_vm0, %v526_v52   ;;  %531 = vst.msk [vmem:[#allocation0 + $0x541] ss:$8 sm:$0xf0] %vm3_vm0, %v526_v52  }
  0x9e   :  { %520 = vst.msk [vmem:[#allocation0 + $0x501] ss:$8 sm:$0xf] %vm3_vm0, %v517_v53   ;;  %522 = vst.msk [vmem:[#allocation0 + $0x501] ss:$8 sm:$0xf0] %vm3_vm0, %v517_v53   ;;  %1046 = vrot.lane.b32.xlu1 %v5558_v30, %s5273_s12  ;;  %1037 = vrot.lane.b32.xlu0 %v5563_v31, %s5273_s12 }
  0xa0   :  { %v544_v54 = vpop.permute.xlu1 %543   ;;  %v535_v55 = vpop.permute.xlu0 %534  }
  0xa1   :  { %547 = vst.msk [vmem:[#allocation0 + $0x5c1] ss:$8 sm:$0xf] %vm3_vm0, %v544_v54   ;;  %549 = vst.msk [vmem:[#allocation0 + $0x5c1] ss:$8 sm:$0xf0] %vm3_vm0, %v544_v54  }
  0xa2   :  { %538 = vst.msk [vmem:[#allocation0 + $0x581] ss:$8 sm:$0xf] %vm3_vm0, %v535_v55   ;;  %540 = vst.msk [vmem:[#allocation0 + $0x581] ss:$8 sm:$0xf0] %vm3_vm0, %v535_v55   ;;  %1064 = vrot.lane.b32.xlu1 %v5572_v32, %s5273_s12  ;;  %1055 = vrot.lane.b32.xlu0 %v5577_v33, %s5273_s12 }
  0xa4   :  { %v562_v56 = vpop.permute.xlu1 %561   ;;  %v553_v57 = vpop.permute.xlu0 %552  }
  0xa5   :  { %565 = vst.msk [vmem:[#allocation0 + $0x641] ss:$8 sm:$0xf] %vm3_vm0, %v562_v56   ;;  %567 = vst.msk [vmem:[#allocation0 + $0x641] ss:$8 sm:$0xf0] %vm3_vm0, %v562_v56  }
  0xa6   :  { %556 = vst.msk [vmem:[#allocation0 + $0x601] ss:$8 sm:$0xf] %vm3_vm0, %v553_v57   ;;  %558 = vst.msk [vmem:[#allocation0 + $0x601] ss:$8 sm:$0xf0] %vm3_vm0, %v553_v57   ;;  %1082 = vrot.lane.b32.xlu1 %v5586_v34, %s5273_s12  ;;  %1073 = vrot.lane.b32.xlu0 %v5591_v35, %s5273_s12 }
  0xa7   :  { %v4711_v56 = vld [vmem:[%s7478_s0 + $0x70] sm:$0xff]  }
  0xa8   :  { %v580_v58 = vpop.permute.xlu1 %579   ;;  %v571_v59 = vpop.permute.xlu0 %570   ;;  %101 = vst.msk [vmem:[#allocation0 + $0x380] ss:$8 sm:$0xf] %vm3_vm0, %v4711_v56   ;;  %103 = vst.msk [vmem:[#allocation0 + $0x380] ss:$8 sm:$0xf0] %vm3_vm0, %v4711_v56  }
  0xa9   :  { %583 = vst.msk [vmem:[#allocation0 + $0x6c1] ss:$8 sm:$0xf] %vm3_vm0, %v580_v58   ;;  %585 = vst.msk [vmem:[#allocation0 + $0x6c1] ss:$8 sm:$0xf0] %vm3_vm0, %v580_v58  }
  0xaa   :  { %574 = vst.msk [vmem:[#allocation0 + $0x681] ss:$8 sm:$0xf] %vm3_vm0, %v571_v59   ;;  %576 = vst.msk [vmem:[#allocation0 + $0x681] ss:$8 sm:$0xf0] %vm3_vm0, %v571_v59   ;;  %1100 = vrot.lane.b32.xlu1 %v5600_v36, %s5273_s12  ;;  %1091 = vrot.lane.b32.xlu0 %v5605_v37, %s5273_s12 }
  0xab   :  { %v4739_v56 = vld [vmem:[%s7478_s0 + $0x150] sm:$0xff]  }
  0xac   :  { %v598_v60 = vpop.permute.xlu1 %597   ;;  %v589_v61 = vpop.permute.xlu0 %588   ;;  %297 = vst.msk [vmem:[#allocation0 + $0xa80] ss:$8 sm:$0xf] %vm3_vm0, %v4739_v56   ;;  %299 = vst.msk [vmem:[#allocation0 + $0xa80] ss:$8 sm:$0xf0] %vm3_vm0, %v4739_v56  }
  0xad   :  { %601 = vst.msk [vmem:[#allocation0 + $0x741] ss:$8 sm:$0xf] %vm3_vm0, %v598_v60   ;;  %603 = vst.msk [vmem:[#allocation0 + $0x741] ss:$8 sm:$0xf0] %vm3_vm0, %v598_v60  }
  0xae   :  { %592 = vst.msk [vmem:[#allocation0 + $0x701] ss:$8 sm:$0xf] %vm3_vm0, %v589_v61   ;;  %594 = vst.msk [vmem:[#allocation0 + $0x701] ss:$8 sm:$0xf0] %vm3_vm0, %v589_v61   ;;  %1118 = vrot.lane.b32.xlu1 %v5614_v38, %s5273_s12  ;;  %1109 = vrot.lane.b32.xlu0 %v5619_v39, %s5273_s12 }
  0xaf   :  { %v4718_v61 = vld [vmem:[%s7478_s0 + $0xa8] sm:$0xff]  }
  0xb0   :  { %v616_v62 = vpop.permute.xlu1 %615   ;;  %v607_v63 = vpop.permute.xlu0 %606   ;;  %150 = vst.msk [vmem:[#allocation0 + $0x540] ss:$8 sm:$0xf] %vm3_vm0, %v4718_v61   ;;  %152 = vst.msk [vmem:[#allocation0 + $0x540] ss:$8 sm:$0xf0] %vm3_vm0, %v4718_v61  }
  0xb1   :  { %619 = vst.msk [vmem:[#allocation0 + $0x7c1] ss:$8 sm:$0xf] %vm3_vm0, %v616_v62   ;;  %621 = vst.msk [vmem:[#allocation0 + $0x7c1] ss:$8 sm:$0xf0] %vm3_vm0, %v616_v62  }
  0xb2   :  { %610 = vst.msk [vmem:[#allocation0 + $0x781] ss:$8 sm:$0xf] %vm3_vm0, %v607_v63   ;;  %612 = vst.msk [vmem:[#allocation0 + $0x781] ss:$8 sm:$0xf0] %vm3_vm0, %v607_v63   ;;  %1136 = vrot.lane.b32.xlu1 %v5628_v40, %s5273_s12  ;;  %1127 = vrot.lane.b32.xlu0 %v5633_v41, %s5273_s12 }
  0xb3   :  { %v4717_v62 = vld [vmem:[%s7478_s0 + $0xa0] sm:$0xff]  }
  0xb4   :  { %v634_v48 = vpop.permute.xlu1 %633   ;;  %v625_v49 = vpop.permute.xlu0 %624   ;;  %143 = vst.msk [vmem:[#allocation0 + $0x500] ss:$8 sm:$0xf] %vm3_vm0, %v4717_v62   ;;  %145 = vst.msk [vmem:[#allocation0 + $0x500] ss:$8 sm:$0xf0] %vm3_vm0, %v4717_v62  }
  0xb5   :  { %637 = vst.msk [vmem:[#allocation0 + $0x841] ss:$8 sm:$0xf] %vm3_vm0, %v634_v48   ;;  %639 = vst.msk [vmem:[#allocation0 + $0x841] ss:$8 sm:$0xf0] %vm3_vm0, %v634_v48  }
  0xb6   :  { %628 = vst.msk [vmem:[#allocation0 + $0x801] ss:$8 sm:$0xf] %vm3_vm0, %v625_v49   ;;  %630 = vst.msk [vmem:[#allocation0 + $0x801] ss:$8 sm:$0xf0] %vm3_vm0, %v625_v49   ;;  %1154 = vrot.lane.b32.xlu1 %v5642_v42, %s5273_s12  ;;  %1145 = vrot.lane.b32.xlu0 %v5647_v43, %s5273_s12 }
  0xb8   :  { %v652_v50 = vpop.permute.xlu1 %651   ;;  %v643_v51 = vpop.permute.xlu0 %642  }
  0xb9   :  { %655 = vst.msk [vmem:[#allocation0 + $0x8c1] ss:$8 sm:$0xf] %vm3_vm0, %v652_v50   ;;  %657 = vst.msk [vmem:[#allocation0 + $0x8c1] ss:$8 sm:$0xf0] %vm3_vm0, %v652_v50  }
  0xba   :  { %646 = vst.msk [vmem:[#allocation0 + $0x881] ss:$8 sm:$0xf] %vm3_vm0, %v643_v51   ;;  %648 = vst.msk [vmem:[#allocation0 + $0x881] ss:$8 sm:$0xf0] %vm3_vm0, %v643_v51   ;;  %1172 = vrot.lane.b32.xlu1 %v5656_v44, %s5273_s12  ;;  %1163 = vrot.lane.b32.xlu0 %v5661_v45, %s5273_s12 }
  0xbb   :  { %v4724_v51 = vld [vmem:[%s7478_s0 + $0xd8] sm:$0xff]  }
  0xbc   :  { %v670_v52 = vpop.permute.xlu1 %669   ;;  %v661_v53 = vpop.permute.xlu0 %660   ;;  %192 = vst.msk [vmem:[#allocation0 + $0x6c0] ss:$8 sm:$0xf] %vm3_vm0, %v4724_v51   ;;  %194 = vst.msk [vmem:[#allocation0 + $0x6c0] ss:$8 sm:$0xf0] %vm3_vm0, %v4724_v51  }
  0xbd   :  { %673 = vst.msk [vmem:[#allocation0 + $0x941] ss:$8 sm:$0xf] %vm3_vm0, %v670_v52   ;;  %675 = vst.msk [vmem:[#allocation0 + $0x941] ss:$8 sm:$0xf0] %vm3_vm0, %v670_v52  }
  0xbe   :  { %664 = vst.msk [vmem:[#allocation0 + $0x901] ss:$8 sm:$0xf] %vm3_vm0, %v661_v53   ;;  %666 = vst.msk [vmem:[#allocation0 + $0x901] ss:$8 sm:$0xf0] %vm3_vm0, %v661_v53   ;;  %1190 = vrot.lane.b32.xlu1 %v5670_v46, %s5273_s12  ;;  %1181 = vrot.lane.b32.xlu0 %v5675_v47, %s5273_s12 }
  0xbf   :  { %v4723_v52 = vld [vmem:[%s7478_s0 + $0xd0] sm:$0xff]  }
  0xc0   :  { %v688_v54 = vpop.permute.xlu1 %687   ;;  %v679_v55 = vpop.permute.xlu0 %678   ;;  %185 = vst.msk [vmem:[#allocation0 + $0x680] ss:$8 sm:$0xf] %vm3_vm0, %v4723_v52   ;;  %187 = vst.msk [vmem:[#allocation0 + $0x680] ss:$8 sm:$0xf0] %vm3_vm0, %v4723_v52  }
  0xc1   :  { %691 = vst.msk [vmem:[#allocation0 + $0x9c1] ss:$8 sm:$0xf] %vm3_vm0, %v688_v54   ;;  %693 = vst.msk [vmem:[#allocation0 + $0x9c1] ss:$8 sm:$0xf0] %vm3_vm0, %v688_v54  }
  0xc2   :  { %682 = vst.msk [vmem:[#allocation0 + $0x981] ss:$8 sm:$0xf] %vm3_vm0, %v679_v55   ;;  %684 = vst.msk [vmem:[#allocation0 + $0x981] ss:$8 sm:$0xf0] %vm3_vm0, %v679_v55   ;;  %1207 = vrot.lane.b32.xlu1 %v5307_v3, %s5274_s19  ;;  %1198 = vrot.lane.b32.xlu0 %v5293_v1, %s5274_s19 }
  0xc4   :  { %v706_v1 = vpop.permute.xlu1 %705   ;;  %v697_v3 = vpop.permute.xlu0 %696  }
  0xc5   :  { %709 = vst.msk [vmem:[#allocation0 + $0xa41] ss:$8 sm:$0xf] %vm3_vm0, %v706_v1   ;;  %711 = vst.msk [vmem:[#allocation0 + $0xa41] ss:$8 sm:$0xf0] %vm3_vm0, %v706_v1  }
  0xc6   :  { %700 = vst.msk [vmem:[#allocation0 + $0xa01] ss:$8 sm:$0xf] %vm3_vm0, %v697_v3   ;;  %702 = vst.msk [vmem:[#allocation0 + $0xa01] ss:$8 sm:$0xf0] %vm3_vm0, %v697_v3   ;;  %1225 = vrot.lane.b32.xlu1 %v5298_v2, %s5274_s19  ;;  %1216 = vrot.lane.b32.xlu0 %v5288_v0, %s5274_s19 }
  0xc7   :  { %v4730_v3 = vld [vmem:[%s7478_s0 + $0x108] sm:$0xff]  }
  0xc8   :  { %v724_v0 = vpop.permute.xlu1 %723   ;;  %v715_v2 = vpop.permute.xlu0 %714   ;;  %234 = vst.msk [vmem:[#allocation0 + $0x840] ss:$8 sm:$0xf] %vm3_vm0, %v4730_v3   ;;  %236 = vst.msk [vmem:[#allocation0 + $0x840] ss:$8 sm:$0xf0] %vm3_vm0, %v4730_v3  }
  0xc9   :  { %727 = vst.msk [vmem:[#allocation0 + $0xac1] ss:$8 sm:$0xf] %vm3_vm0, %v724_v0   ;;  %729 = vst.msk [vmem:[#allocation0 + $0xac1] ss:$8 sm:$0xf0] %vm3_vm0, %v724_v0  }
  0xca   :  { %718 = vst.msk [vmem:[#allocation0 + $0xa81] ss:$8 sm:$0xf] %vm3_vm0, %v715_v2   ;;  %720 = vst.msk [vmem:[#allocation0 + $0xa81] ss:$8 sm:$0xf0] %vm3_vm0, %v715_v2   ;;  %1243 = vrot.lane.b32.xlu1 %v5312_v4, %s5274_s19  ;;  %1234 = vrot.lane.b32.xlu0 %v5329_v5, %s5274_s19 }
  0xcb   :  { %v4729_v0 = vld [vmem:[%s7478_s0 + $0x100] sm:$0xff]  }
  0xcc   :  { %v742_v4 = vpop.permute.xlu1 %741   ;;  %v733_v5 = vpop.permute.xlu0 %732   ;;  %227 = vst.msk [vmem:[#allocation0 + $0x800] ss:$8 sm:$0xf] %vm3_vm0, %v4729_v0   ;;  %229 = vst.msk [vmem:[#allocation0 + $0x800] ss:$8 sm:$0xf0] %vm3_vm0, %v4729_v0  }
  0xcd   :  { %745 = vst.msk [vmem:[#allocation0 + $0xb41] ss:$8 sm:$0xf] %vm3_vm0, %v742_v4   ;;  %747 = vst.msk [vmem:[#allocation0 + $0xb41] ss:$8 sm:$0xf0] %vm3_vm0, %v742_v4  }
  0xce   :  { %736 = vst.msk [vmem:[#allocation0 + $0xb01] ss:$8 sm:$0xf] %vm3_vm0, %v733_v5   ;;  %738 = vst.msk [vmem:[#allocation0 + $0xb01] ss:$8 sm:$0xf0] %vm3_vm0, %v733_v5   ;;  %1261 = vrot.lane.b32.xlu1 %v5334_v6, %s5274_s19  ;;  %1252 = vrot.lane.b32.xlu0 %v5339_v7, %s5274_s19 }
  0xd0   :  { %v760_v6 = vpop.permute.xlu1 %759   ;;  %v751_v7 = vpop.permute.xlu0 %750  }
  0xd1   :  { %763 = vst.msk [vmem:[#allocation0 + $0xbc1] ss:$8 sm:$0xf] %vm3_vm0, %v760_v6   ;;  %765 = vst.msk [vmem:[#allocation0 + $0xbc1] ss:$8 sm:$0xf0] %vm3_vm0, %v760_v6  }
  0xd2   :  { %754 = vst.msk [vmem:[#allocation0 + $0xb81] ss:$8 sm:$0xf] %vm3_vm0, %v751_v7   ;;  %756 = vst.msk [vmem:[#allocation0 + $0xb81] ss:$8 sm:$0xf0] %vm3_vm0, %v751_v7   ;;  %1279 = vrot.lane.b32.xlu1 %v5352_v8, %s5274_s19  ;;  %1270 = vrot.lane.b32.xlu0 %v5357_v9, %s5274_s19 }
  0xd3   :  { %v4736_v7 = vld [vmem:[%s7478_s0 + $0x138] sm:$0xff]  }
  0xd4   :  { %v777_v8 = vpop.permute.xlu1 %776   ;;  %v768_v9 = vpop.permute.xlu0 %767   ;;  %276 = vst.msk [vmem:[#allocation0 + $0x9c0] ss:$8 sm:$0xf] %vm3_vm0, %v4736_v7   ;;  %278 = vst.msk [vmem:[#allocation0 + $0x9c0] ss:$8 sm:$0xf0] %vm3_vm0, %v4736_v7  }
  0xd5   :  { %780 = vst.msk [vmem:[#allocation0 + $0x42] ss:$8 sm:$0xf] %vm3_vm0, %v777_v8   ;;  %782 = vst.msk [vmem:[#allocation0 + $0x42] ss:$8 sm:$0xf0] %vm3_vm0, %v777_v8  }
  0xd6   :  { %771 = vst.msk [vmem:[#allocation0 + $0x2] ss:$8 sm:$0xf] %vm3_vm0, %v768_v9   ;;  %773 = vst.msk [vmem:[#allocation0 + $0x2] ss:$8 sm:$0xf0] %vm3_vm0, %v768_v9   ;;  %1297 = vrot.lane.b32.xlu1 %v5362_v10, %s5274_s19  ;;  %1288 = vrot.lane.b32.xlu0 %v5379_v11, %s5274_s19 }
  0xd7   :  { %v4735_v8 = vld [vmem:[%s7478_s0 + $0x130] sm:$0xff]   ;;  %v4738_v9 = vld [vmem:[%s7478_s0 + $0x148] sm:$0xff]  }
  0xd8   :  { %v795_v10 = vpop.permute.xlu1 %794   ;;  %v786_v11 = vpop.permute.xlu0 %785   ;;  %269 = vst.msk [vmem:[#allocation0 + $0x980] ss:$8 sm:$0xf] %vm3_vm0, %v4735_v8   ;;  %271 = vst.msk [vmem:[#allocation0 + $0x980] ss:$8 sm:$0xf0] %vm3_vm0, %v4735_v8  }
  0xd9   :  { %798 = vst.msk [vmem:[#allocation0 + $0xc2] ss:$8 sm:$0xf] %vm3_vm0, %v795_v10   ;;  %800 = vst.msk [vmem:[#allocation0 + $0xc2] ss:$8 sm:$0xf0] %vm3_vm0, %v795_v10  }
  0xda   :  { %789 = vst.msk [vmem:[#allocation0 + $0x82] ss:$8 sm:$0xf] %vm3_vm0, %v786_v11   ;;  %791 = vst.msk [vmem:[#allocation0 + $0x82] ss:$8 sm:$0xf0] %vm3_vm0, %v786_v11   ;;  %1315 = vrot.lane.b32.xlu1 %v5384_v12, %s5274_s19  ;;  %1306 = vrot.lane.b32.xlu0 %v5389_v13, %s5274_s19 }
  0xdb   :  { %v4737_v10 = vld [vmem:[%s7478_s0 + $0x140] sm:$0xff]   ;;  %290 = vst.msk [vmem:[#allocation0 + $0xa40] ss:$8 sm:$0xf] %vm3_vm0, %v4738_v9  }
  0xdc   :  { %v813_v12 = vpop.permute.xlu1 %812   ;;  %v804_v13 = vpop.permute.xlu0 %803   ;;  %292 = vst.msk [vmem:[#allocation0 + $0xa40] ss:$8 sm:$0xf0] %vm3_vm0, %v4738_v9   ;;  %283 = vst.msk [vmem:[#allocation0 + $0xa00] ss:$8 sm:$0xf] %vm3_vm0, %v4737_v10  }
  0xdd   :  { %816 = vst.msk [vmem:[#allocation0 + $0x142] ss:$8 sm:$0xf] %vm3_vm0, %v813_v12   ;;  %818 = vst.msk [vmem:[#allocation0 + $0x142] ss:$8 sm:$0xf0] %vm3_vm0, %v813_v12  }
  0xde   :  { %807 = vst.msk [vmem:[#allocation0 + $0x102] ss:$8 sm:$0xf] %vm3_vm0, %v804_v13   ;;  %809 = vst.msk [vmem:[#allocation0 + $0x102] ss:$8 sm:$0xf0] %vm3_vm0, %v804_v13   ;;  %1333 = vrot.lane.b32.xlu1 %v5410_v14, %s5274_s19  ;;  %1324 = vrot.lane.b32.xlu0 %v5451_v15, %s5274_s19 }
  0xdf   :  { %285 = vst.msk [vmem:[#allocation0 + $0xa00] ss:$8 sm:$0xf0] %vm3_vm0, %v4737_v10   ;;  %v4740_v13 = vld [vmem:[%s7478_s0 + $0x158] sm:$0xff]  }
  0xe0   :  { %v831_v14 = vpop.permute.xlu1 %830   ;;  %v822_v15 = vpop.permute.xlu0 %821   ;;  %304 = vst.msk [vmem:[#allocation0 + $0xac0] ss:$8 sm:$0xf] %vm3_vm0, %v4740_v13   ;;  %306 = vst.msk [vmem:[#allocation0 + $0xac0] ss:$8 sm:$0xf0] %vm3_vm0, %v4740_v13  }
  0xe1   :  { %834 = vst.msk [vmem:[#allocation0 + $0x1c2] ss:$8 sm:$0xf] %vm3_vm0, %v831_v14   ;;  %836 = vst.msk [vmem:[#allocation0 + $0x1c2] ss:$8 sm:$0xf0] %vm3_vm0, %v831_v14  }
  0xe2   :  { %825 = vst.msk [vmem:[#allocation0 + $0x182] ss:$8 sm:$0xf] %vm3_vm0, %v822_v15   ;;  %827 = vst.msk [vmem:[#allocation0 + $0x182] ss:$8 sm:$0xf0] %vm3_vm0, %v822_v15   ;;  %1351 = vrot.lane.b32.xlu1 %v5460_v16, %s5274_s19  ;;  %1342 = vrot.lane.b32.xlu0 %v5465_v17, %s5274_s19 }
  0xe3   :  { %v4714_v16 = vld [vmem:[%s7478_s0 + $0x88] sm:$0xff]   ;;  %v4713_v17 = vld [vmem:[%s7478_s0 + $0x80] sm:$0xff]  }
  0xe4   :  { %122 = vst.msk [vmem:[#allocation0 + $0x440] ss:$8 sm:$0xf] %vm3_vm0, %v4714_v16   ;;  %124 = vst.msk [vmem:[#allocation0 + $0x440] ss:$8 sm:$0xf0] %vm3_vm0, %v4714_v16   ;;  %v849_v57 = vpop.permute.xlu1 %848   ;;  %v840_v58 = vpop.permute.xlu0 %839  }
  0xe5   :  { %115 = vst.msk [vmem:[#allocation0 + $0x400] ss:$8 sm:$0xf] %vm3_vm0, %v4713_v17   ;;  %117 = vst.msk [vmem:[#allocation0 + $0x400] ss:$8 sm:$0xf0] %vm3_vm0, %v4713_v17  }
  0xe6   :  { %852 = vst.msk [vmem:[#allocation0 + $0x242] ss:$8 sm:$0xf] %vm3_vm0, %v849_v57   ;;  %854 = vst.msk [vmem:[#allocation0 + $0x242] ss:$8 sm:$0xf0] %vm3_vm0, %v849_v57   ;;  %1369 = vrot.lane.b32.xlu1 %v5474_v18, %s5274_s19  ;;  %1360 = vrot.lane.b32.xlu0 %v5479_v19, %s5274_s19 }
  0xe7   :  { %843 = vst.msk [vmem:[#allocation0 + $0x202] ss:$8 sm:$0xf] %vm3_vm0, %v840_v58   ;;  %845 = vst.msk [vmem:[#allocation0 + $0x202] ss:$8 sm:$0xf0] %vm3_vm0, %v840_v58  }
  0xe8   :  { %v4716_v18 = vld [vmem:[%s7478_s0 + $0x98] sm:$0xff]   ;;  %v4715_v19 = vld [vmem:[%s7478_s0 + $0x90] sm:$0xff]   ;;  %v867_v59 = vpop.permute.xlu1 %866   ;;  %v858_v60 = vpop.permute.xlu0 %857   ;;  %v4742_v57 = vld [vmem:[%s7478_s0 + $0x168] sm:$0xff]  }
  0xe9   :  { %136 = vst.msk [vmem:[#allocation0 + $0x4c0] ss:$8 sm:$0xf] %vm3_vm0, %v4716_v18   ;;  %138 = vst.msk [vmem:[#allocation0 + $0x4c0] ss:$8 sm:$0xf0] %vm3_vm0, %v4716_v18  }
  0xea   :  { %129 = vst.msk [vmem:[#allocation0 + $0x480] ss:$8 sm:$0xf] %vm3_vm0, %v4715_v19   ;;  %131 = vst.msk [vmem:[#allocation0 + $0x480] ss:$8 sm:$0xf0] %vm3_vm0, %v4715_v19   ;;  %1387 = vrot.lane.b32.xlu1 %v5488_v20, %s5274_s19  ;;  %1378 = vrot.lane.b32.xlu0 %v5493_v21, %s5274_s19 }
  0xeb   :  { %870 = vst.msk [vmem:[#allocation0 + $0x2c2] ss:$8 sm:$0xf] %vm3_vm0, %v867_v59   ;;  %872 = vst.msk [vmem:[#allocation0 + $0x2c2] ss:$8 sm:$0xf0] %vm3_vm0, %v867_v59  }
  0xec   :  { %861 = vst.msk [vmem:[#allocation0 + $0x282] ss:$8 sm:$0xf] %vm3_vm0, %v858_v60   ;;  %863 = vst.msk [vmem:[#allocation0 + $0x282] ss:$8 sm:$0xf0] %vm3_vm0, %v858_v60   ;;  %v885_v20 = vpop.permute.xlu1 %884   ;;  %v876_v21 = vpop.permute.xlu0 %875  }
  0xed   :  { %888 = vst.msk [vmem:[#allocation0 + $0x342] ss:$8 sm:$0xf] %vm3_vm0, %v885_v20   ;;  %890 = vst.msk [vmem:[#allocation0 + $0x342] ss:$8 sm:$0xf0] %vm3_vm0, %v885_v20  }
  0xee   :  { %879 = vst.msk [vmem:[#allocation0 + $0x302] ss:$8 sm:$0xf] %vm3_vm0, %v876_v21   ;;  %881 = vst.msk [vmem:[#allocation0 + $0x302] ss:$8 sm:$0xf0] %vm3_vm0, %v876_v21   ;;  %1405 = vrot.lane.b32.xlu1 %v5502_v22, %s5274_s19  ;;  %1396 = vrot.lane.b32.xlu0 %v5507_v23, %s5274_s19 }
  0xef   :  { %v4741_v58 = vld [vmem:[%s7478_s0 + $0x160] sm:$0xff]   ;;  %318 = vst.msk [vmem:[#allocation0 + $0xb40] ss:$8 sm:$0xf] %vm3_vm0, %v4742_v57   ;;  %v4744_v59 = vld [vmem:[%s7478_s0 + $0x178] sm:$0xff]   ;;  %v4743_v60 = vld [vmem:[%s7478_s0 + $0x170] sm:$0xff]  }
  0xf0   :  { %v903_v22 = vpop.permute.xlu1 %902   ;;  %v894_v23 = vpop.permute.xlu0 %893   ;;  %320 = vst.msk [vmem:[#allocation0 + $0xb40] ss:$8 sm:$0xf0] %vm3_vm0, %v4742_v57   ;;  %311 = vst.msk [vmem:[#allocation0 + $0xb00] ss:$8 sm:$0xf] %vm3_vm0, %v4741_v58  }
  0xf1   :  { %906 = vst.msk [vmem:[#allocation0 + $0x3c2] ss:$8 sm:$0xf] %vm3_vm0, %v903_v22   ;;  %908 = vst.msk [vmem:[#allocation0 + $0x3c2] ss:$8 sm:$0xf0] %vm3_vm0, %v903_v22  }
  0xf2   :  { %897 = vst.msk [vmem:[#allocation0 + $0x382] ss:$8 sm:$0xf] %vm3_vm0, %v894_v23   ;;  %899 = vst.msk [vmem:[#allocation0 + $0x382] ss:$8 sm:$0xf0] %vm3_vm0, %v894_v23   ;;  %1423 = vrot.lane.b32.xlu1 %v5516_v24, %s5274_s19  ;;  %1414 = vrot.lane.b32.xlu0 %v5521_v25, %s5274_s19 }
  0xf3   :  { %v4720_v24 = vld [vmem:[%s7478_s0 + $0xb8] sm:$0xff]   ;;  %v4719_v25 = vld [vmem:[%s7478_s0 + $0xb0] sm:$0xff]   ;;  %313 = vst.msk [vmem:[#allocation0 + $0xb00] ss:$8 sm:$0xf0] %vm3_vm0, %v4741_v58  }
  0xf4   :  { %164 = vst.msk [vmem:[#allocation0 + $0x5c0] ss:$8 sm:$0xf] %vm3_vm0, %v4720_v24   ;;  %166 = vst.msk [vmem:[#allocation0 + $0x5c0] ss:$8 sm:$0xf0] %vm3_vm0, %v4720_v24   ;;  %v921_v63 = vpop.permute.xlu1 %920   ;;  %v912_v48 = vpop.permute.xlu0 %911  }
  0xf5   :  { %157 = vst.msk [vmem:[#allocation0 + $0x580] ss:$8 sm:$0xf] %vm3_vm0, %v4719_v25   ;;  %159 = vst.msk [vmem:[#allocation0 + $0x580] ss:$8 sm:$0xf0] %vm3_vm0, %v4719_v25  }
  0xf6   :  { %924 = vst.msk [vmem:[#allocation0 + $0x442] ss:$8 sm:$0xf] %vm3_vm0, %v921_v63   ;;  %926 = vst.msk [vmem:[#allocation0 + $0x442] ss:$8 sm:$0xf0] %vm3_vm0, %v921_v63   ;;  %1441 = vrot.lane.b32.xlu1 %v5530_v26, %s5274_s19  ;;  %1432 = vrot.lane.b32.xlu0 %v5535_v27, %s5274_s19 }
  0xf7   :  { %915 = vst.msk [vmem:[#allocation0 + $0x402] ss:$8 sm:$0xf] %vm3_vm0, %v912_v48   ;;  %917 = vst.msk [vmem:[#allocation0 + $0x402] ss:$8 sm:$0xf0] %vm3_vm0, %v912_v48  }
  0xf8   :  { %v4722_v26 = vld [vmem:[%s7478_s0 + $0xc8] sm:$0xff]   ;;  %v4721_v27 = vld [vmem:[%s7478_s0 + $0xc0] sm:$0xff]   ;;  %v939_v49 = vpop.permute.xlu1 %938   ;;  %v930_v50 = vpop.permute.xlu0 %929   ;;  %332 = vst.msk [vmem:[#allocation0 + $0xbc0] ss:$8 sm:$0xf] %vm3_vm0, %v4744_v59  }
  0xf9   :  { %178 = vst.msk [vmem:[#allocation0 + $0x640] ss:$8 sm:$0xf] %vm3_vm0, %v4722_v26   ;;  %180 = vst.msk [vmem:[#allocation0 + $0x640] ss:$8 sm:$0xf0] %vm3_vm0, %v4722_v26  }
  0xfa   :  { %171 = vst.msk [vmem:[#allocation0 + $0x600] ss:$8 sm:$0xf] %vm3_vm0, %v4721_v27   ;;  %173 = vst.msk [vmem:[#allocation0 + $0x600] ss:$8 sm:$0xf0] %vm3_vm0, %v4721_v27   ;;  %1459 = vrot.lane.b32.xlu1 %v5544_v28, %s5274_s19  ;;  %1450 = vrot.lane.b32.xlu0 %v5549_v29, %s5274_s19 }
  0xfb   :  { %942 = vst.msk [vmem:[#allocation0 + $0x4c2] ss:$8 sm:$0xf] %vm3_vm0, %v939_v49   ;;  %944 = vst.msk [vmem:[#allocation0 + $0x4c2] ss:$8 sm:$0xf0] %vm3_vm0, %v939_v49  }
  0xfc   :  { %933 = vst.msk [vmem:[#allocation0 + $0x482] ss:$8 sm:$0xf] %vm3_vm0, %v930_v50   ;;  %935 = vst.msk [vmem:[#allocation0 + $0x482] ss:$8 sm:$0xf0] %vm3_vm0, %v930_v50   ;;  %v957_v28 = vpop.permute.xlu1 %956   ;;  %v948_v29 = vpop.permute.xlu0 %947  }
  0xfd   :  { %960 = vst.msk [vmem:[#allocation0 + $0x542] ss:$8 sm:$0xf] %vm3_vm0, %v957_v28   ;;  %962 = vst.msk [vmem:[#allocation0 + $0x542] ss:$8 sm:$0xf0] %vm3_vm0, %v957_v28  }
  0xfe   :  { %951 = vst.msk [vmem:[#allocation0 + $0x502] ss:$8 sm:$0xf] %vm3_vm0, %v948_v29   ;;  %953 = vst.msk [vmem:[#allocation0 + $0x502] ss:$8 sm:$0xf0] %vm3_vm0, %v948_v29   ;;  %1477 = vrot.lane.b32.xlu1 %v5558_v30, %s5274_s19  ;;  %1468 = vrot.lane.b32.xlu0 %v5563_v31, %s5274_s19 }
  0xff   :  { %334 = vst.msk [vmem:[#allocation0 + $0xbc0] ss:$8 sm:$0xf0] %vm3_vm0, %v4744_v59   ;;  %325 = vst.msk [vmem:[#allocation0 + $0xb80] ss:$8 sm:$0xf] %vm3_vm0, %v4743_v60  }
 0x100   :  { %v975_v30 = vpop.permute.xlu1 %974   ;;  %v966_v31 = vpop.permute.xlu0 %965   ;;  %327 = vst.msk [vmem:[#allocation0 + $0xb80] ss:$8 sm:$0xf0] %vm3_vm0, %v4743_v60  }
 0x101   :  { %978 = vst.msk [vmem:[#allocation0 + $0x5c2] ss:$8 sm:$0xf] %vm3_vm0, %v975_v30   ;;  %980 = vst.msk [vmem:[#allocation0 + $0x5c2] ss:$8 sm:$0xf0] %vm3_vm0, %v975_v30  }
 0x102   :  { %969 = vst.msk [vmem:[#allocation0 + $0x582] ss:$8 sm:$0xf] %vm3_vm0, %v966_v31   ;;  %971 = vst.msk [vmem:[#allocation0 + $0x582] ss:$8 sm:$0xf0] %vm3_vm0, %v966_v31   ;;  %1495 = vrot.lane.b32.xlu1 %v5572_v32, %s5274_s19  ;;  %1486 = vrot.lane.b32.xlu0 %v5577_v33, %s5274_s19 }
 0x103   :  { %v4726_v32 = vld [vmem:[%s7478_s0 + $0xe8] sm:$0xff]   ;;  %v4725_v33 = vld [vmem:[%s7478_s0 + $0xe0] sm:$0xff]  }
 0x104   :  { %206 = vst.msk [vmem:[#allocation0 + $0x740] ss:$8 sm:$0xf] %vm3_vm0, %v4726_v32   ;;  %208 = vst.msk [vmem:[#allocation0 + $0x740] ss:$8 sm:$0xf0] %vm3_vm0, %v4726_v32   ;;  %v993_v53 = vpop.permute.xlu1 %992   ;;  %v984_v54 = vpop.permute.xlu0 %983  }
 0x105   :  { %199 = vst.msk [vmem:[#allocation0 + $0x700] ss:$8 sm:$0xf] %vm3_vm0, %v4725_v33   ;;  %201 = vst.msk [vmem:[#allocation0 + $0x700] ss:$8 sm:$0xf0] %vm3_vm0, %v4725_v33  }
 0x106   :  { %996 = vst.msk [vmem:[#allocation0 + $0x642] ss:$8 sm:$0xf] %vm3_vm0, %v993_v53   ;;  %998 = vst.msk [vmem:[#allocation0 + $0x642] ss:$8 sm:$0xf0] %vm3_vm0, %v993_v53   ;;  %1513 = vrot.lane.b32.xlu1 %v5586_v34, %s5274_s19  ;;  %1504 = vrot.lane.b32.xlu0 %v5591_v35, %s5274_s19 }
 0x107   :  { %987 = vst.msk [vmem:[#allocation0 + $0x602] ss:$8 sm:$0xf] %vm3_vm0, %v984_v54   ;;  %989 = vst.msk [vmem:[#allocation0 + $0x602] ss:$8 sm:$0xf0] %vm3_vm0, %v984_v54  }
 0x108   :  { %v4728_v34 = vld [vmem:[%s7478_s0 + $0xf8] sm:$0xff]   ;;  %v4727_v35 = vld [vmem:[%s7478_s0 + $0xf0] sm:$0xff]   ;;  %v1011_v55 = vpop.permute.xlu1 %1010   ;;  %v1002_v1 = vpop.permute.xlu0 %1001  }
 0x109   :  { %220 = vst.msk [vmem:[#allocation0 + $0x7c0] ss:$8 sm:$0xf] %vm3_vm0, %v4728_v34   ;;  %222 = vst.msk [vmem:[#allocation0 + $0x7c0] ss:$8 sm:$0xf0] %vm3_vm0, %v4728_v34  }
 0x10a   :  { %213 = vst.msk [vmem:[#allocation0 + $0x780] ss:$8 sm:$0xf] %vm3_vm0, %v4727_v35   ;;  %215 = vst.msk [vmem:[#allocation0 + $0x780] ss:$8 sm:$0xf0] %vm3_vm0, %v4727_v35   ;;  %1531 = vrot.lane.b32.xlu1 %v5600_v36, %s5274_s19  ;;  %1522 = vrot.lane.b32.xlu0 %v5605_v37, %s5274_s19 }
 0x10b   :  { %1014 = vst.msk [vmem:[#allocation0 + $0x6c2] ss:$8 sm:$0xf] %vm3_vm0, %v1011_v55   ;;  %1016 = vst.msk [vmem:[#allocation0 + $0x6c2] ss:$8 sm:$0xf0] %vm3_vm0, %v1011_v55  }
 0x10c   :  { %1005 = vst.msk [vmem:[#allocation0 + $0x682] ss:$8 sm:$0xf] %vm3_vm0, %v1002_v1   ;;  %1007 = vst.msk [vmem:[#allocation0 + $0x682] ss:$8 sm:$0xf0] %vm3_vm0, %v1002_v1   ;;  %v1029_v36 = vpop.permute.xlu1 %1028   ;;  %v1020_v37 = vpop.permute.xlu0 %1019  }
 0x10d   :  { %1032 = vst.msk [vmem:[#allocation0 + $0x742] ss:$8 sm:$0xf] %vm3_vm0, %v1029_v36   ;;  %1034 = vst.msk [vmem:[#allocation0 + $0x742] ss:$8 sm:$0xf0] %vm3_vm0, %v1029_v36  }
 0x10e   :  { %1023 = vst.msk [vmem:[#allocation0 + $0x702] ss:$8 sm:$0xf] %vm3_vm0, %v1020_v37   ;;  %1025 = vst.msk [vmem:[#allocation0 + $0x702] ss:$8 sm:$0xf0] %vm3_vm0, %v1020_v37   ;;  %1549 = vrot.lane.b32.xlu1 %v5614_v38, %s5274_s19  ;;  %1540 = vrot.lane.b32.xlu0 %v5619_v39, %s5274_s19 }
 0x110   :  { %v1047_v38 = vpop.permute.xlu1 %1046   ;;  %v1038_v39 = vpop.permute.xlu0 %1037  }
 0x111   :  { %1050 = vst.msk [vmem:[#allocation0 + $0x7c2] ss:$8 sm:$0xf] %vm3_vm0, %v1047_v38   ;;  %1052 = vst.msk [vmem:[#allocation0 + $0x7c2] ss:$8 sm:$0xf0] %vm3_vm0, %v1047_v38  }
 0x112   :  { %1041 = vst.msk [vmem:[#allocation0 + $0x782] ss:$8 sm:$0xf] %vm3_vm0, %v1038_v39   ;;  %1043 = vst.msk [vmem:[#allocation0 + $0x782] ss:$8 sm:$0xf0] %vm3_vm0, %v1038_v39   ;;  %1567 = vrot.lane.b32.xlu1 %v5628_v40, %s5274_s19  ;;  %1558 = vrot.lane.b32.xlu0 %v5633_v41, %s5274_s19 }
 0x113   :  { %v4732_v40 = vld [vmem:[%s7478_s0 + $0x118] sm:$0xff]   ;;  %v4731_v41 = vld [vmem:[%s7478_s0 + $0x110] sm:$0xff]  }
 0x114   :  { %248 = vst.msk [vmem:[#allocation0 + $0x8c0] ss:$8 sm:$0xf] %vm3_vm0, %v4732_v40   ;;  %250 = vst.msk [vmem:[#allocation0 + $0x8c0] ss:$8 sm:$0xf0] %vm3_vm0, %v4732_v40   ;;  %v1065_v2 = vpop.permute.xlu1 %1064   ;;  %v1056_v4 = vpop.permute.xlu0 %1055  }
 0x115   :  { %241 = vst.msk [vmem:[#allocation0 + $0x880] ss:$8 sm:$0xf] %vm3_vm0, %v4731_v41   ;;  %243 = vst.msk [vmem:[#allocation0 + $0x880] ss:$8 sm:$0xf0] %vm3_vm0, %v4731_v41  }
 0x116   :  { %1068 = vst.msk [vmem:[#allocation0 + $0x842] ss:$8 sm:$0xf] %vm3_vm0, %v1065_v2   ;;  %1070 = vst.msk [vmem:[#allocation0 + $0x842] ss:$8 sm:$0xf0] %vm3_vm0, %v1065_v2   ;;  %1585 = vrot.lane.b32.xlu1 %v5642_v42, %s5274_s19  ;;  %1576 = vrot.lane.b32.xlu0 %v5647_v43, %s5274_s19 }
 0x117   :  { %1059 = vst.msk [vmem:[#allocation0 + $0x802] ss:$8 sm:$0xf] %vm3_vm0, %v1056_v4   ;;  %1061 = vst.msk [vmem:[#allocation0 + $0x802] ss:$8 sm:$0xf0] %vm3_vm0, %v1056_v4  }
 0x118   :  { %v4734_v42 = vld [vmem:[%s7478_s0 + $0x128] sm:$0xff]   ;;  %v4733_v43 = vld [vmem:[%s7478_s0 + $0x120] sm:$0xff]   ;;  %v1083_v5 = vpop.permute.xlu1 %1082   ;;  %v1074_v6 = vpop.permute.xlu0 %1073  }
 0x119   :  { %262 = vst.msk [vmem:[#allocation0 + $0x940] ss:$8 sm:$0xf] %vm3_vm0, %v4734_v42   ;;  %264 = vst.msk [vmem:[#allocation0 + $0x940] ss:$8 sm:$0xf0] %vm3_vm0, %v4734_v42  }
 0x11a   :  { %255 = vst.msk [vmem:[#allocation0 + $0x900] ss:$8 sm:$0xf] %vm3_vm0, %v4733_v43   ;;  %257 = vst.msk [vmem:[#allocation0 + $0x900] ss:$8 sm:$0xf0] %vm3_vm0, %v4733_v43   ;;  %1603 = vrot.lane.b32.xlu1 %v5656_v44, %s5274_s19  ;;  %1594 = vrot.lane.b32.xlu0 %v5661_v45, %s5274_s19 }
 0x11b   :  { %1086 = vst.msk [vmem:[#allocation0 + $0x8c2] ss:$8 sm:$0xf] %vm3_vm0, %v1083_v5   ;;  %1088 = vst.msk [vmem:[#allocation0 + $0x8c2] ss:$8 sm:$0xf0] %vm3_vm0, %v1083_v5  }
 0x11c   :  { %1077 = vst.msk [vmem:[#allocation0 + $0x882] ss:$8 sm:$0xf] %vm3_vm0, %v1074_v6   ;;  %1079 = vst.msk [vmem:[#allocation0 + $0x882] ss:$8 sm:$0xf0] %vm3_vm0, %v1074_v6   ;;  %v1101_v44 = vpop.permute.xlu1 %1100   ;;  %v1092_v45 = vpop.permute.xlu0 %1091  }
 0x11d   :  { %1104 = vst.msk [vmem:[#allocation0 + $0x942] ss:$8 sm:$0xf] %vm3_vm0, %v1101_v44   ;;  %1106 = vst.msk [vmem:[#allocation0 + $0x942] ss:$8 sm:$0xf0] %vm3_vm0, %v1101_v44  }
 0x11e   :  { %1095 = vst.msk [vmem:[#allocation0 + $0x902] ss:$8 sm:$0xf] %vm3_vm0, %v1092_v45   ;;  %1097 = vst.msk [vmem:[#allocation0 + $0x902] ss:$8 sm:$0xf0] %vm3_vm0, %v1092_v45   ;;  %1621 = vrot.lane.b32.xlu1 %v5670_v46, %s5274_s19  ;;  %1612 = vrot.lane.b32.xlu0 %v5675_v47, %s5274_s19 }
 0x120   :  { %v1119_v46 = vpop.permute.xlu1 %1118   ;;  %v1110_v47 = vpop.permute.xlu0 %1109  }
 0x121   :  { %1122 = vst.msk [vmem:[#allocation0 + $0x9c2] ss:$8 sm:$0xf] %vm3_vm0, %v1119_v46   ;;  %1124 = vst.msk [vmem:[#allocation0 + $0x9c2] ss:$8 sm:$0xf0] %vm3_vm0, %v1119_v46  }
 0x122   :  { %1113 = vst.msk [vmem:[#allocation0 + $0x982] ss:$8 sm:$0xf] %vm3_vm0, %v1110_v47   ;;  %1115 = vst.msk [vmem:[#allocation0 + $0x982] ss:$8 sm:$0xf0] %vm3_vm0, %v1110_v47  }
 0x124   :  { %v1137_v11 = vpop.permute.xlu1 %1136   ;;  %v1128_v12 = vpop.permute.xlu0 %1127  }
 0x125   :  { %1140 = vst.msk [vmem:[#allocation0 + $0xa42] ss:$8 sm:$0xf] %vm3_vm0, %v1137_v11   ;;  %1142 = vst.msk [vmem:[#allocation0 + $0xa42] ss:$8 sm:$0xf0] %vm3_vm0, %v1137_v11  }
 0x126   :  { %1131 = vst.msk [vmem:[#allocation0 + $0xa02] ss:$8 sm:$0xf] %vm3_vm0, %v1128_v12   ;;  %1133 = vst.msk [vmem:[#allocation0 + $0xa02] ss:$8 sm:$0xf0] %vm3_vm0, %v1128_v12  }
 0x128   :  { %v1155_v14 = vpop.permute.xlu1 %1154   ;;  %v1146_v15 = vpop.permute.xlu0 %1145  }
 0x129   :  { %1158 = vst.msk [vmem:[#allocation0 + $0xac2] ss:$8 sm:$0xf] %vm3_vm0, %v1155_v14   ;;  %1160 = vst.msk [vmem:[#allocation0 + $0xac2] ss:$8 sm:$0xf0] %vm3_vm0, %v1155_v14  }
 0x12a   :  { %1149 = vst.msk [vmem:[#allocation0 + $0xa82] ss:$8 sm:$0xf] %vm3_vm0, %v1146_v15   ;;  %1151 = vst.msk [vmem:[#allocation0 + $0xa82] ss:$8 sm:$0xf0] %vm3_vm0, %v1146_v15  }
 0x12c   :  { %v1173_v16 = vpop.permute.xlu1 %1172   ;;  %v1164_v17 = vpop.permute.xlu0 %1163  }
 0x12d   :  { %1176 = vst.msk [vmem:[#allocation0 + $0xb42] ss:$8 sm:$0xf] %vm3_vm0, %v1173_v16   ;;  %1178 = vst.msk [vmem:[#allocation0 + $0xb42] ss:$8 sm:$0xf0] %vm3_vm0, %v1173_v16  }
 0x12e   :  { %1167 = vst.msk [vmem:[#allocation0 + $0xb02] ss:$8 sm:$0xf] %vm3_vm0, %v1164_v17   ;;  %1169 = vst.msk [vmem:[#allocation0 + $0xb02] ss:$8 sm:$0xf0] %vm3_vm0, %v1164_v17  }
 0x130   :  { %v1191_v18 = vpop.permute.xlu1 %1190   ;;  %v1182_v19 = vpop.permute.xlu0 %1181  }
 0x131   :  { %1194 = vst.msk [vmem:[#allocation0 + $0xbc2] ss:$8 sm:$0xf] %vm3_vm0, %v1191_v18   ;;  %1196 = vst.msk [vmem:[#allocation0 + $0xbc2] ss:$8 sm:$0xf0] %vm3_vm0, %v1191_v18  }
 0x132   :  { %1185 = vst.msk [vmem:[#allocation0 + $0xb82] ss:$8 sm:$0xf] %vm3_vm0, %v1182_v19   ;;  %1187 = vst.msk [vmem:[#allocation0 + $0xb82] ss:$8 sm:$0xf0] %vm3_vm0, %v1182_v19  }
 0x134   :  { %v1208_v20 = vpop.permute.xlu1 %1207   ;;  %v1199_v21 = vpop.permute.xlu0 %1198  }
 0x135   :  { %1211 = vst.msk [vmem:[#allocation0 + $0x43] ss:$8 sm:$0xf] %vm3_vm0, %v1208_v20   ;;  %1213 = vst.msk [vmem:[#allocation0 + $0x43] ss:$8 sm:$0xf0] %vm3_vm0, %v1208_v20  }
 0x136   :  { %1202 = vst.msk [vmem:[#allocation0 + $0x3] ss:$8 sm:$0xf] %vm3_vm0, %v1199_v21   ;;  %1204 = vst.msk [vmem:[#allocation0 + $0x3] ss:$8 sm:$0xf0] %vm3_vm0, %v1199_v21  }
 0x138   :  { %v1226_v61 = vpop.permute.xlu1 %1225   ;;  %v1217_v62 = vpop.permute.xlu0 %1216  }
 0x139   :  { %1229 = vst.msk [vmem:[#allocation0 + $0xc3] ss:$8 sm:$0xf] %vm3_vm0, %v1226_v61   ;;  %1231 = vst.msk [vmem:[#allocation0 + $0xc3] ss:$8 sm:$0xf0] %vm3_vm0, %v1226_v61  }
 0x13a   :  { %1220 = vst.msk [vmem:[#allocation0 + $0x83] ss:$8 sm:$0xf] %vm3_vm0, %v1217_v62   ;;  %1222 = vst.msk [vmem:[#allocation0 + $0x83] ss:$8 sm:$0xf0] %vm3_vm0, %v1217_v62  }
 0x13c   :  { %v1685_v22 = vld [vmem:[#allocation0 + $0x40] sm:$0xf]  ;;  %v1692_v23 = vld [vmem:[#allocation0 + $0x48] sm:$0xf]  ;;  %v1699_v24 = vld [vmem:[#allocation0 + $0x50] sm:$0xf]  ;;  %v1244_v25 = vpop.permute.xlu1 %1243   ;;  %v1235_v63 = vpop.permute.xlu0 %1234  }
 0x13d   :  { %v1706_v48 = vld [vmem:[#allocation0 + $0x58] sm:$0xf]  ;;  %v1713_v26 = vld [vmem:[#allocation0 + $0x60] sm:$0xf]  ;;  %v1720_v27 = vld [vmem:[#allocation0 + $0x68] sm:$0xf] }
 0x13e   :  { %4893 = vst [vmem:[%s7479_s1 + $0x20] sm:$0xf] %v1685_v22  ;;  %4894 = vst [vmem:[%s7479_s1 + $0x24] sm:$0xf] %v1692_v23  ;;  %v1727_v49 = vld [vmem:[#allocation0 + $0x70] sm:$0xf] }
 0x13f   :  { %4895 = vst [vmem:[%s7479_s1 + $0x28] sm:$0xf] %v1699_v24  ;;  %1247 = vst.msk [vmem:[#allocation0 + $0x143] ss:$8 sm:$0xf] %vm3_vm0, %v1244_v25  }
 0x140   :  { %1249 = vst.msk [vmem:[#allocation0 + $0x143] ss:$8 sm:$0xf0] %vm3_vm0, %v1244_v25   ;;  %1238 = vst.msk [vmem:[#allocation0 + $0x103] ss:$8 sm:$0xf] %vm3_vm0, %v1235_v63   ;;  %v1262_v33 = vpop.permute.xlu1 %1261   ;;  %v1253_v53 = vpop.permute.xlu0 %1252  }
 0x141   :  { %1240 = vst.msk [vmem:[#allocation0 + $0x103] ss:$8 sm:$0xf0] %vm3_vm0, %v1235_v63   ;;  %v1734_v50 = vld [vmem:[#allocation0 + $0x78] sm:$0xf] }
 0x142   :  { %v1632_v28 = vld [vmem:[#allocation0] sm:$0xf]  ;;  %4896 = vst [vmem:[%s7479_s1 + $0x2c] sm:$0xf] %v1706_v48  ;;  %4897 = vst [vmem:[%s7479_s1 + $0x30] sm:$0xf] %v1713_v26 }
 0x143   :  { %4898 = vst [vmem:[%s7479_s1 + $0x34] sm:$0xf] %v1720_v27  ;;  %v1637_v29 = vld [vmem:[#allocation0 + $0x8] sm:$0xf]  ;;  %v1643_v51 = vld [vmem:[#allocation0 + $0x10] sm:$0xf] }
 0x144   :  { %v1650_v52 = vld [vmem:[#allocation0 + $0x18] sm:$0xf]  ;;  %4899 = vst [vmem:[%s7479_s1 + $0x38] sm:$0xf] %v1727_v49  ;;  %4900 = vst [vmem:[%s7479_s1 + $0x3c] sm:$0xf] %v1734_v50  ;;  %v1280_v41 = vpop.permute.xlu1 %1279   ;;  %v1271_v2 = vpop.permute.xlu0 %1270  }
 0x145   :  { %1635 = vst [vmem:[%s7479_s1] sm:$0xf] %v1632_v28  ;;  %v1657_v30 = vld [vmem:[#allocation0 + $0x20] sm:$0xf]  ;;  %v1664_v31 = vld [vmem:[#allocation0 + $0x28] sm:$0xf] }
 0x146   :  { %v1671_v32 = vld [vmem:[#allocation0 + $0x30] sm:$0xf]  ;;  %4886 = vst [vmem:[%s7479_s1 + $0x4] sm:$0xf] %v1637_v29  ;;  %4887 = vst [vmem:[%s7479_s1 + $0x8] sm:$0xf] %v1643_v51 }
 0x147   :  { %4888 = vst [vmem:[%s7479_s1 + $0xc] sm:$0xf] %v1650_v52  ;;  %v1678_v54 = vld [vmem:[#allocation0 + $0x38] sm:$0xf]  ;;  %4889 = vst [vmem:[%s7479_s1 + $0x10] sm:$0xf] %v1657_v30 }
 0x148   :  { %4890 = vst [vmem:[%s7479_s1 + $0x14] sm:$0xf] %v1664_v31  ;;  %4891 = vst [vmem:[%s7479_s1 + $0x18] sm:$0xf] %v1671_v32  ;;  %v1797_v34 = vld [vmem:[#allocation0 + $0xc0] sm:$0xf]  ;;  %v1298_v10 = vpop.permute.xlu1 %1297   ;;  %v1289_v11 = vpop.permute.xlu0 %1288  }
 0x149   :  { %v1804_v35 = vld [vmem:[#allocation0 + $0xc8] sm:$0xf]  ;;  %1265 = vst.msk [vmem:[#allocation0 + $0x1c3] ss:$8 sm:$0xf] %vm3_vm0, %v1262_v33  }
 0x14a   :  { %1267 = vst.msk [vmem:[#allocation0 + $0x1c3] ss:$8 sm:$0xf0] %vm3_vm0, %v1262_v33   ;;  %1256 = vst.msk [vmem:[#allocation0 + $0x183] ss:$8 sm:$0xf] %vm3_vm0, %v1253_v53  }
 0x14b   :  { %1258 = vst.msk [vmem:[#allocation0 + $0x183] ss:$8 sm:$0xf0] %vm3_vm0, %v1253_v53   ;;  %4892 = vst [vmem:[%s7479_s1 + $0x1c] sm:$0xf] %v1678_v54 }
 0x14c   :  { %v1811_v55 = vld [vmem:[#allocation0 + $0xd0] sm:$0xf]  ;;  %v1818_v1 = vld [vmem:[#allocation0 + $0xd8] sm:$0xf]  ;;  %v1825_v36 = vld [vmem:[#allocation0 + $0xe0] sm:$0xf]  ;;  %v1316_v60 = vpop.permute.xlu1 %1315   ;;  %v1307_v20 = vpop.permute.xlu0 %1306  }
 0x14d   :  { %4909 = vst [vmem:[%s7479_s1 + $0x60] sm:$0xf] %v1797_v34  ;;  %4910 = vst [vmem:[%s7479_s1 + $0x64] sm:$0xf] %v1804_v35  ;;  %v1832_v37 = vld [vmem:[#allocation0 + $0xe8] sm:$0xf] }
 0x14e   :  { %v1839_v3 = vld [vmem:[#allocation0 + $0xf0] sm:$0xf]  ;;  %v1846_v0 = vld [vmem:[#allocation0 + $0xf8] sm:$0xf]  ;;  %4911 = vst [vmem:[%s7479_s1 + $0x68] sm:$0xf] %v1811_v55 }
 0x14f   :  { %4912 = vst [vmem:[%s7479_s1 + $0x6c] sm:$0xf] %v1818_v1  ;;  %4913 = vst [vmem:[%s7479_s1 + $0x70] sm:$0xf] %v1825_v36  ;;  %v1741_v38 = vld [vmem:[#allocation0 + $0x80] sm:$0xf] }
 0x150   :  { %v1748_v39 = vld [vmem:[#allocation0 + $0x88] sm:$0xf]  ;;  %v1755_v40 = vld [vmem:[#allocation0 + $0x90] sm:$0xf]  ;;  %4914 = vst [vmem:[%s7479_s1 + $0x74] sm:$0xf] %v1832_v37  ;;  %v1334_v50 = vpop.permute.xlu1 %1333   ;;  %v1325_v28 = vpop.permute.xlu0 %1324  }
 0x151   :  { %4915 = vst [vmem:[%s7479_s1 + $0x78] sm:$0xf] %v1839_v3  ;;  %4916 = vst [vmem:[%s7479_s1 + $0x7c] sm:$0xf] %v1846_v0  ;;  %v1762_v4 = vld [vmem:[#allocation0 + $0x98] sm:$0xf] }
 0x152   :  { %v1769_v42 = vld [vmem:[#allocation0 + $0xa0] sm:$0xf]  ;;  %v1776_v43 = vld [vmem:[#allocation0 + $0xa8] sm:$0xf]  ;;  %4901 = vst [vmem:[%s7479_s1 + $0x40] sm:$0xf] %v1741_v38 }
 0x153   :  { %4902 = vst [vmem:[%s7479_s1 + $0x44] sm:$0xf] %v1748_v39  ;;  %4903 = vst [vmem:[%s7479_s1 + $0x48] sm:$0xf] %v1755_v40  ;;  %v1783_v5 = vld [vmem:[#allocation0 + $0xb0] sm:$0xf] }
 0x154   :  { %1283 = vst.msk [vmem:[#allocation0 + $0x243] ss:$8 sm:$0xf] %vm3_vm0, %v1280_v41   ;;  %1285 = vst.msk [vmem:[#allocation0 + $0x243] ss:$8 sm:$0xf0] %vm3_vm0, %v1280_v41   ;;  %v1352_v1 = vpop.permute.xlu1 %1351   ;;  %v1343_v36 = vpop.permute.xlu0 %1342  }
 0x155   :  { %1274 = vst.msk [vmem:[#allocation0 + $0x203] ss:$8 sm:$0xf] %vm3_vm0, %v1271_v2   ;;  %1276 = vst.msk [vmem:[#allocation0 + $0x203] ss:$8 sm:$0xf0] %vm3_vm0, %v1271_v2  }
 0x156   :  { %v1790_v6 = vld [vmem:[#allocation0 + $0xb8] sm:$0xf]  ;;  %4904 = vst [vmem:[%s7479_s1 + $0x4c] sm:$0xf] %v1762_v4  ;;  %4905 = vst [vmem:[%s7479_s1 + $0x50] sm:$0xf] %v1769_v42 }
 0x157   :  { %4906 = vst [vmem:[%s7479_s1 + $0x54] sm:$0xf] %v1776_v43  ;;  %v1909_v44 = vld [vmem:[#allocation0 + $0x140] sm:$0xf]  ;;  %4907 = vst [vmem:[%s7479_s1 + $0x58] sm:$0xf] %v1783_v5 }
 0x158   :  { %4908 = vst [vmem:[%s7479_s1 + $0x5c] sm:$0xf] %v1790_v6  ;;  %v1916_v45 = vld [vmem:[#allocation0 + $0x148] sm:$0xf]  ;;  %v1923_v7 = vld [vmem:[#allocation0 + $0x150] sm:$0xf]  ;;  %v1370_v6 = vpop.permute.xlu1 %1369  }
 0x159   :  { %v1930_v8 = vld [vmem:[#allocation0 + $0x158] sm:$0xf]  ;;  %4925 = vst [vmem:[%s7479_s1 + $0xa0] sm:$0xf] %v1909_v44  ;;  %v1937_v46 = vld [vmem:[#allocation0 + $0x160] sm:$0xf]  ;;  %v1361_v44 = vpop.permute.xlu0 %1360  }
 0x15a   :  { %v1944_v47 = vld [vmem:[#allocation0 + $0x168] sm:$0xf]  ;;  %v1951_v9 = vld [vmem:[#allocation0 + $0x170] sm:$0xf]  ;;  %4926 = vst [vmem:[%s7479_s1 + $0xa4] sm:$0xf] %v1916_v45 }
 0x15b   :  { %4927 = vst [vmem:[%s7479_s1 + $0xa8] sm:$0xf] %v1923_v7  ;;  %4928 = vst [vmem:[%s7479_s1 + $0xac] sm:$0xf] %v1930_v8  ;;  %v1958_v12 = vld [vmem:[#allocation0 + $0x178] sm:$0xf] }
 0x15c   :  { %v1853_v13 = vld [vmem:[#allocation0 + $0x100] sm:$0xf]  ;;  %v1860_v56 = vld [vmem:[#allocation0 + $0x108] sm:$0xf]  ;;  %4929 = vst [vmem:[%s7479_s1 + $0xb0] sm:$0xf] %v1937_v46 }
 0x15d   :  { %4930 = vst [vmem:[%s7479_s1 + $0xb4] sm:$0xf] %v1944_v47  ;;  %4931 = vst [vmem:[%s7479_s1 + $0xb8] sm:$0xf] %v1951_v9  ;;  %v1867_v14 = vld [vmem:[#allocation0 + $0x110] sm:$0xf] }
 0x15e   :  { %1301 = vst.msk [vmem:[#allocation0 + $0x2c3] ss:$8 sm:$0xf] %vm3_vm0, %v1298_v10   ;;  %1303 = vst.msk [vmem:[#allocation0 + $0x2c3] ss:$8 sm:$0xf0] %vm3_vm0, %v1298_v10  }
 0x15f   :  { %1292 = vst.msk [vmem:[#allocation0 + $0x283] ss:$8 sm:$0xf] %vm3_vm0, %v1289_v11   ;;  %1294 = vst.msk [vmem:[#allocation0 + $0x283] ss:$8 sm:$0xf0] %vm3_vm0, %v1289_v11  }
 0x160   :  { %v1874_v15 = vld [vmem:[#allocation0 + $0x118] sm:$0xf]  ;;  %v1881_v16 = vld [vmem:[#allocation0 + $0x120] sm:$0xf]  ;;  %4932 = vst [vmem:[%s7479_s1 + $0xbc] sm:$0xf] %v1958_v12 }
 0x161   :  { %4917 = vst [vmem:[%s7479_s1 + $0x80] sm:$0xf] %v1853_v13  ;;  %4918 = vst [vmem:[%s7479_s1 + $0x84] sm:$0xf] %v1860_v56  ;;  %v1888_v17 = vld [vmem:[#allocation0 + $0x128] sm:$0xf] }
 0x162   :  { %v1895_v57 = vld [vmem:[#allocation0 + $0x130] sm:$0xf]  ;;  %v1902_v58 = vld [vmem:[#allocation0 + $0x138] sm:$0xf]  ;;  %4919 = vst [vmem:[%s7479_s1 + $0x88] sm:$0xf] %v1867_v14 }
 0x163   :  { %4920 = vst [vmem:[%s7479_s1 + $0x8c] sm:$0xf] %v1874_v15  ;;  %4921 = vst [vmem:[%s7479_s1 + $0x90] sm:$0xf] %v1881_v16  ;;  %v2021_v18 = vld [vmem:[#allocation0 + $0x1c0] sm:$0xf]  ;;  %v1388_v15 = vpop.permute.xlu1 %1387   ;;  %v1379_v16 = vpop.permute.xlu0 %1378  }
 0x164   :  { %4922 = vst [vmem:[%s7479_s1 + $0x94] sm:$0xf] %v1888_v17  ;;  %4923 = vst [vmem:[%s7479_s1 + $0x98] sm:$0xf] %v1895_v57  ;;  %v2028_v19 = vld [vmem:[#allocation0 + $0x1c8] sm:$0xf] }
 0x165   :  { %4924 = vst [vmem:[%s7479_s1 + $0x9c] sm:$0xf] %v1902_v58  ;;  %v2035_v59 = vld [vmem:[#allocation0 + $0x1d0] sm:$0xf]  ;;  %v2042_v21 = vld [vmem:[#allocation0 + $0x1d8] sm:$0xf] }
 0x166   :  { %v2049_v61 = vld [vmem:[#allocation0 + $0x1e0] sm:$0xf]  ;;  %v2056_v62 = vld [vmem:[#allocation0 + $0x1e8] sm:$0xf]  ;;  %4941 = vst [vmem:[%s7479_s1 + $0xe0] sm:$0xf] %v2021_v18 }
 0x167   :  { %4942 = vst [vmem:[%s7479_s1 + $0xe4] sm:$0xf] %v2028_v19  ;;  %4943 = vst [vmem:[%s7479_s1 + $0xe8] sm:$0xf] %v2035_v59  ;;  %v2063_v22 = vld [vmem:[#allocation0 + $0x1f0] sm:$0xf] }
 0x168   :  { %1319 = vst.msk [vmem:[#allocation0 + $0x343] ss:$8 sm:$0xf] %vm3_vm0, %v1316_v60   ;;  %1321 = vst.msk [vmem:[#allocation0 + $0x343] ss:$8 sm:$0xf0] %vm3_vm0, %v1316_v60  }
 0x169   :  { %1310 = vst.msk [vmem:[#allocation0 + $0x303] ss:$8 sm:$0xf] %vm3_vm0, %v1307_v20   ;;  %1312 = vst.msk [vmem:[#allocation0 + $0x303] ss:$8 sm:$0xf0] %vm3_vm0, %v1307_v20  }
 0x16a   :  { %v2070_v23 = vld [vmem:[#allocation0 + $0x1f8] sm:$0xf]  ;;  %v1965_v24 = vld [vmem:[#allocation0 + $0x180] sm:$0xf]  ;;  %4944 = vst [vmem:[%s7479_s1 + $0xec] sm:$0xf] %v2042_v21 }
 0x16b   :  { %4945 = vst [vmem:[%s7479_s1 + $0xf0] sm:$0xf] %v2049_v61  ;;  %4946 = vst [vmem:[%s7479_s1 + $0xf4] sm:$0xf] %v2056_v62  ;;  %v1972_v25 = vld [vmem:[#allocation0 + $0x188] sm:$0xf] }
 0x16c   :  { %v1979_v63 = vld [vmem:[#allocation0 + $0x190] sm:$0xf]  ;;  %v1986_v48 = vld [vmem:[#allocation0 + $0x198] sm:$0xf]  ;;  %4947 = vst [vmem:[%s7479_s1 + $0xf8] sm:$0xf] %v2063_v22 }
 0x16d   :  { %4948 = vst [vmem:[%s7479_s1 + $0xfc] sm:$0xf] %v2070_v23  ;;  %4933 = vst [vmem:[%s7479_s1 + $0xc0] sm:$0xf] %v1965_v24  ;;  %v1993_v26 = vld [vmem:[#allocation0 + $0x1a0] sm:$0xf]  ;;  %v1406_v23 = vpop.permute.xlu1 %1405   ;;  %v1397_v24 = vpop.permute.xlu0 %1396  }
 0x16e   :  { %v2000_v27 = vld [vmem:[#allocation0 + $0x1a8] sm:$0xf]  ;;  %v2007_v49 = vld [vmem:[#allocation0 + $0x1b0] sm:$0xf]  ;;  %4934 = vst [vmem:[%s7479_s1 + $0xc4] sm:$0xf] %v1972_v25 }
 0x16f   :  { %4935 = vst [vmem:[%s7479_s1 + $0xc8] sm:$0xf] %v1979_v63  ;;  %4936 = vst [vmem:[%s7479_s1 + $0xcc] sm:$0xf] %v1986_v48  ;;  %v2014_v29 = vld [vmem:[#allocation0 + $0x1b8] sm:$0xf] }
 0x170   :  { %4937 = vst [vmem:[%s7479_s1 + $0xd0] sm:$0xf] %v1993_v26  ;;  %4938 = vst [vmem:[%s7479_s1 + $0xd4] sm:$0xf] %v2000_v27  ;;  %v2133_v51 = vld [vmem:[#allocation0 + $0x240] sm:$0xf] }
 0x171   :  { %4939 = vst [vmem:[%s7479_s1 + $0xd8] sm:$0xf] %v2007_v49  ;;  %v2140_v52 = vld [vmem:[#allocation0 + $0x248] sm:$0xf]  ;;  %4940 = vst [vmem:[%s7479_s1 + $0xdc] sm:$0xf] %v2014_v29 }
 0x172   :  { %1337 = vst.msk [vmem:[#allocation0 + $0x3c3] ss:$8 sm:$0xf] %vm3_vm0, %v1334_v50   ;;  %1339 = vst.msk [vmem:[#allocation0 + $0x3c3] ss:$8 sm:$0xf0] %vm3_vm0, %v1334_v50  }
 0x173   :  { %1328 = vst.msk [vmem:[#allocation0 + $0x383] ss:$8 sm:$0xf] %vm3_vm0, %v1325_v28   ;;  %1330 = vst.msk [vmem:[#allocation0 + $0x383] ss:$8 sm:$0xf0] %vm3_vm0, %v1325_v28  }
 0x174   :  { %v2147_v30 = vld [vmem:[#allocation0 + $0x250] sm:$0xf]  ;;  %v2154_v31 = vld [vmem:[#allocation0 + $0x258] sm:$0xf]  ;;  %v2161_v32 = vld [vmem:[#allocation0 + $0x260] sm:$0xf] }
 0x175   :  { %4957 = vst [vmem:[%s7479_s1 + $0x120] sm:$0xf] %v2133_v51  ;;  %4958 = vst [vmem:[%s7479_s1 + $0x124] sm:$0xf] %v2140_v52  ;;  %v2168_v33 = vld [vmem:[#allocation0 + $0x268] sm:$0xf] }
 0x176   :  { %v2175_v53 = vld [vmem:[#allocation0 + $0x270] sm:$0xf]  ;;  %v2182_v54 = vld [vmem:[#allocation0 + $0x278] sm:$0xf]  ;;  %4959 = vst [vmem:[%s7479_s1 + $0x128] sm:$0xf] %v2147_v30 }
 0x177   :  { %4960 = vst [vmem:[%s7479_s1 + $0x12c] sm:$0xf] %v2154_v31  ;;  %4961 = vst [vmem:[%s7479_s1 + $0x130] sm:$0xf] %v2161_v32  ;;  %v2077_v34 = vld [vmem:[#allocation0 + $0x200] sm:$0xf]  ;;  %v1424_v31 = vpop.permute.xlu1 %1423   ;;  %v1415_v32 = vpop.permute.xlu0 %1414  }
 0x178   :  { %v2084_v35 = vld [vmem:[#allocation0 + $0x208] sm:$0xf]  ;;  %v2091_v55 = vld [vmem:[#allocation0 + $0x210] sm:$0xf]  ;;  %4962 = vst [vmem:[%s7479_s1 + $0x134] sm:$0xf] %v2168_v33 }
 0x179   :  { %4963 = vst [vmem:[%s7479_s1 + $0x138] sm:$0xf] %v2175_v53  ;;  %4964 = vst [vmem:[%s7479_s1 + $0x13c] sm:$0xf] %v2182_v54  ;;  %v2098_v37 = vld [vmem:[#allocation0 + $0x218] sm:$0xf] }
 0x17a   :  { %v2105_v3 = vld [vmem:[#allocation0 + $0x220] sm:$0xf]  ;;  %v2112_v0 = vld [vmem:[#allocation0 + $0x228] sm:$0xf]  ;;  %4949 = vst [vmem:[%s7479_s1 + $0x100] sm:$0xf] %v2077_v34 }
 0x17b   :  { %4950 = vst [vmem:[%s7479_s1 + $0x104] sm:$0xf] %v2084_v35  ;;  %4951 = vst [vmem:[%s7479_s1 + $0x108] sm:$0xf] %v2091_v55  ;;  %v2119_v38 = vld [vmem:[#allocation0 + $0x230] sm:$0xf] }
 0x17c   :  { %1355 = vst.msk [vmem:[#allocation0 + $0x443] ss:$8 sm:$0xf] %vm3_vm0, %v1352_v1   ;;  %1357 = vst.msk [vmem:[#allocation0 + $0x443] ss:$8 sm:$0xf0] %vm3_vm0, %v1352_v1  }
 0x17d   :  { %1346 = vst.msk [vmem:[#allocation0 + $0x403] ss:$8 sm:$0xf] %vm3_vm0, %v1343_v36   ;;  %1348 = vst.msk [vmem:[#allocation0 + $0x403] ss:$8 sm:$0xf0] %vm3_vm0, %v1343_v36  }
 0x17e   :  { %v2126_v39 = vld [vmem:[#allocation0 + $0x238] sm:$0xf]  ;;  %4952 = vst [vmem:[%s7479_s1 + $0x10c] sm:$0xf] %v2098_v37  ;;  %4953 = vst [vmem:[%s7479_s1 + $0x110] sm:$0xf] %v2105_v3 }
 0x17f   :  { %4954 = vst [vmem:[%s7479_s1 + $0x114] sm:$0xf] %v2112_v0  ;;  %v2245_v40 = vld [vmem:[#allocation0 + $0x2c0] sm:$0xf]  ;;  %4955 = vst [vmem:[%s7479_s1 + $0x118] sm:$0xf] %v2119_v38 }
 0x180   :  { %4956 = vst [vmem:[%s7479_s1 + $0x11c] sm:$0xf] %v2126_v39  ;;  %v2252_v41 = vld [vmem:[#allocation0 + $0x2c8] sm:$0xf]  ;;  %v2259_v2 = vld [vmem:[#allocation0 + $0x2d0] sm:$0xf]  ;;  %v1442_v39 = vpop.permute.xlu1 %1441  }
 0x181   :  { %v2266_v4 = vld [vmem:[#allocation0 + $0x2d8] sm:$0xf]  ;;  %4973 = vst [vmem:[%s7479_s1 + $0x160] sm:$0xf] %v2245_v40  ;;  %v2273_v42 = vld [vmem:[#allocation0 + $0x2e0] sm:$0xf]  ;;  %v1433_v40 = vpop.permute.xlu0 %1432  }
 0x182   :  { %v2280_v43 = vld [vmem:[#allocation0 + $0x2e8] sm:$0xf]  ;;  %v2287_v5 = vld [vmem:[#allocation0 + $0x2f0] sm:$0xf]  ;;  %4974 = vst [vmem:[%s7479_s1 + $0x164] sm:$0xf] %v2252_v41 }
 0x183   :  { %4975 = vst [vmem:[%s7479_s1 + $0x168] sm:$0xf] %v2259_v2  ;;  %4976 = vst [vmem:[%s7479_s1 + $0x16c] sm:$0xf] %v2266_v4  ;;  %v2294_v45 = vld [vmem:[#allocation0 + $0x2f8] sm:$0xf] }
 0x184   :  { %v2189_v7 = vld [vmem:[#allocation0 + $0x280] sm:$0xf]  ;;  %v2196_v8 = vld [vmem:[#allocation0 + $0x288] sm:$0xf]  ;;  %4977 = vst [vmem:[%s7479_s1 + $0x170] sm:$0xf] %v2273_v42 }
 0x185   :  { %4978 = vst [vmem:[%s7479_s1 + $0x174] sm:$0xf] %v2280_v43  ;;  %4979 = vst [vmem:[%s7479_s1 + $0x178] sm:$0xf] %v2287_v5  ;;  %v2203_v46 = vld [vmem:[#allocation0 + $0x290] sm:$0xf] }
 0x186   :  { %1373 = vst.msk [vmem:[#allocation0 + $0x4c3] ss:$8 sm:$0xf] %vm3_vm0, %v1370_v6   ;;  %1375 = vst.msk [vmem:[#allocation0 + $0x4c3] ss:$8 sm:$0xf0] %vm3_vm0, %v1370_v6  }
 0x187   :  { %1364 = vst.msk [vmem:[#allocation0 + $0x483] ss:$8 sm:$0xf] %vm3_vm0, %v1361_v44   ;;  %1366 = vst.msk [vmem:[#allocation0 + $0x483] ss:$8 sm:$0xf0] %vm3_vm0, %v1361_v44  }
 0x188   :  { %v2210_v47 = vld [vmem:[#allocation0 + $0x298] sm:$0xf]  ;;  %v2217_v9 = vld [vmem:[#allocation0 + $0x2a0] sm:$0xf]  ;;  %4980 = vst [vmem:[%s7479_s1 + $0x17c] sm:$0xf] %v2294_v45 }
 0x189   :  { %4965 = vst [vmem:[%s7479_s1 + $0x140] sm:$0xf] %v2189_v7  ;;  %4966 = vst [vmem:[%s7479_s1 + $0x144] sm:$0xf] %v2196_v8  ;;  %v2224_v10 = vld [vmem:[#allocation0 + $0x2a8] sm:$0xf] }
 0x18a   :  { %v2231_v11 = vld [vmem:[#allocation0 + $0x2b0] sm:$0xf]  ;;  %v2238_v12 = vld [vmem:[#allocation0 + $0x2b8] sm:$0xf]  ;;  %4967 = vst [vmem:[%s7479_s1 + $0x148] sm:$0xf] %v2203_v46 }
 0x18b   :  { %4968 = vst [vmem:[%s7479_s1 + $0x14c] sm:$0xf] %v2210_v47  ;;  %4969 = vst [vmem:[%s7479_s1 + $0x150] sm:$0xf] %v2217_v9  ;;  %v2357_v13 = vld [vmem:[#allocation0 + $0x340] sm:$0xf]  ;;  %v1460_v47 = vpop.permute.xlu1 %1459   ;;  %v1451_v9 = vpop.permute.xlu0 %1450  }
 0x18c   :  { %4970 = vst [vmem:[%s7479_s1 + $0x154] sm:$0xf] %v2224_v10  ;;  %4971 = vst [vmem:[%s7479_s1 + $0x158] sm:$0xf] %v2231_v11  ;;  %v2364_v56 = vld [vmem:[#allocation0 + $0x348] sm:$0xf] }
 0x18d   :  { %4972 = vst [vmem:[%s7479_s1 + $0x15c] sm:$0xf] %v2238_v12  ;;  %v2371_v14 = vld [vmem:[#allocation0 + $0x350] sm:$0xf]  ;;  %v2378_v17 = vld [vmem:[#allocation0 + $0x358] sm:$0xf] }
 0x18e   :  { %v2385_v57 = vld [vmem:[#allocation0 + $0x360] sm:$0xf]  ;;  %v2392_v58 = vld [vmem:[#allocation0 + $0x368] sm:$0xf]  ;;  %4989 = vst [vmem:[%s7479_s1 + $0x1a0] sm:$0xf] %v2357_v13 }
 0x18f   :  { %4990 = vst [vmem:[%s7479_s1 + $0x1a4] sm:$0xf] %v2364_v56  ;;  %4991 = vst [vmem:[%s7479_s1 + $0x1a8] sm:$0xf] %v2371_v14  ;;  %v2399_v18 = vld [vmem:[#allocation0 + $0x370] sm:$0xf] }
 0x190   :  { %1391 = vst.msk [vmem:[#allocation0 + $0x543] ss:$8 sm:$0xf] %vm3_vm0, %v1388_v15   ;;  %1393 = vst.msk [vmem:[#allocation0 + $0x543] ss:$8 sm:$0xf0] %vm3_vm0, %v1388_v15  }
 0x191   :  { %1382 = vst.msk [vmem:[#allocation0 + $0x503] ss:$8 sm:$0xf] %vm3_vm0, %v1379_v16   ;;  %1384 = vst.msk [vmem:[#allocation0 + $0x503] ss:$8 sm:$0xf0] %vm3_vm0, %v1379_v16  }
 0x192   :  { %v2406_v19 = vld [vmem:[#allocation0 + $0x378] sm:$0xf]  ;;  %v2301_v59 = vld [vmem:[#allocation0 + $0x300] sm:$0xf]  ;;  %4992 = vst [vmem:[%s7479_s1 + $0x1ac] sm:$0xf] %v2378_v17 }
 0x193   :  { %4993 = vst [vmem:[%s7479_s1 + $0x1b0] sm:$0xf] %v2385_v57  ;;  %4994 = vst [vmem:[%s7479_s1 + $0x1b4] sm:$0xf] %v2392_v58  ;;  %v2308_v60 = vld [vmem:[#allocation0 + $0x308] sm:$0xf] }
 0x194   :  { %v2315_v20 = vld [vmem:[#allocation0 + $0x310] sm:$0xf]  ;;  %v2322_v21 = vld [vmem:[#allocation0 + $0x318] sm:$0xf]  ;;  %4995 = vst [vmem:[%s7479_s1 + $0x1b8] sm:$0xf] %v2399_v18 }
 0x195   :  { %4996 = vst [vmem:[%s7479_s1 + $0x1bc] sm:$0xf] %v2406_v19  ;;  %4981 = vst [vmem:[%s7479_s1 + $0x180] sm:$0xf] %v2301_v59  ;;  %v2329_v61 = vld [vmem:[#allocation0 + $0x320] sm:$0xf]  ;;  %v1478_v19 = vpop.permute.xlu1 %1477   ;;  %v1469_v59 = vpop.permute.xlu0 %1468  }
 0x196   :  { %v2336_v62 = vld [vmem:[#allocation0 + $0x328] sm:$0xf]  ;;  %v2343_v22 = vld [vmem:[#allocation0 + $0x330] sm:$0xf]  ;;  %4982 = vst [vmem:[%s7479_s1 + $0x184] sm:$0xf] %v2308_v60 }
 0x197   :  { %4983 = vst [vmem:[%s7479_s1 + $0x188] sm:$0xf] %v2315_v20  ;;  %4984 = vst [vmem:[%s7479_s1 + $0x18c] sm:$0xf] %v2322_v21  ;;  %v2350_v25 = vld [vmem:[#allocation0 + $0x338] sm:$0xf] }
 0x198   :  { %v2469_v63 = vld [vmem:[#allocation0 + $0x3c0] sm:$0xf]  ;;  %v2476_v48 = vld [vmem:[#allocation0 + $0x3c8] sm:$0xf]  ;;  %4985 = vst [vmem:[%s7479_s1 + $0x190] sm:$0xf] %v2329_v61 }
 0x199   :  { %4986 = vst [vmem:[%s7479_s1 + $0x194] sm:$0xf] %v2336_v62  ;;  %4987 = vst [vmem:[%s7479_s1 + $0x198] sm:$0xf] %v2343_v22  ;;  %v2483_v26 = vld [vmem:[#allocation0 + $0x3d0] sm:$0xf] }
 0x19a   :  { %1409 = vst.msk [vmem:[#allocation0 + $0x5c3] ss:$8 sm:$0xf] %vm3_vm0, %v1406_v23   ;;  %1411 = vst.msk [vmem:[#allocation0 + $0x5c3] ss:$8 sm:$0xf0] %vm3_vm0, %v1406_v23  }
 0x19b   :  { %1400 = vst.msk [vmem:[#allocation0 + $0x583] ss:$8 sm:$0xf] %vm3_vm0, %v1397_v24   ;;  %1402 = vst.msk [vmem:[#allocation0 + $0x583] ss:$8 sm:$0xf0] %vm3_vm0, %v1397_v24  }
 0x19c   :  { %5005 = vst [vmem:[%s7479_s1 + $0x1e0] sm:$0xf] %v2469_v63  ;;  %5006 = vst [vmem:[%s7479_s1 + $0x1e4] sm:$0xf] %v2476_v48  ;;  %v2490_v27 = vld [vmem:[#allocation0 + $0x3d8] sm:$0xf] }
 0x19d   :  { %4988 = vst [vmem:[%s7479_s1 + $0x19c] sm:$0xf] %v2350_v25  ;;  %v2497_v49 = vld [vmem:[#allocation0 + $0x3e0] sm:$0xf]  ;;  %5007 = vst [vmem:[%s7479_s1 + $0x1e8] sm:$0xf] %v2483_v26 }
 0x19e   :  { %5008 = vst [vmem:[%s7479_s1 + $0x1ec] sm:$0xf] %v2490_v27  ;;  %v2504_v50 = vld [vmem:[#allocation0 + $0x3e8] sm:$0xf]  ;;  %v2511_v28 = vld [vmem:[#allocation0 + $0x3f0] sm:$0xf]  ;;  %v1496_v27 = vpop.permute.xlu1 %1495  }
 0x19f   :  { %v2518_v29 = vld [vmem:[#allocation0 + $0x3f8] sm:$0xf]  ;;  %5009 = vst [vmem:[%s7479_s1 + $0x1f0] sm:$0xf] %v2497_v49  ;;  %v2413_v51 = vld [vmem:[#allocation0 + $0x380] sm:$0xf]  ;;  %v1487_v49 = vpop.permute.xlu0 %1486  }
 0x1a0   :  { %v2420_v52 = vld [vmem:[#allocation0 + $0x388] sm:$0xf]  ;;  %v2427_v30 = vld [vmem:[#allocation0 + $0x390] sm:$0xf]  ;;  %5010 = vst [vmem:[%s7479_s1 + $0x1f4] sm:$0xf] %v2504_v50 }
 0x1a1   :  { %5011 = vst [vmem:[%s7479_s1 + $0x1f8] sm:$0xf] %v2511_v28  ;;  %5012 = vst [vmem:[%s7479_s1 + $0x1fc] sm:$0xf] %v2518_v29  ;;  %v2434_v33 = vld [vmem:[#allocation0 + $0x398] sm:$0xf] }
 0x1a2   :  { %4997 = vst [vmem:[%s7479_s1 + $0x1c0] sm:$0xf] %v2413_v51  ;;  %4998 = vst [vmem:[%s7479_s1 + $0x1c4] sm:$0xf] %v2420_v52  ;;  %v2441_v53 = vld [vmem:[#allocation0 + $0x3a0] sm:$0xf] }
 0x1a3   :  { %4999 = vst [vmem:[%s7479_s1 + $0x1c8] sm:$0xf] %v2427_v30  ;;  %v2448_v54 = vld [vmem:[#allocation0 + $0x3a8] sm:$0xf]  ;;  %5000 = vst [vmem:[%s7479_s1 + $0x1cc] sm:$0xf] %v2434_v33 }
 0x1a4   :  { %1427 = vst.msk [vmem:[#allocation0 + $0x643] ss:$8 sm:$0xf] %vm3_vm0, %v1424_v31   ;;  %1429 = vst.msk [vmem:[#allocation0 + $0x643] ss:$8 sm:$0xf0] %vm3_vm0, %v1424_v31  }
 0x1a5   :  { %1418 = vst.msk [vmem:[#allocation0 + $0x603] ss:$8 sm:$0xf] %vm3_vm0, %v1415_v32   ;;  %1420 = vst.msk [vmem:[#allocation0 + $0x603] ss:$8 sm:$0xf0] %vm3_vm0, %v1415_v32  }
 0x1a6   :  { %5001 = vst [vmem:[%s7479_s1 + $0x1d0] sm:$0xf] %v2441_v53  ;;  %5002 = vst [vmem:[%s7479_s1 + $0x1d4] sm:$0xf] %v2448_v54  ;;  %v2455_v34 = vld [vmem:[#allocation0 + $0x3b0] sm:$0xf] }
 0x1a7   :  { %v2462_v35 = vld [vmem:[#allocation0 + $0x3b8] sm:$0xf]  ;;  %v2581_v55 = vld [vmem:[#allocation0 + $0x440] sm:$0xf]  ;;  %5003 = vst [vmem:[%s7479_s1 + $0x1d8] sm:$0xf] %v2455_v34 }
 0x1a8   :  { %5004 = vst [vmem:[%s7479_s1 + $0x1dc] sm:$0xf] %v2462_v35  ;;  %5021 = vst [vmem:[%s7479_s1 + $0x220] sm:$0xf] %v2581_v55  ;;  %v2588_v1 = vld [vmem:[#allocation0 + $0x448] sm:$0xf]  ;;  %v1514_v35 = vpop.permute.xlu1 %1513   ;;  %v1505_v55 = vpop.permute.xlu0 %1504  }
 0x1a9   :  { %v2595_v36 = vld [vmem:[#allocation0 + $0x450] sm:$0xf]  ;;  %v2602_v37 = vld [vmem:[#allocation0 + $0x458] sm:$0xf]  ;;  %5022 = vst [vmem:[%s7479_s1 + $0x224] sm:$0xf] %v2588_v1 }
 0x1aa   :  { %5023 = vst [vmem:[%s7479_s1 + $0x228] sm:$0xf] %v2595_v36  ;;  %5024 = vst [vmem:[%s7479_s1 + $0x22c] sm:$0xf] %v2602_v37  ;;  %v2609_v3 = vld [vmem:[#allocation0 + $0x460] sm:$0xf] }
 0x1ab   :  { %v2616_v0 = vld [vmem:[#allocation0 + $0x468] sm:$0xf]  ;;  %v2623_v38 = vld [vmem:[#allocation0 + $0x470] sm:$0xf]  ;;  %5025 = vst [vmem:[%s7479_s1 + $0x230] sm:$0xf] %v2609_v3 }
 0x1ac   :  { %5026 = vst [vmem:[%s7479_s1 + $0x234] sm:$0xf] %v2616_v0  ;;  %5027 = vst [vmem:[%s7479_s1 + $0x238] sm:$0xf] %v2623_v38  ;;  %v2630_v41 = vld [vmem:[#allocation0 + $0x478] sm:$0xf] }
 0x1ad   :  { %v2525_v2 = vld [vmem:[#allocation0 + $0x400] sm:$0xf]  ;;  %v2532_v4 = vld [vmem:[#allocation0 + $0x408] sm:$0xf]  ;;  %5028 = vst [vmem:[%s7479_s1 + $0x23c] sm:$0xf] %v2630_v41 }
 0x1ae   :  { %1445 = vst.msk [vmem:[#allocation0 + $0x6c3] ss:$8 sm:$0xf] %vm3_vm0, %v1442_v39   ;;  %1447 = vst.msk [vmem:[#allocation0 + $0x6c3] ss:$8 sm:$0xf0] %vm3_vm0, %v1442_v39  }
 0x1af   :  { %1436 = vst.msk [vmem:[#allocation0 + $0x683] ss:$8 sm:$0xf] %vm3_vm0, %v1433_v40   ;;  %1438 = vst.msk [vmem:[#allocation0 + $0x683] ss:$8 sm:$0xf0] %vm3_vm0, %v1433_v40  }
 0x1b0   :  { %5013 = vst [vmem:[%s7479_s1 + $0x200] sm:$0xf] %v2525_v2  ;;  %5014 = vst [vmem:[%s7479_s1 + $0x204] sm:$0xf] %v2532_v4  ;;  %v2539_v42 = vld [vmem:[#allocation0 + $0x410] sm:$0xf] }
 0x1b1   :  { %v2546_v43 = vld [vmem:[#allocation0 + $0x418] sm:$0xf]  ;;  %v2553_v5 = vld [vmem:[#allocation0 + $0x420] sm:$0xf]  ;;  %5015 = vst [vmem:[%s7479_s1 + $0x208] sm:$0xf] %v2539_v42 }
 0x1b2   :  { %5016 = vst [vmem:[%s7479_s1 + $0x20c] sm:$0xf] %v2546_v43  ;;  %5017 = vst [vmem:[%s7479_s1 + $0x210] sm:$0xf] %v2553_v5  ;;  %v2560_v6 = vld [vmem:[#allocation0 + $0x428] sm:$0xf]  ;;  %v1532_v43 = vpop.permute.xlu1 %1531   ;;  %v1523_v5 = vpop.permute.xlu0 %1522  }
 0x1b3   :  { %v2567_v44 = vld [vmem:[#allocation0 + $0x430] sm:$0xf]  ;;  %v2574_v45 = vld [vmem:[#allocation0 + $0x438] sm:$0xf]  ;;  %5018 = vst [vmem:[%s7479_s1 + $0x214] sm:$0xf] %v2560_v6 }
 0x1b4   :  { %5019 = vst [vmem:[%s7479_s1 + $0x218] sm:$0xf] %v2567_v44  ;;  %5020 = vst [vmem:[%s7479_s1 + $0x21c] sm:$0xf] %v2574_v45  ;;  %v2693_v7 = vld [vmem:[#allocation0 + $0x4c0] sm:$0xf] }
 0x1b5   :  { %v2700_v8 = vld [vmem:[#allocation0 + $0x4c8] sm:$0xf]  ;;  %v2707_v46 = vld [vmem:[#allocation0 + $0x4d0] sm:$0xf]  ;;  %5037 = vst [vmem:[%s7479_s1 + $0x260] sm:$0xf] %v2693_v7 }
 0x1b6   :  { %5038 = vst [vmem:[%s7479_s1 + $0x264] sm:$0xf] %v2700_v8  ;;  %5039 = vst [vmem:[%s7479_s1 + $0x268] sm:$0xf] %v2707_v46  ;;  %v2714_v10 = vld [vmem:[#allocation0 + $0x4d8] sm:$0xf] }
 0x1b7   :  { %v2721_v11 = vld [vmem:[#allocation0 + $0x4e0] sm:$0xf]  ;;  %v2728_v12 = vld [vmem:[#allocation0 + $0x4e8] sm:$0xf]  ;;  %5040 = vst [vmem:[%s7479_s1 + $0x26c] sm:$0xf] %v2714_v10 }
 0x1b8   :  { %1463 = vst.msk [vmem:[#allocation0 + $0x743] ss:$8 sm:$0xf] %vm3_vm0, %v1460_v47   ;;  %1465 = vst.msk [vmem:[#allocation0 + $0x743] ss:$8 sm:$0xf0] %vm3_vm0, %v1460_v47  }
 0x1b9   :  { %1454 = vst.msk [vmem:[#allocation0 + $0x703] ss:$8 sm:$0xf] %vm3_vm0, %v1451_v9   ;;  %1456 = vst.msk [vmem:[#allocation0 + $0x703] ss:$8 sm:$0xf0] %vm3_vm0, %v1451_v9  }
 0x1ba   :  { %5041 = vst [vmem:[%s7479_s1 + $0x270] sm:$0xf] %v2721_v11  ;;  %5042 = vst [vmem:[%s7479_s1 + $0x274] sm:$0xf] %v2728_v12  ;;  %v2735_v13 = vld [vmem:[#allocation0 + $0x4f0] sm:$0xf] }
 0x1bb   :  { %v2742_v56 = vld [vmem:[#allocation0 + $0x4f8] sm:$0xf]  ;;  %v2637_v14 = vld [vmem:[#allocation0 + $0x480] sm:$0xf]  ;;  %5043 = vst [vmem:[%s7479_s1 + $0x278] sm:$0xf] %v2735_v13 }
 0x1bc   :  { %5044 = vst [vmem:[%s7479_s1 + $0x27c] sm:$0xf] %v2742_v56  ;;  %5029 = vst [vmem:[%s7479_s1 + $0x240] sm:$0xf] %v2637_v14  ;;  %v2644_v15 = vld [vmem:[#allocation0 + $0x488] sm:$0xf]  ;;  %v1550_v56 = vpop.permute.xlu1 %1549   ;;  %v1541_v14 = vpop.permute.xlu0 %1540  }
 0x1bd   :  { %v2651_v16 = vld [vmem:[#allocation0 + $0x490] sm:$0xf]  ;;  %v2658_v17 = vld [vmem:[#allocation0 + $0x498] sm:$0xf]  ;;  %5030 = vst [vmem:[%s7479_s1 + $0x244] sm:$0xf] %v2644_v15 }
 0x1be   :  { %5031 = vst [vmem:[%s7479_s1 + $0x248] sm:$0xf] %v2651_v16  ;;  %5032 = vst [vmem:[%s7479_s1 + $0x24c] sm:$0xf] %v2658_v17  ;;  %v2665_v57 = vld [vmem:[#allocation0 + $0x4a0] sm:$0xf] }
 0x1bf   :  { %v2672_v58 = vld [vmem:[#allocation0 + $0x4a8] sm:$0xf]  ;;  %v2679_v18 = vld [vmem:[#allocation0 + $0x4b0] sm:$0xf]  ;;  %5033 = vst [vmem:[%s7479_s1 + $0x250] sm:$0xf] %v2665_v57 }
 0x1c0   :  { %5034 = vst [vmem:[%s7479_s1 + $0x254] sm:$0xf] %v2672_v58  ;;  %5035 = vst [vmem:[%s7479_s1 + $0x258] sm:$0xf] %v2679_v18  ;;  %v2686_v60 = vld [vmem:[#allocation0 + $0x4b8] sm:$0xf] }
 0x1c1   :  { %v2805_v20 = vld [vmem:[#allocation0 + $0x540] sm:$0xf]  ;;  %v2812_v21 = vld [vmem:[#allocation0 + $0x548] sm:$0xf]  ;;  %5036 = vst [vmem:[%s7479_s1 + $0x25c] sm:$0xf] %v2686_v60 }
 0x1c2   :  { %1481 = vst.msk [vmem:[#allocation0 + $0x7c3] ss:$8 sm:$0xf] %vm3_vm0, %v1478_v19   ;;  %1483 = vst.msk [vmem:[#allocation0 + $0x7c3] ss:$8 sm:$0xf0] %vm3_vm0, %v1478_v19  }
 0x1c3   :  { %1472 = vst.msk [vmem:[#allocation0 + $0x783] ss:$8 sm:$0xf] %vm3_vm0, %v1469_v59   ;;  %1474 = vst.msk [vmem:[#allocation0 + $0x783] ss:$8 sm:$0xf0] %vm3_vm0, %v1469_v59  }
 0x1c4   :  { %5053 = vst [vmem:[%s7479_s1 + $0x2a0] sm:$0xf] %v2805_v20  ;;  %5054 = vst [vmem:[%s7479_s1 + $0x2a4] sm:$0xf] %v2812_v21  ;;  %v2819_v61 = vld [vmem:[#allocation0 + $0x550] sm:$0xf] }
 0x1c5   :  { %v2826_v62 = vld [vmem:[#allocation0 + $0x558] sm:$0xf]  ;;  %v2833_v22 = vld [vmem:[#allocation0 + $0x560] sm:$0xf]  ;;  %5055 = vst [vmem:[%s7479_s1 + $0x2a8] sm:$0xf] %v2819_v61 }
 0x1c6   :  { %5056 = vst [vmem:[%s7479_s1 + $0x2ac] sm:$0xf] %v2826_v62  ;;  %5057 = vst [vmem:[%s7479_s1 + $0x2b0] sm:$0xf] %v2833_v22  ;;  %v2840_v23 = vld [vmem:[#allocation0 + $0x568] sm:$0xf]  ;;  %v1568_v62 = vpop.permute.xlu1 %1567   ;;  %v1559_v22 = vpop.permute.xlu0 %1558  }
 0x1c7   :  { %v2847_v24 = vld [vmem:[#allocation0 + $0x570] sm:$0xf]  ;;  %v2854_v25 = vld [vmem:[#allocation0 + $0x578] sm:$0xf]  ;;  %5058 = vst [vmem:[%s7479_s1 + $0x2b4] sm:$0xf] %v2840_v23 }
 0x1c8   :  { %5059 = vst [vmem:[%s7479_s1 + $0x2b8] sm:$0xf] %v2847_v24  ;;  %5060 = vst [vmem:[%s7479_s1 + $0x2bc] sm:$0xf] %v2854_v25  ;;  %v2749_v63 = vld [vmem:[#allocation0 + $0x500] sm:$0xf] }
 0x1c9   :  { %v2756_v48 = vld [vmem:[#allocation0 + $0x508] sm:$0xf]  ;;  %v2763_v26 = vld [vmem:[#allocation0 + $0x510] sm:$0xf]  ;;  %5045 = vst [vmem:[%s7479_s1 + $0x280] sm:$0xf] %v2749_v63 }
 0x1ca   :  { %5046 = vst [vmem:[%s7479_s1 + $0x284] sm:$0xf] %v2756_v48  ;;  %5047 = vst [vmem:[%s7479_s1 + $0x288] sm:$0xf] %v2763_v26  ;;  %v2770_v50 = vld [vmem:[#allocation0 + $0x518] sm:$0xf] }
 0x1cb   :  { %v2777_v28 = vld [vmem:[#allocation0 + $0x520] sm:$0xf]  ;;  %v2784_v29 = vld [vmem:[#allocation0 + $0x528] sm:$0xf]  ;;  %5048 = vst [vmem:[%s7479_s1 + $0x28c] sm:$0xf] %v2770_v50 }
 0x1cc   :  { %1499 = vst.msk [vmem:[#allocation0 + $0x843] ss:$8 sm:$0xf] %vm3_vm0, %v1496_v27   ;;  %1501 = vst.msk [vmem:[#allocation0 + $0x843] ss:$8 sm:$0xf0] %vm3_vm0, %v1496_v27  }
 0x1cd   :  { %1490 = vst.msk [vmem:[#allocation0 + $0x803] ss:$8 sm:$0xf] %vm3_vm0, %v1487_v49   ;;  %1492 = vst.msk [vmem:[#allocation0 + $0x803] ss:$8 sm:$0xf0] %vm3_vm0, %v1487_v49  }
 0x1ce   :  { %5049 = vst [vmem:[%s7479_s1 + $0x290] sm:$0xf] %v2777_v28  ;;  %5050 = vst [vmem:[%s7479_s1 + $0x294] sm:$0xf] %v2784_v29  ;;  %v2791_v51 = vld [vmem:[#allocation0 + $0x530] sm:$0xf] }
 0x1cf   :  { %v2798_v52 = vld [vmem:[#allocation0 + $0x538] sm:$0xf]  ;;  %v2917_v30 = vld [vmem:[#allocation0 + $0x5c0] sm:$0xf]  ;;  %5051 = vst [vmem:[%s7479_s1 + $0x298] sm:$0xf] %v2791_v51 }
 0x1d0   :  { %5052 = vst [vmem:[%s7479_s1 + $0x29c] sm:$0xf] %v2798_v52  ;;  %5069 = vst [vmem:[%s7479_s1 + $0x2e0] sm:$0xf] %v2917_v30  ;;  %v2924_v31 = vld [vmem:[#allocation0 + $0x5c8] sm:$0xf]  ;;  %v1586_v52 = vpop.permute.xlu1 %1585   ;;  %v1577_v30 = vpop.permute.xlu0 %1576  }
 0x1d1   :  { %v2931_v32 = vld [vmem:[#allocation0 + $0x5d0] sm:$0xf]  ;;  %v2938_v33 = vld [vmem:[#allocation0 + $0x5d8] sm:$0xf]  ;;  %5070 = vst [vmem:[%s7479_s1 + $0x2e4] sm:$0xf] %v2924_v31 }
 0x1d2   :  { %5071 = vst [vmem:[%s7479_s1 + $0x2e8] sm:$0xf] %v2931_v32  ;;  %5072 = vst [vmem:[%s7479_s1 + $0x2ec] sm:$0xf] %v2938_v33  ;;  %v2945_v53 = vld [vmem:[#allocation0 + $0x5e0] sm:$0xf] }
 0x1d3   :  { %v2952_v54 = vld [vmem:[#allocation0 + $0x5e8] sm:$0xf]  ;;  %v2959_v34 = vld [vmem:[#allocation0 + $0x5f0] sm:$0xf]  ;;  %5073 = vst [vmem:[%s7479_s1 + $0x2f0] sm:$0xf] %v2945_v53 }
 0x1d4   :  { %5074 = vst [vmem:[%s7479_s1 + $0x2f4] sm:$0xf] %v2952_v54  ;;  %5075 = vst [vmem:[%s7479_s1 + $0x2f8] sm:$0xf] %v2959_v34  ;;  %v2966_v1 = vld [vmem:[#allocation0 + $0x5f8] sm:$0xf] }
 0x1d5   :  { %v2861_v36 = vld [vmem:[#allocation0 + $0x580] sm:$0xf]  ;;  %v2868_v37 = vld [vmem:[#allocation0 + $0x588] sm:$0xf]  ;;  %5076 = vst [vmem:[%s7479_s1 + $0x2fc] sm:$0xf] %v2966_v1 }
 0x1d6   :  { %1517 = vst.msk [vmem:[#allocation0 + $0x8c3] ss:$8 sm:$0xf] %vm3_vm0, %v1514_v35   ;;  %1519 = vst.msk [vmem:[#allocation0 + $0x8c3] ss:$8 sm:$0xf0] %vm3_vm0, %v1514_v35  }
 0x1d7   :  { %1508 = vst.msk [vmem:[#allocation0 + $0x883] ss:$8 sm:$0xf] %vm3_vm0, %v1505_v55   ;;  %1510 = vst.msk [vmem:[#allocation0 + $0x883] ss:$8 sm:$0xf0] %vm3_vm0, %v1505_v55  }
 0x1d8   :  { %5061 = vst [vmem:[%s7479_s1 + $0x2c0] sm:$0xf] %v2861_v36  ;;  %5062 = vst [vmem:[%s7479_s1 + $0x2c4] sm:$0xf] %v2868_v37  ;;  %v2875_v3 = vld [vmem:[#allocation0 + $0x590] sm:$0xf] }
 0x1d9   :  { %v2882_v0 = vld [vmem:[#allocation0 + $0x598] sm:$0xf]  ;;  %v2889_v38 = vld [vmem:[#allocation0 + $0x5a0] sm:$0xf]  ;;  %5063 = vst [vmem:[%s7479_s1 + $0x2c8] sm:$0xf] %v2875_v3 }
 0x1da   :  { %5064 = vst [vmem:[%s7479_s1 + $0x2cc] sm:$0xf] %v2882_v0  ;;  %5065 = vst [vmem:[%s7479_s1 + $0x2d0] sm:$0xf] %v2889_v38  ;;  %v2896_v39 = vld [vmem:[#allocation0 + $0x5a8] sm:$0xf]  ;;  %v1604_v0 = vpop.permute.xlu1 %1603   ;;  %v1595_v38 = vpop.permute.xlu0 %1594  }
 0x1db   :  { %v2903_v40 = vld [vmem:[#allocation0 + $0x5b0] sm:$0xf]  ;;  %v2910_v41 = vld [vmem:[#allocation0 + $0x5b8] sm:$0xf]  ;;  %5066 = vst [vmem:[%s7479_s1 + $0x2d4] sm:$0xf] %v2896_v39 }
 0x1dc   :  { %5067 = vst [vmem:[%s7479_s1 + $0x2d8] sm:$0xf] %v2903_v40  ;;  %5068 = vst [vmem:[%s7479_s1 + $0x2dc] sm:$0xf] %v2910_v41  ;;  %v3029_v2 = vld [vmem:[#allocation0 + $0x640] sm:$0xf] }
 0x1dd   :  { %v3036_v4 = vld [vmem:[#allocation0 + $0x648] sm:$0xf]  ;;  %v3043_v42 = vld [vmem:[#allocation0 + $0x650] sm:$0xf]  ;;  %5085 = vst [vmem:[%s7479_s1 + $0x320] sm:$0xf] %v3029_v2 }
 0x1de   :  { %5086 = vst [vmem:[%s7479_s1 + $0x324] sm:$0xf] %v3036_v4  ;;  %5087 = vst [vmem:[%s7479_s1 + $0x328] sm:$0xf] %v3043_v42  ;;  %v3050_v6 = vld [vmem:[#allocation0 + $0x658] sm:$0xf] }
 0x1df   :  { %v3057_v44 = vld [vmem:[#allocation0 + $0x660] sm:$0xf]  ;;  %v3064_v45 = vld [vmem:[#allocation0 + $0x668] sm:$0xf]  ;;  %5088 = vst [vmem:[%s7479_s1 + $0x32c] sm:$0xf] %v3050_v6 }
 0x1e0   :  { %1535 = vst.msk [vmem:[#allocation0 + $0x943] ss:$8 sm:$0xf] %vm3_vm0, %v1532_v43   ;;  %1537 = vst.msk [vmem:[#allocation0 + $0x943] ss:$8 sm:$0xf0] %vm3_vm0, %v1532_v43  }
 0x1e1   :  { %1526 = vst.msk [vmem:[#allocation0 + $0x903] ss:$8 sm:$0xf] %vm3_vm0, %v1523_v5   ;;  %1528 = vst.msk [vmem:[#allocation0 + $0x903] ss:$8 sm:$0xf0] %vm3_vm0, %v1523_v5  }
 0x1e2   :  { %5089 = vst [vmem:[%s7479_s1 + $0x330] sm:$0xf] %v3057_v44  ;;  %5090 = vst [vmem:[%s7479_s1 + $0x334] sm:$0xf] %v3064_v45  ;;  %v3071_v7 = vld [vmem:[#allocation0 + $0x670] sm:$0xf] }
 0x1e3   :  { %v3078_v8 = vld [vmem:[#allocation0 + $0x678] sm:$0xf]  ;;  %v2973_v46 = vld [vmem:[#allocation0 + $0x600] sm:$0xf]  ;;  %5091 = vst [vmem:[%s7479_s1 + $0x338] sm:$0xf] %v3071_v7 }
 0x1e4   :  { %5092 = vst [vmem:[%s7479_s1 + $0x33c] sm:$0xf] %v3078_v8  ;;  %5077 = vst [vmem:[%s7479_s1 + $0x300] sm:$0xf] %v2973_v46  ;;  %v2980_v47 = vld [vmem:[#allocation0 + $0x608] sm:$0xf]  ;;  %v1622_v8 = vpop.permute.xlu1 %1621   ;;  %v1613_v46 = vpop.permute.xlu0 %1612  }
 0x1e5   :  { %v2987_v9 = vld [vmem:[#allocation0 + $0x610] sm:$0xf]  ;;  %v2994_v10 = vld [vmem:[#allocation0 + $0x618] sm:$0xf]  ;;  %5078 = vst [vmem:[%s7479_s1 + $0x304] sm:$0xf] %v2980_v47 }
 0x1e6   :  { %5079 = vst [vmem:[%s7479_s1 + $0x308] sm:$0xf] %v2987_v9  ;;  %5080 = vst [vmem:[%s7479_s1 + $0x30c] sm:$0xf] %v2994_v10  ;;  %v3001_v11 = vld [vmem:[#allocation0 + $0x620] sm:$0xf] }
 0x1e7   :  { %v3008_v12 = vld [vmem:[#allocation0 + $0x628] sm:$0xf]  ;;  %v3015_v13 = vld [vmem:[#allocation0 + $0x630] sm:$0xf]  ;;  %5081 = vst [vmem:[%s7479_s1 + $0x310] sm:$0xf] %v3001_v11 }
 0x1e8   :  { %5082 = vst [vmem:[%s7479_s1 + $0x314] sm:$0xf] %v3008_v12  ;;  %5083 = vst [vmem:[%s7479_s1 + $0x318] sm:$0xf] %v3015_v13  ;;  %v3022_v15 = vld [vmem:[#allocation0 + $0x638] sm:$0xf] }
 0x1e9   :  { %v3141_v16 = vld [vmem:[#allocation0 + $0x6c0] sm:$0xf]  ;;  %v3148_v17 = vld [vmem:[#allocation0 + $0x6c8] sm:$0xf]  ;;  %5084 = vst [vmem:[%s7479_s1 + $0x31c] sm:$0xf] %v3022_v15 }
 0x1ea   :  { %1553 = vst.msk [vmem:[#allocation0 + $0x9c3] ss:$8 sm:$0xf] %vm3_vm0, %v1550_v56   ;;  %1555 = vst.msk [vmem:[#allocation0 + $0x9c3] ss:$8 sm:$0xf0] %vm3_vm0, %v1550_v56  }
 0x1eb   :  { %1544 = vst.msk [vmem:[#allocation0 + $0x983] ss:$8 sm:$0xf] %vm3_vm0, %v1541_v14   ;;  %1546 = vst.msk [vmem:[#allocation0 + $0x983] ss:$8 sm:$0xf0] %vm3_vm0, %v1541_v14  }
 0x1ec   :  { %5101 = vst [vmem:[%s7479_s1 + $0x360] sm:$0xf] %v3141_v16  ;;  %5102 = vst [vmem:[%s7479_s1 + $0x364] sm:$0xf] %v3148_v17  ;;  %v3155_v57 = vld [vmem:[#allocation0 + $0x6d0] sm:$0xf] }
 0x1ed   :  { %v3162_v58 = vld [vmem:[#allocation0 + $0x6d8] sm:$0xf]  ;;  %v3169_v18 = vld [vmem:[#allocation0 + $0x6e0] sm:$0xf]  ;;  %5103 = vst [vmem:[%s7479_s1 + $0x368] sm:$0xf] %v3155_v57 }
 0x1ee   :  { %5104 = vst [vmem:[%s7479_s1 + $0x36c] sm:$0xf] %v3162_v58  ;;  %5105 = vst [vmem:[%s7479_s1 + $0x370] sm:$0xf] %v3169_v18  ;;  %v3176_v19 = vld [vmem:[#allocation0 + $0x6e8] sm:$0xf] }
 0x1ef   :  { %v3183_v59 = vld [vmem:[#allocation0 + $0x6f0] sm:$0xf]  ;;  %v3190_v60 = vld [vmem:[#allocation0 + $0x6f8] sm:$0xf]  ;;  %5106 = vst [vmem:[%s7479_s1 + $0x374] sm:$0xf] %v3176_v19 }
 0x1f0   :  { %5107 = vst [vmem:[%s7479_s1 + $0x378] sm:$0xf] %v3183_v59  ;;  %5108 = vst [vmem:[%s7479_s1 + $0x37c] sm:$0xf] %v3190_v60  ;;  %v3085_v20 = vld [vmem:[#allocation0 + $0x680] sm:$0xf] }
 0x1f1   :  { %v3092_v21 = vld [vmem:[#allocation0 + $0x688] sm:$0xf]  ;;  %v3099_v61 = vld [vmem:[#allocation0 + $0x690] sm:$0xf]  ;;  %5093 = vst [vmem:[%s7479_s1 + $0x340] sm:$0xf] %v3085_v20 }
 0x1f2   :  { %5094 = vst [vmem:[%s7479_s1 + $0x344] sm:$0xf] %v3092_v21  ;;  %5095 = vst [vmem:[%s7479_s1 + $0x348] sm:$0xf] %v3099_v61  ;;  %v3106_v23 = vld [vmem:[#allocation0 + $0x698] sm:$0xf] }
 0x1f3   :  { %v3113_v24 = vld [vmem:[#allocation0 + $0x6a0] sm:$0xf]  ;;  %v3120_v25 = vld [vmem:[#allocation0 + $0x6a8] sm:$0xf]  ;;  %5096 = vst [vmem:[%s7479_s1 + $0x34c] sm:$0xf] %v3106_v23 }
 0x1f4   :  { %1571 = vst.msk [vmem:[#allocation0 + $0xa43] ss:$8 sm:$0xf] %vm3_vm0, %v1568_v62   ;;  %1573 = vst.msk [vmem:[#allocation0 + $0xa43] ss:$8 sm:$0xf0] %vm3_vm0, %v1568_v62  }
 0x1f5   :  { %1562 = vst.msk [vmem:[#allocation0 + $0xa03] ss:$8 sm:$0xf] %vm3_vm0, %v1559_v22   ;;  %1564 = vst.msk [vmem:[#allocation0 + $0xa03] ss:$8 sm:$0xf0] %vm3_vm0, %v1559_v22  }
 0x1f6   :  { %5097 = vst [vmem:[%s7479_s1 + $0x350] sm:$0xf] %v3113_v24  ;;  %5098 = vst [vmem:[%s7479_s1 + $0x354] sm:$0xf] %v3120_v25  ;;  %v3127_v63 = vld [vmem:[#allocation0 + $0x6b0] sm:$0xf] }
 0x1f7   :  { %v3134_v48 = vld [vmem:[#allocation0 + $0x6b8] sm:$0xf]  ;;  %v3253_v26 = vld [vmem:[#allocation0 + $0x740] sm:$0xf]  ;;  %5099 = vst [vmem:[%s7479_s1 + $0x358] sm:$0xf] %v3127_v63 }
 0x1f8   :  { %5100 = vst [vmem:[%s7479_s1 + $0x35c] sm:$0xf] %v3134_v48  ;;  %5117 = vst [vmem:[%s7479_s1 + $0x3a0] sm:$0xf] %v3253_v26  ;;  %v3260_v27 = vld [vmem:[#allocation0 + $0x748] sm:$0xf] }
 0x1f9   :  { %v3267_v49 = vld [vmem:[#allocation0 + $0x750] sm:$0xf]  ;;  %v3274_v50 = vld [vmem:[#allocation0 + $0x758] sm:$0xf]  ;;  %5118 = vst [vmem:[%s7479_s1 + $0x3a4] sm:$0xf] %v3260_v27 }
 0x1fa   :  { %5119 = vst [vmem:[%s7479_s1 + $0x3a8] sm:$0xf] %v3267_v49  ;;  %5120 = vst [vmem:[%s7479_s1 + $0x3ac] sm:$0xf] %v3274_v50  ;;  %v3281_v28 = vld [vmem:[#allocation0 + $0x760] sm:$0xf] }
 0x1fb   :  { %v3288_v29 = vld [vmem:[#allocation0 + $0x768] sm:$0xf]  ;;  %v3295_v51 = vld [vmem:[#allocation0 + $0x770] sm:$0xf]  ;;  %5121 = vst [vmem:[%s7479_s1 + $0x3b0] sm:$0xf] %v3281_v28 }
 0x1fc   :  { %5122 = vst [vmem:[%s7479_s1 + $0x3b4] sm:$0xf] %v3288_v29  ;;  %5123 = vst [vmem:[%s7479_s1 + $0x3b8] sm:$0xf] %v3295_v51  ;;  %v3302_v31 = vld [vmem:[#allocation0 + $0x778] sm:$0xf] }
 0x1fd   :  { %v3197_v32 = vld [vmem:[#allocation0 + $0x700] sm:$0xf]  ;;  %v3204_v33 = vld [vmem:[#allocation0 + $0x708] sm:$0xf]  ;;  %5124 = vst [vmem:[%s7479_s1 + $0x3bc] sm:$0xf] %v3302_v31 }
 0x1fe   :  { %1589 = vst.msk [vmem:[#allocation0 + $0xac3] ss:$8 sm:$0xf] %vm3_vm0, %v1586_v52   ;;  %1591 = vst.msk [vmem:[#allocation0 + $0xac3] ss:$8 sm:$0xf0] %vm3_vm0, %v1586_v52  }
 0x1ff   :  { %1580 = vst.msk [vmem:[#allocation0 + $0xa83] ss:$8 sm:$0xf] %vm3_vm0, %v1577_v30   ;;  %1582 = vst.msk [vmem:[#allocation0 + $0xa83] ss:$8 sm:$0xf0] %vm3_vm0, %v1577_v30  }
 0x200   :  { %5109 = vst [vmem:[%s7479_s1 + $0x380] sm:$0xf] %v3197_v32  ;;  %5110 = vst [vmem:[%s7479_s1 + $0x384] sm:$0xf] %v3204_v33  ;;  %v3211_v53 = vld [vmem:[#allocation0 + $0x710] sm:$0xf] }
 0x201   :  { %v3218_v54 = vld [vmem:[#allocation0 + $0x718] sm:$0xf]  ;;  %v3225_v34 = vld [vmem:[#allocation0 + $0x720] sm:$0xf]  ;;  %5111 = vst [vmem:[%s7479_s1 + $0x388] sm:$0xf] %v3211_v53 }
 0x202   :  { %5112 = vst [vmem:[%s7479_s1 + $0x38c] sm:$0xf] %v3218_v54  ;;  %5113 = vst [vmem:[%s7479_s1 + $0x390] sm:$0xf] %v3225_v34  ;;  %v3232_v35 = vld [vmem:[#allocation0 + $0x728] sm:$0xf] }
 0x203   :  { %v3239_v55 = vld [vmem:[#allocation0 + $0x730] sm:$0xf]  ;;  %v3246_v1 = vld [vmem:[#allocation0 + $0x738] sm:$0xf]  ;;  %5114 = vst [vmem:[%s7479_s1 + $0x394] sm:$0xf] %v3232_v35 }
 0x204   :  { %5115 = vst [vmem:[%s7479_s1 + $0x398] sm:$0xf] %v3239_v55  ;;  %5116 = vst [vmem:[%s7479_s1 + $0x39c] sm:$0xf] %v3246_v1  ;;  %v3365_v36 = vld [vmem:[#allocation0 + $0x7c0] sm:$0xf] }
 0x205   :  { %v3372_v37 = vld [vmem:[#allocation0 + $0x7c8] sm:$0xf]  ;;  %v3379_v3 = vld [vmem:[#allocation0 + $0x7d0] sm:$0xf]  ;;  %5133 = vst [vmem:[%s7479_s1 + $0x3e0] sm:$0xf] %v3365_v36 }
 0x206   :  { %5134 = vst [vmem:[%s7479_s1 + $0x3e4] sm:$0xf] %v3372_v37  ;;  %5135 = vst [vmem:[%s7479_s1 + $0x3e8] sm:$0xf] %v3379_v3  ;;  %v3386_v39 = vld [vmem:[#allocation0 + $0x7d8] sm:$0xf] }
 0x207   :  { %v3393_v40 = vld [vmem:[#allocation0 + $0x7e0] sm:$0xf]  ;;  %v3400_v41 = vld [vmem:[#allocation0 + $0x7e8] sm:$0xf]  ;;  %5136 = vst [vmem:[%s7479_s1 + $0x3ec] sm:$0xf] %v3386_v39 }
 0x208   :  { %1607 = vst.msk [vmem:[#allocation0 + $0xb43] ss:$8 sm:$0xf] %vm3_vm0, %v1604_v0   ;;  %1609 = vst.msk [vmem:[#allocation0 + $0xb43] ss:$8 sm:$0xf0] %vm3_vm0, %v1604_v0  }
 0x209   :  { %1598 = vst.msk [vmem:[#allocation0 + $0xb03] ss:$8 sm:$0xf] %vm3_vm0, %v1595_v38   ;;  %1600 = vst.msk [vmem:[#allocation0 + $0xb03] ss:$8 sm:$0xf0] %vm3_vm0, %v1595_v38  }
 0x20a   :  { %5137 = vst [vmem:[%s7479_s1 + $0x3f0] sm:$0xf] %v3393_v40  ;;  %5138 = vst [vmem:[%s7479_s1 + $0x3f4] sm:$0xf] %v3400_v41  ;;  %v3407_v2 = vld [vmem:[#allocation0 + $0x7f0] sm:$0xf] }
 0x20b   :  { %v3414_v4 = vld [vmem:[#allocation0 + $0x7f8] sm:$0xf]  ;;  %v3309_v42 = vld [vmem:[#allocation0 + $0x780] sm:$0xf]  ;;  %5139 = vst [vmem:[%s7479_s1 + $0x3f8] sm:$0xf] %v3407_v2 }
 0x20c   :  { %5140 = vst [vmem:[%s7479_s1 + $0x3fc] sm:$0xf] %v3414_v4  ;;  %5125 = vst [vmem:[%s7479_s1 + $0x3c0] sm:$0xf] %v3309_v42  ;;  %v3316_v43 = vld [vmem:[#allocation0 + $0x788] sm:$0xf] }
 0x20d   :  { %v3323_v5 = vld [vmem:[#allocation0 + $0x790] sm:$0xf]  ;;  %v3330_v6 = vld [vmem:[#allocation0 + $0x798] sm:$0xf]  ;;  %5126 = vst [vmem:[%s7479_s1 + $0x3c4] sm:$0xf] %v3316_v43 }
 0x20e   :  { %5127 = vst [vmem:[%s7479_s1 + $0x3c8] sm:$0xf] %v3323_v5  ;;  %5128 = vst [vmem:[%s7479_s1 + $0x3cc] sm:$0xf] %v3330_v6  ;;  %v3337_v44 = vld [vmem:[#allocation0 + $0x7a0] sm:$0xf] }
 0x20f   :  { %v3344_v45 = vld [vmem:[#allocation0 + $0x7a8] sm:$0xf]  ;;  %v3351_v7 = vld [vmem:[#allocation0 + $0x7b0] sm:$0xf]  ;;  %5129 = vst [vmem:[%s7479_s1 + $0x3d0] sm:$0xf] %v3337_v44 }
 0x210   :  { %5130 = vst [vmem:[%s7479_s1 + $0x3d4] sm:$0xf] %v3344_v45  ;;  %5131 = vst [vmem:[%s7479_s1 + $0x3d8] sm:$0xf] %v3351_v7  ;;  %v3358_v47 = vld [vmem:[#allocation0 + $0x7b8] sm:$0xf] }
 0x211   :  { %v3477_v9 = vld [vmem:[#allocation0 + $0x840] sm:$0xf]  ;;  %v3484_v10 = vld [vmem:[#allocation0 + $0x848] sm:$0xf]  ;;  %5132 = vst [vmem:[%s7479_s1 + $0x3dc] sm:$0xf] %v3358_v47 }
 0x212   :  { %1625 = vst.msk [vmem:[#allocation0 + $0xbc3] ss:$8 sm:$0xf] %vm3_vm0, %v1622_v8   ;;  %1627 = vst.msk [vmem:[#allocation0 + $0xbc3] ss:$8 sm:$0xf0] %vm3_vm0, %v1622_v8  }
 0x213   :  { %1616 = vst.msk [vmem:[#allocation0 + $0xb83] ss:$8 sm:$0xf] %vm3_vm0, %v1613_v46   ;;  %1618 = vst.msk [vmem:[#allocation0 + $0xb83] ss:$8 sm:$0xf0] %vm3_vm0, %v1613_v46  }
 0x214   :  { %5149 = vst [vmem:[%s7479_s1 + $0x420] sm:$0xf] %v3477_v9  ;;  %5150 = vst [vmem:[%s7479_s1 + $0x424] sm:$0xf] %v3484_v10  ;;  %v3491_v11 = vld [vmem:[#allocation0 + $0x850] sm:$0xf] }
 0x215   :  { %v3498_v12 = vld [vmem:[#allocation0 + $0x858] sm:$0xf]  ;;  %v3505_v13 = vld [vmem:[#allocation0 + $0x860] sm:$0xf]  ;;  %5151 = vst [vmem:[%s7479_s1 + $0x428] sm:$0xf] %v3491_v11 }
 0x216   :  { %5152 = vst [vmem:[%s7479_s1 + $0x42c] sm:$0xf] %v3498_v12  ;;  %5153 = vst [vmem:[%s7479_s1 + $0x430] sm:$0xf] %v3505_v13  ;;  %v3512_v56 = vld [vmem:[#allocation0 + $0x868] sm:$0xf] }
 0x217   :  { %v3519_v14 = vld [vmem:[#allocation0 + $0x870] sm:$0xf]  ;;  %v3526_v15 = vld [vmem:[#allocation0 + $0x878] sm:$0xf]  ;;  %5154 = vst [vmem:[%s7479_s1 + $0x434] sm:$0xf] %v3512_v56 }
 0x218   :  { %5155 = vst [vmem:[%s7479_s1 + $0x438] sm:$0xf] %v3519_v14  ;;  %5156 = vst [vmem:[%s7479_s1 + $0x43c] sm:$0xf] %v3526_v15  ;;  %v3421_v16 = vld [vmem:[#allocation0 + $0x800] sm:$0xf] }
 0x219   :  { %v3428_v17 = vld [vmem:[#allocation0 + $0x808] sm:$0xf]  ;;  %v3435_v57 = vld [vmem:[#allocation0 + $0x810] sm:$0xf]  ;;  %5141 = vst [vmem:[%s7479_s1 + $0x400] sm:$0xf] %v3421_v16 }
 0x21a   :  { %5142 = vst [vmem:[%s7479_s1 + $0x404] sm:$0xf] %v3428_v17  ;;  %5143 = vst [vmem:[%s7479_s1 + $0x408] sm:$0xf] %v3435_v57  ;;  %v3442_v58 = vld [vmem:[#allocation0 + $0x818] sm:$0xf] }
 0x21b   :  { %v3449_v18 = vld [vmem:[#allocation0 + $0x820] sm:$0xf]  ;;  %v3456_v19 = vld [vmem:[#allocation0 + $0x828] sm:$0xf]  ;;  %5144 = vst [vmem:[%s7479_s1 + $0x40c] sm:$0xf] %v3442_v58 }
 0x21c   :  { %5145 = vst [vmem:[%s7479_s1 + $0x410] sm:$0xf] %v3449_v18  ;;  %5146 = vst [vmem:[%s7479_s1 + $0x414] sm:$0xf] %v3456_v19  ;;  %v3463_v59 = vld [vmem:[#allocation0 + $0x830] sm:$0xf] }
 0x21d   :  { %v3470_v60 = vld [vmem:[#allocation0 + $0x838] sm:$0xf]  ;;  %v3589_v20 = vld [vmem:[#allocation0 + $0x8c0] sm:$0xf]  ;;  %5147 = vst [vmem:[%s7479_s1 + $0x418] sm:$0xf] %v3463_v59 }
 0x21e   :  { %5148 = vst [vmem:[%s7479_s1 + $0x41c] sm:$0xf] %v3470_v60  ;;  %5165 = vst [vmem:[%s7479_s1 + $0x460] sm:$0xf] %v3589_v20  ;;  %v3596_v21 = vld [vmem:[#allocation0 + $0x8c8] sm:$0xf] }
 0x21f   :  { %v3603_v61 = vld [vmem:[#allocation0 + $0x8d0] sm:$0xf]  ;;  %v3610_v62 = vld [vmem:[#allocation0 + $0x8d8] sm:$0xf]  ;;  %5166 = vst [vmem:[%s7479_s1 + $0x464] sm:$0xf] %v3596_v21 }
 0x220   :  { %5167 = vst [vmem:[%s7479_s1 + $0x468] sm:$0xf] %v3603_v61  ;;  %5168 = vst [vmem:[%s7479_s1 + $0x46c] sm:$0xf] %v3610_v62  ;;  %v3617_v22 = vld [vmem:[#allocation0 + $0x8e0] sm:$0xf] }
 0x221   :  { %v3624_v23 = vld [vmem:[#allocation0 + $0x8e8] sm:$0xf]  ;;  %v3631_v24 = vld [vmem:[#allocation0 + $0x8f0] sm:$0xf]  ;;  %5169 = vst [vmem:[%s7479_s1 + $0x470] sm:$0xf] %v3617_v22 }
 0x222   :  { %5170 = vst [vmem:[%s7479_s1 + $0x474] sm:$0xf] %v3624_v23  ;;  %5171 = vst [vmem:[%s7479_s1 + $0x478] sm:$0xf] %v3631_v24  ;;  %v3638_v25 = vld [vmem:[#allocation0 + $0x8f8] sm:$0xf] }
 0x223   :  { %v3533_v63 = vld [vmem:[#allocation0 + $0x880] sm:$0xf]  ;;  %v3540_v48 = vld [vmem:[#allocation0 + $0x888] sm:$0xf]  ;;  %5172 = vst [vmem:[%s7479_s1 + $0x47c] sm:$0xf] %v3638_v25 }
 0x224   :  { %5157 = vst [vmem:[%s7479_s1 + $0x440] sm:$0xf] %v3533_v63  ;;  %5158 = vst [vmem:[%s7479_s1 + $0x444] sm:$0xf] %v3540_v48  ;;  %v3547_v26 = vld [vmem:[#allocation0 + $0x890] sm:$0xf] }
 0x225   :  { %v3554_v27 = vld [vmem:[#allocation0 + $0x898] sm:$0xf]  ;;  %v3561_v49 = vld [vmem:[#allocation0 + $0x8a0] sm:$0xf]  ;;  %5159 = vst [vmem:[%s7479_s1 + $0x448] sm:$0xf] %v3547_v26 }
 0x226   :  { %5160 = vst [vmem:[%s7479_s1 + $0x44c] sm:$0xf] %v3554_v27  ;;  %5161 = vst [vmem:[%s7479_s1 + $0x450] sm:$0xf] %v3561_v49  ;;  %v3568_v50 = vld [vmem:[#allocation0 + $0x8a8] sm:$0xf] }
 0x227   :  { %v3575_v28 = vld [vmem:[#allocation0 + $0x8b0] sm:$0xf]  ;;  %v3582_v29 = vld [vmem:[#allocation0 + $0x8b8] sm:$0xf]  ;;  %5162 = vst [vmem:[%s7479_s1 + $0x454] sm:$0xf] %v3568_v50 }
 0x228   :  { %5163 = vst [vmem:[%s7479_s1 + $0x458] sm:$0xf] %v3575_v28  ;;  %5164 = vst [vmem:[%s7479_s1 + $0x45c] sm:$0xf] %v3582_v29  ;;  %v3701_v51 = vld [vmem:[#allocation0 + $0x940] sm:$0xf] }
 0x229   :  { %v3708_v52 = vld [vmem:[#allocation0 + $0x948] sm:$0xf]  ;;  %v3715_v30 = vld [vmem:[#allocation0 + $0x950] sm:$0xf]  ;;  %5181 = vst [vmem:[%s7479_s1 + $0x4a0] sm:$0xf] %v3701_v51 }
 0x22a   :  { %5182 = vst [vmem:[%s7479_s1 + $0x4a4] sm:$0xf] %v3708_v52  ;;  %5183 = vst [vmem:[%s7479_s1 + $0x4a8] sm:$0xf] %v3715_v30  ;;  %v3722_v31 = vld [vmem:[#allocation0 + $0x958] sm:$0xf] }
 0x22b   :  { %v3729_v32 = vld [vmem:[#allocation0 + $0x960] sm:$0xf]  ;;  %v3736_v33 = vld [vmem:[#allocation0 + $0x968] sm:$0xf]  ;;  %5184 = vst [vmem:[%s7479_s1 + $0x4ac] sm:$0xf] %v3722_v31 }
 0x22c   :  { %5185 = vst [vmem:[%s7479_s1 + $0x4b0] sm:$0xf] %v3729_v32  ;;  %5186 = vst [vmem:[%s7479_s1 + $0x4b4] sm:$0xf] %v3736_v33  ;;  %v3743_v53 = vld [vmem:[#allocation0 + $0x970] sm:$0xf] }
 0x22d   :  { %v3750_v54 = vld [vmem:[#allocation0 + $0x978] sm:$0xf]  ;;  %v3645_v34 = vld [vmem:[#allocation0 + $0x900] sm:$0xf]  ;;  %5187 = vst [vmem:[%s7479_s1 + $0x4b8] sm:$0xf] %v3743_v53 }
 0x22e   :  { %5188 = vst [vmem:[%s7479_s1 + $0x4bc] sm:$0xf] %v3750_v54  ;;  %5173 = vst [vmem:[%s7479_s1 + $0x480] sm:$0xf] %v3645_v34  ;;  %v3652_v35 = vld [vmem:[#allocation0 + $0x908] sm:$0xf] }
 0x22f   :  { %v3659_v55 = vld [vmem:[#allocation0 + $0x910] sm:$0xf]  ;;  %v3666_v1 = vld [vmem:[#allocation0 + $0x918] sm:$0xf]  ;;  %5174 = vst [vmem:[%s7479_s1 + $0x484] sm:$0xf] %v3652_v35 }
 0x230   :  { %5175 = vst [vmem:[%s7479_s1 + $0x488] sm:$0xf] %v3659_v55  ;;  %5176 = vst [vmem:[%s7479_s1 + $0x48c] sm:$0xf] %v3666_v1  ;;  %v3673_v36 = vld [vmem:[#allocation0 + $0x920] sm:$0xf] }
 0x231   :  { %v3680_v37 = vld [vmem:[#allocation0 + $0x928] sm:$0xf]  ;;  %v3687_v3 = vld [vmem:[#allocation0 + $0x930] sm:$0xf]  ;;  %5177 = vst [vmem:[%s7479_s1 + $0x490] sm:$0xf] %v3673_v36 }
 0x232   :  { %5178 = vst [vmem:[%s7479_s1 + $0x494] sm:$0xf] %v3680_v37  ;;  %5179 = vst [vmem:[%s7479_s1 + $0x498] sm:$0xf] %v3687_v3  ;;  %v3694_v0 = vld [vmem:[#allocation0 + $0x938] sm:$0xf] }
 0x233   :  { %v3813_v38 = vld [vmem:[#allocation0 + $0x9c0] sm:$0xf]  ;;  %v3820_v39 = vld [vmem:[#allocation0 + $0x9c8] sm:$0xf]  ;;  %5180 = vst [vmem:[%s7479_s1 + $0x49c] sm:$0xf] %v3694_v0 }
 0x234   :  { %5197 = vst [vmem:[%s7479_s1 + $0x4e0] sm:$0xf] %v3813_v38  ;;  %5198 = vst [vmem:[%s7479_s1 + $0x4e4] sm:$0xf] %v3820_v39  ;;  %v3827_v40 = vld [vmem:[#allocation0 + $0x9d0] sm:$0xf] }
 0x235   :  { %v3834_v41 = vld [vmem:[#allocation0 + $0x9d8] sm:$0xf]  ;;  %v3841_v2 = vld [vmem:[#allocation0 + $0x9e0] sm:$0xf]  ;;  %5199 = vst [vmem:[%s7479_s1 + $0x4e8] sm:$0xf] %v3827_v40 }
 0x236   :  { %5200 = vst [vmem:[%s7479_s1 + $0x4ec] sm:$0xf] %v3834_v41  ;;  %5201 = vst [vmem:[%s7479_s1 + $0x4f0] sm:$0xf] %v3841_v2  ;;  %v3848_v4 = vld [vmem:[#allocation0 + $0x9e8] sm:$0xf] }
 0x237   :  { %v3855_v42 = vld [vmem:[#allocation0 + $0x9f0] sm:$0xf]  ;;  %v3862_v43 = vld [vmem:[#allocation0 + $0x9f8] sm:$0xf]  ;;  %5202 = vst [vmem:[%s7479_s1 + $0x4f4] sm:$0xf] %v3848_v4 }
 0x238   :  { %5203 = vst [vmem:[%s7479_s1 + $0x4f8] sm:$0xf] %v3855_v42  ;;  %5204 = vst [vmem:[%s7479_s1 + $0x4fc] sm:$0xf] %v3862_v43  ;;  %v3757_v5 = vld [vmem:[#allocation0 + $0x980] sm:$0xf] }
 0x239   :  { %v3764_v6 = vld [vmem:[#allocation0 + $0x988] sm:$0xf]  ;;  %v3771_v44 = vld [vmem:[#allocation0 + $0x990] sm:$0xf]  ;;  %5189 = vst [vmem:[%s7479_s1 + $0x4c0] sm:$0xf] %v3757_v5 }
 0x23a   :  { %5190 = vst [vmem:[%s7479_s1 + $0x4c4] sm:$0xf] %v3764_v6  ;;  %5191 = vst [vmem:[%s7479_s1 + $0x4c8] sm:$0xf] %v3771_v44  ;;  %v3778_v45 = vld [vmem:[#allocation0 + $0x998] sm:$0xf] }
 0x23b   :  { %v3785_v7 = vld [vmem:[#allocation0 + $0x9a0] sm:$0xf]  ;;  %v3792_v8 = vld [vmem:[#allocation0 + $0x9a8] sm:$0xf]  ;;  %5192 = vst [vmem:[%s7479_s1 + $0x4cc] sm:$0xf] %v3778_v45 }
 0x23c   :  { %5193 = vst [vmem:[%s7479_s1 + $0x4d0] sm:$0xf] %v3785_v7  ;;  %5194 = vst [vmem:[%s7479_s1 + $0x4d4] sm:$0xf] %v3792_v8  ;;  %v3799_v46 = vld [vmem:[#allocation0 + $0x9b0] sm:$0xf] }
 0x23d   :  { %v3806_v47 = vld [vmem:[#allocation0 + $0x9b8] sm:$0xf]  ;;  %v3925_v9 = vld [vmem:[#allocation0 + $0xa40] sm:$0xf]  ;;  %5195 = vst [vmem:[%s7479_s1 + $0x4d8] sm:$0xf] %v3799_v46 }
 0x23e   :  { %5196 = vst [vmem:[%s7479_s1 + $0x4dc] sm:$0xf] %v3806_v47  ;;  %5213 = vst [vmem:[%s7479_s1 + $0x520] sm:$0xf] %v3925_v9  ;;  %v3932_v10 = vld [vmem:[#allocation0 + $0xa48] sm:$0xf] }
 0x23f   :  { %v3939_v11 = vld [vmem:[#allocation0 + $0xa50] sm:$0xf]  ;;  %v3946_v12 = vld [vmem:[#allocation0 + $0xa58] sm:$0xf]  ;;  %5214 = vst [vmem:[%s7479_s1 + $0x524] sm:$0xf] %v3932_v10 }
 0x240   :  { %5215 = vst [vmem:[%s7479_s1 + $0x528] sm:$0xf] %v3939_v11  ;;  %5216 = vst [vmem:[%s7479_s1 + $0x52c] sm:$0xf] %v3946_v12  ;;  %v3953_v13 = vld [vmem:[#allocation0 + $0xa60] sm:$0xf] }
 0x241   :  { %v3960_v56 = vld [vmem:[#allocation0 + $0xa68] sm:$0xf]  ;;  %v3967_v14 = vld [vmem:[#allocation0 + $0xa70] sm:$0xf]  ;;  %5217 = vst [vmem:[%s7479_s1 + $0x530] sm:$0xf] %v3953_v13 }
 0x242   :  { %5218 = vst [vmem:[%s7479_s1 + $0x534] sm:$0xf] %v3960_v56  ;;  %5219 = vst [vmem:[%s7479_s1 + $0x538] sm:$0xf] %v3967_v14  ;;  %v3974_v15 = vld [vmem:[#allocation0 + $0xa78] sm:$0xf] }
 0x243   :  { %v3869_v16 = vld [vmem:[#allocation0 + $0xa00] sm:$0xf]  ;;  %v3876_v17 = vld [vmem:[#allocation0 + $0xa08] sm:$0xf]  ;;  %5220 = vst [vmem:[%s7479_s1 + $0x53c] sm:$0xf] %v3974_v15 }
 0x244   :  { %5205 = vst [vmem:[%s7479_s1 + $0x500] sm:$0xf] %v3869_v16  ;;  %5206 = vst [vmem:[%s7479_s1 + $0x504] sm:$0xf] %v3876_v17  ;;  %v3883_v57 = vld [vmem:[#allocation0 + $0xa10] sm:$0xf] }
 0x245   :  { %v3890_v58 = vld [vmem:[#allocation0 + $0xa18] sm:$0xf]  ;;  %v3897_v18 = vld [vmem:[#allocation0 + $0xa20] sm:$0xf]  ;;  %5207 = vst [vmem:[%s7479_s1 + $0x508] sm:$0xf] %v3883_v57 }
 0x246   :  { %5208 = vst [vmem:[%s7479_s1 + $0x50c] sm:$0xf] %v3890_v58  ;;  %5209 = vst [vmem:[%s7479_s1 + $0x510] sm:$0xf] %v3897_v18  ;;  %v3904_v19 = vld [vmem:[#allocation0 + $0xa28] sm:$0xf] }
 0x247   :  { %v3911_v59 = vld [vmem:[#allocation0 + $0xa30] sm:$0xf]  ;;  %v3918_v60 = vld [vmem:[#allocation0 + $0xa38] sm:$0xf]  ;;  %5210 = vst [vmem:[%s7479_s1 + $0x514] sm:$0xf] %v3904_v19 }
 0x248   :  { %5211 = vst [vmem:[%s7479_s1 + $0x518] sm:$0xf] %v3911_v59  ;;  %5212 = vst [vmem:[%s7479_s1 + $0x51c] sm:$0xf] %v3918_v60  ;;  %v4037_v20 = vld [vmem:[#allocation0 + $0xac0] sm:$0xf] }
 0x249   :  { %v4044_v21 = vld [vmem:[#allocation0 + $0xac8] sm:$0xf]  ;;  %v4051_v61 = vld [vmem:[#allocation0 + $0xad0] sm:$0xf]  ;;  %5229 = vst [vmem:[%s7479_s1 + $0x560] sm:$0xf] %v4037_v20 }
 0x24a   :  { %5230 = vst [vmem:[%s7479_s1 + $0x564] sm:$0xf] %v4044_v21  ;;  %5231 = vst [vmem:[%s7479_s1 + $0x568] sm:$0xf] %v4051_v61  ;;  %v4058_v62 = vld [vmem:[#allocation0 + $0xad8] sm:$0xf] }
 0x24b   :  { %v4065_v22 = vld [vmem:[#allocation0 + $0xae0] sm:$0xf]  ;;  %v4072_v23 = vld [vmem:[#allocation0 + $0xae8] sm:$0xf]  ;;  %5232 = vst [vmem:[%s7479_s1 + $0x56c] sm:$0xf] %v4058_v62 }
 0x24c   :  { %5233 = vst [vmem:[%s7479_s1 + $0x570] sm:$0xf] %v4065_v22  ;;  %5234 = vst [vmem:[%s7479_s1 + $0x574] sm:$0xf] %v4072_v23  ;;  %v4079_v24 = vld [vmem:[#allocation0 + $0xaf0] sm:$0xf] }
 0x24d   :  { %v4086_v25 = vld [vmem:[#allocation0 + $0xaf8] sm:$0xf]  ;;  %v3981_v63 = vld [vmem:[#allocation0 + $0xa80] sm:$0xf]  ;;  %5235 = vst [vmem:[%s7479_s1 + $0x578] sm:$0xf] %v4079_v24 }
 0x24e   :  { %5236 = vst [vmem:[%s7479_s1 + $0x57c] sm:$0xf] %v4086_v25  ;;  %5221 = vst [vmem:[%s7479_s1 + $0x540] sm:$0xf] %v3981_v63  ;;  %v3988_v48 = vld [vmem:[#allocation0 + $0xa88] sm:$0xf] }
 0x24f   :  { %v3995_v26 = vld [vmem:[#allocation0 + $0xa90] sm:$0xf]  ;;  %v4002_v27 = vld [vmem:[#allocation0 + $0xa98] sm:$0xf]  ;;  %5222 = vst [vmem:[%s7479_s1 + $0x544] sm:$0xf] %v3988_v48 }
 0x250   :  { %5223 = vst [vmem:[%s7479_s1 + $0x548] sm:$0xf] %v3995_v26  ;;  %5224 = vst [vmem:[%s7479_s1 + $0x54c] sm:$0xf] %v4002_v27  ;;  %v4009_v49 = vld [vmem:[#allocation0 + $0xaa0] sm:$0xf] }
 0x251   :  { %v4016_v50 = vld [vmem:[#allocation0 + $0xaa8] sm:$0xf]  ;;  %v4023_v28 = vld [vmem:[#allocation0 + $0xab0] sm:$0xf]  ;;  %5225 = vst [vmem:[%s7479_s1 + $0x550] sm:$0xf] %v4009_v49 }
 0x252   :  { %5226 = vst [vmem:[%s7479_s1 + $0x554] sm:$0xf] %v4016_v50  ;;  %5227 = vst [vmem:[%s7479_s1 + $0x558] sm:$0xf] %v4023_v28  ;;  %v4030_v29 = vld [vmem:[#allocation0 + $0xab8] sm:$0xf] }
 0x253   :  { %v4149_v51 = vld [vmem:[#allocation0 + $0xb40] sm:$0xf]  ;;  %v4156_v52 = vld [vmem:[#allocation0 + $0xb48] sm:$0xf]  ;;  %5228 = vst [vmem:[%s7479_s1 + $0x55c] sm:$0xf] %v4030_v29 }
 0x254   :  { %5245 = vst [vmem:[%s7479_s1 + $0x5a0] sm:$0xf] %v4149_v51  ;;  %5246 = vst [vmem:[%s7479_s1 + $0x5a4] sm:$0xf] %v4156_v52  ;;  %v4163_v30 = vld [vmem:[#allocation0 + $0xb50] sm:$0xf] }
 0x255   :  { %v4170_v31 = vld [vmem:[#allocation0 + $0xb58] sm:$0xf]  ;;  %v4177_v32 = vld [vmem:[#allocation0 + $0xb60] sm:$0xf]  ;;  %5247 = vst [vmem:[%s7479_s1 + $0x5a8] sm:$0xf] %v4163_v30 }
 0x256   :  { %5248 = vst [vmem:[%s7479_s1 + $0x5ac] sm:$0xf] %v4170_v31  ;;  %5249 = vst [vmem:[%s7479_s1 + $0x5b0] sm:$0xf] %v4177_v32  ;;  %v4184_v33 = vld [vmem:[#allocation0 + $0xb68] sm:$0xf] }
 0x257   :  { %v4191_v53 = vld [vmem:[#allocation0 + $0xb70] sm:$0xf]  ;;  %v4198_v54 = vld [vmem:[#allocation0 + $0xb78] sm:$0xf]  ;;  %5250 = vst [vmem:[%s7479_s1 + $0x5b4] sm:$0xf] %v4184_v33 }
 0x258   :  { %5251 = vst [vmem:[%s7479_s1 + $0x5b8] sm:$0xf] %v4191_v53  ;;  %5252 = vst [vmem:[%s7479_s1 + $0x5bc] sm:$0xf] %v4198_v54  ;;  %v4093_v34 = vld [vmem:[#allocation0 + $0xb00] sm:$0xf] }
 0x259   :  { %v4100_v35 = vld [vmem:[#allocation0 + $0xb08] sm:$0xf]  ;;  %v4107_v55 = vld [vmem:[#allocation0 + $0xb10] sm:$0xf]  ;;  %5237 = vst [vmem:[%s7479_s1 + $0x580] sm:$0xf] %v4093_v34 }
 0x25a   :  { %5238 = vst [vmem:[%s7479_s1 + $0x584] sm:$0xf] %v4100_v35  ;;  %5239 = vst [vmem:[%s7479_s1 + $0x588] sm:$0xf] %v4107_v55  ;;  %v4114_v1 = vld [vmem:[#allocation0 + $0xb18] sm:$0xf] }
 0x25b   :  { %v4121_v36 = vld [vmem:[#allocation0 + $0xb20] sm:$0xf]  ;;  %v4128_v37 = vld [vmem:[#allocation0 + $0xb28] sm:$0xf]  ;;  %5240 = vst [vmem:[%s7479_s1 + $0x58c] sm:$0xf] %v4114_v1 }
 0x25c   :  { %5241 = vst [vmem:[%s7479_s1 + $0x590] sm:$0xf] %v4121_v36  ;;  %5242 = vst [vmem:[%s7479_s1 + $0x594] sm:$0xf] %v4128_v37  ;;  %v4135_v3 = vld [vmem:[#allocation0 + $0xb30] sm:$0xf] }
 0x25d   :  { %v4142_v0 = vld [vmem:[#allocation0 + $0xb38] sm:$0xf]  ;;  %v4261_v38 = vld [vmem:[#allocation0 + $0xbc0] sm:$0xf]  ;;  %5243 = vst [vmem:[%s7479_s1 + $0x598] sm:$0xf] %v4135_v3 }
 0x25e   :  { %5244 = vst [vmem:[%s7479_s1 + $0x59c] sm:$0xf] %v4142_v0  ;;  %5261 = vst [vmem:[%s7479_s1 + $0x5e0] sm:$0xf] %v4261_v38  ;;  %v4268_v39 = vld [vmem:[#allocation0 + $0xbc8] sm:$0xf] }
 0x25f   :  { %v4275_v40 = vld [vmem:[#allocation0 + $0xbd0] sm:$0xf]  ;;  %v4282_v41 = vld [vmem:[#allocation0 + $0xbd8] sm:$0xf]  ;;  %5262 = vst [vmem:[%s7479_s1 + $0x5e4] sm:$0xf] %v4268_v39 }
 0x260   :  { %5263 = vst [vmem:[%s7479_s1 + $0x5e8] sm:$0xf] %v4275_v40  ;;  %5264 = vst [vmem:[%s7479_s1 + $0x5ec] sm:$0xf] %v4282_v41  ;;  %v4289_v2 = vld [vmem:[#allocation0 + $0xbe0] sm:$0xf] }
 0x261   :  { %v4296_v4 = vld [vmem:[#allocation0 + $0xbe8] sm:$0xf]  ;;  %v4303_v42 = vld [vmem:[#allocation0 + $0xbf0] sm:$0xf]  ;;  %5265 = vst [vmem:[%s7479_s1 + $0x5f0] sm:$0xf] %v4289_v2 }
 0x262   :  { %5266 = vst [vmem:[%s7479_s1 + $0x5f4] sm:$0xf] %v4296_v4  ;;  %5267 = vst [vmem:[%s7479_s1 + $0x5f8] sm:$0xf] %v4303_v42  ;;  %v4310_v43 = vld [vmem:[#allocation0 + $0xbf8] sm:$0xf] }
 0x263   :  { %v4205_v5 = vld [vmem:[#allocation0 + $0xb80] sm:$0xf]  ;;  %v4212_v6 = vld [vmem:[#allocation0 + $0xb88] sm:$0xf]  ;;  %5268 = vst [vmem:[%s7479_s1 + $0x5fc] sm:$0xf] %v4310_v43 }
 0x264   :  { %5253 = vst [vmem:[%s7479_s1 + $0x5c0] sm:$0xf] %v4205_v5  ;;  %5254 = vst [vmem:[%s7479_s1 + $0x5c4] sm:$0xf] %v4212_v6  ;;  %v4219_v44 = vld [vmem:[#allocation0 + $0xb90] sm:$0xf] }
 0x265   :  { %v4226_v45 = vld [vmem:[#allocation0 + $0xb98] sm:$0xf]  ;;  %v4233_v7 = vld [vmem:[#allocation0 + $0xba0] sm:$0xf]  ;;  %5255 = vst [vmem:[%s7479_s1 + $0x5c8] sm:$0xf] %v4219_v44 }
 0x266   :  { %5256 = vst [vmem:[%s7479_s1 + $0x5cc] sm:$0xf] %v4226_v45  ;;  %5257 = vst [vmem:[%s7479_s1 + $0x5d0] sm:$0xf] %v4233_v7  ;;  %v4240_v8 = vld [vmem:[#allocation0 + $0xba8] sm:$0xf] }
 0x267   :  { %v4247_v46 = vld [vmem:[#allocation0 + $0xbb0] sm:$0xf]  ;;  %v4254_v47 = vld [vmem:[#allocation0 + $0xbb8] sm:$0xf]  ;;  %5258 = vst [vmem:[%s7479_s1 + $0x5d4] sm:$0xf] %v4240_v8 }
 0x268   :  { %5259 = vst [vmem:[%s7479_s1 + $0x5d8] sm:$0xf] %v4247_v46  ;;  %5260 = vst [vmem:[%s7479_s1 + $0x5dc] sm:$0xf] %v4254_v47 }

// kernel: squeeze.5
= control target key start
LH: loop header
LB: loop body
LE: loop exit
PB: predicated region body
PF: predicated region fallthrough
CT: control target
= control target key end

     0   :  { %vm3_vm0 = vcmask 261120   ;;  %s4314_s12 = smov 96   ;;  %s5942_s0 = inlined_call_operand.vmem [shape: f32[2,3,1,64,64], index: 0, kind: input, shape index: {}]   ;;  %s5943_s1 = inlined_call_operand.vmem [shape: f32[2,3,2,32,2,32], index: 1, kind: output, shape index: {}]  }
   0x1   :  { %v3884_v0 = vld [vmem:[%s5942_s0 + $0x10] sm:$0xff]   ;;  %v335_v1 = vld [vmem:[%s5942_s0] sm:$0xff]   ;;  %v3885_v2 = vld [vmem:[%s5942_s0 + $0x18] sm:$0xff]  }
   0x2   :  { %354 = vrot.lane.b32.xlu1 %v3884_v0, %s4314_s12  ;;  %336 = vrot.lane.b32.xlu0 %v335_v1, %s4314_s12  ;;  %v3883_v3 = vld [vmem:[%s5942_s0 + $0x8] sm:$0xff]   ;;  %17 = vst.msk [vmem:[#allocation0 + $0x80] ss:$8 sm:$0xf] %vm3_vm0, %v3884_v0   ;;  %v3886_v5 = vld [vmem:[%s5942_s0 + $0x20] sm:$0xff]  }
   0x3   :  { %v3887_v4 = vld [vmem:[%s5942_s0 + $0x28] sm:$0xff]   ;;  %19 = vst.msk [vmem:[#allocation0 + $0x80] ss:$8 sm:$0xf0] %vm3_vm0, %v3884_v0   ;;  %v3889_v6 = vld [vmem:[%s5942_s0 + $0x38] sm:$0xff]   ;;  %v3888_v7 = vld [vmem:[%s5942_s0 + $0x30] sm:$0xff]  }
   0x4   :  { %4 = vst.msk [vmem:[#allocation0] ss:$8 sm:$0xf] %vm3_vm0, %v335_v1   ;;  %5 = vst.msk [vmem:[#allocation0] ss:$8 sm:$0xf0] %vm3_vm0, %v335_v1  }
   0x5   :  { %24 = vst.msk [vmem:[#allocation0 + $0xc0] ss:$8 sm:$0xf] %vm3_vm0, %v3885_v2   ;;  %26 = vst.msk [vmem:[#allocation0 + $0xc0] ss:$8 sm:$0xf0] %vm3_vm0, %v3885_v2  }
   0x6   :  { %10 = vst.msk [vmem:[#allocation0 + $0x40] ss:$8 sm:$0xf] %vm3_vm0, %v3883_v3   ;;  %12 = vst.msk [vmem:[#allocation0 + $0x40] ss:$8 sm:$0xf0] %vm3_vm0, %v3883_v3   ;;  %363 = vrot.lane.b32.xlu1 %v3885_v2, %s4314_s12  ;;  %345 = vrot.lane.b32.xlu0 %v3883_v3, %s4314_s12 }
   0x7   :  { %38 = vst.msk [vmem:[#allocation0 + $0x140] ss:$8 sm:$0xf] %vm3_vm0, %v3887_v4   ;;  %40 = vst.msk [vmem:[#allocation0 + $0x140] ss:$8 sm:$0xf0] %vm3_vm0, %v3887_v4  }
   0x8   :  { %v3891_v8 = vld [vmem:[%s5942_s0 + $0x48] sm:$0xff]   ;;  %v3890_v9 = vld [vmem:[%s5942_s0 + $0x40] sm:$0xff]   ;;  %v3893_v10 = vld [vmem:[%s5942_s0 + $0x58] sm:$0xff]   ;;  %31 = vst.msk [vmem:[#allocation0 + $0x100] ss:$8 sm:$0xf] %vm3_vm0, %v3886_v5  }
   0x9   :  { %33 = vst.msk [vmem:[#allocation0 + $0x100] ss:$8 sm:$0xf0] %vm3_vm0, %v3886_v5   ;;  %52 = vst.msk [vmem:[#allocation0 + $0x1c0] ss:$8 sm:$0xf] %vm3_vm0, %v3889_v6  }
   0xa   :  { %54 = vst.msk [vmem:[#allocation0 + $0x1c0] ss:$8 sm:$0xf0] %vm3_vm0, %v3889_v6   ;;  %45 = vst.msk [vmem:[#allocation0 + $0x180] ss:$8 sm:$0xf] %vm3_vm0, %v3888_v7   ;;  %381 = vrot.lane.b32.xlu1 %v3887_v4, %s4314_s12  ;;  %372 = vrot.lane.b32.xlu0 %v3886_v5, %s4314_s12 }
   0xb   :  { %47 = vst.msk [vmem:[#allocation0 + $0x180] ss:$8 sm:$0xf0] %vm3_vm0, %v3888_v7   ;;  %v3892_v11 = vld [vmem:[%s5942_s0 + $0x50] sm:$0xff]   ;;  %v3895_v12 = vld [vmem:[%s5942_s0 + $0x68] sm:$0xff]   ;;  %v3894_v13 = vld [vmem:[%s5942_s0 + $0x60] sm:$0xff]  }
   0xc   :  { %66 = vst.msk [vmem:[#allocation0 + $0x240] ss:$8 sm:$0xf] %vm3_vm0, %v3891_v8   ;;  %68 = vst.msk [vmem:[#allocation0 + $0x240] ss:$8 sm:$0xf0] %vm3_vm0, %v3891_v8  }
   0xd   :  { %59 = vst.msk [vmem:[#allocation0 + $0x200] ss:$8 sm:$0xf] %vm3_vm0, %v3890_v9   ;;  %61 = vst.msk [vmem:[#allocation0 + $0x200] ss:$8 sm:$0xf0] %vm3_vm0, %v3890_v9  }
   0xe   :  { %80 = vst.msk [vmem:[#allocation0 + $0x2c0] ss:$8 sm:$0xf] %vm3_vm0, %v3893_v10   ;;  %82 = vst.msk [vmem:[#allocation0 + $0x2c0] ss:$8 sm:$0xf0] %vm3_vm0, %v3893_v10   ;;  %399 = vrot.lane.b32.xlu1 %v3889_v6, %s4314_s12  ;;  %390 = vrot.lane.b32.xlu0 %v3888_v7, %s4314_s12 }
   0xf   :  { %v3897_v14 = vld [vmem:[%s5942_s0 + $0x78] sm:$0xff]   ;;  %v3896_v15 = vld [vmem:[%s5942_s0 + $0x70] sm:$0xff]   ;;  %73 = vst.msk [vmem:[#allocation0 + $0x280] ss:$8 sm:$0xf] %vm3_vm0, %v3892_v11   ;;  %v3899_v16 = vld [vmem:[%s5942_s0 + $0x88] sm:$0xff]  }
  0x10   :  { %75 = vst.msk [vmem:[#allocation0 + $0x280] ss:$8 sm:$0xf0] %vm3_vm0, %v3892_v11   ;;  %94 = vst.msk [vmem:[#allocation0 + $0x340] ss:$8 sm:$0xf] %vm3_vm0, %v3895_v12  }
  0x11   :  { %96 = vst.msk [vmem:[#allocation0 + $0x340] ss:$8 sm:$0xf0] %vm3_vm0, %v3895_v12   ;;  %87 = vst.msk [vmem:[#allocation0 + $0x300] ss:$8 sm:$0xf] %vm3_vm0, %v3894_v13  }
  0x12   :  { %89 = vst.msk [vmem:[#allocation0 + $0x300] ss:$8 sm:$0xf0] %vm3_vm0, %v3894_v13   ;;  %v3898_v17 = vld [vmem:[%s5942_s0 + $0x80] sm:$0xff]   ;;  %v3901_v18 = vld [vmem:[%s5942_s0 + $0x98] sm:$0xff]   ;;  %v3900_v19 = vld [vmem:[%s5942_s0 + $0x90] sm:$0xff]   ;;  %417 = vrot.lane.b32.xlu1 %v3891_v8, %s4314_s12 }
  0x13   :  { %108 = vst.msk [vmem:[#allocation0 + $0x3c0] ss:$8 sm:$0xf] %vm3_vm0, %v3897_v14   ;;  %110 = vst.msk [vmem:[#allocation0 + $0x3c0] ss:$8 sm:$0xf0] %vm3_vm0, %v3897_v14   ;;  %408 = vrot.lane.b32.xlu0 %v3890_v9, %s4314_s12 }
  0x14   :  { %101 = vst.msk [vmem:[#allocation0 + $0x380] ss:$8 sm:$0xf] %vm3_vm0, %v3896_v15   ;;  %103 = vst.msk [vmem:[#allocation0 + $0x380] ss:$8 sm:$0xf0] %vm3_vm0, %v3896_v15  }
  0x15   :  { %v3903_v20 = vld [vmem:[%s5942_s0 + $0xa8] sm:$0xff]   ;;  %122 = vst.msk [vmem:[#allocation0 + $0x440] ss:$8 sm:$0xf] %vm3_vm0, %v3899_v16   ;;  %v3902_v21 = vld [vmem:[%s5942_s0 + $0xa0] sm:$0xff]   ;;  %v3905_v22 = vld [vmem:[%s5942_s0 + $0xb8] sm:$0xff]  }
  0x16   :  { %124 = vst.msk [vmem:[#allocation0 + $0x440] ss:$8 sm:$0xf0] %vm3_vm0, %v3899_v16   ;;  %115 = vst.msk [vmem:[#allocation0 + $0x400] ss:$8 sm:$0xf] %vm3_vm0, %v3898_v17   ;;  %435 = vrot.lane.b32.xlu1 %v3893_v10, %s4314_s12 }
  0x17   :  { %117 = vst.msk [vmem:[#allocation0 + $0x400] ss:$8 sm:$0xf0] %vm3_vm0, %v3898_v17   ;;  %136 = vst.msk [vmem:[#allocation0 + $0x4c0] ss:$8 sm:$0xf] %vm3_vm0, %v3901_v18   ;;  %426 = vrot.lane.b32.xlu0 %v3892_v11, %s4314_s12 }
  0x18   :  { %138 = vst.msk [vmem:[#allocation0 + $0x4c0] ss:$8 sm:$0xf0] %vm3_vm0, %v3901_v18   ;;  %129 = vst.msk [vmem:[#allocation0 + $0x480] ss:$8 sm:$0xf] %vm3_vm0, %v3900_v19  }
  0x19   :  { %131 = vst.msk [vmem:[#allocation0 + $0x480] ss:$8 sm:$0xf0] %vm3_vm0, %v3900_v19   ;;  %150 = vst.msk [vmem:[#allocation0 + $0x540] ss:$8 sm:$0xf] %vm3_vm0, %v3903_v20  }
  0x1a   :  { %152 = vst.msk [vmem:[#allocation0 + $0x540] ss:$8 sm:$0xf0] %vm3_vm0, %v3903_v20   ;;  %453 = vrot.lane.b32.xlu1 %v3895_v12, %s4314_s12  ;;  %v3904_v23 = vld [vmem:[%s5942_s0 + $0xb0] sm:$0xff]   ;;  %v3855_v24 = vld [vmem:[%s5942_s0 + $0xa0] sm:$0xff]   ;;  %v3907_v25 = vld [vmem:[%s5942_s0 + $0xc8] sm:$0xff]  }
  0x1b   :  { %444 = vrot.lane.b32.xlu0 %v3894_v13, %s4314_s12  ;;  %143 = vst.msk [vmem:[#allocation0 + $0x500] ss:$8 sm:$0xf] %vm3_vm0, %v3855_v24   ;;  %145 = vst.msk [vmem:[#allocation0 + $0x500] ss:$8 sm:$0xf0] %vm3_vm0, %v3855_v24  }
  0x1c   :  { %v3906_v26 = vld [vmem:[%s5942_s0 + $0xc0] sm:$0xff]   ;;  %v3858_v27 = vld [vmem:[%s5942_s0 + $0xb8] sm:$0xff]   ;;  %v3857_v28 = vld [vmem:[%s5942_s0 + $0xb0] sm:$0xff]  }
  0x1d   :  { %v3909_v29 = vld [vmem:[%s5942_s0 + $0xd8] sm:$0xff]   ;;  %v3908_v30 = vld [vmem:[%s5942_s0 + $0xd0] sm:$0xff]   ;;  %164 = vst.msk [vmem:[#allocation0 + $0x5c0] ss:$8 sm:$0xf] %vm3_vm0, %v3858_v27   ;;  %v3911_v31 = vld [vmem:[%s5942_s0 + $0xe8] sm:$0xff]  }
  0x1e   :  { %471 = vrot.lane.b32.xlu1 %v3897_v14, %s4314_s12  ;;  %166 = vst.msk [vmem:[#allocation0 + $0x5c0] ss:$8 sm:$0xf0] %vm3_vm0, %v3858_v27   ;;  %157 = vst.msk [vmem:[#allocation0 + $0x580] ss:$8 sm:$0xf] %vm3_vm0, %v3857_v28  }
  0x1f   :  { %462 = vrot.lane.b32.xlu0 %v3896_v15, %s4314_s12  ;;  %159 = vst.msk [vmem:[#allocation0 + $0x580] ss:$8 sm:$0xf0] %vm3_vm0, %v3857_v28   ;;  %v3910_v32 = vld [vmem:[%s5942_s0 + $0xe0] sm:$0xff]   ;;  %v3860_v33 = vld [vmem:[%s5942_s0 + $0xc8] sm:$0xff]   ;;  %v3913_v35 = vld [vmem:[%s5942_s0 + $0xf8] sm:$0xff]  }
  0x20   :  { %v3859_v34 = vld [vmem:[%s5942_s0 + $0xc0] sm:$0xff]   ;;  %178 = vst.msk [vmem:[#allocation0 + $0x640] ss:$8 sm:$0xf] %vm3_vm0, %v3860_v33   ;;  %v3912_v36 = vld [vmem:[%s5942_s0 + $0xf0] sm:$0xff]   ;;  %v3862_v37 = vld [vmem:[%s5942_s0 + $0xd8] sm:$0xff]  }
  0x21   :  { %180 = vst.msk [vmem:[#allocation0 + $0x640] ss:$8 sm:$0xf0] %vm3_vm0, %v3860_v33   ;;  %171 = vst.msk [vmem:[#allocation0 + $0x600] ss:$8 sm:$0xf] %vm3_vm0, %v3859_v34  }
  0x22   :  { %489 = vrot.lane.b32.xlu1 %v3899_v16, %s4314_s12  ;;  %173 = vst.msk [vmem:[#allocation0 + $0x600] ss:$8 sm:$0xf0] %vm3_vm0, %v3859_v34   ;;  %v3861_v38 = vld [vmem:[%s5942_s0 + $0xd0] sm:$0xff]   ;;  %v3915_v39 = vld [vmem:[%s5942_s0 + $0x108] sm:$0xff]   ;;  %v3914_v40 = vld [vmem:[%s5942_s0 + $0x100] sm:$0xff]  }
  0x23   :  { %480 = vrot.lane.b32.xlu0 %v3898_v17, %s4314_s12  ;;  %192 = vst.msk [vmem:[#allocation0 + $0x6c0] ss:$8 sm:$0xf] %vm3_vm0, %v3862_v37   ;;  %194 = vst.msk [vmem:[#allocation0 + $0x6c0] ss:$8 sm:$0xf0] %vm3_vm0, %v3862_v37  }
  0x24   :  { %185 = vst.msk [vmem:[#allocation0 + $0x680] ss:$8 sm:$0xf] %vm3_vm0, %v3861_v38   ;;  %187 = vst.msk [vmem:[#allocation0 + $0x680] ss:$8 sm:$0xf0] %vm3_vm0, %v3861_v38  }
  0x25   :  { %v3864_v41 = vld [vmem:[%s5942_s0 + $0xe8] sm:$0xff]   ;;  %v3863_v42 = vld [vmem:[%s5942_s0 + $0xe0] sm:$0xff]   ;;  %v3917_v43 = vld [vmem:[%s5942_s0 + $0x118] sm:$0xff]  }
  0x26   :  { %507 = vrot.lane.b32.xlu1 %v3901_v18, %s4314_s12  ;;  %v3916_v44 = vld [vmem:[%s5942_s0 + $0x110] sm:$0xff]   ;;  %206 = vst.msk [vmem:[#allocation0 + $0x740] ss:$8 sm:$0xf] %vm3_vm0, %v3864_v41   ;;  %v3919_v45 = vld [vmem:[%s5942_s0 + $0x128] sm:$0xff]   ;;  %v3918_v46 = vld [vmem:[%s5942_s0 + $0x120] sm:$0xff]  }
  0x27   :  { %498 = vrot.lane.b32.xlu0 %v3900_v19, %s4314_s12  ;;  %208 = vst.msk [vmem:[#allocation0 + $0x740] ss:$8 sm:$0xf0] %vm3_vm0, %v3864_v41   ;;  %199 = vst.msk [vmem:[#allocation0 + $0x700] ss:$8 sm:$0xf] %vm3_vm0, %v3863_v42  }
  0x28   :  { %201 = vst.msk [vmem:[#allocation0 + $0x700] ss:$8 sm:$0xf0] %vm3_vm0, %v3863_v42   ;;  %v3866_v47 = vld [vmem:[%s5942_s0 + $0xf8] sm:$0xff]   ;;  %v3865_v48 = vld [vmem:[%s5942_s0 + $0xf0] sm:$0xff]   ;;  %v3868_v51 = vld [vmem:[%s5942_s0 + $0x108] sm:$0xff]  }
  0x29   :  { %220 = vst.msk [vmem:[#allocation0 + $0x7c0] ss:$8 sm:$0xf] %vm3_vm0, %v3866_v47   ;;  %222 = vst.msk [vmem:[#allocation0 + $0x7c0] ss:$8 sm:$0xf0] %vm3_vm0, %v3866_v47  }
  0x2a   :  { %525 = vrot.lane.b32.xlu1 %v3903_v20, %s4314_s12  ;;  %213 = vst.msk [vmem:[#allocation0 + $0x780] ss:$8 sm:$0xf] %vm3_vm0, %v3865_v48   ;;  %215 = vst.msk [vmem:[#allocation0 + $0x780] ss:$8 sm:$0xf0] %vm3_vm0, %v3865_v48  }
  0x2b   :  { %516 = vrot.lane.b32.xlu0 %v3902_v21, %s4314_s12  ;;  %v3921_v49 = vld [vmem:[%s5942_s0 + $0x138] sm:$0xff]   ;;  %v3920_v50 = vld [vmem:[%s5942_s0 + $0x130] sm:$0xff]   ;;  %v3867_v52 = vld [vmem:[%s5942_s0 + $0x100] sm:$0xff]   ;;  %234 = vst.msk [vmem:[#allocation0 + $0x840] ss:$8 sm:$0xf] %vm3_vm0, %v3868_v51  }
  0x2c   :  { %236 = vst.msk [vmem:[#allocation0 + $0x840] ss:$8 sm:$0xf0] %vm3_vm0, %v3868_v51   ;;  %227 = vst.msk [vmem:[#allocation0 + $0x800] ss:$8 sm:$0xf] %vm3_vm0, %v3867_v52  }
  0x2d   :  { %229 = vst.msk [vmem:[#allocation0 + $0x800] ss:$8 sm:$0xf0] %vm3_vm0, %v3867_v52   ;;  %v3923_v53 = vld [vmem:[%s5942_s0 + $0x148] sm:$0xff]   ;;  %v3922_v54 = vld [vmem:[%s5942_s0 + $0x140] sm:$0xff]   ;;  %v3870_v55 = vld [vmem:[%s5942_s0 + $0x118] sm:$0xff]  }
  0x2e   :  { %543 = vrot.lane.b32.xlu1 %v3905_v22, %s4314_s12  ;;  %v3869_v56 = vld [vmem:[%s5942_s0 + $0x110] sm:$0xff]   ;;  %v3925_v57 = vld [vmem:[%s5942_s0 + $0x158] sm:$0xff]   ;;  %248 = vst.msk [vmem:[#allocation0 + $0x8c0] ss:$8 sm:$0xf] %vm3_vm0, %v3870_v55   ;;  %v3927_v59 = vld [vmem:[%s5942_s0 + $0x168] sm:$0xff]  }
  0x2f   :  { %534 = vrot.lane.b32.xlu0 %v3904_v23, %s4314_s12  ;;  %v3924_v58 = vld [vmem:[%s5942_s0 + $0x150] sm:$0xff]   ;;  %250 = vst.msk [vmem:[#allocation0 + $0x8c0] ss:$8 sm:$0xf0] %vm3_vm0, %v3870_v55   ;;  %v3926_v60 = vld [vmem:[%s5942_s0 + $0x160] sm:$0xff]   ;;  %v3872_v61 = vld [vmem:[%s5942_s0 + $0x128] sm:$0xff]  }
  0x30   :  { %241 = vst.msk [vmem:[#allocation0 + $0x880] ss:$8 sm:$0xf] %vm3_vm0, %v3869_v56   ;;  %243 = vst.msk [vmem:[#allocation0 + $0x880] ss:$8 sm:$0xf0] %vm3_vm0, %v3869_v56  }
  0x31   :  { %v3871_v62 = vld [vmem:[%s5942_s0 + $0x120] sm:$0xff]   ;;  %262 = vst.msk [vmem:[#allocation0 + $0x940] ss:$8 sm:$0xf] %vm3_vm0, %v3872_v61   ;;  %v3929_v63 = vld [vmem:[%s5942_s0 + $0x178] sm:$0xff]   ;;  %v3928_v0 = vld [vmem:[%s5942_s0 + $0x170] sm:$0xff]  }
  0x32   :  { %561 = vrot.lane.b32.xlu1 %v3907_v25, %s4314_s12  ;;  %264 = vst.msk [vmem:[#allocation0 + $0x940] ss:$8 sm:$0xf0] %vm3_vm0, %v3872_v61   ;;  %255 = vst.msk [vmem:[#allocation0 + $0x900] ss:$8 sm:$0xf] %vm3_vm0, %v3871_v62  }
  0x33   :  { %552 = vrot.lane.b32.xlu0 %v3906_v26, %s4314_s12  ;;  %257 = vst.msk [vmem:[#allocation0 + $0x900] ss:$8 sm:$0xf0] %vm3_vm0, %v3871_v62   ;;  %v3874_v1 = vld [vmem:[%s5942_s0 + $0x138] sm:$0xff]   ;;  %v3873_v2 = vld [vmem:[%s5942_s0 + $0x130] sm:$0xff]   ;;  %v3876_v3 = vld [vmem:[%s5942_s0 + $0x148] sm:$0xff]  }
  0x34   :  { %276 = vst.msk [vmem:[#allocation0 + $0x9c0] ss:$8 sm:$0xf] %vm3_vm0, %v3874_v1   ;;  %278 = vst.msk [vmem:[#allocation0 + $0x9c0] ss:$8 sm:$0xf0] %vm3_vm0, %v3874_v1  }
  0x35   :  { %269 = vst.msk [vmem:[#allocation0 + $0x980] ss:$8 sm:$0xf] %vm3_vm0, %v3873_v2   ;;  %271 = vst.msk [vmem:[#allocation0 + $0x980] ss:$8 sm:$0xf0] %vm3_vm0, %v3873_v2  }
  0x36   :  { %579 = vrot.lane.b32.xlu1 %v3909_v29, %s4314_s12  ;;  %v3875_v4 = vld [vmem:[%s5942_s0 + $0x140] sm:$0xff]   ;;  %290 = vst.msk [vmem:[#allocation0 + $0xa40] ss:$8 sm:$0xf] %vm3_vm0, %v3876_v3   ;;  %v3878_v5 = vld [vmem:[%s5942_s0 + $0x158] sm:$0xff]   ;;  %v3877_v6 = vld [vmem:[%s5942_s0 + $0x150] sm:$0xff]  }
  0x37   :  { %570 = vrot.lane.b32.xlu0 %v3908_v30, %s4314_s12  ;;  %292 = vst.msk [vmem:[#allocation0 + $0xa40] ss:$8 sm:$0xf0] %vm3_vm0, %v3876_v3   ;;  %283 = vst.msk [vmem:[#allocation0 + $0xa00] ss:$8 sm:$0xf] %vm3_vm0, %v3875_v4  }
  0x38   :  { %285 = vst.msk [vmem:[#allocation0 + $0xa00] ss:$8 sm:$0xf0] %vm3_vm0, %v3875_v4   ;;  %304 = vst.msk [vmem:[#allocation0 + $0xac0] ss:$8 sm:$0xf] %vm3_vm0, %v3878_v5  }
  0x39   :  { %306 = vst.msk [vmem:[#allocation0 + $0xac0] ss:$8 sm:$0xf0] %vm3_vm0, %v3878_v5   ;;  %297 = vst.msk [vmem:[#allocation0 + $0xa80] ss:$8 sm:$0xf] %vm3_vm0, %v3877_v6  }
  0x3a   :  { %597 = vrot.lane.b32.xlu1 %v3911_v31, %s4314_s12  ;;  %299 = vst.msk [vmem:[#allocation0 + $0xa80] ss:$8 sm:$0xf0] %vm3_vm0, %v3877_v6   ;;  %v3880_v7 = vld [vmem:[%s5942_s0 + $0x168] sm:$0xff]   ;;  %v3879_v8 = vld [vmem:[%s5942_s0 + $0x160] sm:$0xff]   ;;  %v3882_v9 = vld [vmem:[%s5942_s0 + $0x178] sm:$0xff]  }
  0x3b   :  { %588 = vrot.lane.b32.xlu0 %v3910_v32, %s4314_s12  ;;  %318 = vst.msk [vmem:[#allocation0 + $0xb40] ss:$8 sm:$0xf] %vm3_vm0, %v3880_v7   ;;  %320 = vst.msk [vmem:[#allocation0 + $0xb40] ss:$8 sm:$0xf0] %vm3_vm0, %v3880_v7  }
  0x3c   :  { %311 = vst.msk [vmem:[#allocation0 + $0xb00] ss:$8 sm:$0xf] %vm3_vm0, %v3879_v8   ;;  %313 = vst.msk [vmem:[#allocation0 + $0xb00] ss:$8 sm:$0xf0] %vm3_vm0, %v3879_v8  }
  0x3d   :  { %v3881_v10 = vld [vmem:[%s5942_s0 + $0x170] sm:$0xff]   ;;  %332 = vst.msk [vmem:[#allocation0 + $0xbc0] ss:$8 sm:$0xf] %vm3_vm0, %v3882_v9  }
  0x3e   :  { %615 = vrot.lane.b32.xlu1 %v3913_v35, %s4314_s12  ;;  %334 = vst.msk [vmem:[#allocation0 + $0xbc0] ss:$8 sm:$0xf0] %vm3_vm0, %v3882_v9   ;;  %325 = vst.msk [vmem:[#allocation0 + $0xb80] ss:$8 sm:$0xf] %vm3_vm0, %v3881_v10  }
  0x3f   :  { %606 = vrot.lane.b32.xlu0 %v3912_v36, %s4314_s12  ;;  %327 = vst.msk [vmem:[#allocation0 + $0xb80] ss:$8 sm:$0xf0] %vm3_vm0, %v3881_v10  }
  0x42   :  { %633 = vrot.lane.b32.xlu1 %v3915_v39, %s4314_s12 }
  0x43   :  { %624 = vrot.lane.b32.xlu0 %v3914_v40, %s4314_s12 }
  0x46   :  { %651 = vrot.lane.b32.xlu1 %v3917_v43, %s4314_s12 }
  0x47   :  { %642 = vrot.lane.b32.xlu0 %v3916_v44, %s4314_s12 }
  0x4a   :  { %669 = vrot.lane.b32.xlu1 %v3919_v45, %s4314_s12 }
  0x4b   :  { %660 = vrot.lane.b32.xlu0 %v3918_v46, %s4314_s12 }
  0x4e   :  { %687 = vrot.lane.b32.xlu1 %v3921_v49, %s4314_s12 }
  0x4f   :  { %678 = vrot.lane.b32.xlu0 %v3920_v50, %s4314_s12 }
  0x52   :  { %705 = vrot.lane.b32.xlu1 %v3923_v53, %s4314_s12 }
  0x53   :  { %696 = vrot.lane.b32.xlu0 %v3922_v54, %s4314_s12 }
  0x56   :  { %723 = vrot.lane.b32.xlu1 %v3925_v57, %s4314_s12 }
  0x57   :  { %714 = vrot.lane.b32.xlu0 %v3924_v58, %s4314_s12 }
  0x5a   :  { %741 = vrot.lane.b32.xlu1 %v3927_v59, %s4314_s12 }
  0x5b   :  { %732 = vrot.lane.b32.xlu0 %v3926_v60, %s4314_s12 }
  0x5e   :  { %759 = vrot.lane.b32.xlu1 %v3929_v63, %s4314_s12 }
  0x5f   :  { %750 = vrot.lane.b32.xlu0 %v3928_v0, %s4314_s12 }
  0x74   :  { %v355_v11 = vpop.permute.xlu1 %354   ;;  %v337_v12 = vpop.permute.xlu0 %336  }
  0x75   :  { %358 = vst.msk [vmem:[#allocation0 + $0x81] ss:$8 sm:$0xf] %vm3_vm0, %v355_v11   ;;  %360 = vst.msk [vmem:[#allocation0 + $0x81] ss:$8 sm:$0xf0] %vm3_vm0, %v355_v11  }
  0x76   :  { %340 = vst.msk [vmem:[#allocation0 + $0x1] ss:$8 sm:$0xf] %vm3_vm0, %v337_v12   ;;  %342 = vst.msk [vmem:[#allocation0 + $0x1] ss:$8 sm:$0xf0] %vm3_vm0, %v337_v12  }
  0x78   :  { %v364_v13 = vpop.permute.xlu1 %363   ;;  %v346_v14 = vpop.permute.xlu0 %345  }
  0x79   :  { %367 = vst.msk [vmem:[#allocation0 + $0xc1] ss:$8 sm:$0xf] %vm3_vm0, %v364_v13   ;;  %369 = vst.msk [vmem:[#allocation0 + $0xc1] ss:$8 sm:$0xf0] %vm3_vm0, %v364_v13  }
  0x7a   :  { %349 = vst.msk [vmem:[#allocation0 + $0x41] ss:$8 sm:$0xf] %vm3_vm0, %v346_v14   ;;  %351 = vst.msk [vmem:[#allocation0 + $0x41] ss:$8 sm:$0xf0] %vm3_vm0, %v346_v14  }
  0x7c   :  { %v879_v15 = vld [vmem:[#allocation0 + $0x80] sm:$0x3]  ;;  %v886_v16 = vld [vmem:[#allocation0 + $0x88] sm:$0x3]  ;;  %v893_v17 = vld [vmem:[#allocation0 + $0x90] sm:$0x3]  ;;  %v382_v18 = vpop.permute.xlu1 %381   ;;  %v373_v19 = vpop.permute.xlu0 %372  }
  0x7d   :  { %3945 = vst [vmem:[%s5943_s1 + $0x20] sm:$0x3] %v879_v15  ;;  %3946 = vst [vmem:[%s5943_s1 + $0x22] sm:$0x3] %v886_v16  ;;  %v900_v20 = vld [vmem:[#allocation0 + $0x98] sm:$0x3] }
  0x7e   :  { %3947 = vst [vmem:[%s5943_s1 + $0x24] sm:$0x3] %v893_v17  ;;  %v907_v21 = vld [vmem:[#allocation0 + $0xa0] sm:$0x3]  ;;  %v914_v22 = vld [vmem:[#allocation0 + $0xa8] sm:$0x3] }
  0x7f   :  { %385 = vst.msk [vmem:[#allocation0 + $0x141] ss:$8 sm:$0xf] %vm3_vm0, %v382_v18   ;;  %387 = vst.msk [vmem:[#allocation0 + $0x141] ss:$8 sm:$0xf0] %vm3_vm0, %v382_v18  }
  0x80   :  { %376 = vst.msk [vmem:[#allocation0 + $0x101] ss:$8 sm:$0xf] %vm3_vm0, %v373_v19   ;;  %378 = vst.msk [vmem:[#allocation0 + $0x101] ss:$8 sm:$0xf0] %vm3_vm0, %v373_v19   ;;  %v400_v32 = vpop.permute.xlu1 %399   ;;  %v391_v33 = vpop.permute.xlu0 %390  }
  0x81   :  { %3948 = vst [vmem:[%s5943_s1 + $0x26] sm:$0x3] %v900_v20  ;;  %3949 = vst [vmem:[%s5943_s1 + $0x28] sm:$0x3] %v907_v21  ;;  %v921_v23 = vld [vmem:[#allocation0 + $0xb0] sm:$0x3] }
  0x82   :  { %3950 = vst [vmem:[%s5943_s1 + $0x2a] sm:$0x3] %v914_v22  ;;  %v928_v24 = vld [vmem:[#allocation0 + $0xb8] sm:$0x3]  ;;  %v770_v25 = vld [vmem:[#allocation0] sm:$0x3] }
  0x83   :  { %3951 = vst [vmem:[%s5943_s1 + $0x2c] sm:$0x3] %v921_v23  ;;  %3952 = vst [vmem:[%s5943_s1 + $0x2e] sm:$0x3] %v928_v24  ;;  %v775_v26 = vld [vmem:[#allocation0 + $0x8] sm:$0x3] }
  0x84   :  { %773 = vst [vmem:[%s5943_s1] sm:$0x3] %v770_v25  ;;  %v781_v27 = vld [vmem:[#allocation0 + $0x10] sm:$0x3]  ;;  %v788_v28 = vld [vmem:[#allocation0 + $0x18] sm:$0x3]  ;;  %v418_v46 = vpop.permute.xlu1 %417  }
  0x85   :  { %3930 = vst [vmem:[%s5943_s1 + $0x2] sm:$0x3] %v775_v26  ;;  %3931 = vst [vmem:[%s5943_s1 + $0x4] sm:$0x3] %v781_v27  ;;  %v795_v29 = vld [vmem:[#allocation0 + $0x20] sm:$0x3]  ;;  %v409_v47 = vpop.permute.xlu0 %408  }
  0x86   :  { %3932 = vst [vmem:[%s5943_s1 + $0x6] sm:$0x3] %v788_v28  ;;  %v802_v30 = vld [vmem:[#allocation0 + $0x28] sm:$0x3]  ;;  %v809_v31 = vld [vmem:[#allocation0 + $0x30] sm:$0x3] }
  0x87   :  { %3933 = vst [vmem:[%s5943_s1 + $0x8] sm:$0x3] %v795_v29  ;;  %3934 = vst [vmem:[%s5943_s1 + $0xa] sm:$0x3] %v802_v30  ;;  %v816_v34 = vld [vmem:[#allocation0 + $0x38] sm:$0x3] }
  0x88   :  { %3935 = vst [vmem:[%s5943_s1 + $0xc] sm:$0x3] %v809_v31  ;;  %v935_v35 = vld [vmem:[#allocation0 + $0xc0] sm:$0x3]  ;;  %v942_v36 = vld [vmem:[#allocation0 + $0xc8] sm:$0x3]  ;;  %v436_v60 = vpop.permute.xlu1 %435  }
  0x89   :  { %403 = vst.msk [vmem:[#allocation0 + $0x1c1] ss:$8 sm:$0xf] %vm3_vm0, %v400_v32   ;;  %405 = vst.msk [vmem:[#allocation0 + $0x1c1] ss:$8 sm:$0xf0] %vm3_vm0, %v400_v32   ;;  %v427_v61 = vpop.permute.xlu0 %426  }
  0x8a   :  { %394 = vst.msk [vmem:[#allocation0 + $0x181] ss:$8 sm:$0xf] %vm3_vm0, %v391_v33   ;;  %396 = vst.msk [vmem:[#allocation0 + $0x181] ss:$8 sm:$0xf0] %vm3_vm0, %v391_v33  }
  0x8b   :  { %3936 = vst [vmem:[%s5943_s1 + $0xe] sm:$0x3] %v816_v34  ;;  %3953 = vst [vmem:[%s5943_s1 + $0x30] sm:$0x3] %v935_v35  ;;  %v949_v37 = vld [vmem:[#allocation0 + $0xd0] sm:$0x3] }
  0x8c   :  { %3954 = vst [vmem:[%s5943_s1 + $0x32] sm:$0x3] %v942_v36  ;;  %v956_v38 = vld [vmem:[#allocation0 + $0xd8] sm:$0x3]  ;;  %v963_v39 = vld [vmem:[#allocation0 + $0xe0] sm:$0x3]  ;;  %v454_v10 = vpop.permute.xlu1 %453  }
  0x8d   :  { %3955 = vst [vmem:[%s5943_s1 + $0x34] sm:$0x3] %v949_v37  ;;  %3956 = vst [vmem:[%s5943_s1 + $0x36] sm:$0x3] %v956_v38  ;;  %v970_v40 = vld [vmem:[#allocation0 + $0xe8] sm:$0x3]  ;;  %v445_v11 = vpop.permute.xlu0 %444  }
  0x8e   :  { %3957 = vst [vmem:[%s5943_s1 + $0x38] sm:$0x3] %v963_v39  ;;  %v977_v41 = vld [vmem:[#allocation0 + $0xf0] sm:$0x3]  ;;  %v984_v42 = vld [vmem:[#allocation0 + $0xf8] sm:$0x3] }
  0x8f   :  { %3958 = vst [vmem:[%s5943_s1 + $0x3a] sm:$0x3] %v970_v40  ;;  %3959 = vst [vmem:[%s5943_s1 + $0x3c] sm:$0x3] %v977_v41  ;;  %v823_v43 = vld [vmem:[#allocation0 + $0x40] sm:$0x3] }
  0x90   :  { %3960 = vst [vmem:[%s5943_s1 + $0x3e] sm:$0x3] %v984_v42  ;;  %v830_v44 = vld [vmem:[#allocation0 + $0x48] sm:$0x3]  ;;  %v837_v45 = vld [vmem:[#allocation0 + $0x50] sm:$0x3]  ;;  %v472_v24 = vpop.permute.xlu1 %471  }
  0x91   :  { %3937 = vst [vmem:[%s5943_s1 + $0x10] sm:$0x3] %v823_v43  ;;  %3938 = vst [vmem:[%s5943_s1 + $0x12] sm:$0x3] %v830_v44  ;;  %v844_v48 = vld [vmem:[#allocation0 + $0x58] sm:$0x3]  ;;  %v463_v25 = vpop.permute.xlu0 %462  }
  0x92   :  { %3939 = vst [vmem:[%s5943_s1 + $0x14] sm:$0x3] %v837_v45  ;;  %v851_v49 = vld [vmem:[#allocation0 + $0x60] sm:$0x3]  ;;  %v858_v50 = vld [vmem:[#allocation0 + $0x68] sm:$0x3] }
  0x93   :  { %421 = vst.msk [vmem:[#allocation0 + $0x241] ss:$8 sm:$0xf] %vm3_vm0, %v418_v46   ;;  %423 = vst.msk [vmem:[#allocation0 + $0x241] ss:$8 sm:$0xf0] %vm3_vm0, %v418_v46  }
  0x94   :  { %412 = vst.msk [vmem:[#allocation0 + $0x201] ss:$8 sm:$0xf] %vm3_vm0, %v409_v47   ;;  %414 = vst.msk [vmem:[#allocation0 + $0x201] ss:$8 sm:$0xf0] %vm3_vm0, %v409_v47   ;;  %v490_v38 = vpop.permute.xlu1 %489  }
  0x95   :  { %3940 = vst [vmem:[%s5943_s1 + $0x16] sm:$0x3] %v844_v48  ;;  %3941 = vst [vmem:[%s5943_s1 + $0x18] sm:$0x3] %v851_v49  ;;  %v865_v51 = vld [vmem:[#allocation0 + $0x70] sm:$0x3]  ;;  %v481_v39 = vpop.permute.xlu0 %480  }
  0x96   :  { %3942 = vst [vmem:[%s5943_s1 + $0x1a] sm:$0x3] %v858_v50  ;;  %v872_v52 = vld [vmem:[#allocation0 + $0x78] sm:$0x3]  ;;  %v1047_v53 = vld [vmem:[#allocation0 + $0x140] sm:$0x3] }
  0x97   :  { %3943 = vst [vmem:[%s5943_s1 + $0x1c] sm:$0x3] %v865_v51  ;;  %3944 = vst [vmem:[%s5943_s1 + $0x1e] sm:$0x3] %v872_v52  ;;  %v1054_v54 = vld [vmem:[#allocation0 + $0x148] sm:$0x3] }
  0x98   :  { %3969 = vst [vmem:[%s5943_s1 + $0x50] sm:$0x3] %v1047_v53  ;;  %v1061_v55 = vld [vmem:[#allocation0 + $0x150] sm:$0x3]  ;;  %v1068_v56 = vld [vmem:[#allocation0 + $0x158] sm:$0x3]  ;;  %v508_v52 = vpop.permute.xlu1 %507  }
  0x99   :  { %3970 = vst [vmem:[%s5943_s1 + $0x52] sm:$0x3] %v1054_v54  ;;  %3971 = vst [vmem:[%s5943_s1 + $0x54] sm:$0x3] %v1061_v55  ;;  %v1075_v57 = vld [vmem:[#allocation0 + $0x160] sm:$0x3]  ;;  %v499_v53 = vpop.permute.xlu0 %498  }
  0x9a   :  { %3972 = vst [vmem:[%s5943_s1 + $0x56] sm:$0x3] %v1068_v56  ;;  %v1082_v58 = vld [vmem:[#allocation0 + $0x168] sm:$0x3]  ;;  %v1089_v59 = vld [vmem:[#allocation0 + $0x170] sm:$0x3] }
  0x9b   :  { %3973 = vst [vmem:[%s5943_s1 + $0x58] sm:$0x3] %v1075_v57  ;;  %3974 = vst [vmem:[%s5943_s1 + $0x5a] sm:$0x3] %v1082_v58  ;;  %v1096_v62 = vld [vmem:[#allocation0 + $0x178] sm:$0x3] }
  0x9c   :  { %3975 = vst [vmem:[%s5943_s1 + $0x5c] sm:$0x3] %v1089_v59  ;;  %v991_v63 = vld [vmem:[#allocation0 + $0x100] sm:$0x3]  ;;  %v998_v0 = vld [vmem:[#allocation0 + $0x108] sm:$0x3] }
  0x9d   :  { %439 = vst.msk [vmem:[#allocation0 + $0x2c1] ss:$8 sm:$0xf] %vm3_vm0, %v436_v60   ;;  %441 = vst.msk [vmem:[#allocation0 + $0x2c1] ss:$8 sm:$0xf0] %vm3_vm0, %v436_v60  }
  0x9e   :  { %430 = vst.msk [vmem:[#allocation0 + $0x281] ss:$8 sm:$0xf] %vm3_vm0, %v427_v61   ;;  %432 = vst.msk [vmem:[#allocation0 + $0x281] ss:$8 sm:$0xf0] %vm3_vm0, %v427_v61  }
  0x9f   :  { %3976 = vst [vmem:[%s5943_s1 + $0x5e] sm:$0x3] %v1096_v62  ;;  %3961 = vst [vmem:[%s5943_s1 + $0x40] sm:$0x3] %v991_v63  ;;  %v1005_v1 = vld [vmem:[#allocation0 + $0x110] sm:$0x3] }
  0xa0   :  { %3962 = vst [vmem:[%s5943_s1 + $0x42] sm:$0x3] %v998_v0  ;;  %v1012_v2 = vld [vmem:[#allocation0 + $0x118] sm:$0x3]  ;;  %v1019_v3 = vld [vmem:[#allocation0 + $0x120] sm:$0x3] }
  0xa1   :  { %3963 = vst [vmem:[%s5943_s1 + $0x44] sm:$0x3] %v1005_v1  ;;  %3964 = vst [vmem:[%s5943_s1 + $0x46] sm:$0x3] %v1012_v2  ;;  %v1026_v4 = vld [vmem:[#allocation0 + $0x128] sm:$0x3]  ;;  %v526_v2 = vpop.permute.xlu1 %525  }
  0xa2   :  { %3965 = vst [vmem:[%s5943_s1 + $0x48] sm:$0x3] %v1019_v3  ;;  %v1033_v5 = vld [vmem:[#allocation0 + $0x130] sm:$0x3]  ;;  %v1040_v6 = vld [vmem:[#allocation0 + $0x138] sm:$0x3]  ;;  %v517_v3 = vpop.permute.xlu0 %516  }
  0xa3   :  { %3966 = vst [vmem:[%s5943_s1 + $0x4a] sm:$0x3] %v1026_v4  ;;  %3967 = vst [vmem:[%s5943_s1 + $0x4c] sm:$0x3] %v1033_v5  ;;  %v1159_v7 = vld [vmem:[#allocation0 + $0x1c0] sm:$0x3] }
  0xa4   :  { %3968 = vst [vmem:[%s5943_s1 + $0x4e] sm:$0x3] %v1040_v6  ;;  %v1166_v8 = vld [vmem:[#allocation0 + $0x1c8] sm:$0x3]  ;;  %v1173_v9 = vld [vmem:[#allocation0 + $0x1d0] sm:$0x3] }
  0xa5   :  { %3985 = vst [vmem:[%s5943_s1 + $0x70] sm:$0x3] %v1159_v7  ;;  %3986 = vst [vmem:[%s5943_s1 + $0x72] sm:$0x3] %v1166_v8  ;;  %v1180_v12 = vld [vmem:[#allocation0 + $0x1d8] sm:$0x3] }
  0xa6   :  { %3987 = vst [vmem:[%s5943_s1 + $0x74] sm:$0x3] %v1173_v9  ;;  %v1187_v13 = vld [vmem:[#allocation0 + $0x1e0] sm:$0x3]  ;;  %v1194_v14 = vld [vmem:[#allocation0 + $0x1e8] sm:$0x3] }
  0xa7   :  { %457 = vst.msk [vmem:[#allocation0 + $0x341] ss:$8 sm:$0xf] %vm3_vm0, %v454_v10   ;;  %459 = vst.msk [vmem:[#allocation0 + $0x341] ss:$8 sm:$0xf0] %vm3_vm0, %v454_v10  }
  0xa8   :  { %448 = vst.msk [vmem:[#allocation0 + $0x301] ss:$8 sm:$0xf] %vm3_vm0, %v445_v11   ;;  %450 = vst.msk [vmem:[#allocation0 + $0x301] ss:$8 sm:$0xf0] %vm3_vm0, %v445_v11  }
  0xa9   :  { %3988 = vst [vmem:[%s5943_s1 + $0x76] sm:$0x3] %v1180_v12  ;;  %3989 = vst [vmem:[%s5943_s1 + $0x78] sm:$0x3] %v1187_v13  ;;  %v1201_v15 = vld [vmem:[#allocation0 + $0x1f0] sm:$0x3] }
  0xaa   :  { %3990 = vst [vmem:[%s5943_s1 + $0x7a] sm:$0x3] %v1194_v14  ;;  %v1208_v16 = vld [vmem:[#allocation0 + $0x1f8] sm:$0x3]  ;;  %v1103_v17 = vld [vmem:[#allocation0 + $0x180] sm:$0x3] }
  0xab   :  { %3991 = vst [vmem:[%s5943_s1 + $0x7c] sm:$0x3] %v1201_v15  ;;  %3992 = vst [vmem:[%s5943_s1 + $0x7e] sm:$0x3] %v1208_v16  ;;  %v1110_v18 = vld [vmem:[#allocation0 + $0x188] sm:$0x3]  ;;  %v544_v16 = vpop.permute.xlu1 %543  }
  0xac   :  { %3977 = vst [vmem:[%s5943_s1 + $0x60] sm:$0x3] %v1103_v17  ;;  %v1117_v19 = vld [vmem:[#allocation0 + $0x190] sm:$0x3]  ;;  %v1124_v20 = vld [vmem:[#allocation0 + $0x198] sm:$0x3]  ;;  %v535_v17 = vpop.permute.xlu0 %534  }
  0xad   :  { %3978 = vst [vmem:[%s5943_s1 + $0x62] sm:$0x3] %v1110_v18  ;;  %3979 = vst [vmem:[%s5943_s1 + $0x64] sm:$0x3] %v1117_v19  ;;  %v1131_v21 = vld [vmem:[#allocation0 + $0x1a0] sm:$0x3] }
  0xae   :  { %3980 = vst [vmem:[%s5943_s1 + $0x66] sm:$0x3] %v1124_v20  ;;  %v1138_v22 = vld [vmem:[#allocation0 + $0x1a8] sm:$0x3]  ;;  %v1145_v23 = vld [vmem:[#allocation0 + $0x1b0] sm:$0x3] }
  0xaf   :  { %3981 = vst [vmem:[%s5943_s1 + $0x68] sm:$0x3] %v1131_v21  ;;  %3982 = vst [vmem:[%s5943_s1 + $0x6a] sm:$0x3] %v1138_v22  ;;  %v1152_v26 = vld [vmem:[#allocation0 + $0x1b8] sm:$0x3] }
  0xb0   :  { %3983 = vst [vmem:[%s5943_s1 + $0x6c] sm:$0x3] %v1145_v23  ;;  %v1271_v27 = vld [vmem:[#allocation0 + $0x240] sm:$0x3]  ;;  %v1278_v28 = vld [vmem:[#allocation0 + $0x248] sm:$0x3] }
  0xb1   :  { %475 = vst.msk [vmem:[#allocation0 + $0x3c1] ss:$8 sm:$0xf] %vm3_vm0, %v472_v24   ;;  %477 = vst.msk [vmem:[#allocation0 + $0x3c1] ss:$8 sm:$0xf0] %vm3_vm0, %v472_v24  }
  0xb2   :  { %466 = vst.msk [vmem:[#allocation0 + $0x381] ss:$8 sm:$0xf] %vm3_vm0, %v463_v25   ;;  %468 = vst.msk [vmem:[#allocation0 + $0x381] ss:$8 sm:$0xf0] %vm3_vm0, %v463_v25  }
  0xb3   :  { %3984 = vst [vmem:[%s5943_s1 + $0x6e] sm:$0x3] %v1152_v26  ;;  %4001 = vst [vmem:[%s5943_s1 + $0x90] sm:$0x3] %v1271_v27  ;;  %v1285_v29 = vld [vmem:[#allocation0 + $0x250] sm:$0x3] }
  0xb4   :  { %4002 = vst [vmem:[%s5943_s1 + $0x92] sm:$0x3] %v1278_v28  ;;  %v1292_v30 = vld [vmem:[#allocation0 + $0x258] sm:$0x3]  ;;  %v1299_v31 = vld [vmem:[#allocation0 + $0x260] sm:$0x3] }
  0xb5   :  { %4003 = vst [vmem:[%s5943_s1 + $0x94] sm:$0x3] %v1285_v29  ;;  %4004 = vst [vmem:[%s5943_s1 + $0x96] sm:$0x3] %v1292_v30  ;;  %v1306_v32 = vld [vmem:[#allocation0 + $0x268] sm:$0x3]  ;;  %v562_v30 = vpop.permute.xlu1 %561  }
  0xb6   :  { %4005 = vst [vmem:[%s5943_s1 + $0x98] sm:$0x3] %v1299_v31  ;;  %v1313_v33 = vld [vmem:[#allocation0 + $0x270] sm:$0x3]  ;;  %v1320_v34 = vld [vmem:[#allocation0 + $0x278] sm:$0x3]  ;;  %v553_v31 = vpop.permute.xlu0 %552  }
  0xb7   :  { %4006 = vst [vmem:[%s5943_s1 + $0x9a] sm:$0x3] %v1306_v32  ;;  %4007 = vst [vmem:[%s5943_s1 + $0x9c] sm:$0x3] %v1313_v33  ;;  %v1215_v35 = vld [vmem:[#allocation0 + $0x200] sm:$0x3] }
  0xb8   :  { %4008 = vst [vmem:[%s5943_s1 + $0x9e] sm:$0x3] %v1320_v34  ;;  %v1222_v36 = vld [vmem:[#allocation0 + $0x208] sm:$0x3]  ;;  %v1229_v37 = vld [vmem:[#allocation0 + $0x210] sm:$0x3] }
  0xb9   :  { %3993 = vst [vmem:[%s5943_s1 + $0x80] sm:$0x3] %v1215_v35  ;;  %3994 = vst [vmem:[%s5943_s1 + $0x82] sm:$0x3] %v1222_v36  ;;  %v1236_v40 = vld [vmem:[#allocation0 + $0x218] sm:$0x3] }
  0xba   :  { %3995 = vst [vmem:[%s5943_s1 + $0x84] sm:$0x3] %v1229_v37  ;;  %v1243_v41 = vld [vmem:[#allocation0 + $0x220] sm:$0x3]  ;;  %v1250_v42 = vld [vmem:[#allocation0 + $0x228] sm:$0x3] }
  0xbb   :  { %493 = vst.msk [vmem:[#allocation0 + $0x441] ss:$8 sm:$0xf] %vm3_vm0, %v490_v38   ;;  %495 = vst.msk [vmem:[#allocation0 + $0x441] ss:$8 sm:$0xf0] %vm3_vm0, %v490_v38  }
  0xbc   :  { %484 = vst.msk [vmem:[#allocation0 + $0x401] ss:$8 sm:$0xf] %vm3_vm0, %v481_v39   ;;  %486 = vst.msk [vmem:[#allocation0 + $0x401] ss:$8 sm:$0xf0] %vm3_vm0, %v481_v39  }
  0xbd   :  { %3996 = vst [vmem:[%s5943_s1 + $0x86] sm:$0x3] %v1236_v40  ;;  %3997 = vst [vmem:[%s5943_s1 + $0x88] sm:$0x3] %v1243_v41  ;;  %v1257_v43 = vld [vmem:[#allocation0 + $0x230] sm:$0x3] }
  0xbe   :  { %3998 = vst [vmem:[%s5943_s1 + $0x8a] sm:$0x3] %v1250_v42  ;;  %v1264_v44 = vld [vmem:[#allocation0 + $0x238] sm:$0x3]  ;;  %v1383_v45 = vld [vmem:[#allocation0 + $0x2c0] sm:$0x3] }
  0xbf   :  { %3999 = vst [vmem:[%s5943_s1 + $0x8c] sm:$0x3] %v1257_v43  ;;  %4000 = vst [vmem:[%s5943_s1 + $0x8e] sm:$0x3] %v1264_v44  ;;  %v1390_v46 = vld [vmem:[#allocation0 + $0x2c8] sm:$0x3]  ;;  %v580_v44 = vpop.permute.xlu1 %579  }
  0xc0   :  { %4017 = vst [vmem:[%s5943_s1 + $0xb0] sm:$0x3] %v1383_v45  ;;  %v1397_v47 = vld [vmem:[#allocation0 + $0x2d0] sm:$0x3]  ;;  %v1404_v48 = vld [vmem:[#allocation0 + $0x2d8] sm:$0x3]  ;;  %v571_v45 = vpop.permute.xlu0 %570  }
  0xc1   :  { %4018 = vst [vmem:[%s5943_s1 + $0xb2] sm:$0x3] %v1390_v46  ;;  %4019 = vst [vmem:[%s5943_s1 + $0xb4] sm:$0x3] %v1397_v47  ;;  %v1411_v49 = vld [vmem:[#allocation0 + $0x2e0] sm:$0x3] }
  0xc2   :  { %4020 = vst [vmem:[%s5943_s1 + $0xb6] sm:$0x3] %v1404_v48  ;;  %v1418_v50 = vld [vmem:[#allocation0 + $0x2e8] sm:$0x3]  ;;  %v1425_v51 = vld [vmem:[#allocation0 + $0x2f0] sm:$0x3] }
  0xc3   :  { %4021 = vst [vmem:[%s5943_s1 + $0xb8] sm:$0x3] %v1411_v49  ;;  %4022 = vst [vmem:[%s5943_s1 + $0xba] sm:$0x3] %v1418_v50  ;;  %v1432_v54 = vld [vmem:[#allocation0 + $0x2f8] sm:$0x3] }
  0xc4   :  { %4023 = vst [vmem:[%s5943_s1 + $0xbc] sm:$0x3] %v1425_v51  ;;  %v1327_v55 = vld [vmem:[#allocation0 + $0x280] sm:$0x3]  ;;  %v1334_v56 = vld [vmem:[#allocation0 + $0x288] sm:$0x3] }
  0xc5   :  { %511 = vst.msk [vmem:[#allocation0 + $0x4c1] ss:$8 sm:$0xf] %vm3_vm0, %v508_v52   ;;  %513 = vst.msk [vmem:[#allocation0 + $0x4c1] ss:$8 sm:$0xf0] %vm3_vm0, %v508_v52  }
  0xc6   :  { %502 = vst.msk [vmem:[#allocation0 + $0x481] ss:$8 sm:$0xf] %vm3_vm0, %v499_v53   ;;  %504 = vst.msk [vmem:[#allocation0 + $0x481] ss:$8 sm:$0xf0] %vm3_vm0, %v499_v53  }
  0xc7   :  { %4024 = vst [vmem:[%s5943_s1 + $0xbe] sm:$0x3] %v1432_v54  ;;  %4009 = vst [vmem:[%s5943_s1 + $0xa0] sm:$0x3] %v1327_v55  ;;  %v1341_v57 = vld [vmem:[#allocation0 + $0x290] sm:$0x3] }
  0xc8   :  { %4010 = vst [vmem:[%s5943_s1 + $0xa2] sm:$0x3] %v1334_v56  ;;  %v1348_v58 = vld [vmem:[#allocation0 + $0x298] sm:$0x3]  ;;  %v1355_v59 = vld [vmem:[#allocation0 + $0x2a0] sm:$0x3] }
  0xc9   :  { %4011 = vst [vmem:[%s5943_s1 + $0xa4] sm:$0x3] %v1341_v57  ;;  %4012 = vst [vmem:[%s5943_s1 + $0xa6] sm:$0x3] %v1348_v58  ;;  %v1362_v60 = vld [vmem:[#allocation0 + $0x2a8] sm:$0x3]  ;;  %v598_v58 = vpop.permute.xlu1 %597  }
  0xca   :  { %4013 = vst [vmem:[%s5943_s1 + $0xa8] sm:$0x3] %v1355_v59  ;;  %v1369_v61 = vld [vmem:[#allocation0 + $0x2b0] sm:$0x3]  ;;  %v1376_v62 = vld [vmem:[#allocation0 + $0x2b8] sm:$0x3]  ;;  %v589_v59 = vpop.permute.xlu0 %588  }
  0xcb   :  { %4014 = vst [vmem:[%s5943_s1 + $0xaa] sm:$0x3] %v1362_v60  ;;  %4015 = vst [vmem:[%s5943_s1 + $0xac] sm:$0x3] %v1369_v61  ;;  %v1495_v63 = vld [vmem:[#allocation0 + $0x340] sm:$0x3] }
  0xcc   :  { %4016 = vst [vmem:[%s5943_s1 + $0xae] sm:$0x3] %v1376_v62  ;;  %v1502_v0 = vld [vmem:[#allocation0 + $0x348] sm:$0x3]  ;;  %v1509_v1 = vld [vmem:[#allocation0 + $0x350] sm:$0x3] }
  0xcd   :  { %4033 = vst [vmem:[%s5943_s1 + $0xd0] sm:$0x3] %v1495_v63  ;;  %4034 = vst [vmem:[%s5943_s1 + $0xd2] sm:$0x3] %v1502_v0  ;;  %v1516_v4 = vld [vmem:[#allocation0 + $0x358] sm:$0x3] }
  0xce   :  { %4035 = vst [vmem:[%s5943_s1 + $0xd4] sm:$0x3] %v1509_v1  ;;  %v1523_v5 = vld [vmem:[#allocation0 + $0x360] sm:$0x3]  ;;  %v1530_v6 = vld [vmem:[#allocation0 + $0x368] sm:$0x3] }
  0xcf   :  { %529 = vst.msk [vmem:[#allocation0 + $0x541] ss:$8 sm:$0xf] %vm3_vm0, %v526_v2   ;;  %531 = vst.msk [vmem:[#allocation0 + $0x541] ss:$8 sm:$0xf0] %vm3_vm0, %v526_v2  }
  0xd0   :  { %520 = vst.msk [vmem:[#allocation0 + $0x501] ss:$8 sm:$0xf] %vm3_vm0, %v517_v3   ;;  %522 = vst.msk [vmem:[#allocation0 + $0x501] ss:$8 sm:$0xf0] %vm3_vm0, %v517_v3  }
  0xd1   :  { %4036 = vst [vmem:[%s5943_s1 + $0xd6] sm:$0x3] %v1516_v4  ;;  %4037 = vst [vmem:[%s5943_s1 + $0xd8] sm:$0x3] %v1523_v5  ;;  %v1537_v7 = vld [vmem:[#allocation0 + $0x370] sm:$0x3] }
  0xd2   :  { %4038 = vst [vmem:[%s5943_s1 + $0xda] sm:$0x3] %v1530_v6  ;;  %v1544_v8 = vld [vmem:[#allocation0 + $0x378] sm:$0x3]  ;;  %v1439_v9 = vld [vmem:[#allocation0 + $0x300] sm:$0x3] }
  0xd3   :  { %4039 = vst [vmem:[%s5943_s1 + $0xdc] sm:$0x3] %v1537_v7  ;;  %4040 = vst [vmem:[%s5943_s1 + $0xde] sm:$0x3] %v1544_v8  ;;  %v1446_v10 = vld [vmem:[#allocation0 + $0x308] sm:$0x3]  ;;  %v616_v8 = vpop.permute.xlu1 %615  }
  0xd4   :  { %4025 = vst [vmem:[%s5943_s1 + $0xc0] sm:$0x3] %v1439_v9  ;;  %v1453_v11 = vld [vmem:[#allocation0 + $0x310] sm:$0x3]  ;;  %v1460_v12 = vld [vmem:[#allocation0 + $0x318] sm:$0x3]  ;;  %v607_v9 = vpop.permute.xlu0 %606  }
  0xd5   :  { %4026 = vst [vmem:[%s5943_s1 + $0xc2] sm:$0x3] %v1446_v10  ;;  %4027 = vst [vmem:[%s5943_s1 + $0xc4] sm:$0x3] %v1453_v11  ;;  %v1467_v13 = vld [vmem:[#allocation0 + $0x320] sm:$0x3] }
  0xd6   :  { %4028 = vst [vmem:[%s5943_s1 + $0xc6] sm:$0x3] %v1460_v12  ;;  %v1474_v14 = vld [vmem:[#allocation0 + $0x328] sm:$0x3]  ;;  %v1481_v15 = vld [vmem:[#allocation0 + $0x330] sm:$0x3] }
  0xd7   :  { %4029 = vst [vmem:[%s5943_s1 + $0xc8] sm:$0x3] %v1467_v13  ;;  %4030 = vst [vmem:[%s5943_s1 + $0xca] sm:$0x3] %v1474_v14  ;;  %v1488_v18 = vld [vmem:[#allocation0 + $0x338] sm:$0x3] }
  0xd8   :  { %4031 = vst [vmem:[%s5943_s1 + $0xcc] sm:$0x3] %v1481_v15  ;;  %v1607_v19 = vld [vmem:[#allocation0 + $0x3c0] sm:$0x3]  ;;  %v1614_v20 = vld [vmem:[#allocation0 + $0x3c8] sm:$0x3] }
  0xd9   :  { %547 = vst.msk [vmem:[#allocation0 + $0x5c1] ss:$8 sm:$0xf] %vm3_vm0, %v544_v16   ;;  %549 = vst.msk [vmem:[#allocation0 + $0x5c1] ss:$8 sm:$0xf0] %vm3_vm0, %v544_v16  }
  0xda   :  { %538 = vst.msk [vmem:[#allocation0 + $0x581] ss:$8 sm:$0xf] %vm3_vm0, %v535_v17   ;;  %540 = vst.msk [vmem:[#allocation0 + $0x581] ss:$8 sm:$0xf0] %vm3_vm0, %v535_v17  }
  0xdb   :  { %4032 = vst [vmem:[%s5943_s1 + $0xce] sm:$0x3] %v1488_v18  ;;  %4049 = vst [vmem:[%s5943_s1 + $0xf0] sm:$0x3] %v1607_v19  ;;  %v1621_v21 = vld [vmem:[#allocation0 + $0x3d0] sm:$0x3] }
  0xdc   :  { %4050 = vst [vmem:[%s5943_s1 + $0xf2] sm:$0x3] %v1614_v20  ;;  %v1628_v22 = vld [vmem:[#allocation0 + $0x3d8] sm:$0x3]  ;;  %v1635_v23 = vld [vmem:[#allocation0 + $0x3e0] sm:$0x3] }
  0xdd   :  { %4051 = vst [vmem:[%s5943_s1 + $0xf4] sm:$0x3] %v1621_v21  ;;  %4052 = vst [vmem:[%s5943_s1 + $0xf6] sm:$0x3] %v1628_v22  ;;  %v1642_v24 = vld [vmem:[#allocation0 + $0x3e8] sm:$0x3]  ;;  %v634_v22 = vpop.permute.xlu1 %633  }
  0xde   :  { %4053 = vst [vmem:[%s5943_s1 + $0xf8] sm:$0x3] %v1635_v23  ;;  %v1649_v25 = vld [vmem:[#allocation0 + $0x3f0] sm:$0x3]  ;;  %v1656_v26 = vld [vmem:[#allocation0 + $0x3f8] sm:$0x3]  ;;  %v625_v23 = vpop.permute.xlu0 %624  }
  0xdf   :  { %4054 = vst [vmem:[%s5943_s1 + $0xfa] sm:$0x3] %v1642_v24  ;;  %4055 = vst [vmem:[%s5943_s1 + $0xfc] sm:$0x3] %v1649_v25  ;;  %v1551_v27 = vld [vmem:[#allocation0 + $0x380] sm:$0x3] }
  0xe0   :  { %4056 = vst [vmem:[%s5943_s1 + $0xfe] sm:$0x3] %v1656_v26  ;;  %v1558_v28 = vld [vmem:[#allocation0 + $0x388] sm:$0x3]  ;;  %v1565_v29 = vld [vmem:[#allocation0 + $0x390] sm:$0x3] }
  0xe1   :  { %4041 = vst [vmem:[%s5943_s1 + $0xe0] sm:$0x3] %v1551_v27  ;;  %4042 = vst [vmem:[%s5943_s1 + $0xe2] sm:$0x3] %v1558_v28  ;;  %v1572_v32 = vld [vmem:[#allocation0 + $0x398] sm:$0x3] }
  0xe2   :  { %4043 = vst [vmem:[%s5943_s1 + $0xe4] sm:$0x3] %v1565_v29  ;;  %v1579_v33 = vld [vmem:[#allocation0 + $0x3a0] sm:$0x3]  ;;  %v1586_v34 = vld [vmem:[#allocation0 + $0x3a8] sm:$0x3] }
  0xe3   :  { %565 = vst.msk [vmem:[#allocation0 + $0x641] ss:$8 sm:$0xf] %vm3_vm0, %v562_v30   ;;  %567 = vst.msk [vmem:[#allocation0 + $0x641] ss:$8 sm:$0xf0] %vm3_vm0, %v562_v30  }
  0xe4   :  { %556 = vst.msk [vmem:[#allocation0 + $0x601] ss:$8 sm:$0xf] %vm3_vm0, %v553_v31   ;;  %558 = vst.msk [vmem:[#allocation0 + $0x601] ss:$8 sm:$0xf0] %vm3_vm0, %v553_v31  }
  0xe5   :  { %4044 = vst [vmem:[%s5943_s1 + $0xe6] sm:$0x3] %v1572_v32  ;;  %4045 = vst [vmem:[%s5943_s1 + $0xe8] sm:$0x3] %v1579_v33  ;;  %v1593_v35 = vld [vmem:[#allocation0 + $0x3b0] sm:$0x3] }
  0xe6   :  { %4046 = vst [vmem:[%s5943_s1 + $0xea] sm:$0x3] %v1586_v34  ;;  %v1600_v36 = vld [vmem:[#allocation0 + $0x3b8] sm:$0x3]  ;;  %v1719_v37 = vld [vmem:[#allocation0 + $0x440] sm:$0x3] }
  0xe7   :  { %4047 = vst [vmem:[%s5943_s1 + $0xec] sm:$0x3] %v1593_v35  ;;  %4048 = vst [vmem:[%s5943_s1 + $0xee] sm:$0x3] %v1600_v36  ;;  %v1726_v38 = vld [vmem:[#allocation0 + $0x448] sm:$0x3]  ;;  %v652_v36 = vpop.permute.xlu1 %651  }
  0xe8   :  { %4065 = vst [vmem:[%s5943_s1 + $0x110] sm:$0x3] %v1719_v37  ;;  %v1733_v39 = vld [vmem:[#allocation0 + $0x450] sm:$0x3]  ;;  %v1740_v40 = vld [vmem:[#allocation0 + $0x458] sm:$0x3]  ;;  %v643_v37 = vpop.permute.xlu0 %642  }
  0xe9   :  { %4066 = vst [vmem:[%s5943_s1 + $0x112] sm:$0x3] %v1726_v38  ;;  %4067 = vst [vmem:[%s5943_s1 + $0x114] sm:$0x3] %v1733_v39  ;;  %v1747_v41 = vld [vmem:[#allocation0 + $0x460] sm:$0x3] }
  0xea   :  { %4068 = vst [vmem:[%s5943_s1 + $0x116] sm:$0x3] %v1740_v40  ;;  %v1754_v42 = vld [vmem:[#allocation0 + $0x468] sm:$0x3]  ;;  %v1761_v43 = vld [vmem:[#allocation0 + $0x470] sm:$0x3] }
  0xeb   :  { %4069 = vst [vmem:[%s5943_s1 + $0x118] sm:$0x3] %v1747_v41  ;;  %4070 = vst [vmem:[%s5943_s1 + $0x11a] sm:$0x3] %v1754_v42  ;;  %v1768_v46 = vld [vmem:[#allocation0 + $0x478] sm:$0x3] }
  0xec   :  { %4071 = vst [vmem:[%s5943_s1 + $0x11c] sm:$0x3] %v1761_v43  ;;  %v1663_v47 = vld [vmem:[#allocation0 + $0x400] sm:$0x3]  ;;  %v1670_v48 = vld [vmem:[#allocation0 + $0x408] sm:$0x3] }
  0xed   :  { %583 = vst.msk [vmem:[#allocation0 + $0x6c1] ss:$8 sm:$0xf] %vm3_vm0, %v580_v44   ;;  %585 = vst.msk [vmem:[#allocation0 + $0x6c1] ss:$8 sm:$0xf0] %vm3_vm0, %v580_v44  }
  0xee   :  { %574 = vst.msk [vmem:[#allocation0 + $0x681] ss:$8 sm:$0xf] %vm3_vm0, %v571_v45   ;;  %576 = vst.msk [vmem:[#allocation0 + $0x681] ss:$8 sm:$0xf0] %vm3_vm0, %v571_v45  }
  0xef   :  { %4072 = vst [vmem:[%s5943_s1 + $0x11e] sm:$0x3] %v1768_v46  ;;  %4057 = vst [vmem:[%s5943_s1 + $0x100] sm:$0x3] %v1663_v47  ;;  %v1677_v49 = vld [vmem:[#allocation0 + $0x410] sm:$0x3] }
  0xf0   :  { %4058 = vst [vmem:[%s5943_s1 + $0x102] sm:$0x3] %v1670_v48  ;;  %v1684_v50 = vld [vmem:[#allocation0 + $0x418] sm:$0x3]  ;;  %v1691_v51 = vld [vmem:[#allocation0 + $0x420] sm:$0x3] }
  0xf1   :  { %4059 = vst [vmem:[%s5943_s1 + $0x104] sm:$0x3] %v1677_v49  ;;  %4060 = vst [vmem:[%s5943_s1 + $0x106] sm:$0x3] %v1684_v50  ;;  %v1698_v52 = vld [vmem:[#allocation0 + $0x428] sm:$0x3]  ;;  %v670_v50 = vpop.permute.xlu1 %669  }
  0xf2   :  { %4061 = vst [vmem:[%s5943_s1 + $0x108] sm:$0x3] %v1691_v51  ;;  %v1705_v53 = vld [vmem:[#allocation0 + $0x430] sm:$0x3]  ;;  %v1712_v54 = vld [vmem:[#allocation0 + $0x438] sm:$0x3]  ;;  %v661_v51 = vpop.permute.xlu0 %660  }
  0xf3   :  { %4062 = vst [vmem:[%s5943_s1 + $0x10a] sm:$0x3] %v1698_v52  ;;  %4063 = vst [vmem:[%s5943_s1 + $0x10c] sm:$0x3] %v1705_v53  ;;  %v1831_v55 = vld [vmem:[#allocation0 + $0x4c0] sm:$0x3] }
  0xf4   :  { %4064 = vst [vmem:[%s5943_s1 + $0x10e] sm:$0x3] %v1712_v54  ;;  %v1838_v56 = vld [vmem:[#allocation0 + $0x4c8] sm:$0x3]  ;;  %v1845_v57 = vld [vmem:[#allocation0 + $0x4d0] sm:$0x3] }
  0xf5   :  { %4081 = vst [vmem:[%s5943_s1 + $0x130] sm:$0x3] %v1831_v55  ;;  %4082 = vst [vmem:[%s5943_s1 + $0x132] sm:$0x3] %v1838_v56  ;;  %v1852_v60 = vld [vmem:[#allocation0 + $0x4d8] sm:$0x3] }
  0xf6   :  { %4083 = vst [vmem:[%s5943_s1 + $0x134] sm:$0x3] %v1845_v57  ;;  %v1859_v61 = vld [vmem:[#allocation0 + $0x4e0] sm:$0x3]  ;;  %v1866_v62 = vld [vmem:[#allocation0 + $0x4e8] sm:$0x3] }
  0xf7   :  { %601 = vst.msk [vmem:[#allocation0 + $0x741] ss:$8 sm:$0xf] %vm3_vm0, %v598_v58   ;;  %603 = vst.msk [vmem:[#allocation0 + $0x741] ss:$8 sm:$0xf0] %vm3_vm0, %v598_v58  }
  0xf8   :  { %592 = vst.msk [vmem:[#allocation0 + $0x701] ss:$8 sm:$0xf] %vm3_vm0, %v589_v59   ;;  %594 = vst.msk [vmem:[#allocation0 + $0x701] ss:$8 sm:$0xf0] %vm3_vm0, %v589_v59  }
  0xf9   :  { %4084 = vst [vmem:[%s5943_s1 + $0x136] sm:$0x3] %v1852_v60  ;;  %4085 = vst [vmem:[%s5943_s1 + $0x138] sm:$0x3] %v1859_v61  ;;  %v1873_v63 = vld [vmem:[#allocation0 + $0x4f0] sm:$0x3] }
  0xfa   :  { %4086 = vst [vmem:[%s5943_s1 + $0x13a] sm:$0x3] %v1866_v62  ;;  %v1880_v0 = vld [vmem:[#allocation0 + $0x4f8] sm:$0x3]  ;;  %v1775_v1 = vld [vmem:[#allocation0 + $0x480] sm:$0x3] }
  0xfb   :  { %4087 = vst [vmem:[%s5943_s1 + $0x13c] sm:$0x3] %v1873_v63  ;;  %4088 = vst [vmem:[%s5943_s1 + $0x13e] sm:$0x3] %v1880_v0  ;;  %v1782_v2 = vld [vmem:[#allocation0 + $0x488] sm:$0x3]  ;;  %v688_v0 = vpop.permute.xlu1 %687  }
  0xfc   :  { %4073 = vst [vmem:[%s5943_s1 + $0x120] sm:$0x3] %v1775_v1  ;;  %v1789_v3 = vld [vmem:[#allocation0 + $0x490] sm:$0x3]  ;;  %v1796_v4 = vld [vmem:[#allocation0 + $0x498] sm:$0x3]  ;;  %v679_v1 = vpop.permute.xlu0 %678  }
  0xfd   :  { %4074 = vst [vmem:[%s5943_s1 + $0x122] sm:$0x3] %v1782_v2  ;;  %4075 = vst [vmem:[%s5943_s1 + $0x124] sm:$0x3] %v1789_v3  ;;  %v1803_v5 = vld [vmem:[#allocation0 + $0x4a0] sm:$0x3] }
  0xfe   :  { %4076 = vst [vmem:[%s5943_s1 + $0x126] sm:$0x3] %v1796_v4  ;;  %v1810_v6 = vld [vmem:[#allocation0 + $0x4a8] sm:$0x3]  ;;  %v1817_v7 = vld [vmem:[#allocation0 + $0x4b0] sm:$0x3] }
  0xff   :  { %4077 = vst [vmem:[%s5943_s1 + $0x128] sm:$0x3] %v1803_v5  ;;  %4078 = vst [vmem:[%s5943_s1 + $0x12a] sm:$0x3] %v1810_v6  ;;  %v1824_v10 = vld [vmem:[#allocation0 + $0x4b8] sm:$0x3] }
 0x100   :  { %4079 = vst [vmem:[%s5943_s1 + $0x12c] sm:$0x3] %v1817_v7  ;;  %v1943_v11 = vld [vmem:[#allocation0 + $0x540] sm:$0x3]  ;;  %v1950_v12 = vld [vmem:[#allocation0 + $0x548] sm:$0x3] }
 0x101   :  { %619 = vst.msk [vmem:[#allocation0 + $0x7c1] ss:$8 sm:$0xf] %vm3_vm0, %v616_v8   ;;  %621 = vst.msk [vmem:[#allocation0 + $0x7c1] ss:$8 sm:$0xf0] %vm3_vm0, %v616_v8  }
 0x102   :  { %610 = vst.msk [vmem:[#allocation0 + $0x781] ss:$8 sm:$0xf] %vm3_vm0, %v607_v9   ;;  %612 = vst.msk [vmem:[#allocation0 + $0x781] ss:$8 sm:$0xf0] %vm3_vm0, %v607_v9  }
 0x103   :  { %4080 = vst [vmem:[%s5943_s1 + $0x12e] sm:$0x3] %v1824_v10  ;;  %4097 = vst [vmem:[%s5943_s1 + $0x150] sm:$0x3] %v1943_v11  ;;  %v1957_v13 = vld [vmem:[#allocation0 + $0x550] sm:$0x3] }
 0x104   :  { %4098 = vst [vmem:[%s5943_s1 + $0x152] sm:$0x3] %v1950_v12  ;;  %v1964_v14 = vld [vmem:[#allocation0 + $0x558] sm:$0x3]  ;;  %v1971_v15 = vld [vmem:[#allocation0 + $0x560] sm:$0x3] }
 0x105   :  { %4099 = vst [vmem:[%s5943_s1 + $0x154] sm:$0x3] %v1957_v13  ;;  %4100 = vst [vmem:[%s5943_s1 + $0x156] sm:$0x3] %v1964_v14  ;;  %v1978_v16 = vld [vmem:[#allocation0 + $0x568] sm:$0x3]  ;;  %v706_v14 = vpop.permute.xlu1 %705  }
 0x106   :  { %4101 = vst [vmem:[%s5943_s1 + $0x158] sm:$0x3] %v1971_v15  ;;  %v1985_v17 = vld [vmem:[#allocation0 + $0x570] sm:$0x3]  ;;  %v1992_v18 = vld [vmem:[#allocation0 + $0x578] sm:$0x3]  ;;  %v697_v15 = vpop.permute.xlu0 %696  }
 0x107   :  { %4102 = vst [vmem:[%s5943_s1 + $0x15a] sm:$0x3] %v1978_v16  ;;  %4103 = vst [vmem:[%s5943_s1 + $0x15c] sm:$0x3] %v1985_v17  ;;  %v1887_v19 = vld [vmem:[#allocation0 + $0x500] sm:$0x3] }
 0x108   :  { %4104 = vst [vmem:[%s5943_s1 + $0x15e] sm:$0x3] %v1992_v18  ;;  %v1894_v20 = vld [vmem:[#allocation0 + $0x508] sm:$0x3]  ;;  %v1901_v21 = vld [vmem:[#allocation0 + $0x510] sm:$0x3] }
 0x109   :  { %4089 = vst [vmem:[%s5943_s1 + $0x140] sm:$0x3] %v1887_v19  ;;  %4090 = vst [vmem:[%s5943_s1 + $0x142] sm:$0x3] %v1894_v20  ;;  %v1908_v24 = vld [vmem:[#allocation0 + $0x518] sm:$0x3] }
 0x10a   :  { %4091 = vst [vmem:[%s5943_s1 + $0x144] sm:$0x3] %v1901_v21  ;;  %v1915_v25 = vld [vmem:[#allocation0 + $0x520] sm:$0x3]  ;;  %v1922_v26 = vld [vmem:[#allocation0 + $0x528] sm:$0x3] }
 0x10b   :  { %637 = vst.msk [vmem:[#allocation0 + $0x841] ss:$8 sm:$0xf] %vm3_vm0, %v634_v22   ;;  %639 = vst.msk [vmem:[#allocation0 + $0x841] ss:$8 sm:$0xf0] %vm3_vm0, %v634_v22  }
 0x10c   :  { %628 = vst.msk [vmem:[#allocation0 + $0x801] ss:$8 sm:$0xf] %vm3_vm0, %v625_v23   ;;  %630 = vst.msk [vmem:[#allocation0 + $0x801] ss:$8 sm:$0xf0] %vm3_vm0, %v625_v23  }
 0x10d   :  { %4092 = vst [vmem:[%s5943_s1 + $0x146] sm:$0x3] %v1908_v24  ;;  %4093 = vst [vmem:[%s5943_s1 + $0x148] sm:$0x3] %v1915_v25  ;;  %v1929_v27 = vld [vmem:[#allocation0 + $0x530] sm:$0x3] }
 0x10e   :  { %4094 = vst [vmem:[%s5943_s1 + $0x14a] sm:$0x3] %v1922_v26  ;;  %v1936_v28 = vld [vmem:[#allocation0 + $0x538] sm:$0x3]  ;;  %v2055_v29 = vld [vmem:[#allocation0 + $0x5c0] sm:$0x3] }
 0x10f   :  { %4095 = vst [vmem:[%s5943_s1 + $0x14c] sm:$0x3] %v1929_v27  ;;  %4096 = vst [vmem:[%s5943_s1 + $0x14e] sm:$0x3] %v1936_v28  ;;  %v2062_v30 = vld [vmem:[#allocation0 + $0x5c8] sm:$0x3]  ;;  %v724_v28 = vpop.permute.xlu1 %723  }
 0x110   :  { %4113 = vst [vmem:[%s5943_s1 + $0x170] sm:$0x3] %v2055_v29  ;;  %v2069_v31 = vld [vmem:[#allocation0 + $0x5d0] sm:$0x3]  ;;  %v2076_v32 = vld [vmem:[#allocation0 + $0x5d8] sm:$0x3]  ;;  %v715_v29 = vpop.permute.xlu0 %714  }
 0x111   :  { %4114 = vst [vmem:[%s5943_s1 + $0x172] sm:$0x3] %v2062_v30  ;;  %4115 = vst [vmem:[%s5943_s1 + $0x174] sm:$0x3] %v2069_v31  ;;  %v2083_v33 = vld [vmem:[#allocation0 + $0x5e0] sm:$0x3] }
 0x112   :  { %4116 = vst [vmem:[%s5943_s1 + $0x176] sm:$0x3] %v2076_v32  ;;  %v2090_v34 = vld [vmem:[#allocation0 + $0x5e8] sm:$0x3]  ;;  %v2097_v35 = vld [vmem:[#allocation0 + $0x5f0] sm:$0x3] }
 0x113   :  { %4117 = vst [vmem:[%s5943_s1 + $0x178] sm:$0x3] %v2083_v33  ;;  %4118 = vst [vmem:[%s5943_s1 + $0x17a] sm:$0x3] %v2090_v34  ;;  %v2104_v38 = vld [vmem:[#allocation0 + $0x5f8] sm:$0x3] }
 0x114   :  { %4119 = vst [vmem:[%s5943_s1 + $0x17c] sm:$0x3] %v2097_v35  ;;  %v1999_v39 = vld [vmem:[#allocation0 + $0x580] sm:$0x3]  ;;  %v2006_v40 = vld [vmem:[#allocation0 + $0x588] sm:$0x3] }
 0x115   :  { %655 = vst.msk [vmem:[#allocation0 + $0x8c1] ss:$8 sm:$0xf] %vm3_vm0, %v652_v36   ;;  %657 = vst.msk [vmem:[#allocation0 + $0x8c1] ss:$8 sm:$0xf0] %vm3_vm0, %v652_v36  }
 0x116   :  { %646 = vst.msk [vmem:[#allocation0 + $0x881] ss:$8 sm:$0xf] %vm3_vm0, %v643_v37   ;;  %648 = vst.msk [vmem:[#allocation0 + $0x881] ss:$8 sm:$0xf0] %vm3_vm0, %v643_v37  }
 0x117   :  { %4120 = vst [vmem:[%s5943_s1 + $0x17e] sm:$0x3] %v2104_v38  ;;  %4105 = vst [vmem:[%s5943_s1 + $0x160] sm:$0x3] %v1999_v39  ;;  %v2013_v41 = vld [vmem:[#allocation0 + $0x590] sm:$0x3] }
 0x118   :  { %4106 = vst [vmem:[%s5943_s1 + $0x162] sm:$0x3] %v2006_v40  ;;  %v2020_v42 = vld [vmem:[#allocation0 + $0x598] sm:$0x3]  ;;  %v2027_v43 = vld [vmem:[#allocation0 + $0x5a0] sm:$0x3] }
 0x119   :  { %4107 = vst [vmem:[%s5943_s1 + $0x164] sm:$0x3] %v2013_v41  ;;  %4108 = vst [vmem:[%s5943_s1 + $0x166] sm:$0x3] %v2020_v42  ;;  %v2034_v44 = vld [vmem:[#allocation0 + $0x5a8] sm:$0x3]  ;;  %v742_v42 = vpop.permute.xlu1 %741  }
 0x11a   :  { %4109 = vst [vmem:[%s5943_s1 + $0x168] sm:$0x3] %v2027_v43  ;;  %v2041_v45 = vld [vmem:[#allocation0 + $0x5b0] sm:$0x3]  ;;  %v2048_v46 = vld [vmem:[#allocation0 + $0x5b8] sm:$0x3]  ;;  %v733_v43 = vpop.permute.xlu0 %732  }
 0x11b   :  { %4110 = vst [vmem:[%s5943_s1 + $0x16a] sm:$0x3] %v2034_v44  ;;  %4111 = vst [vmem:[%s5943_s1 + $0x16c] sm:$0x3] %v2041_v45  ;;  %v2167_v47 = vld [vmem:[#allocation0 + $0x640] sm:$0x3] }
 0x11c   :  { %4112 = vst [vmem:[%s5943_s1 + $0x16e] sm:$0x3] %v2048_v46  ;;  %v2174_v48 = vld [vmem:[#allocation0 + $0x648] sm:$0x3]  ;;  %v2181_v49 = vld [vmem:[#allocation0 + $0x650] sm:$0x3] }
 0x11d   :  { %4129 = vst [vmem:[%s5943_s1 + $0x190] sm:$0x3] %v2167_v47  ;;  %4130 = vst [vmem:[%s5943_s1 + $0x192] sm:$0x3] %v2174_v48  ;;  %v2188_v52 = vld [vmem:[#allocation0 + $0x658] sm:$0x3] }
 0x11e   :  { %4131 = vst [vmem:[%s5943_s1 + $0x194] sm:$0x3] %v2181_v49  ;;  %v2195_v53 = vld [vmem:[#allocation0 + $0x660] sm:$0x3]  ;;  %v2202_v54 = vld [vmem:[#allocation0 + $0x668] sm:$0x3] }
 0x11f   :  { %673 = vst.msk [vmem:[#allocation0 + $0x941] ss:$8 sm:$0xf] %vm3_vm0, %v670_v50   ;;  %675 = vst.msk [vmem:[#allocation0 + $0x941] ss:$8 sm:$0xf0] %vm3_vm0, %v670_v50  }
 0x120   :  { %664 = vst.msk [vmem:[#allocation0 + $0x901] ss:$8 sm:$0xf] %vm3_vm0, %v661_v51   ;;  %666 = vst.msk [vmem:[#allocation0 + $0x901] ss:$8 sm:$0xf0] %vm3_vm0, %v661_v51  }
 0x121   :  { %4132 = vst [vmem:[%s5943_s1 + $0x196] sm:$0x3] %v2188_v52  ;;  %4133 = vst [vmem:[%s5943_s1 + $0x198] sm:$0x3] %v2195_v53  ;;  %v2209_v55 = vld [vmem:[#allocation0 + $0x670] sm:$0x3] }
 0x122   :  { %4134 = vst [vmem:[%s5943_s1 + $0x19a] sm:$0x3] %v2202_v54  ;;  %v2216_v56 = vld [vmem:[#allocation0 + $0x678] sm:$0x3]  ;;  %v2111_v57 = vld [vmem:[#allocation0 + $0x600] sm:$0x3] }
 0x123   :  { %4135 = vst [vmem:[%s5943_s1 + $0x19c] sm:$0x3] %v2209_v55  ;;  %4136 = vst [vmem:[%s5943_s1 + $0x19e] sm:$0x3] %v2216_v56  ;;  %v2118_v58 = vld [vmem:[#allocation0 + $0x608] sm:$0x3]  ;;  %v760_v56 = vpop.permute.xlu1 %759  }
 0x124   :  { %4121 = vst [vmem:[%s5943_s1 + $0x180] sm:$0x3] %v2111_v57  ;;  %v2125_v59 = vld [vmem:[#allocation0 + $0x610] sm:$0x3]  ;;  %v2132_v60 = vld [vmem:[#allocation0 + $0x618] sm:$0x3]  ;;  %v751_v57 = vpop.permute.xlu0 %750  }
 0x125   :  { %4122 = vst [vmem:[%s5943_s1 + $0x182] sm:$0x3] %v2118_v58  ;;  %4123 = vst [vmem:[%s5943_s1 + $0x184] sm:$0x3] %v2125_v59  ;;  %v2139_v61 = vld [vmem:[#allocation0 + $0x620] sm:$0x3] }
 0x126   :  { %4124 = vst [vmem:[%s5943_s1 + $0x186] sm:$0x3] %v2132_v60  ;;  %v2146_v62 = vld [vmem:[#allocation0 + $0x628] sm:$0x3]  ;;  %v2153_v63 = vld [vmem:[#allocation0 + $0x630] sm:$0x3] }
 0x127   :  { %4125 = vst [vmem:[%s5943_s1 + $0x188] sm:$0x3] %v2139_v61  ;;  %4126 = vst [vmem:[%s5943_s1 + $0x18a] sm:$0x3] %v2146_v62  ;;  %v2160_v2 = vld [vmem:[#allocation0 + $0x638] sm:$0x3] }
 0x128   :  { %4127 = vst [vmem:[%s5943_s1 + $0x18c] sm:$0x3] %v2153_v63  ;;  %v2279_v3 = vld [vmem:[#allocation0 + $0x6c0] sm:$0x3]  ;;  %v2286_v4 = vld [vmem:[#allocation0 + $0x6c8] sm:$0x3] }
 0x129   :  { %691 = vst.msk [vmem:[#allocation0 + $0x9c1] ss:$8 sm:$0xf] %vm3_vm0, %v688_v0   ;;  %693 = vst.msk [vmem:[#allocation0 + $0x9c1] ss:$8 sm:$0xf0] %vm3_vm0, %v688_v0  }
 0x12a   :  { %682 = vst.msk [vmem:[#allocation0 + $0x981] ss:$8 sm:$0xf] %vm3_vm0, %v679_v1   ;;  %684 = vst.msk [vmem:[#allocation0 + $0x981] ss:$8 sm:$0xf0] %vm3_vm0, %v679_v1  }
 0x12b   :  { %4128 = vst [vmem:[%s5943_s1 + $0x18e] sm:$0x3] %v2160_v2  ;;  %4145 = vst [vmem:[%s5943_s1 + $0x1b0] sm:$0x3] %v2279_v3  ;;  %v2293_v5 = vld [vmem:[#allocation0 + $0x6d0] sm:$0x3] }
 0x12c   :  { %4146 = vst [vmem:[%s5943_s1 + $0x1b2] sm:$0x3] %v2286_v4  ;;  %v2300_v6 = vld [vmem:[#allocation0 + $0x6d8] sm:$0x3]  ;;  %v2307_v7 = vld [vmem:[#allocation0 + $0x6e0] sm:$0x3] }
 0x12d   :  { %4147 = vst [vmem:[%s5943_s1 + $0x1b4] sm:$0x3] %v2293_v5  ;;  %4148 = vst [vmem:[%s5943_s1 + $0x1b6] sm:$0x3] %v2300_v6  ;;  %v2314_v8 = vld [vmem:[#allocation0 + $0x6e8] sm:$0x3] }
 0x12e   :  { %4149 = vst [vmem:[%s5943_s1 + $0x1b8] sm:$0x3] %v2307_v7  ;;  %v2321_v9 = vld [vmem:[#allocation0 + $0x6f0] sm:$0x3]  ;;  %v2328_v10 = vld [vmem:[#allocation0 + $0x6f8] sm:$0x3] }
 0x12f   :  { %4150 = vst [vmem:[%s5943_s1 + $0x1ba] sm:$0x3] %v2314_v8  ;;  %4151 = vst [vmem:[%s5943_s1 + $0x1bc] sm:$0x3] %v2321_v9  ;;  %v2223_v11 = vld [vmem:[#allocation0 + $0x680] sm:$0x3] }
 0x130   :  { %4152 = vst [vmem:[%s5943_s1 + $0x1be] sm:$0x3] %v2328_v10  ;;  %v2230_v12 = vld [vmem:[#allocation0 + $0x688] sm:$0x3]  ;;  %v2237_v13 = vld [vmem:[#allocation0 + $0x690] sm:$0x3] }
 0x131   :  { %4137 = vst [vmem:[%s5943_s1 + $0x1a0] sm:$0x3] %v2223_v11  ;;  %4138 = vst [vmem:[%s5943_s1 + $0x1a2] sm:$0x3] %v2230_v12  ;;  %v2244_v16 = vld [vmem:[#allocation0 + $0x698] sm:$0x3] }
 0x132   :  { %4139 = vst [vmem:[%s5943_s1 + $0x1a4] sm:$0x3] %v2237_v13  ;;  %v2251_v17 = vld [vmem:[#allocation0 + $0x6a0] sm:$0x3]  ;;  %v2258_v18 = vld [vmem:[#allocation0 + $0x6a8] sm:$0x3] }
 0x133   :  { %709 = vst.msk [vmem:[#allocation0 + $0xa41] ss:$8 sm:$0xf] %vm3_vm0, %v706_v14   ;;  %711 = vst.msk [vmem:[#allocation0 + $0xa41] ss:$8 sm:$0xf0] %vm3_vm0, %v706_v14  }
 0x134   :  { %700 = vst.msk [vmem:[#allocation0 + $0xa01] ss:$8 sm:$0xf] %vm3_vm0, %v697_v15   ;;  %702 = vst.msk [vmem:[#allocation0 + $0xa01] ss:$8 sm:$0xf0] %vm3_vm0, %v697_v15  }
 0x135   :  { %4140 = vst [vmem:[%s5943_s1 + $0x1a6] sm:$0x3] %v2244_v16  ;;  %4141 = vst [vmem:[%s5943_s1 + $0x1a8] sm:$0x3] %v2251_v17  ;;  %v2265_v19 = vld [vmem:[#allocation0 + $0x6b0] sm:$0x3] }
 0x136   :  { %4142 = vst [vmem:[%s5943_s1 + $0x1aa] sm:$0x3] %v2258_v18  ;;  %v2272_v20 = vld [vmem:[#allocation0 + $0x6b8] sm:$0x3]  ;;  %v2391_v21 = vld [vmem:[#allocation0 + $0x740] sm:$0x3] }
 0x137   :  { %4143 = vst [vmem:[%s5943_s1 + $0x1ac] sm:$0x3] %v2265_v19  ;;  %4144 = vst [vmem:[%s5943_s1 + $0x1ae] sm:$0x3] %v2272_v20  ;;  %v2398_v22 = vld [vmem:[#allocation0 + $0x748] sm:$0x3] }
 0x138   :  { %4161 = vst [vmem:[%s5943_s1 + $0x1d0] sm:$0x3] %v2391_v21  ;;  %v2405_v23 = vld [vmem:[#allocation0 + $0x750] sm:$0x3]  ;;  %v2412_v24 = vld [vmem:[#allocation0 + $0x758] sm:$0x3] }
 0x139   :  { %4162 = vst [vmem:[%s5943_s1 + $0x1d2] sm:$0x3] %v2398_v22  ;;  %4163 = vst [vmem:[%s5943_s1 + $0x1d4] sm:$0x3] %v2405_v23  ;;  %v2419_v25 = vld [vmem:[#allocation0 + $0x760] sm:$0x3] }
 0x13a   :  { %4164 = vst [vmem:[%s5943_s1 + $0x1d6] sm:$0x3] %v2412_v24  ;;  %v2426_v26 = vld [vmem:[#allocation0 + $0x768] sm:$0x3]  ;;  %v2433_v27 = vld [vmem:[#allocation0 + $0x770] sm:$0x3] }
 0x13b   :  { %4165 = vst [vmem:[%s5943_s1 + $0x1d8] sm:$0x3] %v2419_v25  ;;  %4166 = vst [vmem:[%s5943_s1 + $0x1da] sm:$0x3] %v2426_v26  ;;  %v2440_v30 = vld [vmem:[#allocation0 + $0x778] sm:$0x3] }
 0x13c   :  { %4167 = vst [vmem:[%s5943_s1 + $0x1dc] sm:$0x3] %v2433_v27  ;;  %v2335_v31 = vld [vmem:[#allocation0 + $0x700] sm:$0x3]  ;;  %v2342_v32 = vld [vmem:[#allocation0 + $0x708] sm:$0x3] }
 0x13d   :  { %727 = vst.msk [vmem:[#allocation0 + $0xac1] ss:$8 sm:$0xf] %vm3_vm0, %v724_v28   ;;  %729 = vst.msk [vmem:[#allocation0 + $0xac1] ss:$8 sm:$0xf0] %vm3_vm0, %v724_v28  }
 0x13e   :  { %718 = vst.msk [vmem:[#allocation0 + $0xa81] ss:$8 sm:$0xf] %vm3_vm0, %v715_v29   ;;  %720 = vst.msk [vmem:[#allocation0 + $0xa81] ss:$8 sm:$0xf0] %vm3_vm0, %v715_v29  }
 0x13f   :  { %4168 = vst [vmem:[%s5943_s1 + $0x1de] sm:$0x3] %v2440_v30  ;;  %4153 = vst [vmem:[%s5943_s1 + $0x1c0] sm:$0x3] %v2335_v31  ;;  %v2349_v33 = vld [vmem:[#allocation0 + $0x710] sm:$0x3] }
 0x140   :  { %4154 = vst [vmem:[%s5943_s1 + $0x1c2] sm:$0x3] %v2342_v32  ;;  %v2356_v34 = vld [vmem:[#allocation0 + $0x718] sm:$0x3]  ;;  %v2363_v35 = vld [vmem:[#allocation0 + $0x720] sm:$0x3] }
 0x141   :  { %4155 = vst [vmem:[%s5943_s1 + $0x1c4] sm:$0x3] %v2349_v33  ;;  %4156 = vst [vmem:[%s5943_s1 + $0x1c6] sm:$0x3] %v2356_v34  ;;  %v2370_v36 = vld [vmem:[#allocation0 + $0x728] sm:$0x3] }
 0x142   :  { %4157 = vst [vmem:[%s5943_s1 + $0x1c8] sm:$0x3] %v2363_v35  ;;  %v2377_v37 = vld [vmem:[#allocation0 + $0x730] sm:$0x3]  ;;  %v2384_v38 = vld [vmem:[#allocation0 + $0x738] sm:$0x3] }
 0x143   :  { %4158 = vst [vmem:[%s5943_s1 + $0x1ca] sm:$0x3] %v2370_v36  ;;  %4159 = vst [vmem:[%s5943_s1 + $0x1cc] sm:$0x3] %v2377_v37  ;;  %v2503_v39 = vld [vmem:[#allocation0 + $0x7c0] sm:$0x3] }
 0x144   :  { %4160 = vst [vmem:[%s5943_s1 + $0x1ce] sm:$0x3] %v2384_v38  ;;  %v2510_v40 = vld [vmem:[#allocation0 + $0x7c8] sm:$0x3]  ;;  %v2517_v41 = vld [vmem:[#allocation0 + $0x7d0] sm:$0x3] }
 0x145   :  { %4177 = vst [vmem:[%s5943_s1 + $0x1f0] sm:$0x3] %v2503_v39  ;;  %4178 = vst [vmem:[%s5943_s1 + $0x1f2] sm:$0x3] %v2510_v40  ;;  %v2524_v44 = vld [vmem:[#allocation0 + $0x7d8] sm:$0x3] }
 0x146   :  { %4179 = vst [vmem:[%s5943_s1 + $0x1f4] sm:$0x3] %v2517_v41  ;;  %v2531_v45 = vld [vmem:[#allocation0 + $0x7e0] sm:$0x3]  ;;  %v2538_v46 = vld [vmem:[#allocation0 + $0x7e8] sm:$0x3] }
 0x147   :  { %745 = vst.msk [vmem:[#allocation0 + $0xb41] ss:$8 sm:$0xf] %vm3_vm0, %v742_v42   ;;  %747 = vst.msk [vmem:[#allocation0 + $0xb41] ss:$8 sm:$0xf0] %vm3_vm0, %v742_v42  }
 0x148   :  { %736 = vst.msk [vmem:[#allocation0 + $0xb01] ss:$8 sm:$0xf] %vm3_vm0, %v733_v43   ;;  %738 = vst.msk [vmem:[#allocation0 + $0xb01] ss:$8 sm:$0xf0] %vm3_vm0, %v733_v43  }
 0x149   :  { %4180 = vst [vmem:[%s5943_s1 + $0x1f6] sm:$0x3] %v2524_v44  ;;  %4181 = vst [vmem:[%s5943_s1 + $0x1f8] sm:$0x3] %v2531_v45  ;;  %v2545_v47 = vld [vmem:[#allocation0 + $0x7f0] sm:$0x3] }
 0x14a   :  { %4182 = vst [vmem:[%s5943_s1 + $0x1fa] sm:$0x3] %v2538_v46  ;;  %v2552_v48 = vld [vmem:[#allocation0 + $0x7f8] sm:$0x3]  ;;  %v2447_v49 = vld [vmem:[#allocation0 + $0x780] sm:$0x3] }
 0x14b   :  { %4183 = vst [vmem:[%s5943_s1 + $0x1fc] sm:$0x3] %v2545_v47  ;;  %4184 = vst [vmem:[%s5943_s1 + $0x1fe] sm:$0x3] %v2552_v48  ;;  %v2454_v50 = vld [vmem:[#allocation0 + $0x788] sm:$0x3] }
 0x14c   :  { %4169 = vst [vmem:[%s5943_s1 + $0x1e0] sm:$0x3] %v2447_v49  ;;  %v2461_v51 = vld [vmem:[#allocation0 + $0x790] sm:$0x3]  ;;  %v2468_v52 = vld [vmem:[#allocation0 + $0x798] sm:$0x3] }
 0x14d   :  { %4170 = vst [vmem:[%s5943_s1 + $0x1e2] sm:$0x3] %v2454_v50  ;;  %4171 = vst [vmem:[%s5943_s1 + $0x1e4] sm:$0x3] %v2461_v51  ;;  %v2475_v53 = vld [vmem:[#allocation0 + $0x7a0] sm:$0x3] }
 0x14e   :  { %4172 = vst [vmem:[%s5943_s1 + $0x1e6] sm:$0x3] %v2468_v52  ;;  %v2482_v54 = vld [vmem:[#allocation0 + $0x7a8] sm:$0x3]  ;;  %v2489_v55 = vld [vmem:[#allocation0 + $0x7b0] sm:$0x3] }
 0x14f   :  { %4173 = vst [vmem:[%s5943_s1 + $0x1e8] sm:$0x3] %v2475_v53  ;;  %4174 = vst [vmem:[%s5943_s1 + $0x1ea] sm:$0x3] %v2482_v54  ;;  %v2496_v58 = vld [vmem:[#allocation0 + $0x7b8] sm:$0x3] }
 0x150   :  { %4175 = vst [vmem:[%s5943_s1 + $0x1ec] sm:$0x3] %v2489_v55  ;;  %v2615_v59 = vld [vmem:[#allocation0 + $0x840] sm:$0x3]  ;;  %v2622_v60 = vld [vmem:[#allocation0 + $0x848] sm:$0x3] }
 0x151   :  { %763 = vst.msk [vmem:[#allocation0 + $0xbc1] ss:$8 sm:$0xf] %vm3_vm0, %v760_v56   ;;  %765 = vst.msk [vmem:[#allocation0 + $0xbc1] ss:$8 sm:$0xf0] %vm3_vm0, %v760_v56  }
 0x152   :  { %754 = vst.msk [vmem:[#allocation0 + $0xb81] ss:$8 sm:$0xf] %vm3_vm0, %v751_v57   ;;  %756 = vst.msk [vmem:[#allocation0 + $0xb81] ss:$8 sm:$0xf0] %vm3_vm0, %v751_v57  }
 0x153   :  { %4176 = vst [vmem:[%s5943_s1 + $0x1ee] sm:$0x3] %v2496_v58  ;;  %4193 = vst [vmem:[%s5943_s1 + $0x210] sm:$0x3] %v2615_v59  ;;  %v2629_v61 = vld [vmem:[#allocation0 + $0x850] sm:$0x3] }
 0x154   :  { %4194 = vst [vmem:[%s5943_s1 + $0x212] sm:$0x3] %v2622_v60  ;;  %v2636_v62 = vld [vmem:[#allocation0 + $0x858] sm:$0x3]  ;;  %v2643_v63 = vld [vmem:[#allocation0 + $0x860] sm:$0x3] }
 0x155   :  { %4195 = vst [vmem:[%s5943_s1 + $0x214] sm:$0x3] %v2629_v61  ;;  %4196 = vst [vmem:[%s5943_s1 + $0x216] sm:$0x3] %v2636_v62  ;;  %v2650_v0 = vld [vmem:[#allocation0 + $0x868] sm:$0x3] }
 0x156   :  { %4197 = vst [vmem:[%s5943_s1 + $0x218] sm:$0x3] %v2643_v63  ;;  %v2657_v1 = vld [vmem:[#allocation0 + $0x870] sm:$0x3]  ;;  %v2664_v2 = vld [vmem:[#allocation0 + $0x878] sm:$0x3] }
 0x157   :  { %4198 = vst [vmem:[%s5943_s1 + $0x21a] sm:$0x3] %v2650_v0  ;;  %4199 = vst [vmem:[%s5943_s1 + $0x21c] sm:$0x3] %v2657_v1  ;;  %v2559_v3 = vld [vmem:[#allocation0 + $0x800] sm:$0x3] }
 0x158   :  { %4200 = vst [vmem:[%s5943_s1 + $0x21e] sm:$0x3] %v2664_v2  ;;  %v2566_v4 = vld [vmem:[#allocation0 + $0x808] sm:$0x3]  ;;  %v2573_v5 = vld [vmem:[#allocation0 + $0x810] sm:$0x3] }
 0x159   :  { %4185 = vst [vmem:[%s5943_s1 + $0x200] sm:$0x3] %v2559_v3  ;;  %4186 = vst [vmem:[%s5943_s1 + $0x202] sm:$0x3] %v2566_v4  ;;  %v2580_v6 = vld [vmem:[#allocation0 + $0x818] sm:$0x3] }
 0x15a   :  { %4187 = vst [vmem:[%s5943_s1 + $0x204] sm:$0x3] %v2573_v5  ;;  %v2587_v7 = vld [vmem:[#allocation0 + $0x820] sm:$0x3]  ;;  %v2594_v8 = vld [vmem:[#allocation0 + $0x828] sm:$0x3] }
 0x15b   :  { %4188 = vst [vmem:[%s5943_s1 + $0x206] sm:$0x3] %v2580_v6  ;;  %4189 = vst [vmem:[%s5943_s1 + $0x208] sm:$0x3] %v2587_v7  ;;  %v2601_v9 = vld [vmem:[#allocation0 + $0x830] sm:$0x3] }
 0x15c   :  { %4190 = vst [vmem:[%s5943_s1 + $0x20a] sm:$0x3] %v2594_v8  ;;  %v2608_v10 = vld [vmem:[#allocation0 + $0x838] sm:$0x3]  ;;  %v2727_v11 = vld [vmem:[#allocation0 + $0x8c0] sm:$0x3] }
 0x15d   :  { %4191 = vst [vmem:[%s5943_s1 + $0x20c] sm:$0x3] %v2601_v9  ;;  %4192 = vst [vmem:[%s5943_s1 + $0x20e] sm:$0x3] %v2608_v10  ;;  %v2734_v12 = vld [vmem:[#allocation0 + $0x8c8] sm:$0x3] }
 0x15e   :  { %4209 = vst [vmem:[%s5943_s1 + $0x230] sm:$0x3] %v2727_v11  ;;  %v2741_v13 = vld [vmem:[#allocation0 + $0x8d0] sm:$0x3]  ;;  %v2748_v14 = vld [vmem:[#allocation0 + $0x8d8] sm:$0x3] }
 0x15f   :  { %4210 = vst [vmem:[%s5943_s1 + $0x232] sm:$0x3] %v2734_v12  ;;  %4211 = vst [vmem:[%s5943_s1 + $0x234] sm:$0x3] %v2741_v13  ;;  %v2755_v15 = vld [vmem:[#allocation0 + $0x8e0] sm:$0x3] }
 0x160   :  { %4212 = vst [vmem:[%s5943_s1 + $0x236] sm:$0x3] %v2748_v14  ;;  %v2762_v16 = vld [vmem:[#allocation0 + $0x8e8] sm:$0x3]  ;;  %v2769_v17 = vld [vmem:[#allocation0 + $0x8f0] sm:$0x3] }
 0x161   :  { %4213 = vst [vmem:[%s5943_s1 + $0x238] sm:$0x3] %v2755_v15  ;;  %4214 = vst [vmem:[%s5943_s1 + $0x23a] sm:$0x3] %v2762_v16  ;;  %v2776_v18 = vld [vmem:[#allocation0 + $0x8f8] sm:$0x3] }
 0x162   :  { %4215 = vst [vmem:[%s5943_s1 + $0x23c] sm:$0x3] %v2769_v17  ;;  %v2671_v19 = vld [vmem:[#allocation0 + $0x880] sm:$0x3]  ;;  %v2678_v20 = vld [vmem:[#allocation0 + $0x888] sm:$0x3] }
 0x163   :  { %4216 = vst [vmem:[%s5943_s1 + $0x23e] sm:$0x3] %v2776_v18  ;;  %4201 = vst [vmem:[%s5943_s1 + $0x220] sm:$0x3] %v2671_v19  ;;  %v2685_v21 = vld [vmem:[#allocation0 + $0x890] sm:$0x3] }
 0x164   :  { %4202 = vst [vmem:[%s5943_s1 + $0x222] sm:$0x3] %v2678_v20  ;;  %v2692_v22 = vld [vmem:[#allocation0 + $0x898] sm:$0x3]  ;;  %v2699_v23 = vld [vmem:[#allocation0 + $0x8a0] sm:$0x3] }
 0x165   :  { %4203 = vst [vmem:[%s5943_s1 + $0x224] sm:$0x3] %v2685_v21  ;;  %4204 = vst [vmem:[%s5943_s1 + $0x226] sm:$0x3] %v2692_v22  ;;  %v2706_v24 = vld [vmem:[#allocation0 + $0x8a8] sm:$0x3] }
 0x166   :  { %4205 = vst [vmem:[%s5943_s1 + $0x228] sm:$0x3] %v2699_v23  ;;  %v2713_v25 = vld [vmem:[#allocation0 + $0x8b0] sm:$0x3]  ;;  %v2720_v26 = vld [vmem:[#allocation0 + $0x8b8] sm:$0x3] }
 0x167   :  { %4206 = vst [vmem:[%s5943_s1 + $0x22a] sm:$0x3] %v2706_v24  ;;  %4207 = vst [vmem:[%s5943_s1 + $0x22c] sm:$0x3] %v2713_v25  ;;  %v2839_v27 = vld [vmem:[#allocation0 + $0x940] sm:$0x3] }
 0x168   :  { %4208 = vst [vmem:[%s5943_s1 + $0x22e] sm:$0x3] %v2720_v26  ;;  %v2846_v28 = vld [vmem:[#allocation0 + $0x948] sm:$0x3]  ;;  %v2853_v29 = vld [vmem:[#allocation0 + $0x950] sm:$0x3] }
 0x169   :  { %4225 = vst [vmem:[%s5943_s1 + $0x250] sm:$0x3] %v2839_v27  ;;  %4226 = vst [vmem:[%s5943_s1 + $0x252] sm:$0x3] %v2846_v28  ;;  %v2860_v30 = vld [vmem:[#allocation0 + $0x958] sm:$0x3] }
 0x16a   :  { %4227 = vst [vmem:[%s5943_s1 + $0x254] sm:$0x3] %v2853_v29  ;;  %v2867_v31 = vld [vmem:[#allocation0 + $0x960] sm:$0x3]  ;;  %v2874_v32 = vld [vmem:[#allocation0 + $0x968] sm:$0x3] }
 0x16b   :  { %4228 = vst [vmem:[%s5943_s1 + $0x256] sm:$0x3] %v2860_v30  ;;  %4229 = vst [vmem:[%s5943_s1 + $0x258] sm:$0x3] %v2867_v31  ;;  %v2881_v33 = vld [vmem:[#allocation0 + $0x970] sm:$0x3] }
 0x16c   :  { %4230 = vst [vmem:[%s5943_s1 + $0x25a] sm:$0x3] %v2874_v32  ;;  %v2888_v34 = vld [vmem:[#allocation0 + $0x978] sm:$0x3]  ;;  %v2783_v35 = vld [vmem:[#allocation0 + $0x900] sm:$0x3] }
 0x16d   :  { %4231 = vst [vmem:[%s5943_s1 + $0x25c] sm:$0x3] %v2881_v33  ;;  %4232 = vst [vmem:[%s5943_s1 + $0x25e] sm:$0x3] %v2888_v34  ;;  %v2790_v36 = vld [vmem:[#allocation0 + $0x908] sm:$0x3] }
 0x16e   :  { %4217 = vst [vmem:[%s5943_s1 + $0x240] sm:$0x3] %v2783_v35  ;;  %v2797_v37 = vld [vmem:[#allocation0 + $0x910] sm:$0x3]  ;;  %v2804_v38 = vld [vmem:[#allocation0 + $0x918] sm:$0x3] }
 0x16f   :  { %4218 = vst [vmem:[%s5943_s1 + $0x242] sm:$0x3] %v2790_v36  ;;  %4219 = vst [vmem:[%s5943_s1 + $0x244] sm:$0x3] %v2797_v37  ;;  %v2811_v39 = vld [vmem:[#allocation0 + $0x920] sm:$0x3] }
 0x170   :  { %4220 = vst [vmem:[%s5943_s1 + $0x246] sm:$0x3] %v2804_v38  ;;  %v2818_v40 = vld [vmem:[#allocation0 + $0x928] sm:$0x3]  ;;  %v2825_v41 = vld [vmem:[#allocation0 + $0x930] sm:$0x3] }
 0x171   :  { %4221 = vst [vmem:[%s5943_s1 + $0x248] sm:$0x3] %v2811_v39  ;;  %4222 = vst [vmem:[%s5943_s1 + $0x24a] sm:$0x3] %v2818_v40  ;;  %v2832_v42 = vld [vmem:[#allocation0 + $0x938] sm:$0x3] }
 0x172   :  { %4223 = vst [vmem:[%s5943_s1 + $0x24c] sm:$0x3] %v2825_v41  ;;  %v2951_v43 = vld [vmem:[#allocation0 + $0x9c0] sm:$0x3]  ;;  %v2958_v44 = vld [vmem:[#allocation0 + $0x9c8] sm:$0x3] }
 0x173   :  { %4224 = vst [vmem:[%s5943_s1 + $0x24e] sm:$0x3] %v2832_v42  ;;  %4241 = vst [vmem:[%s5943_s1 + $0x270] sm:$0x3] %v2951_v43  ;;  %v2965_v45 = vld [vmem:[#allocation0 + $0x9d0] sm:$0x3] }
 0x174   :  { %4242 = vst [vmem:[%s5943_s1 + $0x272] sm:$0x3] %v2958_v44  ;;  %v2972_v46 = vld [vmem:[#allocation0 + $0x9d8] sm:$0x3]  ;;  %v2979_v47 = vld [vmem:[#allocation0 + $0x9e0] sm:$0x3] }
 0x175   :  { %4243 = vst [vmem:[%s5943_s1 + $0x274] sm:$0x3] %v2965_v45  ;;  %4244 = vst [vmem:[%s5943_s1 + $0x276] sm:$0x3] %v2972_v46  ;;  %v2986_v48 = vld [vmem:[#allocation0 + $0x9e8] sm:$0x3] }
 0x176   :  { %4245 = vst [vmem:[%s5943_s1 + $0x278] sm:$0x3] %v2979_v47  ;;  %v2993_v49 = vld [vmem:[#allocation0 + $0x9f0] sm:$0x3]  ;;  %v3000_v50 = vld [vmem:[#allocation0 + $0x9f8] sm:$0x3] }
 0x177   :  { %4246 = vst [vmem:[%s5943_s1 + $0x27a] sm:$0x3] %v2986_v48  ;;  %4247 = vst [vmem:[%s5943_s1 + $0x27c] sm:$0x3] %v2993_v49  ;;  %v2895_v51 = vld [vmem:[#allocation0 + $0x980] sm:$0x3] }
 0x178   :  { %4248 = vst [vmem:[%s5943_s1 + $0x27e] sm:$0x3] %v3000_v50  ;;  %v2902_v52 = vld [vmem:[#allocation0 + $0x988] sm:$0x3]  ;;  %v2909_v53 = vld [vmem:[#allocation0 + $0x990] sm:$0x3] }
 0x179   :  { %4233 = vst [vmem:[%s5943_s1 + $0x260] sm:$0x3] %v2895_v51  ;;  %4234 = vst [vmem:[%s5943_s1 + $0x262] sm:$0x3] %v2902_v52  ;;  %v2916_v54 = vld [vmem:[#allocation0 + $0x998] sm:$0x3] }
 0x17a   :  { %4235 = vst [vmem:[%s5943_s1 + $0x264] sm:$0x3] %v2909_v53  ;;  %v2923_v55 = vld [vmem:[#allocation0 + $0x9a0] sm:$0x3]  ;;  %v2930_v56 = vld [vmem:[#allocation0 + $0x9a8] sm:$0x3] }
 0x17b   :  { %4236 = vst [vmem:[%s5943_s1 + $0x266] sm:$0x3] %v2916_v54  ;;  %4237 = vst [vmem:[%s5943_s1 + $0x268] sm:$0x3] %v2923_v55  ;;  %v2937_v57 = vld [vmem:[#allocation0 + $0x9b0] sm:$0x3] }
 0x17c   :  { %4238 = vst [vmem:[%s5943_s1 + $0x26a] sm:$0x3] %v2930_v56  ;;  %v2944_v58 = vld [vmem:[#allocation0 + $0x9b8] sm:$0x3]  ;;  %v3063_v59 = vld [vmem:[#allocation0 + $0xa40] sm:$0x3] }
 0x17d   :  { %4239 = vst [vmem:[%s5943_s1 + $0x26c] sm:$0x3] %v2937_v57  ;;  %4240 = vst [vmem:[%s5943_s1 + $0x26e] sm:$0x3] %v2944_v58  ;;  %v3070_v60 = vld [vmem:[#allocation0 + $0xa48] sm:$0x3] }
 0x17e   :  { %4257 = vst [vmem:[%s5943_s1 + $0x290] sm:$0x3] %v3063_v59  ;;  %v3077_v61 = vld [vmem:[#allocation0 + $0xa50] sm:$0x3]  ;;  %v3084_v62 = vld [vmem:[#allocation0 + $0xa58] sm:$0x3] }
 0x17f   :  { %4258 = vst [vmem:[%s5943_s1 + $0x292] sm:$0x3] %v3070_v60  ;;  %4259 = vst [vmem:[%s5943_s1 + $0x294] sm:$0x3] %v3077_v61  ;;  %v3091_v63 = vld [vmem:[#allocation0 + $0xa60] sm:$0x3] }
 0x180   :  { %4260 = vst [vmem:[%s5943_s1 + $0x296] sm:$0x3] %v3084_v62  ;;  %v3098_v0 = vld [vmem:[#allocation0 + $0xa68] sm:$0x3]  ;;  %v3105_v1 = vld [vmem:[#allocation0 + $0xa70] sm:$0x3] }
 0x181   :  { %4261 = vst [vmem:[%s5943_s1 + $0x298] sm:$0x3] %v3091_v63  ;;  %4262 = vst [vmem:[%s5943_s1 + $0x29a] sm:$0x3] %v3098_v0  ;;  %v3112_v2 = vld [vmem:[#allocation0 + $0xa78] sm:$0x3] }
 0x182   :  { %4263 = vst [vmem:[%s5943_s1 + $0x29c] sm:$0x3] %v3105_v1  ;;  %v3007_v3 = vld [vmem:[#allocation0 + $0xa00] sm:$0x3]  ;;  %v3014_v4 = vld [vmem:[#allocation0 + $0xa08] sm:$0x3] }
 0x183   :  { %4264 = vst [vmem:[%s5943_s1 + $0x29e] sm:$0x3] %v3112_v2  ;;  %4249 = vst [vmem:[%s5943_s1 + $0x280] sm:$0x3] %v3007_v3  ;;  %v3021_v5 = vld [vmem:[#allocation0 + $0xa10] sm:$0x3] }
 0x184   :  { %4250 = vst [vmem:[%s5943_s1 + $0x282] sm:$0x3] %v3014_v4  ;;  %v3028_v6 = vld [vmem:[#allocation0 + $0xa18] sm:$0x3]  ;;  %v3035_v7 = vld [vmem:[#allocation0 + $0xa20] sm:$0x3] }
 0x185   :  { %4251 = vst [vmem:[%s5943_s1 + $0x284] sm:$0x3] %v3021_v5  ;;  %4252 = vst [vmem:[%s5943_s1 + $0x286] sm:$0x3] %v3028_v6  ;;  %v3042_v8 = vld [vmem:[#allocation0 + $0xa28] sm:$0x3] }
 0x186   :  { %4253 = vst [vmem:[%s5943_s1 + $0x288] sm:$0x3] %v3035_v7  ;;  %v3049_v9 = vld [vmem:[#allocation0 + $0xa30] sm:$0x3]  ;;  %v3056_v10 = vld [vmem:[#allocation0 + $0xa38] sm:$0x3] }
 0x187   :  { %4254 = vst [vmem:[%s5943_s1 + $0x28a] sm:$0x3] %v3042_v8  ;;  %4255 = vst [vmem:[%s5943_s1 + $0x28c] sm:$0x3] %v3049_v9  ;;  %v3175_v11 = vld [vmem:[#allocation0 + $0xac0] sm:$0x3] }
 0x188   :  { %4256 = vst [vmem:[%s5943_s1 + $0x28e] sm:$0x3] %v3056_v10  ;;  %v3182_v12 = vld [vmem:[#allocation0 + $0xac8] sm:$0x3]  ;;  %v3189_v13 = vld [vmem:[#allocation0 + $0xad0] sm:$0x3] }
 0x189   :  { %4273 = vst [vmem:[%s5943_s1 + $0x2b0] sm:$0x3] %v3175_v11  ;;  %4274 = vst [vmem:[%s5943_s1 + $0x2b2] sm:$0x3] %v3182_v12  ;;  %v3196_v14 = vld [vmem:[#allocation0 + $0xad8] sm:$0x3] }
 0x18a   :  { %4275 = vst [vmem:[%s5943_s1 + $0x2b4] sm:$0x3] %v3189_v13  ;;  %v3203_v15 = vld [vmem:[#allocation0 + $0xae0] sm:$0x3]  ;;  %v3210_v16 = vld [vmem:[#allocation0 + $0xae8] sm:$0x3] }
 0x18b   :  { %4276 = vst [vmem:[%s5943_s1 + $0x2b6] sm:$0x3] %v3196_v14  ;;  %4277 = vst [vmem:[%s5943_s1 + $0x2b8] sm:$0x3] %v3203_v15  ;;  %v3217_v17 = vld [vmem:[#allocation0 + $0xaf0] sm:$0x3] }
 0x18c   :  { %4278 = vst [vmem:[%s5943_s1 + $0x2ba] sm:$0x3] %v3210_v16  ;;  %v3224_v18 = vld [vmem:[#allocation0 + $0xaf8] sm:$0x3]  ;;  %v3119_v19 = vld [vmem:[#allocation0 + $0xa80] sm:$0x3] }
 0x18d   :  { %4279 = vst [vmem:[%s5943_s1 + $0x2bc] sm:$0x3] %v3217_v17  ;;  %4280 = vst [vmem:[%s5943_s1 + $0x2be] sm:$0x3] %v3224_v18  ;;  %v3126_v20 = vld [vmem:[#allocation0 + $0xa88] sm:$0x3] }
 0x18e   :  { %4265 = vst [vmem:[%s5943_s1 + $0x2a0] sm:$0x3] %v3119_v19  ;;  %v3133_v21 = vld [vmem:[#allocation0 + $0xa90] sm:$0x3]  ;;  %v3140_v22 = vld [vmem:[#allocation0 + $0xa98] sm:$0x3] }
 0x18f   :  { %4266 = vst [vmem:[%s5943_s1 + $0x2a2] sm:$0x3] %v3126_v20  ;;  %4267 = vst [vmem:[%s5943_s1 + $0x2a4] sm:$0x3] %v3133_v21  ;;  %v3147_v23 = vld [vmem:[#allocation0 + $0xaa0] sm:$0x3] }
 0x190   :  { %4268 = vst [vmem:[%s5943_s1 + $0x2a6] sm:$0x3] %v3140_v22  ;;  %v3154_v24 = vld [vmem:[#allocation0 + $0xaa8] sm:$0x3]  ;;  %v3161_v25 = vld [vmem:[#allocation0 + $0xab0] sm:$0x3] }
 0x191   :  { %4269 = vst [vmem:[%s5943_s1 + $0x2a8] sm:$0x3] %v3147_v23  ;;  %4270 = vst [vmem:[%s5943_s1 + $0x2aa] sm:$0x3] %v3154_v24  ;;  %v3168_v26 = vld [vmem:[#allocation0 + $0xab8] sm:$0x3] }
 0x192   :  { %4271 = vst [vmem:[%s5943_s1 + $0x2ac] sm:$0x3] %v3161_v25  ;;  %v3287_v27 = vld [vmem:[#allocation0 + $0xb40] sm:$0x3]  ;;  %v3294_v28 = vld [vmem:[#allocation0 + $0xb48] sm:$0x3] }
 0x193   :  { %4272 = vst [vmem:[%s5943_s1 + $0x2ae] sm:$0x3] %v3168_v26  ;;  %4289 = vst [vmem:[%s5943_s1 + $0x2d0] sm:$0x3] %v3287_v27  ;;  %v3301_v29 = vld [vmem:[#allocation0 + $0xb50] sm:$0x3] }
 0x194   :  { %4290 = vst [vmem:[%s5943_s1 + $0x2d2] sm:$0x3] %v3294_v28  ;;  %v3308_v30 = vld [vmem:[#allocation0 + $0xb58] sm:$0x3]  ;;  %v3315_v31 = vld [vmem:[#allocation0 + $0xb60] sm:$0x3] }
 0x195   :  { %4291 = vst [vmem:[%s5943_s1 + $0x2d4] sm:$0x3] %v3301_v29  ;;  %4292 = vst [vmem:[%s5943_s1 + $0x2d6] sm:$0x3] %v3308_v30  ;;  %v3322_v32 = vld [vmem:[#allocation0 + $0xb68] sm:$0x3] }
 0x196   :  { %4293 = vst [vmem:[%s5943_s1 + $0x2d8] sm:$0x3] %v3315_v31  ;;  %v3329_v33 = vld [vmem:[#allocation0 + $0xb70] sm:$0x3]  ;;  %v3336_v34 = vld [vmem:[#allocation0 + $0xb78] sm:$0x3] }
 0x197   :  { %4294 = vst [vmem:[%s5943_s1 + $0x2da] sm:$0x3] %v3322_v32  ;;  %4295 = vst [vmem:[%s5943_s1 + $0x2dc] sm:$0x3] %v3329_v33  ;;  %v3231_v35 = vld [vmem:[#allocation0 + $0xb00] sm:$0x3] }
 0x198   :  { %4296 = vst [vmem:[%s5943_s1 + $0x2de] sm:$0x3] %v3336_v34  ;;  %v3238_v36 = vld [vmem:[#allocation0 + $0xb08] sm:$0x3]  ;;  %v3245_v37 = vld [vmem:[#allocation0 + $0xb10] sm:$0x3] }
 0x199   :  { %4281 = vst [vmem:[%s5943_s1 + $0x2c0] sm:$0x3] %v3231_v35  ;;  %4282 = vst [vmem:[%s5943_s1 + $0x2c2] sm:$0x3] %v3238_v36  ;;  %v3252_v38 = vld [vmem:[#allocation0 + $0xb18] sm:$0x3] }
 0x19a   :  { %4283 = vst [vmem:[%s5943_s1 + $0x2c4] sm:$0x3] %v3245_v37  ;;  %v3259_v39 = vld [vmem:[#allocation0 + $0xb20] sm:$0x3]  ;;  %v3266_v40 = vld [vmem:[#allocation0 + $0xb28] sm:$0x3] }
 0x19b   :  { %4284 = vst [vmem:[%s5943_s1 + $0x2c6] sm:$0x3] %v3252_v38  ;;  %4285 = vst [vmem:[%s5943_s1 + $0x2c8] sm:$0x3] %v3259_v39  ;;  %v3273_v41 = vld [vmem:[#allocation0 + $0xb30] sm:$0x3] }
 0x19c   :  { %4286 = vst [vmem:[%s5943_s1 + $0x2ca] sm:$0x3] %v3266_v40  ;;  %v3280_v42 = vld [vmem:[#allocation0 + $0xb38] sm:$0x3]  ;;  %v3399_v43 = vld [vmem:[#allocation0 + $0xbc0] sm:$0x3] }
 0x19d   :  { %4287 = vst [vmem:[%s5943_s1 + $0x2cc] sm:$0x3] %v3273_v41  ;;  %4288 = vst [vmem:[%s5943_s1 + $0x2ce] sm:$0x3] %v3280_v42  ;;  %v3406_v44 = vld [vmem:[#allocation0 + $0xbc8] sm:$0x3] }
 0x19e   :  { %4305 = vst [vmem:[%s5943_s1 + $0x2f0] sm:$0x3] %v3399_v43  ;;  %v3413_v45 = vld [vmem:[#allocation0 + $0xbd0] sm:$0x3]  ;;  %v3420_v46 = vld [vmem:[#allocation0 + $0xbd8] sm:$0x3] }
 0x19f   :  { %4306 = vst [vmem:[%s5943_s1 + $0x2f2] sm:$0x3] %v3406_v44  ;;  %4307 = vst [vmem:[%s5943_s1 + $0x2f4] sm:$0x3] %v3413_v45  ;;  %v3427_v47 = vld [vmem:[#allocation0 + $0xbe0] sm:$0x3] }
 0x1a0   :  { %4308 = vst [vmem:[%s5943_s1 + $0x2f6] sm:$0x3] %v3420_v46  ;;  %v3434_v48 = vld [vmem:[#allocation0 + $0xbe8] sm:$0x3]  ;;  %v3441_v49 = vld [vmem:[#allocation0 + $0xbf0] sm:$0x3] }
 0x1a1   :  { %4309 = vst [vmem:[%s5943_s1 + $0x2f8] sm:$0x3] %v3427_v47  ;;  %4310 = vst [vmem:[%s5943_s1 + $0x2fa] sm:$0x3] %v3434_v48  ;;  %v3448_v50 = vld [vmem:[#allocation0 + $0xbf8] sm:$0x3] }
 0x1a2   :  { %4311 = vst [vmem:[%s5943_s1 + $0x2fc] sm:$0x3] %v3441_v49  ;;  %v3343_v51 = vld [vmem:[#allocation0 + $0xb80] sm:$0x3]  ;;  %v3350_v52 = vld [vmem:[#allocation0 + $0xb88] sm:$0x3] }
 0x1a3   :  { %4312 = vst [vmem:[%s5943_s1 + $0x2fe] sm:$0x3] %v3448_v50  ;;  %4297 = vst [vmem:[%s5943_s1 + $0x2e0] sm:$0x3] %v3343_v51  ;;  %v3357_v53 = vld [vmem:[#allocation0 + $0xb90] sm:$0x3] }
 0x1a4   :  { %4298 = vst [vmem:[%s5943_s1 + $0x2e2] sm:$0x3] %v3350_v52  ;;  %v3364_v54 = vld [vmem:[#allocation0 + $0xb98] sm:$0x3]  ;;  %v3371_v55 = vld [vmem:[#allocation0 + $0xba0] sm:$0x3] }
 0x1a5   :  { %4299 = vst [vmem:[%s5943_s1 + $0x2e4] sm:$0x3] %v3357_v53  ;;  %4300 = vst [vmem:[%s5943_s1 + $0x2e6] sm:$0x3] %v3364_v54  ;;  %v3378_v56 = vld [vmem:[#allocation0 + $0xba8] sm:$0x3] }
 0x1a6   :  { %4301 = vst [vmem:[%s5943_s1 + $0x2e8] sm:$0x3] %v3371_v55  ;;  %v3385_v57 = vld [vmem:[#allocation0 + $0xbb0] sm:$0x3]  ;;  %v3392_v58 = vld [vmem:[#allocation0 + $0xbb8] sm:$0x3] }
 0x1a7   :  { %4302 = vst [vmem:[%s5943_s1 + $0x2ea] sm:$0x3] %v3378_v56  ;;  %4303 = vst [vmem:[%s5943_s1 + $0x2ec] sm:$0x3] %v3385_v57 }
 0x1a8   :  { %4304 = vst [vmem:[%s5943_s1 + $0x2ee] sm:$0x3] %v3392_v58 }

// kernel: yowo_forward.1
= control target key start
LH: loop header
LB: loop body
LE: loop exit
PB: predicated region body
PF: predicated region fallthrough
CT: control target
= control target key end

     0   :  { %s2119_s0 = inlined_call_operand.vmem [shape: s32[3], index: 0, kind: input, shape index: {}]   ;;  %s2120_s1 = inlined_call_operand.vmem [shape: bf16[384,24], index: 1, kind: input, shape index: {}]   ;;  %s2121_s2 = inlined_call_operand.vmem [shape: bf16[384,64], index: 2, kind: input, shape index: {}]   ;;  %s2122_s3 = inlined_call_operand.vmem [shape: bf16[3,24,64], index: 3, kind: input, shape index: {}]   ;;  %s2123_s4 = inlined_call_operand.vmem [shape: bf16[3,64,64], index: 4, kind: input, shape index: {}]   ;;  %s2124_s5 = inlined_call_operand.vmem [shape: f32[3,1,64], index: 5, kind: input, shape index: {}]   ;;  %s2125_s6 = inlined_call_operand.vmem [shape: bf16[3,64,64], index: 6, kind: input, shape index: {}]   ;;  %s2126_s7 = inlined_call_operand.vmem [shape: f32[3,1,64], index: 7, kind: input, shape index: {}]   ;;  %s2127_s8 = inlined_call_operand.vmem [shape: bf16[3,64,128], index: 8, kind: input, shape index: {}]   ;;  %s2128_s9 = inlined_call_operand.vmem [shape: f32[3,1,128], index: 9, kind: input, shape index: {}]   ;;  %s2129_s10 = inlined_call_operand.vmem [shape: f32[384,128], index: 10, kind: output, shape index: {}]  }
   0x1   :  { %s15_s15 = sshll.u32 %s2119_s0, 4  ;;  %s16_s15 = int_to_ptr.vmem [resolvable:$true] %s15_s15 }
   0x2   :  { %s1861_s16 = scalar_lea.vmem %s16_s15, 16  ;;  %p1866_p1 = scmp.lt.s32.totalorder %s16_s15, %s16_s15 }
   0x3   :  { %p1862_p0 = scmp.ne.s32.totalorder %s16_s15, %s1861_s16  ;;  %p1867_p2 = scmp.lt.s32.totalorder %s1861_s16, %s1861_s16 }
   0x5   :  { %p1868_p3 = por %p1867_p2, %p1866_p1 }
   0x7   :  { %p1869_p4 = pnand %p1868_p3, %p1862_p0 }
   0x9   :  { %1872 = shalt.err (!%p1869_p4)  }
   0xa   :  { %s1883_s17 = smov [#allocation3]  }
   0xb   :  { %18 = dma.vmem_to_smem %s16_s15, 16, %s1883_s17, [#allocation2] }
   0xc   :  { %1877 = dma.done.wait [#allocation2], 16 }
   0xd   :  { %1878 = vsyncadd [#allocation2], 4294967280 }
   0xe   :  { %20 = sfence }
   0xf   :  { %s1942_s18 = smov 0  }
  0x10 LB: > { %s1948_s0 = sadd.s32 4294967295, %s1881_s18   ;;  %p1575_p5 = scmp.ge.s32.totalorder %s1881_s18, 1  ;;  %s1881_s18 = sphi %s1942_s18, %s26_s18  }
  0x11   : > { %p398_p6 = scmp.lt.s32.totalorder %s1881_s18, 4 }
  0x13   : > { %p399_p7 = pnand %p1575_p5, %p398_p6 }
  0x14   : > { %s487_s19 = sld [smem:[#allocation3 + %s1948_s0]] (!%p399_p7)  ;;  %s1576_s20 = sshll.u32 (!%p399_p7), %s1948_s0, 4 }
  0x15   : > { %402 = sbr.rel (%p399_p7) target bundleno = 889 (0x379), region = 56  ;;  %p476_p8 = scmp.lt.s32.totalorder (!%p399_p7), %s1576_s20, 47 }
  0x16   : > { %s494_s21 = sld [smem:[#allocation3 + %s1948_s0]] (!%p399_p7) }
  0x17   : > { %s506_s14 = sld [smem:[#allocation3 + %s1948_s0]] (!%p399_p7) }
  0x18   : > { %s501_s29 = sld [smem:[#allocation3 + %s1948_s0]] (!%p399_p7) }
  0x19   : > { %s525_s17 = sld [smem:[#allocation3 + %s1948_s0]] (!%p399_p7) }
  0x1a   : > { %s2131_s20 = smov (!%p476_p8, %s1576_s20), 47  ;;  %p488_p9 = scmp.lt.s32.totalorder %s487_s19, 2  ;;  %vm637_vm0 = vcmask 195584   ;;  %vm662_vm1 = vcmask 1043456   ;;  %vm858_vm6 = vcmask 523264  }
  0x1b   : > { %s1577_s22 = sshll.u32 %s2131_s20, 2 }
  0x1c   : > { %s1963_s25 = scalar_lea.vmem %s2120_s1, %s1577_s22  ;;  %p495_p10 = scmp.lt.s32.totalorder %s494_s21, 2 }
  0x1d   : > { %v1841_v0 = vld [vmem:[%s1963_s25] sm:$0xff]   ;;  %s2133_s19 = smov (!%p488_p9, %s487_s19), 2  ;;  %v1842_v4 = vld [vmem:[%s1963_s25 + $0x8] sm:$0xff]   ;;  %v1843_v6 = vld [vmem:[%s1963_s25 + $0x10] sm:$0xff]   ;;  %p507_p11 = scmp.lt.s32.totalorder %s506_s14, 2 }
  0x1e   : > { %1740 = vmatprep.mubr.msk.bf16.mxu0 %vm637_vm0, %v1841_v0  ;;  %s2135_s21 = smov (!%p495_p10, %s494_s21), 2  ;;  %s1829_s26 = smul.u32 12, %s2133_s19  ;;  %v1844_v7 = vld [vmem:[%s1963_s25 + $0x18] sm:$0xff]   ;;  %v1845_v8 = vld [vmem:[%s1963_s25 + $0x20] sm:$0xff]   ;;  %v1846_v9 = vld [vmem:[%s1963_s25 + $0x28] sm:$0xff]  }
  0x1f   : > { %s1648_s27 = sshll.u32 %s2135_s21, 5  ;;  %v1847_v10 = vld [vmem:[%s1963_s25 + $0x30] sm:$0xff]   ;;  %v1848_v11 = vld [vmem:[%s1963_s25 + $0x38] sm:$0xff]   ;;  %s2137_s14 = smov (!%p507_p11, %s506_s14), 2 }
  0x20   : > { %s492_s30 = scalar_lea.vmem %s2122_s3, %s1829_s26  ;;  %s499_s13 = scalar_lea.vmem %s2123_s4, %s1648_s27 }
  0x21   : > { %v1839_v1 = vld [vmem:[%s492_s30 + $0x8] ss:$0 sps:$4 sm:$0xff]   ;;  %v1840_v2 = vld [vmem:[%s492_s30] sm:$0xff]   ;;  %v1849_v5 = vld [vmem:[%s499_s13 + $0x18] sm:$0xff]   ;;  %s1649_s15 = sshll.u32 %s2137_s14, 5  ;;  %s2001_s24 = scalar_lea.vmem %s2121_s2, %s1577_s22 }
  0x22   : > { %1828 = vmatprep.subr.msk.bf16.mxu0 %vm662_vm1, %v1839_v1  ;;  %v664_v3 = vsel %vm662_vm1, %v1839_v1, 0  ;;  %1756 = vmatprep.subr.bf16.mxu1 %v1849_v5  ;;  %v1850_v12 = vld [vmem:[%s499_s13 + $0x10] sm:$0xff]   ;;  %v1851_v13 = vld [vmem:[%s499_s13 + $0x8] sm:$0xff]   ;;  %v1852_v14 = vld [vmem:[%s499_s13] sm:$0xff]   ;;  %s1991_s19 = scalar_lea.vmem %s2125_s6, %s1649_s15  ;;  %s518_s22 = sld [smem:[#allocation3 + %s1948_s0]] }
  0x23   : > { %1737 = vmatpush3.bf16.msra.mxu0 %v664_v3  ;;  %1757 = vmatpush3.bf16.msra.mxu1 %v1849_v5  ;;  %v1853_v15 = vld [vmem:[%s1991_s19 + $0x18] sm:$0xff]   ;;  %v1854_v16 = vld [vmem:[%s1991_s19 + $0x10] sm:$0xff]   ;;  %v1855_v17 = vld [vmem:[%s1991_s19 + $0x8] sm:$0xff]   ;;  %p502_p13 = scmp.lt.s32.totalorder %s501_s29, 2  ;;  %s513_s13 = sld [smem:[#allocation3 + %s1948_s0]] }
  0x24   : > { %1738 = vmatprep.subr.bf16.mxu0 %v1840_v2  ;;  %1758 = vmatprep.subr.bf16.mxu1 %v1850_v12  ;;  %v1652_v18 = vld [vmem:[%s2001_s24] sm:$0xff]   ;;  %v1683_v19 = vld [vmem:[%s2001_s24 + $0x8] sm:$0xff]   ;;  %v1684_v27 = vld [vmem:[%s2001_s24 + $0x10] sm:$0xff]   ;;  %p526_p1 = scmp.lt.s32.totalorder %s525_s17, 2 }
  0x25   : > { %v1653_v20 = vunpack.c.l.bf16 %v1652_v18  ;;  %v1657_v21 = vunpack.c.l.bf16 %v1683_v19  ;;  %v1658_v23 = vunpack.c.h.bf16 %v1683_v19  ;;  %v1654_v26 = vunpack.c.h.bf16 %v1652_v18  ;;  %v1685_v31 = vld [vmem:[%s2001_s24 + $0x18] sm:$0xff]   ;;  %v1686_v48 = vld [vmem:[%s2001_s24 + $0x20] sm:$0xff]   ;;  %v1687_v55 = vld [vmem:[%s2001_s24 + $0x28] sm:$0xff]   ;;  %s2141_s29 = smov (!%p502_p13, %s501_s29), 2 }
  0x26   : > { %v1661_v33 = vunpack.c.l.bf16 %v1684_v27  ;;  %v1665_v38 = vunpack.c.l.bf16 %v1685_v31  ;;  %v1666_v41 = vunpack.c.h.bf16 %v1685_v31  ;;  %v1662_v44 = vunpack.c.h.bf16 %v1684_v27  ;;  %s504_s12 = scalar_lea.vmem %s2124_s5, %s2141_s29  ;;  %s2145_s17 = smov (!%p526_p1, %s525_s17), 2 }
  0x27   : > { %1739 = vmatpush3.bf16.msra.mxu0 %v1840_v2  ;;  %1759 = vmatpush3.bf16.msra.mxu1 %v1850_v12  ;;  %v1669_v57 = vunpack.c.l.bf16 %v1686_v48  ;;  %v1673_v62 = vunpack.c.l.bf16 %v1687_v55  ;;  %v1674_v1 = vunpack.c.h.bf16 %v1687_v55  ;;  %v2033_v55 = vld [vmem:[%s504_s12] ss:$0 sm:$0xff]  ;;  %s528_s23 = scalar_lea.vmem %s2128_s9, %s2145_s17 }
  0x28   : > { %1760 = vmatprep.subr.bf16.mxu1 %v1851_v13  ;;  %1780 = vmatprep.subr.bf16.mxu0 %v1853_v15  ;;  %p519_p12 = scmp.lt.s32.totalorder %s518_s22, 2 }
  0x29   : > { %p514_p0 = scmp.lt.s32.totalorder %s513_s13, 2 }
  0x2a   : > { %1741 = vmatmul.mubr.msk.bf16.vlgmr.msra.gmra.mxu0 %vm637_vm0, %v1842_v4  ;;  %s2139_s22 = smov (!%p519_p12, %s518_s22), 2 }
  0x2b   : > { %1744 = vmatprep.mubr.msk.bf16.mxu0 %vm637_vm0, %v1843_v6  ;;  %1761 = vmatpush3.bf16.msra.mxu1 %v1851_v13  ;;  %s1650_s25 = sshll.u32 %s2139_s22, 5  ;;  %s2143_s13 = smov (!%p514_p0, %s513_s13), 2 }
  0x2c   : > { %1762 = vmatprep.subr.bf16.mxu1 %v1852_v14  ;;  %1781 = vmatpush3.bf16.msra.mxu0 %v1853_v15  ;;  %v1689_v15 = vld [vmem:[%s2001_s24 + $0x38] sm:$0xff]   ;;  %s2024_s28 = scalar_lea.vmem %s2127_s8, %s1650_s25  ;;  %s516_s16 = scalar_lea.vmem %s2126_s7, %s2143_s13 }
  0x2d   : > { %1782 = vmatprep.subr.bf16.mxu0 %v1854_v16 }
  0x2f   : > { %1763 = vmatpush3.bf16.msra.mxu1 %v1852_v14 }
  0x30   : > { %1783 = vmatpush3.bf16.msra.mxu0 %v1854_v16 }
  0x31   : > { %1784 = vmatprep.subr.bf16.mxu0 %v1855_v17 }
  0x32   : > { %1745 = vmatmul.mubr.msk.bf16.gmra.mxu0 %vm637_vm0, %v1844_v7  ;;  %v1670_v7 = vunpack.c.h.bf16 %v1686_v48 }
  0x33   : > { %1748 = vmatprep.mubr.msk.bf16.mxu0 %vm637_vm0, %v1845_v8  ;;  %v1688_v8 = vld [vmem:[%s2001_s24 + $0x30] sm:$0xff]   ;;  %s1588_s24 = sshll.u32 %s2131_s20, 3 }
  0x34   : > { %1785 = vmatpush3.bf16.msra.mxu0 %v1855_v17  ;;  %v1677_v17 = vunpack.c.l.bf16 %v1688_v8  ;;  %v1678_v31 = vunpack.c.h.bf16 %v1688_v8  ;;  %s2098_s26 = scalar_lea.vmem %s2129_s10, %s1588_s24 }
  0x3a   : > { %1749 = vmatmul.mubr.msk.bf16.gmra.mxu0 %vm637_vm0, %v1846_v9 }
  0x3b   : > { %1752 = vmatprep.mubr.msk.bf16.mxu0 %vm637_vm0, %v1847_v10 }
  0x42   : > { %1753 = vmatmul.mubr.msk.bf16.gmra.mxu0 %vm637_vm0, %v1848_v11 }
  0xea   : > { %v1742_v22 = vpop.f32.mrf.mxu0 }
  0xeb   : > { %v709_v28 = vadd.f32 %v1742_v22, %v1657_v21  ;;  %v1681_v22 = vunpack.c.l.bf16 %v1689_v15 }
  0xec   : > { %v700_v24 = vpop.f32.mrf.mxu0 }
  0xed   : > { %v701_v25 = vadd.f32 %v1653_v20, %v700_v24  ;;  %v781_v37 = vmul.f32 0.1, %v709_v28  ;;  %vm765_vm4 = vcmp.gt.f32.partialorder %v709_v28, 0.0 }
  0xee   : > { %v1743_v29 = vpop.f32.mrf.mxu0 }
  0xef   : > { %v712_v30 = vadd.f32 %v1743_v29, %v1658_v23  ;;  %v779_v34 = vmul.f32 0.1, %v701_v25  ;;  %vm763_vm3 = vcmp.gt.f32.partialorder %v701_v25, 0.0  ;;  %v797_v49 = vsel %vm765_vm4, %v709_v28, %v781_v37 }
  0xf0   : > { %v703_v32 = vpop.f32.mrf.mxu0 }
  0xf1   : > { %vm766_vm2 = vcmp.gt.f32.partialorder %v712_v30, 0.0  ;;  %v782_v35 = vmul.f32 0.1, %v712_v30  ;;  %v704_v36 = vadd.f32 %v1654_v26, %v703_v32  ;;  %v795_v46 = vsel %vm763_vm3, %v701_v25, %v779_v34 }
  0xf2   : > { %v1746_v39 = vpop.f32.mrf.mxu0  ;;  %v1682_v25 = vunpack.c.h.bf16 %v1689_v15 }
  0xf3   : > { %v780_v40 = vmul.f32 0.1, %v704_v36  ;;  %vm764_vm5 = vcmp.gt.f32.partialorder %v704_v36, 0.0  ;;  %v798_v42 = vsel %vm766_vm2, %v712_v30, %v782_v35  ;;  %v725_v50 = vadd.f32 %v1746_v39, %v1665_v38 }
  0xf4   : > { %v716_v43 = vpop.f32.mrf.mxu0  ;;  %v812_v53 = vpack.c.bf16 %v798_v42, %v797_v49 }
  0xf5   : > { %v717_v45 = vadd.f32 %v1661_v33, %v716_v43  ;;  %v796_v47 = vsel %vm764_vm5, %v704_v36, %v780_v40  ;;  %v785_v61 = vmul.f32 0.1, %v725_v50  ;;  %vm769_vm9 = vcmp.gt.f32.partialorder %v725_v50, 0.0 }
  0xf6   : > { %v1747_v51 = vpop.f32.mrf.mxu0  ;;  %v811_v52 = vpack.c.bf16 %v796_v47, %v795_v46 }
  0xf7   : > { %v728_v54 = vadd.f32 %v1747_v51, %v1666_v41  ;;  %v783_v58 = vmul.f32 0.1, %v717_v45  ;;  %vm767_vm8 = vcmp.gt.f32.partialorder %v717_v45, 0.0  ;;  %v801_v9 = vsel %vm769_vm9, %v725_v50, %v785_v61  ;;  %v1856_v50 = vld [vmem:[%s1991_s19] sm:$0xff]   ;;  %v1857_v51 = vld [vmem:[%s2024_s28 + $0x18] sm:$0xff]  }
  0xf8   : > { %v719_v56 = vpop.f32.mrf.mxu0  ;;  %1764 = vmatprep.mubr.msk.bf16.mxu1 %vm858_vm6, %v811_v52  ;;  %1786 = vmatprep.subr.bf16.mxu0 %v1856_v50  ;;  %v1858_v52 = vld [vmem:[%s2024_s28 + $0x10] sm:$0xff]  }
  0xf9   : > { %vm770_vm7 = vcmp.gt.f32.partialorder %v728_v54, 0.0  ;;  %v786_v59 = vmul.f32 0.1, %v728_v54  ;;  %v720_v60 = vadd.f32 %v1662_v44, %v719_v56  ;;  %1765 = vmatmul.mubr.msk.bf16.vlgmr.msra.gmra.mxu1 %vm858_vm6, %v812_v53  ;;  %v799_v4 = vsel %vm767_vm8, %v717_v45, %v783_v58  ;;  %1787 = vmatpush3.bf16.msra.mxu0 %v1856_v50  ;;  %v1859_v53 = vld [vmem:[%s2024_s28 + $0x8] sm:$0xff]  }
  0xfa   : > { %v1750_v63 = vpop.f32.mrf.mxu0  ;;  %1804 = vmatprep.subr.bf16.mxu1 %v1857_v51 }
  0xfb   : > { %vm768_vm10 = vcmp.gt.f32.partialorder %v720_v60, 0.0  ;;  %v784_v0 = vmul.f32 0.1, %v720_v60  ;;  %v802_v2 = vsel %vm770_vm7, %v728_v54, %v786_v59  ;;  %v741_v11 = vadd.f32 %v1750_v63, %v1673_v62  ;;  %1805 = vmatpush3.bf16.msra.mxu1 %v1857_v51 }
  0xfc   : > { %v732_v3 = vpop.f32.mrf.mxu0  ;;  %v814_v13 = vpack.c.bf16 %v802_v2, %v801_v9  ;;  %1806 = vmatprep.subr.bf16.mxu1 %v1858_v52 }
  0xfd   : > { %v800_v5 = vsel %vm768_vm10, %v720_v60, %v784_v0  ;;  %v733_v6 = vadd.f32 %v1669_v57, %v732_v3  ;;  %v789_v21 = vmul.f32 0.1, %v741_v11  ;;  %vm773_vm13 = vcmp.gt.f32.partialorder %v741_v11, 0.0 }
  0xfe   : > { %v813_v10 = vpack.c.bf16 %v800_v5, %v799_v4  ;;  %v1751_v12 = vpop.f32.mrf.mxu0 }
  0xff   : > { %v744_v14 = vadd.f32 %v1751_v12, %v1674_v1  ;;  %v787_v18 = vmul.f32 0.1, %v733_v6  ;;  %vm771_vm12 = vcmp.gt.f32.partialorder %v733_v6, 0.0  ;;  %v805_v32 = vsel %vm773_vm13, %v741_v11, %v789_v21  ;;  %1807 = vmatpush3.bf16.msra.mxu1 %v1858_v52 }
 0x100   : > { %v735_v16 = vpop.f32.mrf.mxu0  ;;  %1768 = vmatprep.mubr.msk.bf16.mxu1 %vm858_vm6, %v813_v10  ;;  %1808 = vmatprep.subr.bf16.mxu1 %v1859_v53 }
 0x101   : > { %vm774_vm11 = vcmp.gt.f32.partialorder %v744_v14, 0.0  ;;  %v790_v19 = vmul.f32 0.1, %v744_v14  ;;  %v736_v20 = vadd.f32 %v1670_v7, %v735_v16  ;;  %1769 = vmatmul.mubr.msk.bf16.gmra.mxu1 %vm858_vm6, %v814_v13  ;;  %v803_v28 = vsel %vm771_vm12, %v733_v6, %v787_v18 }
 0x102   : > { %v1754_v23 = vpop.f32.mrf.mxu0 }
 0x103   : > { %vm772_vm14 = vcmp.gt.f32.partialorder %v736_v20, 0.0  ;;  %v788_v24 = vmul.f32 0.1, %v736_v20  ;;  %v806_v26 = vsel %vm774_vm11, %v744_v14, %v790_v19  ;;  %v757_v34 = vadd.f32 %v1754_v23, %v1681_v22  ;;  %1809 = vmatpush3.bf16.msra.mxu1 %v1859_v53 }
 0x104   : > { %v748_v27 = vpop.f32.mrf.mxu0  ;;  %v816_v36 = vpack.c.bf16 %v806_v26, %v805_v32 }
 0x105   : > { %v804_v29 = vsel %vm772_vm14, %v736_v20, %v788_v24  ;;  %v749_v30 = vadd.f32 %v1677_v17, %v748_v27  ;;  %v793_v42 = vmul.f32 0.1, %v757_v34  ;;  %vm777_vm1 = vcmp.gt.f32.partialorder %v757_v34, 0.0 }
 0x106   : > { %v815_v33 = vpack.c.bf16 %v804_v29, %v803_v28  ;;  %v1755_v35 = vpop.f32.mrf.mxu0 }
 0x107   : > { %v760_v37 = vadd.f32 %v1755_v35, %v1682_v25  ;;  %v791_v39 = vmul.f32 0.1, %v749_v30  ;;  %vm775_vm0 = vcmp.gt.f32.partialorder %v749_v30, 0.0  ;;  %v809_v47 = vsel %vm777_vm1, %v757_v34, %v793_v42 }
 0x108   : > { %v751_v38 = vpop.f32.mrf.mxu0  ;;  %1772 = vmatprep.mubr.msk.bf16.mxu1 %vm858_vm6, %v815_v33 }
 0x109   : > { %vm778_vm15 = vcmp.gt.f32.partialorder %v760_v37, 0.0  ;;  %v794_v40 = vmul.f32 0.1, %v760_v37  ;;  %v752_v41 = vadd.f32 %v1678_v31, %v751_v38  ;;  %1773 = vmatmul.mubr.msk.bf16.gmra.mxu1 %vm858_vm6, %v816_v36  ;;  %v807_v45 = vsel %vm775_vm0, %v749_v30, %v791_v39 }
 0x10b   : > { %vm776_vm2 = vcmp.gt.f32.partialorder %v752_v41, 0.0  ;;  %v792_v43 = vmul.f32 0.1, %v752_v41  ;;  %v810_v44 = vsel %vm778_vm15, %v760_v37, %v794_v40 }
 0x10c   : > { %v818_v49 = vpack.c.bf16 %v810_v44, %v809_v47 }
 0x10d   : > { %v808_v46 = vsel %vm776_vm2, %v752_v41, %v792_v43 }
 0x10e   : > { %v817_v48 = vpack.c.bf16 %v808_v46, %v807_v45 }
 0x110   : > { %1776 = vmatprep.mubr.msk.bf16.mxu1 %vm858_vm6, %v817_v48 }
 0x111   : > { %1777 = vmatmul.mubr.msk.bf16.gmra.mxu1 %vm858_vm6, %v818_v49 }
 0x1b9   : > { %v1766_v54 = vpop.f32.mrf.mxu1 }
 0x1ba   : > { %v926_v58 = vadd.f32 %v1766_v54, %v2033_v55 }
 0x1bb   : > { %v917_v56 = vpop.f32.mrf.mxu1 }
 0x1bc   : > { %v918_v57 = vadd.f32 %v2033_v55, %v917_v56  ;;  %v998_v1 = vmul.f32 0.1, %v926_v58  ;;  %vm982_vm5 = vcmp.gt.f32.partialorder %v926_v58, 0.0 }
 0x1bd   : > { %v1767_v59 = vpop.f32.mrf.mxu1 }
 0x1be   : > { %v929_v60 = vadd.f32 %v1767_v59, %v2033_v55  ;;  %v996_v62 = vmul.f32 0.1, %v918_v57  ;;  %vm980_vm4 = vcmp.gt.f32.partialorder %v918_v57, 0.0  ;;  %v1014_v9 = vsel %vm982_vm5, %v926_v58, %v998_v1  ;;  %v2064_v1 = vld [vmem:[%s516_s16] ss:$0 sm:$0xff] }
 0x1bf   : > { %v920_v61 = vpop.f32.mrf.mxu1 }
 0x1c0   : > { %vm983_vm3 = vcmp.gt.f32.partialorder %v929_v60, 0.0  ;;  %v999_v63 = vmul.f32 0.1, %v929_v60  ;;  %v921_v0 = vadd.f32 %v2033_v55, %v920_v61  ;;  %v1012_v6 = vsel %vm980_vm4, %v918_v57, %v996_v62 }
 0x1c1   : > { %v1770_v2 = vpop.f32.mrf.mxu1 }
 0x1c2   : > { %vm981_vm7 = vcmp.gt.f32.partialorder %v921_v0, 0.0  ;;  %v997_v3 = vmul.f32 0.1, %v921_v0  ;;  %v1015_v4 = vsel %vm983_vm3, %v929_v60, %v999_v63  ;;  %v942_v11 = vadd.f32 %v1770_v2, %v2033_v55 }
 0x1c3   : > { %v933_v5 = vpop.f32.mrf.mxu1  ;;  %v1029_v13 = vpack.c.bf16 %v1015_v4, %v1014_v9 }
 0x1c4   : > { %v1013_v7 = vsel %vm981_vm7, %v921_v0, %v997_v3  ;;  %v934_v8 = vadd.f32 %v2033_v55, %v933_v5  ;;  %v1002_v19 = vmul.f32 0.1, %v942_v11  ;;  %vm986_vm10 = vcmp.gt.f32.partialorder %v942_v11, 0.0  ;;  %v1860_v0 = vld [vmem:[%s2024_s28] sm:$0xff]  }
 0x1c5   : > { %v1028_v10 = vpack.c.bf16 %v1013_v7, %v1012_v6  ;;  %v1771_v12 = vpop.f32.mrf.mxu1  ;;  %1810 = vmatprep.subr.bf16.mxu1 %v1860_v0 }
 0x1c6   : > { %v945_v14 = vadd.f32 %v1771_v12, %v2033_v55  ;;  %v1000_v16 = vmul.f32 0.1, %v934_v8  ;;  %vm984_vm9 = vcmp.gt.f32.partialorder %v934_v8, 0.0  ;;  %v1018_v27 = vsel %vm986_vm10, %v942_v11, %v1002_v19  ;;  %1811 = vmatpush3.bf16.msra.mxu1 %v1860_v0 }
 0x1c7   : > { %v936_v15 = vpop.f32.mrf.mxu1  ;;  %1788 = vmatprep.mubr.msk.bf16.mxu0 %vm858_vm6, %v1028_v10 }
 0x1c8   : > { %vm987_vm8 = vcmp.gt.f32.partialorder %v945_v14, 0.0  ;;  %v1003_v17 = vmul.f32 0.1, %v945_v14  ;;  %v937_v18 = vadd.f32 %v2033_v55, %v936_v15  ;;  %1789 = vmatmul.mubr.msk.bf16.vlgmr.msra.gmra.mxu0 %vm858_vm6, %v1029_v13  ;;  %v1016_v24 = vsel %vm984_vm9, %v934_v8, %v1000_v16 }
 0x1c9   : > { %v1774_v20 = vpop.f32.mrf.mxu1 }
 0x1ca   : > { %vm985_vm11 = vcmp.gt.f32.partialorder %v937_v18, 0.0  ;;  %v1001_v21 = vmul.f32 0.1, %v937_v18  ;;  %v1019_v22 = vsel %vm987_vm8, %v945_v14, %v1003_v17  ;;  %v958_v29 = vadd.f32 %v1774_v20, %v2033_v55 }
 0x1cb   : > { %v949_v23 = vpop.f32.mrf.mxu1  ;;  %v1031_v31 = vpack.c.bf16 %v1019_v22, %v1018_v27 }
 0x1cc   : > { %v1017_v25 = vsel %vm985_vm11, %v937_v18, %v1001_v21  ;;  %v950_v26 = vadd.f32 %v2033_v55, %v949_v23  ;;  %v1006_v37 = vmul.f32 0.1, %v958_v29  ;;  %vm990_vm14 = vcmp.gt.f32.partialorder %v958_v29, 0.0 }
 0x1cd   : > { %v1030_v28 = vpack.c.bf16 %v1017_v25, %v1016_v24  ;;  %v1775_v30 = vpop.f32.mrf.mxu1 }
 0x1ce   : > { %v961_v32 = vadd.f32 %v1775_v30, %v2033_v55  ;;  %v1004_v34 = vmul.f32 0.1, %v950_v26  ;;  %vm988_vm13 = vcmp.gt.f32.partialorder %v950_v26, 0.0  ;;  %v1022_v45 = vsel %vm990_vm14, %v958_v29, %v1006_v37 }
 0x1cf   : > { %v952_v33 = vpop.f32.mrf.mxu1  ;;  %1792 = vmatprep.mubr.msk.bf16.mxu0 %vm858_vm6, %v1030_v28 }
 0x1d0   : > { %vm991_vm12 = vcmp.gt.f32.partialorder %v961_v32, 0.0  ;;  %v1007_v35 = vmul.f32 0.1, %v961_v32  ;;  %v953_v36 = vadd.f32 %v2033_v55, %v952_v33  ;;  %1793 = vmatmul.mubr.msk.bf16.gmra.mxu0 %vm858_vm6, %v1031_v31  ;;  %v1020_v42 = vsel %vm988_vm13, %v950_v26, %v1004_v34 }
 0x1d1   : > { %v1778_v38 = vpop.f32.mrf.mxu1 }
 0x1d2   : > { %vm989_vm15 = vcmp.gt.f32.partialorder %v953_v36, 0.0  ;;  %v1005_v39 = vmul.f32 0.1, %v953_v36  ;;  %v1023_v40 = vsel %vm991_vm12, %v961_v32, %v1007_v35  ;;  %v974_v47 = vadd.f32 %v1778_v38, %v2033_v55 }
 0x1d3   : > { %v965_v41 = vpop.f32.mrf.mxu1  ;;  %v1033_v49 = vpack.c.bf16 %v1023_v40, %v1022_v45 }
 0x1d4   : > { %v1021_v43 = vsel %vm989_vm15, %v953_v36, %v1005_v39  ;;  %v966_v44 = vadd.f32 %v2033_v55, %v965_v41  ;;  %v1010_v56 = vmul.f32 0.1, %v974_v47  ;;  %vm994_vm2 = vcmp.gt.f32.partialorder %v974_v47, 0.0 }
 0x1d5   : > { %v1032_v46 = vpack.c.bf16 %v1021_v43, %v1020_v42  ;;  %v1779_v48 = vpop.f32.mrf.mxu1 }
 0x1d6   : > { %v977_v50 = vadd.f32 %v1779_v48, %v2033_v55  ;;  %v1008_v52 = vmul.f32 0.1, %v966_v44  ;;  %vm992_vm1 = vcmp.gt.f32.partialorder %v966_v44, 0.0  ;;  %v1026_v61 = vsel %vm994_vm2, %v974_v47, %v1010_v56 }
 0x1d7   : > { %v968_v51 = vpop.f32.mrf.mxu1  ;;  %1796 = vmatprep.mubr.msk.bf16.mxu0 %vm858_vm6, %v1032_v46 }
 0x1d8   : > { %vm995_vm0 = vcmp.gt.f32.partialorder %v977_v50, 0.0  ;;  %v1011_v53 = vmul.f32 0.1, %v977_v50  ;;  %v969_v54 = vadd.f32 %v2033_v55, %v968_v51  ;;  %1797 = vmatmul.mubr.msk.bf16.gmra.mxu0 %vm858_vm6, %v1033_v49  ;;  %v1024_v59 = vsel %vm992_vm1, %v966_v44, %v1008_v52 }
 0x1da   : > { %vm993_vm3 = vcmp.gt.f32.partialorder %v969_v54, 0.0  ;;  %v1009_v57 = vmul.f32 0.1, %v969_v54  ;;  %v1027_v58 = vsel %vm995_vm0, %v977_v50, %v1011_v53 }
 0x1db   : > { %v1035_v63 = vpack.c.bf16 %v1027_v58, %v1026_v61 }
 0x1dc   : > { %v1025_v60 = vsel %vm993_vm3, %v969_v54, %v1009_v57 }
 0x1dd   : > { %v1034_v62 = vpack.c.bf16 %v1025_v60, %v1024_v59 }
 0x1df   : > { %1800 = vmatprep.mubr.msk.bf16.mxu0 %vm858_vm6, %v1034_v62 }
 0x1e0   : > { %1801 = vmatmul.mubr.msk.bf16.gmra.mxu0 %vm858_vm6, %v1035_v63 }
 0x288   : > { %v1790_v55 = vpop.f32.mrf.mxu0 }
 0x289   : > { %v1142_v4 = vadd.f32 %v1790_v55, %v2064_v1 }
 0x28a   : > { %v1133_v2 = vpop.f32.mrf.mxu0 }
 0x28b   : > { %v1134_v3 = vadd.f32 %v2064_v1, %v1133_v2  ;;  %v1214_v11 = vmul.f32 0.1, %v1142_v4  ;;  %vm1198_vm7 = vcmp.gt.f32.partialorder %v1142_v4, 0.0 }
 0x28c   : > { %v1791_v5 = vpop.f32.mrf.mxu0 }
 0x28d   : > { %v1145_v6 = vadd.f32 %v1791_v5, %v2064_v1  ;;  %v1212_v8 = vmul.f32 0.1, %v1134_v3  ;;  %vm1196_vm5 = vcmp.gt.f32.partialorder %v1134_v3, 0.0  ;;  %v1230_v19 = vsel %vm1198_vm7, %v1142_v4, %v1214_v11 }
 0x28e   : > { %v1136_v7 = vpop.f32.mrf.mxu0 }
 0x28f   : > { %vm1199_vm4 = vcmp.gt.f32.partialorder %v1145_v6, 0.0  ;;  %v1215_v9 = vmul.f32 0.1, %v1145_v6  ;;  %v1137_v10 = vadd.f32 %v2064_v1, %v1136_v7  ;;  %v1228_v16 = vsel %vm1196_vm5, %v1134_v3, %v1212_v8 }
 0x290   : > { %v1794_v12 = vpop.f32.mrf.mxu0 }
 0x291   : > { %vm1197_vm8 = vcmp.gt.f32.partialorder %v1137_v10, 0.0  ;;  %v1213_v13 = vmul.f32 0.1, %v1137_v10  ;;  %v1231_v14 = vsel %vm1199_vm4, %v1145_v6, %v1215_v9  ;;  %v1158_v21 = vadd.f32 %v1794_v12, %v2064_v1 }
 0x292   : > { %v1149_v15 = vpop.f32.mrf.mxu0  ;;  %v1245_v23 = vpack.c.bf16 %v1231_v14, %v1230_v19 }
 0x293   : > { %v1229_v17 = vsel %vm1197_vm8, %v1137_v10, %v1213_v13  ;;  %v1150_v18 = vadd.f32 %v2064_v1, %v1149_v15  ;;  %v1218_v29 = vmul.f32 0.1, %v1158_v21  ;;  %vm1202_vm11 = vcmp.gt.f32.partialorder %v1158_v21, 0.0 }
 0x294   : > { %v1244_v20 = vpack.c.bf16 %v1229_v17, %v1228_v16  ;;  %v1795_v22 = vpop.f32.mrf.mxu0 }
 0x295   : > { %v1161_v24 = vadd.f32 %v1795_v22, %v2064_v1  ;;  %v1216_v26 = vmul.f32 0.1, %v1150_v18  ;;  %vm1200_vm10 = vcmp.gt.f32.partialorder %v1150_v18, 0.0  ;;  %v1234_v37 = vsel %vm1202_vm11, %v1158_v21, %v1218_v29 }
 0x296   : > { %v1152_v25 = vpop.f32.mrf.mxu0  ;;  %1812 = vmatprep.mubr.msk.bf16.mxu1 %vm858_vm6, %v1244_v20 }
 0x297   : > { %vm1203_vm9 = vcmp.gt.f32.partialorder %v1161_v24, 0.0  ;;  %v1219_v27 = vmul.f32 0.1, %v1161_v24  ;;  %v1153_v28 = vadd.f32 %v2064_v1, %v1152_v25  ;;  %1813 = vmatmul.mubr.msk.bf16.vlgmr.msra.gmra.mxu1 %vm858_vm6, %v1245_v23  ;;  %v1232_v34 = vsel %vm1200_vm10, %v1150_v18, %v1216_v26 }
 0x298   : > { %v1798_v30 = vpop.f32.mrf.mxu0 }
 0x299   : > { %vm1201_vm12 = vcmp.gt.f32.partialorder %v1153_v28, 0.0  ;;  %v1217_v31 = vmul.f32 0.1, %v1153_v28  ;;  %v1235_v32 = vsel %vm1203_vm9, %v1161_v24, %v1219_v27  ;;  %v1174_v39 = vadd.f32 %v1798_v30, %v2064_v1 }
 0x29a   : > { %v1165_v33 = vpop.f32.mrf.mxu0  ;;  %v1247_v41 = vpack.c.bf16 %v1235_v32, %v1234_v37 }
 0x29b   : > { %v1233_v35 = vsel %vm1201_vm12, %v1153_v28, %v1217_v31  ;;  %v1166_v36 = vadd.f32 %v2064_v1, %v1165_v33  ;;  %v1222_v47 = vmul.f32 0.1, %v1174_v39  ;;  %vm1206_vm15 = vcmp.gt.f32.partialorder %v1174_v39, 0.0 }
 0x29c   : > { %v1246_v38 = vpack.c.bf16 %v1233_v35, %v1232_v34  ;;  %v1799_v40 = vpop.f32.mrf.mxu0 }
 0x29d   : > { %v1177_v42 = vadd.f32 %v1799_v40, %v2064_v1  ;;  %v1220_v44 = vmul.f32 0.1, %v1166_v36  ;;  %vm1204_vm14 = vcmp.gt.f32.partialorder %v1166_v36, 0.0  ;;  %v1238_v56 = vsel %vm1206_vm15, %v1174_v39, %v1222_v47 }
 0x29e   : > { %v1168_v43 = vpop.f32.mrf.mxu0  ;;  %1816 = vmatprep.mubr.msk.bf16.mxu1 %vm858_vm6, %v1246_v38 }
 0x29f   : > { %vm1207_vm13 = vcmp.gt.f32.partialorder %v1177_v42, 0.0  ;;  %v1223_v45 = vmul.f32 0.1, %v1177_v42  ;;  %v1169_v46 = vadd.f32 %v2064_v1, %v1168_v43  ;;  %1817 = vmatmul.mubr.msk.bf16.gmra.mxu1 %vm858_vm6, %v1247_v41  ;;  %v1236_v52 = vsel %vm1204_vm14, %v1166_v36, %v1220_v44 }
 0x2a0   : > { %v1802_v48 = vpop.f32.mrf.mxu0 }
 0x2a1   : > { %vm1205_vm0 = vcmp.gt.f32.partialorder %v1169_v46, 0.0  ;;  %v1221_v49 = vmul.f32 0.1, %v1169_v46  ;;  %v1239_v50 = vsel %vm1207_vm13, %v1177_v42, %v1223_v45  ;;  %v1190_v58 = vadd.f32 %v1802_v48, %v2064_v1 }
 0x2a2   : > { %v1181_v51 = vpop.f32.mrf.mxu0  ;;  %v1249_v60 = vpack.c.bf16 %v1239_v50, %v1238_v56 }
 0x2a3   : > { %v1237_v53 = vsel %vm1205_vm0, %v1169_v46, %v1221_v49  ;;  %v1182_v54 = vadd.f32 %v2064_v1, %v1181_v51  ;;  %v1226_v2 = vmul.f32 0.1, %v1190_v58  ;;  %vm1210_vm3 = vcmp.gt.f32.partialorder %v1190_v58, 0.0 }
 0x2a4   : > { %v1248_v57 = vpack.c.bf16 %v1237_v53, %v1236_v52  ;;  %v1803_v59 = vpop.f32.mrf.mxu0 }
 0x2a5   : > { %v1193_v61 = vadd.f32 %v1803_v59, %v2064_v1  ;;  %v1224_v63 = vmul.f32 0.1, %v1182_v54  ;;  %vm1208_vm2 = vcmp.gt.f32.partialorder %v1182_v54, 0.0  ;;  %v1242_v7 = vsel %vm1210_vm3, %v1190_v58, %v1226_v2 }
 0x2a6   : > { %v1184_v62 = vpop.f32.mrf.mxu0  ;;  %1820 = vmatprep.mubr.msk.bf16.mxu1 %vm858_vm6, %v1248_v57 }
 0x2a7   : > { %vm1211_vm1 = vcmp.gt.f32.partialorder %v1193_v61, 0.0  ;;  %v1227_v0 = vmul.f32 0.1, %v1193_v61  ;;  %v1185_v55 = vadd.f32 %v2064_v1, %v1184_v62  ;;  %1821 = vmatmul.mubr.msk.bf16.gmra.mxu1 %vm858_vm6, %v1249_v60  ;;  %v1240_v5 = vsel %vm1208_vm2, %v1182_v54, %v1224_v63  ;;  %v1633_v1 = vld [vmem:[%s528_s23] ss:$0 sm:$0xff] }
 0x2a9   : > { %vm1209_vm4 = vcmp.gt.f32.partialorder %v1185_v55, 0.0  ;;  %v1225_v3 = vmul.f32 0.1, %v1185_v55  ;;  %v1243_v4 = vsel %vm1211_vm1, %v1193_v61, %v1227_v0 }
 0x2aa   : > { %v1251_v9 = vpack.c.bf16 %v1243_v4, %v1242_v7 }
 0x2ab   : > { %v1241_v6 = vsel %vm1209_vm4, %v1185_v55, %v1225_v3 }
 0x2ac   : > { %v1250_v8 = vpack.c.bf16 %v1241_v6, %v1240_v5 }
 0x2ae   : > { %1824 = vmatprep.mubr.msk.bf16.mxu1 %vm858_vm6, %v1250_v8 }
 0x2af   : > { %1825 = vmatmul.mubr.msk.bf16.gmra.mxu1 %vm858_vm6, %v1251_v9 }
 0x357   : > { %v1814_v10 = vpop.f32.mrf.mxu1 }
 0x358   : > { %v1358_v11 = vadd.f32 %v1814_v10, %v1633_v1 }
 0x359   : > { %v1349_v12 = vpop.f32.mrf.mxu1 }
 0x35a   : > { %1414 = vst [vmem:[%s2098_s26 + $0x10] sm:$0xff] %v1358_v11  ;;  %v1350_v13 = vadd.f32 %v1633_v1, %v1349_v12 }
 0x35b   : > { %v1815_v14 = vpop.f32.mrf.mxu1 }
 0x35c   : > { %1412 = vst [vmem:[%s2098_s26] sm:$0xff] %v1350_v13  ;;  %v1361_v15 = vadd.f32 %v1815_v14, %v1633_v1 }
 0x35d   : > { %v1352_v16 = vpop.f32.mrf.mxu1 }
 0x35e   : > { %1415 = vst [vmem:[%s2098_s26 + $0x18] sm:$0xff] %v1361_v15  ;;  %v1353_v17 = vadd.f32 %v1633_v1, %v1352_v16 }
 0x35f   : > { %v1818_v18 = vpop.f32.mrf.mxu1 }
 0x360   : > { %1413 = vst [vmem:[%s2098_s26 + $0x8] sm:$0xff] %v1353_v17  ;;  %v1374_v19 = vadd.f32 %v1818_v18, %v1633_v1 }
 0x361   : > { %v1365_v20 = vpop.f32.mrf.mxu1 }
 0x362   : > { %1418 = vst [vmem:[%s2098_s26 + $0x30] sm:$0xff] %v1374_v19  ;;  %v1366_v21 = vadd.f32 %v1633_v1, %v1365_v20 }
 0x363   : > { %v1819_v22 = vpop.f32.mrf.mxu1 }
 0x364   : > { %1416 = vst [vmem:[%s2098_s26 + $0x20] sm:$0xff] %v1366_v21  ;;  %v1377_v23 = vadd.f32 %v1819_v22, %v1633_v1 }
 0x365   : > { %v1368_v24 = vpop.f32.mrf.mxu1 }
 0x366   : > { %1419 = vst [vmem:[%s2098_s26 + $0x38] sm:$0xff] %v1377_v23  ;;  %v1369_v25 = vadd.f32 %v1633_v1, %v1368_v24 }
 0x367   : > { %v1822_v26 = vpop.f32.mrf.mxu1 }
 0x368   : > { %1417 = vst [vmem:[%s2098_s26 + $0x28] sm:$0xff] %v1369_v25  ;;  %v1390_v27 = vadd.f32 %v1822_v26, %v1633_v1 }
 0x369   : > { %v1381_v28 = vpop.f32.mrf.mxu1 }
 0x36a   : > { %1422 = vst [vmem:[%s2098_s26 + $0x50] sm:$0xff] %v1390_v27  ;;  %v1382_v29 = vadd.f32 %v1633_v1, %v1381_v28 }
 0x36b   : > { %v1823_v30 = vpop.f32.mrf.mxu1 }
 0x36c   : > { %1420 = vst [vmem:[%s2098_s26 + $0x40] sm:$0xff] %v1382_v29  ;;  %v1393_v31 = vadd.f32 %v1823_v30, %v1633_v1 }
 0x36d   : > { %v1384_v32 = vpop.f32.mrf.mxu1 }
 0x36e   : > { %1423 = vst [vmem:[%s2098_s26 + $0x58] sm:$0xff] %v1393_v31  ;;  %v1385_v33 = vadd.f32 %v1633_v1, %v1384_v32 }
 0x36f   : > { %v1826_v34 = vpop.f32.mrf.mxu1 }
 0x370   : > { %1421 = vst [vmem:[%s2098_s26 + $0x48] sm:$0xff] %v1385_v33  ;;  %v1406_v35 = vadd.f32 %v1826_v34, %v1633_v1 }
 0x371   : > { %v1397_v36 = vpop.f32.mrf.mxu1 }
 0x372   : > { %1426 = vst [vmem:[%s2098_s26 + $0x70] sm:$0xff] %v1406_v35  ;;  %v1398_v37 = vadd.f32 %v1633_v1, %v1397_v36 }
 0x373   : > { %v1827_v38 = vpop.f32.mrf.mxu1 }
 0x374   : > { %1424 = vst [vmem:[%s2098_s26 + $0x60] sm:$0xff] %v1398_v37  ;;  %v1409_v39 = vadd.f32 %v1827_v38, %v1633_v1 }
 0x375   : > { %v1400_v40 = vpop.f32.mrf.mxu1 }
 0x376   : > { %1427 = vst [vmem:[%s2098_s26 + $0x78] sm:$0xff] %v1409_v39  ;;  %v1401_v41 = vadd.f32 %v1633_v1, %v1400_v40 }
 0x378   : > { %1425 = vst [vmem:[%s2098_s26 + $0x68] sm:$0xff] %v1401_v41 }
 0x379 PF: > { %s26_s18 = sadd.s32 1, %s1881_s18  }
 0x37a   : > { %p23_p2 = scmp.ge.s32.totalorder %s26_s18, 5  }
 0x37c   :  { %25 = sbr.rel (!%p23_p2) target bundleno = 16 (0x10), region = 110 }

</bundles_post_ra>
